<compile_context>
chip_gen: v6e
topology: v6e:2x2x1
jax: 0.10.0
libtpu: 0.0.40
codegen_flags: <defaults>
</compile_context>

<pallas_src>
import functools
import math

import jax
import jax.numpy as jnp
from jax.experimental import pallas as pl
from jax.experimental.pallas import tpu as pltpu

_MASK_VALUE = -1e30  # large finite negative: exp() underflows to 0, no inf/nan


def _round_up(x, m):
    return ((x + m - 1) // m) * m


def _fast_attention_kernel(q_ref, k_ref, v_ref, o_ref,
                           m_sc, l_sc, acc_sc, q_sc, *,
                           scale, kv_len, needs_mask):
    kv_i = pl.program_id(2)
    compute_dtype = q_sc.dtype

    @pl.when(kv_i == 0)
    def _():
        m_sc[...] = jnp.full_like(m_sc, -jnp.inf)
        l_sc[...] = jnp.zeros_like(l_sc)
        acc_sc[...] = jnp.zeros_like(acc_sc)
        # (tq, H, D) -> (H, tq, D), pre-scaled and cast to the MXU compute
        # dtype; done once per q tile instead of once per kv step.
        qt = pltpu.einshape("qhd->hqd", q_ref[0] * scale)
        q_sc[...] = qt.astype(compute_dtype)

    # Per kv step: head-major relayout of the K/V tiles (XLU slot).
    kt = pltpu.einshape("khd->hkd", k_ref[0].astype(compute_dtype))  # (H, tkv, D)
    vt = pltpu.einshape("khd->hkd", v_ref[0].astype(compute_dtype))  # (H, tkv, D)

    # Head-batched scores on the MXU with f32 accumulation.
    s = jnp.einsum("hqd,hkd->hqk", q_sc[...], kt,
                   preferred_element_type=jnp.float32)               # (H, tq, tkv)

    if needs_mask:
        tkv = kt.shape[1]
        kv_pos = kv_i * tkv + jax.lax.broadcasted_iota(jnp.int32, s.shape, 2)
        s = jnp.where(kv_pos < kv_len, s, _MASK_VALUE)

    # Online softmax update. Stats kept as (H, tq, 1): tq stays on sublanes,
    # matching the score/accumulator layout, so every broadcast is a cheap
    # lane broadcast.
    m_prev = m_sc[...]                                               # (H, tq, 1)
    m_new = jnp.maximum(m_prev, s.max(axis=-1, keepdims=True))
    alpha = jnp.exp(m_prev - m_new)                                  # (H, tq, 1)
    p = jnp.exp(s - m_new)                                           # (H, tq, tkv) f32

    l_sc[...] = alpha * l_sc[...] + p.sum(axis=-1, keepdims=True)
    acc_sc[...] = alpha * acc_sc[...] + jnp.einsum(
        "hqk,hkd->hqd", p.astype(compute_dtype), vt,
        preferred_element_type=jnp.float32)                          # (H, tq, D) f32
    m_sc[...] = m_new

    @pl.when(kv_i == pl.num_programs(2) - 1)
    def _():
        inv_l = pl.reciprocal(l_sc[...], approx=True)                # EUP vrcp
        ctx = acc_sc[...] * inv_l                                    # (H, tq, D) f32
        ctx = pltpu.einshape("hqd->qhd", ctx)                        # (tq, H, D)
        tq_, h_, d_ = ctx.shape
        # Lane-dense store: minor dim H*D (128 here) instead of D (32).
        o_ref[0] = ctx.reshape(tq_, h_ * d_).astype(o_ref.dtype)


def fast_attention_pallas(q, k, v, *, tq=None, tkv=None,
                          compute_dtype=jnp.bfloat16,
                          vmem_limit_bytes=32 * 1024 * 1024):
    """q, k, v: (B, N, H, D). Returns attention context (B, N, H, D), q.dtype."""
    B, N, H, D = q.shape
    assert k.shape == (B, N, H, D) and v.shape == (B, N, H, D)
    scale = 1.0 / math.sqrt(D)            # SDPA default scale = 1/sqrt(head_dim)
    out_dtype = q.dtype

    # ---- tile selection --------------------------------------------------
    if tkv is None:
        tkv = 256 if N >= 256 else 128    # lane-width multiple, MXU friendly
    if tq is None:
        tq = min(256, _round_up(N, 8))
        # v7x has 2 TensorCores: make sure there are >= 2 parallel blocks.
        while B * pl.cdiv(N, tq) < 2 and tq > 8:
            tq //= 2
    tq = _round_up(tq, 8)

    nq = _round_up(N, tq)
    nkv = _round_up(N, tkv)
    needs_mask = nkv != N

    if nq != N:
        q = jnp.pad(q, ((0, 0), (0, nq - N), (0, 0), (0, 0)))
    if nkv != N:
        pad = ((0, 0), (0, nkv - N), (0, 0), (0, 0))
        k = jnp.pad(k, pad)
        v = jnp.pad(v, pad)

    grid = (B, nq // tq, nkv // tkv)
    n_q_tiles = nq // tq

    itemsize = jnp.dtype(q.dtype).itemsize
    cost = pl.CostEstimate(
        flops=4 * B * H * nq * nkv * D,                   # QK^T + PV
        transcendentals=B * H * nq * nkv,                 # exp
        # q read + out write + (k + v) re-read once per q tile.
        bytes_accessed=itemsize * B * H * D * (2 * nq + 2 * nkv * n_q_tiles),
    )

    kernel = functools.partial(
        _fast_attention_kernel, scale=scale, kv_len=N, needs_mask=needs_mask)

    out = pl.pallas_call(
        kernel,
        out_shape=jax.ShapeDtypeStruct((B, nq, H * D), out_dtype),
        grid_spec=pltpu.PrefetchScalarGridSpec(
            num_scalar_prefetch=0,
            grid=grid,
            in_specs=[
                pl.BlockSpec((1, tq, H, D), lambda b, qi, ki: (b, qi, 0, 0)),
                pl.BlockSpec((1, tkv, H, D), lambda b, qi, ki: (b, ki, 0, 0)),
                pl.BlockSpec((1, tkv, H, D), lambda b, qi, ki: (b, ki, 0, 0)),
            ],
            out_specs=pl.BlockSpec((1, tq, H * D), lambda b, qi, ki: (b, qi, 0)),
            scratch_shapes=[
                pltpu.VMEM((H, tq, 1), jnp.float32),      # running max  m
                pltpu.VMEM((H, tq, 1), jnp.float32),      # running sum  l
                pltpu.VMEM((H, tq, D), jnp.float32),      # f32 accumulator
                pltpu.VMEM((H, tq, D), compute_dtype),    # cached scaled q tile
            ],
        ),
        compiler_params=pltpu.CompilerParams(
            dimension_semantics=("parallel", "parallel", "arbitrary"),
            vmem_limit_bytes=vmem_limit_bytes),
        cost_estimate=cost,
    )(q, k, v)

    # Slice off padded q rows; the reshape back to (B, N, H, D) is free.
    return out[:, :N].reshape(B, N, H, D)


# ----------------------------------------------------------------------------
# Pure-JAX reference (transcription of the PyTorch module) for verification.
# ----------------------------------------------------------------------------
def reference_forward(q, k, v):
    B, N, H, D = q.shape
    qh = jnp.transpose(q, (0, 2, 1, 3)).astype(jnp.float32)
    kh = jnp.transpose(k, (0, 2, 1, 3)).astype(jnp.float32)
    vh = jnp.transpose(v, (0, 2, 1, 3)).astype(jnp.float32)
    s = jnp.einsum("bhqd,bhkd->bhqk", qh, kh) / math.sqrt(D)
    p = jax.nn.softmax(s, axis=-1)
    ctx = jnp.einsum("bhqk,bhkd->bhqd", p, vh)
    return jnp.transpose(ctx, (0, 2, 1, 3)).astype(q.dtype)


if __name__ == "__main__":
    key = jax.random.PRNGKey(0)

    def run_case(B, N, H, D):
        kq, kk, kv_ = jax.random.split(jax.random.fold_in(key, N), 3)
        q = jax.random.normal(kq, (B, N, H, D), jnp.float32)
        k = jax.random.normal(kk, (B, N, H, D), jnp.float32)
        v = jax.random.normal(kv_, (B, N, H, D), jnp.float32)

        out = jax.block_until_ready(fast_attention_pallas(q, k, v))
        ref = jax.block_until_ready(reference_forward(q, k, v))
        # bf16 MXU compute (f32 accumulation) -> ~1e-2-scale tolerance.
        if not jnp.allclose(out, ref, atol=2e-2, rtol=2e-2):
            max_err = float(jnp.max(jnp.abs(out - ref)))
            raise AssertionError(f"mismatch (B={B}, N={N}): max abs err = {max_err}")

    # Aligned case: single kv tile, no masking.
    run_case(B=2, N=128, H=4, D=32)
    # Ragged case: multiple kv tiles -> online-softmax accumulation + key
    # padding mask (N not a multiple of the 128-wide kv tile).
    run_case(B=2, N=200, H=4, D=32)

    print("KERNEL_OK")
</pallas_src>

<mosaic_0001>
module attributes {stable_mosaic.version = 11 : i64} {
  func.func @_fast_attention_kernel(%arg0: i32, %arg1: i32, %arg2: i32, %arg3: memref<1x128x4x32xf32, #tpu.memory_space<vmem>>, %arg4: memref<1x128x4x32xf32, #tpu.memory_space<vmem>>, %arg5: memref<1x128x4x32xf32, #tpu.memory_space<vmem>>, %arg6: memref<1x128x128xf32, #tpu.memory_space<vmem>>, %arg7: memref<4x128x1xf32, #tpu.memory_space<vmem>>, %arg8: memref<4x128x1xf32, #tpu.memory_space<vmem>>, %arg9: memref<4x128x32xf32, #tpu.memory_space<vmem>>, %arg10: memref<4x128x32xbf16, #tpu.memory_space<vmem>>) attributes {dimension_semantics = [#tpu.dimension_semantics<parallel>, #tpu.dimension_semantics<parallel>, #tpu.dimension_semantics<arbitrary>], iteration_bounds = array<i64: 2, 1, 1>, scalar_prefetch = 0 : i64, scratch_operands = 4 : i64, tpu.core_type = #tpu.core_type<tc>, window_params = [{transform_indices = @transform_0, window_bounds = array<i64: 1, 128, 4, 32>}, {transform_indices = @transform_1, window_bounds = array<i64: 1, 128, 4, 32>}, {transform_indices = @transform_2, window_bounds = array<i64: 1, 128, 4, 32>}, {transform_indices = @transform_3, window_bounds = array<i64: 1, 128, 128>}]} {
    %c0_i32 = arith.constant 0 : i32
    %0 = arith.cmpi eq, %arg2, %c0_i32 : i32
    %1 = arith.extui %0 : i1 to i32
    %c0_i32_0 = arith.constant 0 : i32
    %2 = arith.cmpi ne, %1, %c0_i32_0 : i32
    scf.if %2 {
      %cst_34 = arith.constant 0xFF800000 : f32
      %39 = vector.broadcast %cst_34 : f32 to vector<4x128x1xf32>
      %c0_35 = arith.constant 0 : index
      %c0_36 = arith.constant 0 : index
      %c0_37 = arith.constant 0 : index
      %40 = vector.load %arg7[%c0_35, %c0_36, %c0_37] : memref<4x128x1xf32, #tpu.memory_space<vmem>>, vector<4x128x1xf32>
      tpu.vector_store %arg7[%c0_35, %c0_36, %c0_37], %39 {strides = array<i32>} : memref<4x128x1xf32, #tpu.memory_space<vmem>>, vector<4x128x1xf32>,
      %cst_38 = arith.constant 0.000000e+00 : f32
      %41 = vector.broadcast %cst_38 : f32 to vector<4x128x1xf32>
      %c0_39 = arith.constant 0 : index
      %c0_40 = arith.constant 0 : index
      %c0_41 = arith.constant 0 : index
      %42 = vector.load %arg8[%c0_39, %c0_40, %c0_41] : memref<4x128x1xf32, #tpu.memory_space<vmem>>, vector<4x128x1xf32>
      tpu.vector_store %arg8[%c0_39, %c0_40, %c0_41], %41 {strides = array<i32>} : memref<4x128x1xf32, #tpu.memory_space<vmem>>, vector<4x128x1xf32>,
      %cst_42 = arith.constant 0.000000e+00 : f32
      %43 = vector.broadcast %cst_42 : f32 to vector<4x128x32xf32>
      %c0_43 = arith.constant 0 : index
      %c0_44 = arith.constant 0 : index
      %c0_45 = arith.constant 0 : index
      %44 = vector.load %arg9[%c0_43, %c0_44, %c0_45] : memref<4x128x32xf32, #tpu.memory_space<vmem>>, vector<4x128x32xf32>
      tpu.vector_store %arg9[%c0_43, %c0_44, %c0_45], %43 {strides = array<i32>} : memref<4x128x32xf32, #tpu.memory_space<vmem>>, vector<4x128x32xf32>,
      %c0_46 = arith.constant 0 : index
      %c0_47 = arith.constant 0 : index
      %c0_48 = arith.constant 0 : index
      %c0_49 = arith.constant 0 : index
      %45 = vector.load %arg3[%c0_46, %c0_47, %c0_48, %c0_49] : memref<1x128x4x32xf32, #tpu.memory_space<vmem>>, vector<1x128x4x32xf32>
      %46 = vector.shape_cast %45 : vector<1x128x4x32xf32> to vector<128x4x32xf32>
      %cst_50 = arith.constant 0.176776692 : f32
      %47 = vector.broadcast %cst_50 : f32 to vector<128x4x32xf32>
      %48 = arith.mulf %46, %47 : vector<128x4x32xf32>
      %49 = tpu.transpose %48, [1, 0, 2] : vector<128x4x32xf32> -> vector<4x128x32xf32>
      %50 = arith.truncf %49 : vector<4x128x32xf32> to vector<4x128x32xbf16>
      %c0_51 = arith.constant 0 : index
      %c0_52 = arith.constant 0 : index
      %c0_53 = arith.constant 0 : index
      %51 = vector.load %arg10[%c0_51, %c0_52, %c0_53] : memref<4x128x32xbf16, #tpu.memory_space<vmem>>, vector<4x128x32xbf16>
      tpu.vector_store %arg10[%c0_51, %c0_52, %c0_53], %50 {strides = array<i32>} : memref<4x128x32xbf16, #tpu.memory_space<vmem>>, vector<4x128x32xbf16>,
    } else {
    }
    %c0 = arith.constant 0 : index
    %c0_1 = arith.constant 0 : index
    %c0_2 = arith.constant 0 : index
    %c0_3 = arith.constant 0 : index
    %3 = vector.load %arg4[%c0, %c0_1, %c0_2, %c0_3] : memref<1x128x4x32xf32, #tpu.memory_space<vmem>>, vector<1x128x4x32xf32>
    %4 = vector.shape_cast %3 : vector<1x128x4x32xf32> to vector<128x4x32xf32>
    %5 = arith.truncf %4 : vector<128x4x32xf32> to vector<128x4x32xbf16>
    %6 = tpu.transpose %5, [1, 0, 2] : vector<128x4x32xbf16> -> vector<4x128x32xbf16>
    %c0_4 = arith.constant 0 : index
    %c0_5 = arith.constant 0 : index
    %c0_6 = arith.constant 0 : index
    %c0_7 = arith.constant 0 : index
    %7 = vector.load %arg5[%c0_4, %c0_5, %c0_6, %c0_7] : memref<1x128x4x32xf32, #tpu.memory_space<vmem>>, vector<1x128x4x32xf32>
    %8 = vector.shape_cast %7 : vector<1x128x4x32xf32> to vector<128x4x32xf32>
    %9 = arith.truncf %8 : vector<128x4x32xf32> to vector<128x4x32xbf16>
    %10 = tpu.transpose %9, [1, 0, 2] : vector<128x4x32xbf16> -> vector<4x128x32xbf16>
    %c0_8 = arith.constant 0 : index
    %c0_9 = arith.constant 0 : index
    %c0_10 = arith.constant 0 : index
    %11 = vector.load %arg10[%c0_8, %c0_9, %c0_10] : memref<4x128x32xbf16, #tpu.memory_space<vmem>>, vector<4x128x32xbf16>
    "tpu.trace_start"() <{level = 10 : i32, message = "hqd,hkd->hqk"}> : () -> ()
    %cst = arith.constant dense<0.000000e+00> : vector<4x128x128xf32>
    %12 = tpu.matmul %11, %6, %cst {dimension_numbers = #tpu.dot_dimension_numbers<[2], [2], [1], [1], [0, 0, 0, 1, 1, 1], [0], [0]>} : vector<4x128x32xbf16>, vector<4x128x32xbf16>, vector<4x128x128xf32> -> vector<4x128x128xf32>
    "tpu.trace_stop"() : () -> ()
    %c0_11 = arith.constant 0 : index
    %c0_12 = arith.constant 0 : index
    %c0_13 = arith.constant 0 : index
    %13 = vector.load %arg7[%c0_11, %c0_12, %c0_13] : memref<4x128x1xf32, #tpu.memory_space<vmem>>, vector<4x128x1xf32>
    %cst_14 = arith.constant dense<0xFF800000> : vector<4x128xf32>
    %14 = vector.multi_reduction <maximumf>, %12, %cst_14 [2] : vector<4x128x128xf32> to vector<4x128xf32>
    %15 = vector.shape_cast %14 : vector<4x128xf32> to vector<4x128x1xf32>
    %16 = arith.maximumf %13, %15 : vector<4x128x1xf32>
    %17 = arith.subf %13, %16 : vector<4x128x1xf32>
    %18 = math.exp %17 : vector<4x128x1xf32>
    %19 = vector.broadcast %16 : vector<4x128x1xf32> to vector<4x128x128xf32>
    %20 = arith.subf %12, %19 : vector<4x128x128xf32>
    %21 = math.exp %20 : vector<4x128x128xf32>
    %c0_15 = arith.constant 0 : index
    %c0_16 = arith.constant 0 : index
    %c0_17 = arith.constant 0 : index
    %22 = vector.load %arg8[%c0_15, %c0_16, %c0_17] : memref<4x128x1xf32, #tpu.memory_space<vmem>>, vector<4x128x1xf32>
    %23 = arith.mulf %18, %22 : vector<4x128x1xf32>
    %cst_18 = arith.constant dense<0.000000e+00> : vector<4x128xf32>
    %24 = vector.multi_reduction <add>, %21, %cst_18 [2] : vector<4x128x128xf32> to vector<4x128xf32>
    %25 = vector.shape_cast %24 : vector<4x128xf32> to vector<4x128x1xf32>
    %26 = arith.addf %23, %25 : vector<4x128x1xf32>
    %c0_19 = arith.constant 0 : index
    %c0_20 = arith.constant 0 : index
    %c0_21 = arith.constant 0 : index
    %27 = vector.load %arg8[%c0_19, %c0_20, %c0_21] : memref<4x128x1xf32, #tpu.memory_space<vmem>>, vector<4x128x1xf32>
    tpu.vector_store %arg8[%c0_19, %c0_20, %c0_21], %26 {strides = array<i32>} : memref<4x128x1xf32, #tpu.memory_space<vmem>>, vector<4x128x1xf32>,
    %c0_22 = arith.constant 0 : index
    %c0_23 = arith.constant 0 : index
    %c0_24 = arith.constant 0 : index
    %28 = vector.load %arg9[%c0_22, %c0_23, %c0_24] : memref<4x128x32xf32, #tpu.memory_space<vmem>>, vector<4x128x32xf32>
    %29 = vector.broadcast %18 : vector<4x128x1xf32> to vector<4x128x32xf32>
    %30 = arith.mulf %29, %28 : vector<4x128x32xf32>
    %31 = arith.truncf %21 : vector<4x128x128xf32> to vector<4x128x128xbf16>
    "tpu.trace_start"() <{level = 10 : i32, message = "hqk,hkd->hqd"}> : () -> ()
    %cst_25 = arith.constant dense<0.000000e+00> : vector<4x128x32xf32>
    %32 = tpu.matmul %31, %10, %cst_25 {dimension_numbers = #tpu.dot_dimension_numbers<[2], [1], [1], [2], [0, 0, 0, 1, 1, 2], [0], [0]>} : vector<4x128x128xbf16>, vector<4x128x32xbf16>, vector<4x128x32xf32> -> vector<4x128x32xf32>
    "tpu.trace_stop"() : () -> ()
    %33 = arith.addf %30, %32 : vector<4x128x32xf32>
    %c0_26 = arith.constant 0 : index
    %c0_27 = arith.constant 0 : index
    %c0_28 = arith.constant 0 : index
    %34 = vector.load %arg9[%c0_26, %c0_27, %c0_28] : memref<4x128x32xf32, #tpu.memory_space<vmem>>, vector<4x128x32xf32>
    tpu.vector_store %arg9[%c0_26, %c0_27, %c0_28], %33 {strides = array<i32>} : memref<4x128x32xf32, #tpu.memory_space<vmem>>, vector<4x128x32xf32>,
    %c0_29 = arith.constant 0 : index
    %c0_30 = arith.constant 0 : index
    %c0_31 = arith.constant 0 : index
    %35 = vector.load %arg7[%c0_29, %c0_30, %c0_31] : memref<4x128x1xf32, #tpu.memory_space<vmem>>, vector<4x128x1xf32>
    tpu.vector_store %arg7[%c0_29, %c0_30, %c0_31], %16 {strides = array<i32>} : memref<4x128x1xf32, #tpu.memory_space<vmem>>, vector<4x128x1xf32>,
    %c0_i32_32 = arith.constant 0 : i32
    %36 = arith.cmpi eq, %arg2, %c0_i32_32 : i32
    %37 = arith.extui %36 : i1 to i32
    %c0_i32_33 = arith.constant 0 : i32
    %38 = arith.cmpi ne, %37, %c0_i32_33 : i32
    scf.if %38 {
      %c0_34 = arith.constant 0 : index
      %c0_35 = arith.constant 0 : index
      %c0_36 = arith.constant 0 : index
      %39 = vector.load %arg8[%c0_34, %c0_35, %c0_36] : memref<4x128x1xf32, #tpu.memory_space<vmem>>, vector<4x128x1xf32>
      %40 = tpu.reciprocal %39 {approx = true} : vector<4x128x1xf32> -> vector<4x128x1xf32>
      %c0_37 = arith.constant 0 : index
      %c0_38 = arith.constant 0 : index
      %c0_39 = arith.constant 0 : index
      %41 = vector.load %arg9[%c0_37, %c0_38, %c0_39] : memref<4x128x32xf32, #tpu.memory_space<vmem>>, vector<4x128x32xf32>
      %42 = vector.broadcast %40 : vector<4x128x1xf32> to vector<4x128x32xf32>
      %43 = arith.mulf %41, %42 : vector<4x128x32xf32>
      %44 = tpu.transpose %43, [1, 0, 2] : vector<4x128x32xf32> -> vector<128x4x32xf32>
      %45 = vector.shape_cast %44 : vector<128x4x32xf32> to vector<128x128xf32>
      %c0_40 = arith.constant 0 : index
      %c0_41 = arith.constant 0 : index
      %c0_42 = arith.constant 0 : index
      %46 = vector.load %arg6[%c0_40, %c0_41, %c0_42] : memref<1x128x128xf32, #tpu.memory_space<vmem>>, vector<1x128x128xf32>
      %47 = vector.shape_cast %46 : vector<1x128x128xf32> to vector<128x128xf32>
      %48 = vector.shape_cast %45 : vector<128x128xf32> to vector<1x128x128xf32>
      tpu.vector_store %arg6[%c0_40, %c0_41, %c0_42], %48 {strides = array<i32>} : memref<1x128x128xf32, #tpu.memory_space<vmem>>, vector<1x128x128xf32>,
    } else {
    }
    return
  }
  func.func @transform_0(%arg0: i32, %arg1: i32, %arg2: i32) -> (i32, i32, i32, i32) {
    %c0_i32 = arith.constant 0 : i32
    %c0_i32_0 = arith.constant 0 : i32
    %c0_i32_1 = arith.constant 0 : i32
    return %arg0, %arg1, %c0_i32, %c0_i32_0 : i32, i32, i32, i32
  }
  func.func @transform_1(%arg0: i32, %arg1: i32, %arg2: i32) -> (i32, i32, i32, i32) {
    %c0_i32 = arith.constant 0 : i32
    %c0_i32_0 = arith.constant 0 : i32
    %c0_i32_1 = arith.constant 0 : i32
    return %arg0, %arg2, %c0_i32, %c0_i32_0 : i32, i32, i32, i32
  }
  func.func @transform_2(%arg0: i32, %arg1: i32, %arg2: i32) -> (i32, i32, i32, i32) {
    %c0_i32 = arith.constant 0 : i32
    %c0_i32_0 = arith.constant 0 : i32
    %c0_i32_1 = arith.constant 0 : i32
    return %arg0, %arg2, %c0_i32, %c0_i32_0 : i32, i32, i32, i32
  }
  func.func @transform_3(%arg0: i32, %arg1: i32, %arg2: i32) -> (i32, i32, i32) {
    %c0_i32 = arith.constant 0 : i32
    %c0_i32_0 = arith.constant 0 : i32
    return %arg0, %arg1, %c0_i32 : i32, i32, i32
  }
}

</mosaic_0001>

<bundles_post_ra>
// kernel: tpu_custom_call.1
= control target key start
LH: loop header
LB: loop body
LE: loop exit
PB: predicated region body
PF: predicated region fallthrough
CT: control target
= control target key end

     0   :  { %8 = vsyncpa [#allocation7], 0  ;;  %s17164_s0 = inlined_call_operand.vmem [shape: f32[2,128,4,32], index: 0, kind: input, shape index: {}]   ;;  %s17165_s1 = inlined_call_operand.vmem [shape: f32[2,128,4,32], index: 1, kind: input, shape index: {}]   ;;  %s17166_s2 = inlined_call_operand.vmem [shape: f32[2,128,4,32], index: 2, kind: input, shape index: {}]   ;;  %s17167_s3 = inlined_call_operand.hbm [shape: f32[2,128,128], index: 3, kind: output, shape index: {}]  }
   0x1   :  { %10 = vsyncpa [#allocation7 + $0x1], 0  ;;  %s12217_s12 = smov 0   ;;  %s12219_s13 = smov 0  }
   0x2   :  { %s12221_s14 = smov 0   ;;  %s12223_s15 = smov 0  }
   0x3   :  { %s12225_s16 = smov 0   ;;  %s12227_s17 = smov 0  }
   0x4 LB: > { %s10836_s18 = sadd.s32 4294967295, %s12184_s17   ;;  %s10837_s19 = sadd.s32 4294967294, %s12184_s17   ;;  %s12184_s17 = sphi %s12227_s17, %s16_s17   ;;  %s12180_s16 = sphi %s12225_s16, %s18033_s16   ;;  %s12176_s15 = sphi %s12223_s15, %s18032_s15   ;;  %s12172_s14 = sphi %s12221_s14, %s18031_s14   ;;  %s12168_s13 = sphi %s12219_s13, %s18030_s13   ;;  %s12164_s12 = sphi %s12217_s12, %s18029_s12  }
   0x5   : > { %s35_s20 = sadd.s32 1, %s12180_s16  ;;  %s128_s21 = sadd.s32 1, %s12172_s14 }
   0x6   : > { %p37_p0 = scmp.ge.s32.totalorder %s35_s20, 2  ;;  %p138_p1 = scmp.ne.s32.totalorder %s12172_s14, %s12168_s13 }
   0x7   : > { %p139_p2 = scmp.eq.s32.totalorder %s10836_s18, 1  ;;  %p144_p3 = scmp.ne.s32.totalorder %s12168_s13, %s12164_s12 }
   0x8   : > { %s18035_s20 = smov (%p37_p0, %s35_s20), 0  ;;  %p145_p5 = scmp.eq.s32.totalorder %s10837_s19, 1 }
   0x9   : > { %p12257_p4 = por %p139_p2, %p138_p1  ;;  %s123_s23 = ssub.s32 %s12180_s16, %s18035_s20 }
   0xa   : > { %p10840_p6 = scmp.ge.s32.totalorder %s12184_s17, 1  ;;  %p126_p7 = scmp.eq.s32.totalorder %s123_s23, 0 }
   0xb   : > { %p12264_p8 = por %p145_p5, %p144_p3  ;;  %p202_p9 = scmp.lt.s32.totalorder %s12184_s17, 3 }
   0xc   : > { %s12270_s25 = scalar_select %p126_p7, %s12172_s14, %s128_s21  }
   0xd   : > { %p203_p10 = pnand %p10840_p6, %p202_p9 }
   0xf   : > { %206 = sbr.rel (%p203_p10) target bundleno = 1490 (0x5d2), region = 32 }
  0x14   : > { %p249_p11 = scmp.lt.s32.totalorder %s12176_s15, 1  ;;  %v738_v0 = vlaneseq  ;;  %v12186_v1 = vmov 1983009808   ;;  %v12187_v4 = vmov 1934713408   ;;  %vm413_vm0 = vcmask 261120  }
  0x15   : > { %v736_v2 = vunpack.c.l.s4 %v12186_v1  ;;  %v769_v5 = vunpack.c.l.s4 %v12187_v4  ;;  %vm2078_vm1 = vcmask 257024   ;;  %vm284_vm2 = vcmask 7168   ;;  %s12191_s10 = smov 32   ;;  %s12192_s11 = smov 64  }
  0x16   : > { %s250_s26 = scalar_select %p249_p11, %s12176_s15, 1  ;;  %v739_v3 = vshrl.u32 %v738_v0, 7  ;;  %vm10652_vm3 = vcmask 523264   ;;  %vm10669_vm4 = vcmask 785408  }
  0x17   : > { %v737_v6 = vunpack.c.0.s8 %v736_v2  ;;  %v770_v8 = vunpack.c.0.s8 %v769_v5  ;;  %s12193_s18 = smov 96   ;;  %s245_s19 = sand.u32 1, %s12168_s13  }
  0x18   : > { %s12274_s27 = sshll.u32 %s250_s26, 9  ;;  %s10841_s21 = sshll.u32 %s245_s19, 7 }
  0x19   : > { %s12280_s30 = scalar_lea.vmem %s17165_s1, %s12274_s27  ;;  %v12282_v7 = vsub.s32 %v737_v6, %v739_v3  ;;  %v12296_v25 = vsub.s32 %v770_v8, %v739_v3  ;;  %s12579_s6 = scalar_lea.vmem %s17164_s0, %s12274_s27 }
  0x1a   : > { %v2255_v9 = vld [vmem:[%s12280_s30 + $0x1c0] sm:$0xf]  ;;  %v2256_v10 = vld [vmem:[%s12280_s30 + $0x1c4] sm:$0xf]  ;;  %v2257_v11 = vld [vmem:[%s12280_s30 + $0x1c8] sm:$0xf]  ;;  %s14037_s9 = scalar_lea.vmem %s17166_s2, %s12274_s27 }
  0x1b   : > { %17433 = vst [vmem:[#allocation9_spill] sm:$0xff] %v12282_v7  ;;  %v2258_v12 = vld [vmem:[%s12280_s30 + $0x1cc] sm:$0xf]  ;;  %v2259_v13 = vld [vmem:[%s12280_s30 + $0x1d0] sm:$0xf]  ;;  %17434 = vst [vmem:[#allocation10_spill] sm:$0xff] %v12296_v25 }
  0x1c   : > { %v2260_v14 = vld [vmem:[%s12280_s30 + $0x1d4] sm:$0xf]  ;;  %v2261_v15 = vld [vmem:[%s12280_s30 + $0x1d8] sm:$0xf]  ;;  %v2262_v16 = vld [vmem:[%s12280_s30 + $0x1dc] sm:$0xf]  ;;  %v10968_v18 = vpack.c.bf16 %v2259_v13, %v2255_v9 }
  0x1d   : > { %v2263_v17 = vld [vmem:[%s12280_s30 + $0x1e0] sm:$0xf]  ;;  %v10972_v19 = vpack.c.bf16 %v2260_v14, %v2256_v10  ;;  %v2264_v20 = vld [vmem:[%s12280_s30 + $0x1e4] sm:$0xf]  ;;  %v2265_v21 = vld [vmem:[%s12280_s30 + $0x1e8] sm:$0xf]  ;;  %v10969_v23 = vpack.c.bf16 %v2261_v15, %v2257_v11  ;;  %v10973_v24 = vpack.c.bf16 %v2262_v16, %v2258_v12 }
  0x1e   : > { %v2266_v22 = vld [vmem:[%s12280_s30 + $0x1ec] sm:$0xf]  ;;  %v2267_v26 = vld [vmem:[%s12280_s30 + $0x1f0] sm:$0xf]  ;;  %v2268_v27 = vld [vmem:[%s12280_s30 + $0x1f4] sm:$0xf]  ;;  %v3106_v29 = vrot.slane %v10968_v18, %v12282_v7 }
  0x1f   : > { %v2269_v28 = vld [vmem:[%s12280_s30 + $0x1f8] sm:$0xf]  ;;  %v3156_v30 = vrot.slane %v10972_v19, %v12282_v7  ;;  %v2270_v31 = vld [vmem:[%s12280_s30 + $0x1fc] sm:$0xf]  ;;  %v3114_v32 = vrot.slane %v10969_v23, %v12282_v7  ;;  %v10970_v33 = vpack.c.bf16 %v2267_v26, %v2263_v17  ;;  %v3164_v35 = vrot.slane %v10973_v24, %v12282_v7  ;;  %v2239_v36 = vld [vmem:[%s12280_s30 + $0x180] sm:$0xf] }
  0x20   : > { %v10971_v34 = vpack.c.bf16 %v2269_v28, %v2265_v21  ;;  %v10974_v37 = vpack.c.bf16 %v2268_v27, %v2264_v20  ;;  %v10975_v38 = vpack.c.bf16 %v2270_v31, %v2266_v22  ;;  %v2240_v39 = vld [vmem:[%s12280_s30 + $0x184] sm:$0xf]  ;;  %v2241_v40 = vld [vmem:[%s12280_s30 + $0x188] sm:$0xf]  ;;  %v2243_v41 = vld [vmem:[%s12280_s30 + $0x190] sm:$0xf] }
  0x21   : > { %v3122_v42 = vrot.slane %v10970_v33, %v12282_v7  ;;  %v3131_v44 = vcombine.low %v3106_v29, %v3114_v32  ;;  %v3181_v45 = vcombine.low %v3156_v30, %v3164_v35  ;;  %v2242_v46 = vld [vmem:[%s12280_s30 + $0x18c] sm:$0xf]  ;;  %v2244_v47 = vld [vmem:[%s12280_s30 + $0x194] sm:$0xf]  ;;  %v2245_v48 = vld [vmem:[%s12280_s30 + $0x198] sm:$0xf]  ;;  %v10960_v54 = vpack.c.bf16 %v2243_v41, %v2239_v36 }
  0x22   : > { %v3130_v43 = vrot.slane %v10971_v34, %v12282_v7  ;;  %v3172_v49 = vrot.slane %v10974_v37, %v12282_v7  ;;  %v3180_v50 = vrot.slane %v10975_v38, %v12282_v7  ;;  %v2246_v51 = vld [vmem:[%s12280_s30 + $0x19c] sm:$0xf]  ;;  %v2247_v52 = vld [vmem:[%s12280_s30 + $0x1a0] sm:$0xf]  ;;  %v2249_v53 = vld [vmem:[%s12280_s30 + $0x1a8] sm:$0xf]  ;;  %v10961_v55 = vpack.c.bf16 %v2245_v48, %v2241_v40 }
  0x23   : > { %v3138_v56 = vrot.slane %v3131_v44, %v12296_v25  ;;  %v3188_v58 = vrot.slane %v3181_v45, %v12296_v25  ;;  %v2248_v59 = vld [vmem:[%s12280_s30 + $0x1a4] sm:$0xf]  ;;  %v2251_v60 = vld [vmem:[%s12280_s30 + $0x1b0] sm:$0xf]  ;;  %v2252_v61 = vld [vmem:[%s12280_s30 + $0x1b4] sm:$0xf]  ;;  %v10964_v62 = vpack.c.bf16 %v2244_v47, %v2240_v39  ;;  %v3006_v1 = vrot.slane %v10960_v54, %v12282_v7 }
  0x24   : > { %v3139_v57 = vcombine.low %v3122_v42, %v3130_v43  ;;  %v3189_v63 = vcombine.low %v3172_v49, %v3180_v50  ;;  %v2253_v0 = vld [vmem:[%s12280_s30 + $0x1b8] sm:$0xf]  ;;  %v3014_v2 = vrot.slane %v10961_v55, %v12282_v7  ;;  %v10962_v3 = vpack.c.bf16 %v2251_v60, %v2247_v52  ;;  %v2250_v10 = vld [vmem:[%s12280_s30 + $0x1ac] sm:$0xf]  ;;  %v2254_v11 = vld [vmem:[%s12280_s30 + $0x1bc] sm:$0xf] }
  0x25   : > { %v10963_v5 = vpack.c.bf16 %v2253_v0, %v2249_v53  ;;  %v3056_v6 = vrot.slane %v10964_v62, %v12282_v7  ;;  %v10965_v8 = vpack.c.bf16 %v2246_v51, %v2242_v46  ;;  %v10966_v14 = vpack.c.bf16 %v2252_v61, %v2248_v59  ;;  %v2223_v15 = vld [vmem:[%s12280_s30 + $0x140] sm:$0xf]  ;;  %v2225_v20 = vld [vmem:[%s12280_s30 + $0x148] sm:$0xf]  ;;  %v2227_v21 = vld [vmem:[%s12280_s30 + $0x150] sm:$0xf] }
  0x26   : > { %v3146_v4 = vrot.slane %v3139_v57, %v12296_v25  ;;  %v3196_v9 = vrot.slane %v3189_v63, %v12296_v25  ;;  %v3022_v12 = vrot.slane %v10962_v3, %v12282_v7  ;;  %v3031_v13 = vcombine.low %v3006_v1, %v3014_v2  ;;  %v2229_v22 = vld [vmem:[%s12280_s30 + $0x158] sm:$0xf]  ;;  %v2231_v28 = vld [vmem:[%s12280_s30 + $0x160] sm:$0xf]  ;;  %v2235_v29 = vld [vmem:[%s12280_s30 + $0x170] sm:$0xf] }
  0x27   : > { %v3030_v18 = vrot.slane %v10963_v5, %v12282_v7  ;;  %v3064_v19 = vrot.slane %v10965_v8, %v12282_v7  ;;  %v3072_v27 = vrot.slane %v10966_v14, %v12282_v7  ;;  %v10967_v32 = vpack.c.bf16 %v2254_v11, %v2250_v10  ;;  %v2224_v34 = vld [vmem:[%s12280_s30 + $0x144] sm:$0xf]  ;;  %v2226_v35 = vld [vmem:[%s12280_s30 + $0x14c] sm:$0xf]  ;;  %v2233_v38 = vld [vmem:[%s12280_s30 + $0x168] sm:$0xf] }
  0x28   : > { %v3147_v16 = vcombine.low %v3138_v56, %v3146_v4  ;;  %v12335_v17 = vcombine.high %v3138_v56, %v3146_v4  ;;  %v3197_v23 = vcombine.low %v3188_v58, %v3196_v9  ;;  %v12342_v24 = vcombine.high %v3188_v58, %v3196_v9  ;;  %v2237_v39 = vld [vmem:[%s12280_s30 + $0x178] sm:$0xf]  ;;  %v2228_v45 = vld [vmem:[%s12280_s30 + $0x154] sm:$0xf]  ;;  %v2230_v46 = vld [vmem:[%s12280_s30 + $0x15c] sm:$0xf] }
  0x29   : > { %v12345_v26 = vrot.slane %v3031_v13, %v12296_v25  ;;  %v3039_v31 = vcombine.low %v3022_v12, %v3030_v18  ;;  %v3081_v33 = vcombine.low %v3056_v6, %v3064_v19  ;;  %v10952_v40 = vpack.c.bf16 %v2227_v21, %v2223_v15  ;;  %v2232_v47 = vld [vmem:[%s12280_s30 + $0x164] sm:$0xf]  ;;  %v2234_v51 = vld [vmem:[%s12280_s30 + $0x16c] sm:$0xf]  ;;  %v2236_v52 = vld [vmem:[%s12280_s30 + $0x174] sm:$0xf] }
  0x2a   : > { %v3286_v30 = vshrl.u32 %v3147_v16, 16  ;;  %v3285_v36 = vpack.i.b16 %v3197_v23, %v3147_v16  ;;  %v3287_v37 = vshrl.u32 %v3197_v23, 16  ;;  %v10953_v41 = vpack.c.bf16 %v2229_v22, %v2225_v20  ;;  %v2238_v57 = vld [vmem:[%s12280_s30 + $0x17c] sm:$0xf]  ;;  %v2207_v60 = vld [vmem:[%s12280_s30 + $0x100] sm:$0xf] }
  0x2b   : > { %v12355_v42 = vrot.slane %v3039_v31, %v12296_v25  ;;  %v3080_v43 = vrot.slane %v10967_v32, %v12282_v7  ;;  %v12359_v44 = vrot.slane %v3081_v33, %v12296_v25  ;;  %v10954_v48 = vpack.c.bf16 %v2235_v29, %v2231_v28  ;;  %v2209_v61 = vld [vmem:[%s12280_s30 + $0x108] sm:$0xf]  ;;  %v2211_v2 = vld [vmem:[%s12280_s30 + $0x110] sm:$0xf]  ;;  %v2213_v3 = vld [vmem:[%s12280_s30 + $0x118] sm:$0xf] }
  0x2c   : > { %11593 = vmatprep.subr.msk.bf16.mxu0 %vm413_vm0, %v3285_v36  ;;  %v4630_v49 = vsel %vm413_vm0, %v3285_v36, 0  ;;  %v3288_v50 = vpack.i.b16 %v3287_v37, %v3286_v30  ;;  %v2906_v53 = vrot.slane %v10952_v40, %v12282_v7  ;;  %v2914_v54 = vrot.slane %v10953_v41, %v12282_v7  ;;  %v2215_v9 = vld [vmem:[%s12280_s30 + $0x120] sm:$0xf]  ;;  %v2219_v10 = vld [vmem:[%s12280_s30 + $0x130] sm:$0xf]  ;;  %s17000_s23 = scalar_lea.vmem [#allocation6], %s10841_s21 }
  0x2d   : > { %11338 = vmatpush3.bf16.xpose.msra.mxu0 %v4630_v49  ;;  %v3047_v55 = vcombine.low %v12345_v26, %v12355_v42  ;;  %v3089_v56 = vcombine.low %v3072_v27, %v3080_v43  ;;  %v2922_v58 = vrot.slane %v10954_v48, %v12282_v7  ;;  %v10955_v59 = vpack.c.bf16 %v2237_v39, %v2233_v38  ;;  %v2208_v19 = vld [vmem:[%s12280_s30 + $0x104] sm:$0xf]  ;;  %v2210_v23 = vld [vmem:[%s12280_s30 + $0x10c] sm:$0xf]  ;;  %v2217_v27 = vld [vmem:[%s12280_s30 + $0x128] sm:$0xf] }
  0x2e   : > { %11601 = vmatprep.subr.msk.bf16.mxu1 %vm413_vm0, %v3288_v50  ;;  %v4815_v62 = vsel %vm413_vm0, %v3288_v50, 0  ;;  %v2931_v63 = vcombine.low %v2906_v53, %v2914_v54  ;;  %v10956_v0 = vpack.c.bf16 %v2228_v45, %v2224_v34  ;;  %v10957_v1 = vpack.c.bf16 %v2230_v46, %v2226_v35  ;;  %v2221_v28 = vld [vmem:[%s12280_s30 + $0x138] sm:$0xf]  ;;  %v2212_v34 = vld [vmem:[%s12280_s30 + $0x114] sm:$0xf]  ;;  %s11208_s26 = sshll.u32 %s12176_s15, 11 }
  0x2f   : > { %11370 = vmatpush3.bf16.xpose.msra.mxu1 %v4815_v62  ;;  %v12381_v4 = vrot.slane %v3089_v56, %v12296_v25  ;;  %v3274_v5 = vshrl.u32 %v3047_v55, 16  ;;  %v2930_v6 = vrot.slane %v10955_v59, %v12282_v7  ;;  %v10958_v8 = vpack.c.bf16 %v2236_v52, %v2232_v47  ;;  %v2214_v35 = vld [vmem:[%s12280_s30 + $0x11c] sm:$0xf]  ;;  %v2216_v39 = vld [vmem:[%s12280_s30 + $0x124] sm:$0xf]  ;;  %s10718_s27 = sshll.u32 %s17000_s23, 4  ;;  %s17112_s27 = int_to_ptr.vmem [resolvable:$true] %s10718_s27 }
  0x30   : > { %v12387_v11 = vrot.slane %v2931_v63, %v12296_v25  ;;  %v2956_v12 = vrot.slane %v10956_v0, %v12282_v7  ;;  %v2964_v13 = vrot.slane %v10957_v1, %v12282_v7  ;;  %v10959_v14 = vpack.c.bf16 %v2238_v57, %v2234_v51  ;;  %v2220_v40 = vld [vmem:[%s12280_s30 + $0x134] sm:$0xf]  ;;  %v2218_v48 = vld [vmem:[%s12280_s30 + $0x12c] sm:$0xf]  ;;  %v2222_v51 = vld [vmem:[%s12280_s30 + $0x13c] sm:$0xf] }
  0x31   : > { %v3097_v15 = vcombine.low %v12359_v44, %v12381_v4  ;;  %v2939_v16 = vcombine.low %v2922_v58, %v2930_v6  ;;  %v2972_v18 = vrot.slane %v10958_v8, %v12282_v7  ;;  %v10944_v20 = vpack.c.bf16 %v2211_v2, %v2207_v60  ;;  %v2195_v56 = vld [vmem:[%s12280_s30 + $0xd0] sm:$0xf]  ;;  %v2197_v62 = vld [vmem:[%s12280_s30 + $0xd8] sm:$0xf]  ;;  %s17119_s15 = scalar_lea.sflag [#allocation7], %s245_s19  ;;  %s12108_s4 = scalar_lea.vmem %s17112_s27, 2048 }
  0x32   : > { %v2980_v21 = vrot.slane %v10959_v14, %v12282_v7  ;;  %v2981_v22 = vcombine.low %v2956_v12, %v2964_v13  ;;  %v10945_v29 = vpack.c.bf16 %v2213_v3, %v2209_v61  ;;  %v10946_v30 = vpack.c.bf16 %v2219_v10, %v2215_v9  ;;  %v2193_v61 = vld [vmem:[%s12280_s30 + $0xc8] sm:$0xf]  ;;  %v2199_v3 = vld [vmem:[%s12280_s30 + $0xe0] sm:$0xf]  ;;  %v2192_v10 = vld [vmem:[%s12280_s30 + $0xc4] sm:$0xf]  ;;  %p12109_p12 = scmp.ne.s32.totalorder %s17112_s27, %s12108_s4 }
  0x33   : > { %v3273_v31 = vpack.i.b16 %v3097_v15, %v3047_v55  ;;  %v3275_v32 = vshrl.u32 %v3097_v15, 16  ;;  %v12400_v33 = vrot.slane %v2939_v16, %v12296_v25  ;;  %v2806_v36 = vrot.slane %v10944_v20, %v12282_v7  ;;  %v2191_v55 = vld [vmem:[%s12280_s30 + $0xc0] sm:$0xf]  ;;  %v2194_v12 = vld [vmem:[%s12280_s30 + $0xcc] sm:$0xf]  ;;  %s12194_s5 = smov [#allocation6]  }
  0x34   : > { %v12406_v37 = vrot.slane %v2981_v22, %v12296_v25  ;;  %v2989_v38 = vcombine.low %v2972_v18, %v2980_v21  ;;  %v2814_v41 = vrot.slane %v10945_v29, %v12282_v7  ;;  %v2822_v43 = vrot.slane %v10946_v30, %v12282_v7  ;;  %v2201_v18 = vld [vmem:[%s12280_s30 + $0xe8] sm:$0xf]  ;;  %p12110_p13 = pnand %p12109_p12, %p12257_p4 }
  0x35   : > { %11594 = vmatprep.subr.msk.bf16.mxu0 %vm413_vm0, %v3273_v31  ;;  %v4627_v45 = vsel %vm413_vm0, %v3273_v31, 0  ;;  %v3276_v46 = vpack.i.b16 %v3275_v32, %v3274_v5  ;;  %v2947_v47 = vcombine.low %v12387_v11, %v12400_v33  ;;  %v10947_v49 = vpack.c.bf16 %v2221_v28, %v2217_v27  ;;  %v2203_v5 = vld [vmem:[%s12280_s30 + $0xf0] sm:$0xf]  ;;  %v2198_v27 = vld [vmem:[%s12280_s30 + $0xdc] sm:$0xf] }
  0x36   : > { %11340 = vmatpush3.bf16.xpose.msra.mxu0 %v4627_v45  ;;  %v12418_v50 = vrot.slane %v2989_v38, %v12296_v25  ;;  %v2831_v52 = vcombine.low %v2806_v36, %v2814_v41  ;;  %v10948_v53 = vpack.c.bf16 %v2212_v34, %v2208_v19  ;;  %v10949_v54 = vpack.c.bf16 %v2214_v35, %v2210_v23  ;;  %v2205_v19 = vld [vmem:[%s12280_s30 + $0xf8] sm:$0xf]  ;;  %v2196_v23 = vld [vmem:[%s12280_s30 + $0xd4] sm:$0xf]  ;;  %v2200_v28 = vld [vmem:[%s12280_s30 + $0xe4] sm:$0xf]  ;;  %p12111_p0 = pneg %p12110_p13 }
  0x37   : > { %11602 = vmatprep.subr.msk.bf16.mxu1 %vm413_vm0, %v3276_v46  ;;  %v4812_v57 = vsel %vm413_vm0, %v3276_v46, 0  ;;  %v3262_v58 = vshrl.u32 %v2947_v47, 16  ;;  %v2830_v59 = vrot.slane %v10947_v49, %v12282_v7  ;;  %v10950_v60 = vpack.c.bf16 %v2220_v40, %v2216_v39  ;;  %v2202_v35 = vld [vmem:[%s12280_s30 + $0xec] sm:$0xf]  ;;  %v2204_v36 = vld [vmem:[%s12280_s30 + $0xf4] sm:$0xf] }
  0x38   : > { %11372 = vmatpush3.bf16.xpose.msra.mxu1 %v4812_v57  ;;  %v2997_v63 = vcombine.low %v12406_v37, %v12418_v50  ;;  %v12431_v0 = vrot.slane %v2831_v52, %v12296_v25  ;;  %v2856_v1 = vrot.slane %v10948_v53, %v12282_v7  ;;  %v2864_v2 = vrot.slane %v10949_v54, %v12282_v7  ;;  %v2206_v41 = vld [vmem:[%s12280_s30 + $0xfc] sm:$0xf]  ;;  %v2175_v46 = vld [vmem:[%s12280_s30 + $0x80] sm:$0xf]  ;;  %v2179_v53 = vld [vmem:[%s12280_s30 + $0x90] sm:$0xf] }
  0x39   : > { %v2839_v6 = vcombine.low %v2822_v43, %v2830_v59  ;;  %v2872_v8 = vrot.slane %v10950_v60, %v12282_v7  ;;  %v10951_v9 = vpack.c.bf16 %v2222_v51, %v2218_v48  ;;  %v10936_v13 = vpack.c.bf16 %v2195_v56, %v2191_v55  ;;  %v2181_v54 = vld [vmem:[%s12280_s30 + $0x98] sm:$0xf]  ;;  %v2183_v59 = vld [vmem:[%s12280_s30 + $0xa0] sm:$0xf]  ;;  %v2187_v60 = vld [vmem:[%s12280_s30 + $0xb0] sm:$0xf] }
  0x3a   : > { %v3261_v14 = vpack.i.b16 %v2997_v63, %v2947_v47  ;;  %v3263_v15 = vshrl.u32 %v2997_v63, 16  ;;  %v2881_v16 = vcombine.low %v2856_v1, %v2864_v2  ;;  %v10937_v20 = vpack.c.bf16 %v2197_v62, %v2193_v61  ;;  %v2177_v47 = vld [vmem:[%s12280_s30 + $0x88] sm:$0xf] }
  0x3b   : > { %v12443_v21 = vrot.slane %v2839_v6, %v12296_v25  ;;  %v2880_v22 = vrot.slane %v10951_v9, %v12282_v7  ;;  %v2706_v29 = vrot.slane %v10936_v13, %v12282_v7  ;;  %v10938_v30 = vpack.c.bf16 %v2203_v5, %v2199_v3  ;;  %v2176_v6 = vld [vmem:[%s12280_s30 + $0x84] sm:$0xf]  ;;  %v2185_v13 = vld [vmem:[%s12280_s30 + $0xa8] sm:$0xf] }
  0x3c   : > { %11595 = vmatprep.subr.msk.bf16.mxu0 %vm413_vm0, %v3261_v14  ;;  %v4624_v31 = vsel %vm413_vm0, %v3261_v14, 0  ;;  %v3264_v32 = vpack.i.b16 %v3263_v15, %v3262_v58  ;;  %v12453_v34 = vrot.slane %v2881_v16, %v12296_v25  ;;  %v2714_v38 = vrot.slane %v10937_v20, %v12282_v7  ;;  %v2189_v14 = vld [vmem:[%s12280_s30 + $0xb8] sm:$0xf] }
  0x3d   : > { %v2847_v39 = vcombine.low %v12431_v0, %v12443_v21  ;;  %v2889_v40 = vcombine.low %v2872_v8, %v2880_v22  ;;  %v2722_v43 = vrot.slane %v10938_v30, %v12282_v7  ;;  %v10939_v45 = vpack.c.bf16 %v2205_v19, %v2201_v18  ;;  %v2180_v22 = vld [vmem:[%s12280_s30 + $0x94] sm:$0xf]  ;;  %v2184_v30 = vld [vmem:[%s12280_s30 + $0xa4] sm:$0xf] }
  0x3e   : > { %11342 = vmatpush3.bf16.xpose.msra.mxu0 %v4624_v31  ;;  %11603 = vmatprep.subr.msk.bf16.mxu1 %vm413_vm0, %v3264_v32  ;;  %v4809_v48 = vsel %vm413_vm0, %v3264_v32, 0  ;;  %v2731_v49 = vcombine.low %v2706_v29, %v2714_v38  ;;  %v10940_v51 = vpack.c.bf16 %v2196_v23, %v2192_v10  ;;  %v10941_v52 = vpack.c.bf16 %v2198_v27, %v2194_v12  ;;  %v2178_v12 = vld [vmem:[%s12280_s30 + $0x8c] sm:$0xf]  ;;  %v2182_v23 = vld [vmem:[%s12280_s30 + $0x9c] sm:$0xf] }
  0x3f   : > { %v12469_v55 = vrot.slane %v2889_v40, %v12296_v25  ;;  %v3250_v56 = vshrl.u32 %v2847_v39, 16  ;;  %v2730_v57 = vrot.slane %v10939_v45, %v12282_v7  ;;  %v10942_v58 = vpack.c.bf16 %v2204_v36, %v2200_v28  ;;  %v2188_v31 = vld [vmem:[%s12280_s30 + $0xb4] sm:$0xf]  ;;  %v2186_v40 = vld [vmem:[%s12280_s30 + $0xac] sm:$0xf] }
  0x40   : > { %11374 = vmatpush3.bf16.xpose.msra.mxu1 %v4809_v48  ;;  %v12475_v61 = vrot.slane %v2731_v49, %v12296_v25  ;;  %v2756_v62 = vrot.slane %v10940_v51, %v12282_v7  ;;  %v2764_v63 = vrot.slane %v10941_v52, %v12282_v7  ;;  %v10943_v1 = vpack.c.bf16 %v2206_v41, %v2202_v35  ;;  %v2190_v45 = vld [vmem:[%s12280_s30 + $0xbc] sm:$0xf]  ;;  %v2159_v49 = vld [vmem:[%s12280_s30 + $0x40] sm:$0xf]  ;;  %v2163_v51 = vld [vmem:[%s12280_s30 + $0x50] sm:$0xf] }
  0x41   : > { %v2897_v2 = vcombine.low %v12453_v34, %v12469_v55  ;;  %v2739_v3 = vcombine.low %v2722_v43, %v2730_v57  ;;  %v2772_v5 = vrot.slane %v10942_v58, %v12282_v7  ;;  %v10928_v8 = vpack.c.bf16 %v2179_v53, %v2175_v46  ;;  %v2161_v57 = vld [vmem:[%s12280_s30 + $0x48] sm:$0xf]  ;;  %v2165_v58 = vld [vmem:[%s12280_s30 + $0x58] sm:$0xf] }
  0x42   : > { %v2780_v9 = vrot.slane %v10943_v1, %v12282_v7  ;;  %v2781_v10 = vcombine.low %v2756_v62, %v2764_v63  ;;  %v10929_v15 = vpack.c.bf16 %v2181_v54, %v2177_v47  ;;  %v10930_v16 = vpack.c.bf16 %v2187_v60, %v2183_v59  ;;  %v2167_v1 = vld [vmem:[%s12280_s30 + $0x60] sm:$0xf] }
  0x43   : > { %v3249_v18 = vpack.i.b16 %v2897_v2, %v2847_v39  ;;  %v3251_v19 = vshrl.u32 %v2897_v2, 16  ;;  %v12488_v20 = vrot.slane %v2739_v3, %v12296_v25  ;;  %v2606_v27 = vrot.slane %v10928_v8, %v12282_v7  ;;  %v2171_v2 = vld [vmem:[%s12280_s30 + $0x70] sm:$0xf]  ;;  %v2160_v8 = vld [vmem:[%s12280_s30 + $0x44] sm:$0xf] }
  0x44   : > { %v12494_v28 = vrot.slane %v2781_v10, %v12296_v25  ;;  %v2789_v29 = vcombine.low %v2772_v5, %v2780_v9  ;;  %v2614_v32 = vrot.slane %v10929_v15, %v12282_v7  ;;  %v2622_v35 = vrot.slane %v10930_v16, %v12282_v7  ;;  %v2162_v9 = vld [vmem:[%s12280_s30 + $0x4c] sm:$0xf]  ;;  %v2169_v15 = vld [vmem:[%s12280_s30 + $0x68] sm:$0xf]  ;;  %v2173_v16 = vld [vmem:[%s12280_s30 + $0x78] sm:$0xf] }
  0x45   : > { %11596 = vmatprep.subr.msk.bf16.mxu0 %vm413_vm0, %v3249_v18  ;;  %v4621_v36 = vsel %vm413_vm0, %v3249_v18, 0  ;;  %v3252_v38 = vpack.i.b16 %v3251_v19, %v3250_v56  ;;  %v2747_v39 = vcombine.low %v12475_v61, %v12488_v20  ;;  %v10931_v41 = vpack.c.bf16 %v2189_v14, %v2185_v13 }
  0x46   : > { %11344 = vmatpush3.bf16.xpose.msra.mxu0 %v4621_v36  ;;  %v12506_v43 = vrot.slane %v2789_v29, %v12296_v25  ;;  %v2631_v46 = vcombine.low %v2606_v27, %v2614_v32  ;;  %v10932_v47 = vpack.c.bf16 %v2180_v22, %v2176_v6  ;;  %v10933_v48 = vpack.c.bf16 %v2182_v23, %v2178_v12  ;;  %v2164_v23 = vld [vmem:[%s12280_s30 + $0x54] sm:$0xf]  ;;  %v2166_v27 = vld [vmem:[%s12280_s30 + $0x5c] sm:$0xf]  ;;  %v2168_v29 = vld [vmem:[%s12280_s30 + $0x64] sm:$0xf] }
  0x47   : > { %11604 = vmatprep.subr.msk.bf16.mxu1 %vm413_vm0, %v3252_v38  ;;  %v4806_v52 = vsel %vm413_vm0, %v3252_v38, 0  ;;  %v3238_v53 = vshrl.u32 %v2747_v39, 16  ;;  %v2630_v54 = vrot.slane %v10931_v41, %v12282_v7  ;;  %v10934_v56 = vpack.c.bf16 %v2188_v31, %v2184_v30  ;;  %v2170_v38 = vld [vmem:[%s12280_s30 + $0x6c] sm:$0xf] }
  0x48   : > { %11376 = vmatpush3.bf16.xpose.msra.mxu1 %v4806_v52  ;;  %v2797_v59 = vcombine.low %v12494_v28, %v12506_v43  ;;  %v12519_v60 = vrot.slane %v2631_v46, %v12296_v25  ;;  %v2656_v62 = vrot.slane %v10932_v47, %v12282_v7  ;;  %v2664_v63 = vrot.slane %v10933_v48, %v12282_v7  ;;  %v2174_v46 = vld [vmem:[%s12280_s30 + $0x7c] sm:$0xf] }
  0x49   : > { %v2639_v3 = vcombine.low %v2622_v35, %v2630_v54  ;;  %v2672_v5 = vrot.slane %v10934_v56, %v12282_v7  ;;  %v10935_v6 = vpack.c.bf16 %v2190_v45, %v2186_v40  ;;  %v10920_v10 = vpack.c.bf16 %v2163_v51, %v2159_v49  ;;  %v2143_v49 = vld [vmem:[%s12280_s30] sm:$0xf]  ;;  %v2145_v51 = vld [vmem:[%s12280_s30 + $0x8] sm:$0xf] }
  0x4a   : > { %v3237_v12 = vpack.i.b16 %v2797_v59, %v2747_v39  ;;  %v3239_v13 = vshrl.u32 %v2797_v59, 16  ;;  %v2681_v14 = vcombine.low %v2656_v62, %v2664_v63  ;;  %v10921_v18 = vpack.c.bf16 %v2165_v58, %v2161_v57  ;;  %v2172_v39 = vld [vmem:[%s12280_s30 + $0x74] sm:$0xf]  ;;  %v2147_v57 = vld [vmem:[%s12280_s30 + $0x10] sm:$0xf] }
  0x4b   : > { %v12531_v19 = vrot.slane %v2639_v3, %v12296_v25  ;;  %v2680_v22 = vrot.slane %v10935_v6, %v12282_v7  ;;  %v2506_v30 = vrot.slane %v10920_v10, %v12282_v7  ;;  %v10922_v31 = vpack.c.bf16 %v2171_v2, %v2167_v1  ;;  %v2149_v58 = vld [vmem:[%s12280_s30 + $0x18] sm:$0xf]  ;;  %v2151_v2 = vld [vmem:[%s12280_s30 + $0x20] sm:$0xf]  ;;  %v2155_v3 = vld [vmem:[%s12280_s30 + $0x30] sm:$0xf] }
  0x4c   : > { %11597 = vmatprep.subr.msk.bf16.mxu0 %vm413_vm0, %v3237_v12  ;;  %v4618_v32 = vsel %vm413_vm0, %v3237_v12, 0  ;;  %v3240_v35 = vpack.i.b16 %v3239_v13, %v3238_v53  ;;  %v12541_v36 = vrot.slane %v2681_v14, %v12296_v25  ;;  %v2514_v40 = vrot.slane %v10921_v18, %v12282_v7  ;;  %v2144_v14 = vld [vmem:[%s12280_s30 + $0x4] sm:$0xf] }
  0x4d   : > { %v2647_v41 = vcombine.low %v12519_v60, %v12531_v19  ;;  %v2689_v45 = vcombine.low %v2672_v5, %v2680_v22  ;;  %v2522_v47 = vrot.slane %v10922_v31, %v12282_v7  ;;  %v10923_v48 = vpack.c.bf16 %v2173_v16, %v2169_v15  ;;  %v2146_v22 = vld [vmem:[%s12280_s30 + $0xc] sm:$0xf] }
  0x4e   : > { %11346 = vmatpush3.bf16.xpose.msra.mxu0 %v4618_v32  ;;  %11605 = vmatprep.subr.msk.bf16.mxu1 %vm413_vm0, %v3240_v35  ;;  %v4803_v52 = vsel %vm413_vm0, %v3240_v35, 0  ;;  %v2531_v53 = vcombine.low %v2506_v30, %v2514_v40  ;;  %v10924_v54 = vpack.c.bf16 %v2164_v23, %v2160_v8  ;;  %v10925_v56 = vpack.c.bf16 %v2166_v27, %v2162_v9  ;;  %v2153_v23 = vld [vmem:[%s12280_s30 + $0x28] sm:$0xf]  ;;  %v2157_v27 = vld [vmem:[%s12280_s30 + $0x38] sm:$0xf] }
  0x4f   : > { %v12557_v59 = vrot.slane %v2689_v45, %v12296_v25  ;;  %v3226_v62 = vshrl.u32 %v2647_v41, 16  ;;  %v2530_v63 = vrot.slane %v10923_v48, %v12282_v7  ;;  %v10926_v1 = vpack.c.bf16 %v2172_v39, %v2168_v29  ;;  %v2150_v39 = vld [vmem:[%s12280_s30 + $0x1c] sm:$0xf]  ;;  %v2156_v48 = vld [vmem:[%s12280_s30 + $0x34] sm:$0xf] }
  0x50   : > { %11378 = vmatpush3.bf16.xpose.msra.mxu1 %v4803_v52  ;;  %v12563_v5 = vrot.slane %v2531_v53, %v12296_v25  ;;  %v2556_v6 = vrot.slane %v10924_v54, %v12282_v7  ;;  %v2564_v8 = vrot.slane %v10925_v56, %v12282_v7  ;;  %v10927_v9 = vpack.c.bf16 %v2174_v46, %v2170_v38  ;;  %v2148_v38 = vld [vmem:[%s12280_s30 + $0x14] sm:$0xf]  ;;  %v2154_v54 = vld [vmem:[%s12280_s30 + $0x2c] sm:$0xf] }
  0x51   : > { %v2697_v10 = vcombine.low %v12541_v36, %v12557_v59  ;;  %v2539_v12 = vcombine.low %v2522_v47, %v2530_v63  ;;  %v2572_v13 = vrot.slane %v10926_v1, %v12282_v7  ;;  %v10912_v15 = vpack.c.bf16 %v2147_v57, %v2143_v49  ;;  %v2152_v47 = vld [vmem:[%s12280_s30 + $0x24] sm:$0xf] }
  0x52   : > { %v2580_v16 = vrot.slane %v10927_v9, %v12282_v7  ;;  %v2581_v18 = vcombine.low %v2556_v6, %v2564_v8  ;;  %v10913_v29 = vpack.c.bf16 %v2149_v58, %v2145_v51  ;;  %v10914_v30 = vpack.c.bf16 %v2155_v3, %v2151_v2  ;;  %v2158_v58 = vld [vmem:[%s12280_s30 + $0x3c] sm:$0xf]  ;;  %v478_v3 = vld [vmem:[%s12579_s6] sm:$0xf]  ;;  %s17110_s30 = scalar_lea.hbm %s17167_s3, %s11208_s26 }
  0x53   : > { %v3225_v31 = vpack.i.b16 %v2697_v10, %v2647_v41  ;;  %v3227_v32 = vshrl.u32 %v2697_v10, 16  ;;  %v12582_v35 = vrot.slane %v2539_v12, %v12296_v25  ;;  %v2406_v40 = vrot.slane %v10912_v15, %v12282_v7  ;;  %v480_v12 = vld [vmem:[%s12579_s6 + $0x8] sm:$0xf] }
  0x54   : > { %v12588_v45 = vrot.slane %v2581_v18, %v12296_v25  ;;  %v2589_v46 = vcombine.low %v2572_v13, %v2580_v16  ;;  %v2414_v41 = vrot.slane %v10913_v29, %v12282_v7  ;;  %v2422_v49 = vrot.slane %v10914_v30, %v12282_v7  ;;  %v481_v13 = vld [vmem:[%s12579_s6 + $0xc] sm:$0xf] }
  0x55   : > { %11598 = vmatprep.subr.msk.bf16.mxu0 %vm413_vm0, %v3225_v31  ;;  %v4615_v51 = vsel %vm413_vm0, %v3225_v31, 0  ;;  %v3228_v52 = vpack.i.b16 %v3227_v32, %v3226_v62  ;;  %v2547_v53 = vcombine.low %v12563_v5, %v12582_v35  ;;  %v10915_v56 = vpack.c.bf16 %v2157_v27, %v2153_v23  ;;  %v479_v62 = vld [vmem:[%s12579_s6 + $0x4] sm:$0xf]  ;;  %v483_v23 = vld [vmem:[%s12579_s6 + $0x14] sm:$0xf] }
  0x56   : > { %17435 = vst [vmem:[#allocation11_spill] sm:$0xff] %v12588_v45  ;;  %11348 = vmatpush3.bf16.xpose.msra.mxu0 %v4615_v51  ;;  %v12600_v57 = vrot.slane %v2589_v46, %v12296_v25  ;;  %v2431_v63 = vcombine.low %v2406_v40, %v2414_v41  ;;  %v10916_v1 = vpack.c.bf16 %v2148_v38, %v2144_v14  ;;  %v484_v27 = vld [vmem:[%s12579_s6 + $0x18] sm:$0xf]  ;;  %v485_v32 = vld [vmem:[%s12579_s6 + $0x1c] sm:$0xf] }
  0x57   : > { %v10917_v2 = vpack.c.bf16 %v2150_v39, %v2146_v22  ;;  %11606 = vmatprep.subr.msk.bf16.mxu1 %vm413_vm0, %v3228_v52  ;;  %v4800_v6 = vsel %vm413_vm0, %v3228_v52, 0  ;;  %v3214_v8 = vshrl.u32 %v2547_v53, 16  ;;  %v2430_v9 = vrot.slane %v10915_v56, %v12282_v7  ;;  %v482_v22 = vld [vmem:[%s12579_s6 + $0x10] sm:$0xf]  ;;  %v486_v38 = vld [vmem:[%s12579_s6 + $0x20] sm:$0xf] }
  0x58   : > { %17436 = vst [vmem:[#allocation12_spill] sm:$0xff] %v12600_v57  ;;  %v10918_v10 = vpack.c.bf16 %v2156_v48, %v2152_v47  ;;  %11380 = vmatpush3.bf16.xpose.msra.mxu1 %v4800_v6  ;;  %v2597_v14 = vcombine.low %v12588_v45, %v12600_v57  ;;  %v12613_v15 = vrot.slane %v2431_v63, %v12296_v25  ;;  %v606_v39 = vmul.f32 0.17677669, %v478_v3  ;;  %v487_v48 = vld [vmem:[%s12579_s6 + $0x24] sm:$0xf] }
  0x59   : > { %v2456_v16 = vrot.slane %v10916_v1, %v12282_v7  ;;  %v2464_v18 = vrot.slane %v10917_v2, %v12282_v7  ;;  %v2439_v29 = vcombine.low %v2422_v49, %v2430_v9  ;;  %v10919_v31 = vpack.c.bf16 %v2158_v58, %v2154_v54  ;;  %v488_v41 = vld [vmem:[%s12579_s6 + $0x28] sm:$0xf]  ;;  %v489_v56 = vld [vmem:[%s12579_s6 + $0x2c] sm:$0xf]  ;;  %v490_v63 = vld [vmem:[%s12579_s6 + $0x30] sm:$0xf] }
  0x5a   : > { %17437 = vst [vmem:[#allocation13_spill] sm:$0xff] %v12613_v15  ;;  %v2472_v30 = vrot.slane %v10918_v10, %v12282_v7  ;;  %v3213_v40 = vpack.i.b16 %v2597_v14, %v2547_v53  ;;  %v3215_v46 = vshrl.u32 %v2597_v14, 16  ;;  %v607_v51 = vmul.f32 0.17677669, %v479_v62  ;;  %v491_v1 = vld [vmem:[%s12579_s6 + $0x34] sm:$0xf] }
  0x5b   : > { %v2481_v47 = vcombine.low %v2456_v16, %v2464_v18  ;;  %v12626_v52 = vrot.slane %v2439_v29, %v12296_v25  ;;  %v2480_v49 = vrot.slane %v10919_v31, %v12282_v7  ;;  %v608_v54 = vmul.f32 0.17677669, %v480_v12  ;;  %v492_v62 = vld [vmem:[%s12579_s6 + $0x38] sm:$0xf]  ;;  %v493_v14 = vld [vmem:[%s12579_s6 + $0x3c] sm:$0xf] }
  0x5c   : > { %v609_v58 = vmul.f32 0.17677669, %v481_v13  ;;  %11599 = vmatprep.subr.msk.bf16.mxu0 %vm413_vm0, %v3213_v40  ;;  %v4612_v53 = vsel %vm413_vm0, %v3213_v40, 0  ;;  %v3216_v2 = vpack.i.b16 %v3215_v46, %v3214_v8  ;;  %v610_v6 = vmul.f32 0.17677669, %v482_v22 }
  0x5d   : > { %17438 = vst [vmem:[#allocation14_spill] sm:$0xff] %v12626_v52  ;;  %v12635_v3 = vrot.slane %v2481_v47, %v12296_v25  ;;  %v2447_v9 = vcombine.low %v12613_v15, %v12626_v52  ;;  %v2489_v10 = vcombine.low %v2472_v30, %v2480_v49  ;;  %v611_v16 = vmul.f32 0.17677669, %v483_v23 }
  0x5e   : > { %v612_v18 = vmul.f32 0.17677669, %v484_v27  ;;  %11350 = vmatpush3.bf16.xpose.msra.mxu0 %v4612_v53  ;;  %11607 = vmatprep.subr.msk.bf16.mxu1 %vm413_vm0, %v3216_v2  ;;  %v4797_v12 = vsel %vm413_vm0, %v3216_v2, 0  ;;  %v613_v13 = vmul.f32 0.17677669, %v485_v32  ;;  %v734_v8 = vcombine.low %v606_v39, %v608_v54 }
  0x5f   : > { %17439 = vst [vmem:[#allocation15_spill] sm:$0xff] %v12635_v3  ;;  %v614_v29 = vmul.f32 0.17677669, %v486_v38  ;;  %v12644_v31 = vrot.slane %v2489_v10, %v12296_v25  ;;  %v3202_v40 = vshrl.u32 %v2447_v9, 16  ;;  %v615_v22 = vmul.f32 0.17677669, %v487_v48 }
  0x60   : > { %v616_v46 = vmul.f32 0.17677669, %v488_v41  ;;  %11382 = vmatpush3.bf16.xpose.msra.mxu1 %v4797_v12  ;;  %v617_v47 = vmul.f32 0.17677669, %v489_v56  ;;  %v618_v30 = vmul.f32 0.17677669, %v490_v63  ;;  %v12647_v27 = vrot.slane %v734_v8, %v12282_v7 }
  0x61   : > { %17440 = vst [vmem:[#allocation16_spill] sm:$0xff] %v12644_v31  ;;  %v619_v23 = vmul.f32 0.17677669, %v491_v1  ;;  %v2497_v49 = vcombine.low %v12635_v3, %v12644_v31  ;;  %v620_v32 = vmul.f32 0.17677669, %v492_v62  ;;  %v742_v39 = vcombine.low %v607_v51, %v609_v58 }
  0x62   : > { %17441 = vst [vmem:[#allocation17_spill] sm:$0xff] %v12647_v27  ;;  %v621_v38 = vmul.f32 0.17677669, %v493_v14  ;;  %v750_v54 = vcombine.low %v610_v6, %v612_v18  ;;  %v758_v48 = vcombine.low %v611_v16, %v613_v13  ;;  %v802_v41 = vcombine.low %v614_v29, %v616_v46  ;;  %v494_v10 = vld [vmem:[%s12579_s6 + $0x40] sm:$0xf] }
  0x63   : > { %v810_v53 = vcombine.low %v615_v22, %v617_v47  ;;  %v3201_v56 = vpack.i.b16 %v2497_v49, %v2447_v9  ;;  %v3203_v63 = vshrl.u32 %v2497_v49, 16  ;;  %v12652_v1 = vrot.slane %v742_v39, %v12282_v7  ;;  %v495_v9 = vld [vmem:[%s12579_s6 + $0x44] sm:$0xf]  ;;  %v496_v14 = vld [vmem:[%s12579_s6 + $0x48] sm:$0xf] }
  0x64   : > { %v818_v2 = vcombine.low %v618_v30, %v620_v32  ;;  %v12656_v62 = vrot.slane %v750_v54, %v12282_v7  ;;  %v12659_v51 = vrot.slane %v758_v48, %v12282_v7  ;;  %v12662_v58 = vrot.slane %v802_v41, %v12282_v7  ;;  %v497_v16 = vld [vmem:[%s12579_s6 + $0x4c] sm:$0xf]  ;;  %v498_v8 = vld [vmem:[%s12579_s6 + $0x50] sm:$0xf]  ;;  %v499_v22 = vld [vmem:[%s12579_s6 + $0x54] sm:$0xf] }
  0x65   : > { %17442 = vst [vmem:[#allocation18_spill] sm:$0xff] %v12652_v1  ;;  %v12665_v6 = vrot.slane %v810_v53, %v12282_v7  ;;  %11600 = vmatprep.subr.msk.bf16.mxu0 %vm413_vm0, %v3201_v56  ;;  %v4609_v18 = vsel %vm413_vm0, %v3201_v56, 0  ;;  %v3204_v12 = vpack.i.b16 %v3203_v63, %v3202_v40  ;;  %v766_v13 = vcombine.low %v12647_v27, %v12652_v1  ;;  %v500_v49 = vld [vmem:[%s12579_s6 + $0x58] sm:$0xf]  ;;  %v501_v32 = vld [vmem:[%s12579_s6 + $0x5c] sm:$0xf] }
  0x66   : > { %17443 = vst [vmem:[#allocation19_spill] sm:$0xff] %v12656_v62  ;;  %17444 = vst [vmem:[#allocation20_spill] sm:$0xff] %v12659_v51  ;;  %11352 = vmatpush3.bf16.xpose.msra.mxu0 %v4609_v18  ;;  %v782_v46 = vcombine.low %v12656_v62, %v12659_v51  ;;  %v12683_v40 = vrot.slane %v818_v2, %v12282_v7  ;;  %v826_v30 = vcombine.low %v619_v23, %v621_v38  ;;  %v502_v39 = vld [vmem:[%s12579_s6 + $0x60] sm:$0xf]  ;;  %v503_v56 = vld [vmem:[%s12579_s6 + $0x64] sm:$0xf] }
  0x67   : > { %17445 = vst [vmem:[#allocation21_spill] sm:$0xff] %v12662_v58  ;;  %17446 = vst [vmem:[#allocation22_spill] sm:$0xff] %v12665_v6  ;;  %11608 = vmatprep.subr.msk.bf16.mxu1 %vm413_vm0, %v3204_v12  ;;  %v4794_v54 = vsel %vm413_vm0, %v3204_v12, 0  ;;  %v12691_v48 = vrot.slane %v766_v13, %v12296_v25  ;;  %v834_v41 = vcombine.low %v12662_v58, %v12665_v6  ;;  %v504_v63 = vld [vmem:[%s12579_s6 + $0x68] sm:$0xf] }
  0x68   : > { %11384 = vmatpush3.bf16.xpose.msra.mxu1 %v4794_v54  ;;  %v12700_v23 = vrot.slane %v782_v46, %v12296_v25  ;;  %v12703_v38 = vrot.slane %v826_v30, %v12282_v7  ;;  %v505_v2 = vld [vmem:[%s12579_s6 + $0x6c] sm:$0xf]  ;;  %v506_v18 = vld [vmem:[%s12579_s6 + $0x70] sm:$0xf]  ;;  %v507_v12 = vld [vmem:[%s12579_s6 + $0x74] sm:$0xf] }
  0x69   : > { %v622_v13 = vmul.f32 0.17677669, %v494_v10  ;;  %v623_v47 = vmul.f32 0.17677669, %v495_v9  ;;  %v12709_v29 = vrot.slane %v834_v41, %v12296_v25  ;;  %v624_v53 = vmul.f32 0.17677669, %v496_v14 }
  0x6a   : > { %v625_v6 = vmul.f32 0.17677669, %v497_v16  ;;  %v626_v58 = vmul.f32 0.17677669, %v498_v8  ;;  %v798_v54 = vcombine.low %v12691_v48, %v12700_v23  ;;  %v850_v46 = vcombine.low %v12683_v40, %v12703_v38  ;;  %v508_v51 = vld [vmem:[%s12579_s6 + $0x78] sm:$0xf] }
  0x6b   : > { %v509_v62 = vld [vmem:[%s12579_s6 + $0x7c] sm:$0xf]  ;;  %v627_v1 = vmul.f32 0.17677669, %v499_v22  ;;  %v628_v10 = vmul.f32 0.17677669, %v500_v49  ;;  %v870_v41 = vcombine.low %v622_v13, %v624_v53 }
  0x6c   : > { %v629_v9 = vmul.f32 0.17677669, %v501_v32  ;;  %v630_v27 = vmul.f32 0.17677669, %v502_v39  ;;  %v858_v14 = vrot.slane %v850_v46, %v12296_v25  ;;  %v11144_v16 = vpack.c.bf16 %v798_v54, %v798_v54 }
  0x6d   : > { %v631_v8 = vmul.f32 0.17677669, %v503_v56  ;;  %v632_v3 = vmul.f32 0.17677669, %v504_v63  ;;  %v633_v31 = vmul.f32 0.17677669, %v505_v2  ;;  %v877_v45 = vrot.slane %v870_v41, %v12282_v7 }
  0x6e   : > { %v634_v15 = vmul.f32 0.17677669, %v506_v18  ;;  %v635_v52 = vmul.f32 0.17677669, %v507_v12  ;;  %v866_v57 = vcombine.low %v12709_v29, %v858_v14  ;;  %2079 = vst.msk [vmem:[#allocation5] sm:$0xf] %vm2078_vm1, %v11144_v16  ;;  %v878_v49 = vcombine.low %v623_v47, %v625_v6 }
  0x6f   : > { %v636_v30 = vmul.f32 0.17677669, %v508_v51  ;;  %v637_v22 = vmul.f32 0.17677669, %v509_v62  ;;  %v886_v32 = vcombine.low %v626_v58, %v628_v10  ;;  %v894_v39 = vcombine.low %v627_v1, %v629_v9 }
  0x70   : > { %v938_v53 = vcombine.low %v630_v27, %v632_v3  ;;  %v946_v13 = vcombine.low %v631_v8, %v633_v31  ;;  %v11145_v46 = vpack.c.bf16 %v866_v57, %v866_v57  ;;  %v885_v56 = vrot.slane %v878_v49, %v12282_v7 }
  0x71   : > { %v954_v63 = vcombine.low %v634_v15, %v636_v30  ;;  %v962_v2 = vcombine.low %v635_v52, %v637_v22  ;;  %v893_v18 = vrot.slane %v886_v32, %v12282_v7  ;;  %v901_v12 = vrot.slane %v894_v39, %v12282_v7  ;;  %v510_v32 = vld [vmem:[%s12579_s6 + $0x80] sm:$0xf]  ;;  %v511_v39 = vld [vmem:[%s12579_s6 + $0x84] sm:$0xf] }
  0x72   : > { %v945_v54 = vrot.slane %v938_v53, %v12282_v7  ;;  %v953_v41 = vrot.slane %v946_v13, %v12282_v7  ;;  %2080 = vst.msk [vmem:[#allocation5 + $0x4] sm:$0xf] %vm2078_vm1, %v11145_v46  ;;  %v902_v62 = vcombine.low %v877_v45, %v885_v56  ;;  %v903_v51 = vcombine.high %v877_v45, %v885_v56  ;;  %v512_v53 = vld [vmem:[%s12579_s6 + $0x88] sm:$0xf] }
  0x73   : > { %v961_v3 = vrot.slane %v954_v63, %v12282_v7  ;;  %v969_v57 = vrot.slane %v962_v2, %v12282_v7  ;;  %v918_v31 = vcombine.low %v893_v18, %v901_v12  ;;  %v919_v15 = vcombine.high %v893_v18, %v901_v12  ;;  %v513_v2 = vld [vmem:[%s12579_s6 + $0x8c] sm:$0xf]  ;;  %v514_v18 = vld [vmem:[%s12579_s6 + $0x90] sm:$0xf]  ;;  %v515_v12 = vld [vmem:[%s12579_s6 + $0x94] sm:$0xf] }
  0x74   : > { %v970_v52 = vcombine.low %v945_v54, %v953_v41  ;;  %v971_v27 = vcombine.high %v945_v54, %v953_v41  ;;  %v910_v1 = vrot.slane %v902_v62, %v12296_v25  ;;  %v12733_v58 = vrot.slane %v903_v51, %v12296_v25  ;;  %v516_v62 = vld [vmem:[%s12579_s6 + $0x98] sm:$0xf] }
  0x75   : > { %v986_v6 = vcombine.low %v961_v3, %v969_v57  ;;  %v987_v47 = vcombine.high %v961_v3, %v969_v57  ;;  %v926_v45 = vrot.slane %v918_v31, %v12296_v25  ;;  %v12737_v30 = vrot.slane %v919_v15, %v12296_v25  ;;  %v518_v31 = vld [vmem:[%s12579_s6 + $0xa0] sm:$0xf]  ;;  %v519_v15 = vld [vmem:[%s12579_s6 + $0xa4] sm:$0xf] }
  0x76   : > { %17447 = vst [vmem:[#allocation23_spill] sm:$0xff] %v12733_v58  ;;  %v978_v10 = vrot.slane %v970_v52, %v12296_v25  ;;  %v12741_v9 = vrot.slane %v971_v27, %v12296_v25  ;;  %v3291_v22 = vpack.i.b16 %v12342_v24, %v12335_v17  ;;  %v799_v49 = vcombine.high %v12691_v48, %v12700_v23  ;;  %v520_v52 = vld [vmem:[%s12579_s6 + $0xa8] sm:$0xf] }
  0x77   : > { %v994_v16 = vrot.slane %v986_v6, %v12296_v25  ;;  %v12745_v8 = vrot.slane %v987_v47, %v12296_v25  ;;  %v934_v13 = vcombine.low %v910_v1, %v926_v45  ;;  %v867_v46 = vcombine.high %v12709_v29, %v858_v14  ;;  %v517_v29 = vld [vmem:[%s12579_s6 + $0x9c] sm:$0xf] }
  0x78   : > { %17448 = vst [vmem:[#allocation24_spill] sm:$0xff] %v12741_v9  ;;  %v935_v56 = vcombine.high %v910_v1, %v926_v45  ;;  %v3292_v63 = vshrl.u32 %v12335_v17, 16  ;;  %11609 = vmatprep.subr.msk.bf16.mxu0 %vm413_vm0, %v3291_v22  ;;  %v11160_v48 = vpack.c.bf16 %v799_v49, %v799_v49  ;;  %v12761_v23 = vsel %vm413_vm0, %v3291_v22, 0  ;;  %v521_v45 = vld [vmem:[%s12579_s6 + $0xac] sm:$0xf] }
  0x79   : > { %17449 = vst [vmem:[#allocation25_spill] sm:$0xff] %v12745_v8  ;;  %v1002_v54 = vcombine.low %v978_v10, %v994_v16  ;;  %v1003_v41 = vcombine.high %v978_v10, %v994_v16  ;;  %v11692_v17 = vld [vmem:[#allocation5] sm:$0xff]   ;;  %v11146_v14 = vpack.c.bf16 %v934_v13, %v934_v13  ;;  %v11161_v51 = vpack.c.bf16 %v867_v46, %v867_v46  ;;  %v522_v10 = vld [vmem:[%s12579_s6 + $0xb0] sm:$0xf]  ;;  %v524_v22 = vld [vmem:[%s12579_s6 + $0xb8] sm:$0xf] }
  0x7a   : > { %v11162_v3 = vpack.c.bf16 %v935_v56, %v935_v56  ;;  %v3293_v57 = vshrl.u32 %v12342_v24, 16  ;;  %2095 = vst.msk [vmem:[#allocation5 + $0x40] sm:$0xf] %vm2078_vm1, %v11160_v48  ;;  %v12772_v6 = vcombine.high %v12345_v26, %v12355_v42  ;;  %v12776_v47 = vcombine.high %v12359_v44, %v12381_v4  ;;  %v523_v24 = vld [vmem:[%s12579_s6 + $0xb4] sm:$0xf]  ;;  %11353 = vmatprep.mubr.msk.bf16.mxu0 %vm413_vm0, %v11692_v17 }
  0x7b   : > { %v11147_v27 = vpack.c.bf16 %v1002_v54, %v1002_v54  ;;  %v11163_v1 = vpack.c.bf16 %v1003_v41, %v1003_v41  ;;  %2081 = vst.msk [vmem:[#allocation5 + $0x8] sm:$0xf] %vm2078_vm1, %v11146_v14  ;;  %2096 = vst.msk [vmem:[#allocation5 + $0x44] sm:$0xf] %vm2078_vm1, %v11161_v51  ;;  %v525_v49 = vld [vmem:[%s12579_s6 + $0xbc] sm:$0xf] }
  0x7c   : > { %2097 = vst.msk [vmem:[#allocation5 + $0x48] sm:$0xf] %vm2078_vm1, %v11162_v3  ;;  %v3294_v16 = vpack.i.b16 %v3293_v57, %v3292_v63  ;;  %v638_v26 = vmul.f32 0.17677669, %v510_v32  ;;  %v639_v42 = vmul.f32 0.17677669, %v511_v39  ;;  %v12791_v44 = vpack.i.b16 %v12776_v47, %v12772_v6 }
  0x7d   : > { %v640_v13 = vmul.f32 0.17677669, %v512_v53  ;;  %2082 = vst.msk [vmem:[#allocation5 + $0xc] sm:$0xf] %vm2078_vm1, %v11147_v27  ;;  %2098 = vst.msk [vmem:[#allocation5 + $0x4c] sm:$0xf] %vm2078_vm1, %v11163_v1 }
  0x7e   : > { %v641_v4 = vmul.f32 0.17677669, %v513_v2  ;;  %v642_v46 = vmul.f32 0.17677669, %v514_v18  ;;  %v643_v56 = vmul.f32 0.17677669, %v515_v12  ;;  %11617 = vmatprep.subr.msk.bf16.mxu1 %vm413_vm0, %v3294_v16 }
  0x7f   : > { %v5185_v63 = vsel %vm413_vm0, %v3294_v16, 0  ;;  %v644_v54 = vmul.f32 0.17677669, %v516_v62  ;;  %v645_v32 = vmul.f32 0.17677669, %v517_v29  ;;  %v1006_v39 = vcombine.low %v638_v26, %v640_v13 }
  0x80   : > { %v646_v53 = vmul.f32 0.17677669, %v518_v31  ;;  %v647_v48 = vmul.f32 0.17677669, %v519_v15  ;;  %v648_v41 = vmul.f32 0.17677669, %v520_v52  ;;  %v1014_v17 = vcombine.low %v639_v42, %v641_v4 }
  0x81   : > { %v649_v14 = vmul.f32 0.17677669, %v521_v45  ;;  %v650_v2 = vmul.f32 0.17677669, %v522_v10  ;;  %v651_v18 = vmul.f32 0.17677669, %v523_v24  ;;  %v12796_v12 = vrot.slane %v1006_v39, %v12282_v7 }
  0x82   : > { %v526_v51 = vld [vmem:[%s12579_s6 + $0xc0] sm:$0xf]  ;;  %v652_v3 = vmul.f32 0.17677669, %v524_v22  ;;  %v653_v62 = vmul.f32 0.17677669, %v525_v49  ;;  %v12800_v29 = vrot.slane %v1014_v17, %v12282_v7  ;;  %v1022_v57 = vcombine.low %v642_v46, %v644_v54 }
  0x83   : > { %17450 = vst [vmem:[#allocation26_spill] sm:$0xff] %v12796_v12  ;;  %v527_v31 = vld [vmem:[%s12579_s6 + $0xc4] sm:$0xf]  ;;  %v528_v15 = vld [vmem:[%s12579_s6 + $0xc8] sm:$0xf]  ;;  %v1030_v52 = vcombine.low %v643_v56, %v645_v32  ;;  %v1074_v27 = vcombine.low %v646_v53, %v648_v41  ;;  %v1082_v1 = vcombine.low %v647_v48, %v649_v14  ;;  %v12806_v45 = vsel %vm413_vm0, %v12791_v44, 0 }
  0x84   : > { %17451 = vst [vmem:[#allocation27_spill] sm:$0xff] %v12800_v29  ;;  %v529_v10 = vld [vmem:[%s12579_s6 + $0xcc] sm:$0xf]  ;;  %v530_v24 = vld [vmem:[%s12579_s6 + $0xd0] sm:$0xf]  ;;  %v11694_v22 = vld [vmem:[#allocation5 + $0x40] sm:$0xff]   ;;  %v12812_v49 = vrot.slane %v1022_v57, %v12282_v7  ;;  %v1038_v26 = vcombine.low %v12796_v12, %v12800_v29  ;;  %v1090_v42 = vcombine.low %v650_v2, %v652_v3  ;;  %v1098_v13 = vcombine.low %v651_v18, %v653_v62 }
  0x85   : > { %v531_v16 = vld [vmem:[%s12579_s6 + $0xd4] sm:$0xf]  ;;  %v532_v4 = vld [vmem:[%s12579_s6 + $0xd8] sm:$0xf]  ;;  %v533_v46 = vld [vmem:[%s12579_s6 + $0xdc] sm:$0xf]  ;;  %v12819_v54 = vrot.slane %v1030_v52, %v12282_v7  ;;  %v12822_v32 = vrot.slane %v1074_v27, %v12282_v7  ;;  %v12825_v39 = vrot.slane %v1082_v1, %v12282_v7  ;;  %11385 = vmatprep.mubr.msk.bf16.mxu1 %vm413_vm0, %v11694_v22 }
  0x86   : > { %17452 = vst [vmem:[#allocation28_spill] sm:$0xff] %v12812_v49  ;;  %v11693_v56 = vld [vmem:[#allocation5 + $0x8] sm:$0xff]   ;;  %v534_v53 = vld [vmem:[%s12579_s6 + $0xe0] sm:$0xf]  ;;  %v535_v48 = vld [vmem:[%s12579_s6 + $0xe4] sm:$0xf]  ;;  %v12833_v2 = vrot.slane %v1038_v26, %v12296_v25  ;;  %v12836_v18 = vrot.slane %v1090_v42, %v12282_v7  ;;  %v12839_v3 = vrot.slane %v1098_v13, %v12282_v7 }
  0x87   : > { %17453 = vst [vmem:[#allocation29_spill] sm:$0xff] %v12819_v54  ;;  %17454 = vst [vmem:[#allocation30_spill] sm:$0xff] %v12822_v32  ;;  %v536_v41 = vld [vmem:[%s12579_s6 + $0xe8] sm:$0xf]  ;;  %v537_v62 = vld [vmem:[%s12579_s6 + $0xec] sm:$0xf]  ;;  %11354 = vmatmul.mubr.msk.bf16.vlgmr.msra.gmra.mxu0 %vm413_vm0, %v11693_v56  ;;  %v1054_v1 = vcombine.low %v12812_v49, %v12819_v54  ;;  %v1106_v22 = vcombine.low %v12822_v32, %v12825_v39 }
  0x88   : > { %17455 = vst [vmem:[#allocation31_spill] sm:$0xff] %v12825_v39  ;;  %v11695_v14 = vld [vmem:[#allocation5 + $0x48] sm:$0xff]   ;;  %17456 = vst [vmem:[#allocation32_spill] sm:$0xff] %v12836_v18  ;;  %v538_v57 = vld [vmem:[%s12579_s6 + $0xf0] sm:$0xf]  ;;  %11402 = vmatpush3.bf16.xpose.msra.mxu0 %v12761_v23  ;;  %v1122_v13 = vcombine.low %v12836_v18, %v12839_v3 }
  0x89   : > { %17457 = vst [vmem:[#allocation33_spill] sm:$0xff] %v12839_v3  ;;  %v539_v52 = vld [vmem:[%s12579_s6 + $0xf4] sm:$0xf]  ;;  %v654_v27 = vmul.f32 0.17677669, %v526_v51  ;;  %11386 = vmatmul.mubr.msk.bf16.vlgmr.msra.gmra.mxu1 %vm413_vm0, %v11695_v14  ;;  %11610 = vmatprep.subr.msk.bf16.mxu0 %vm413_vm0, %v12791_v44  ;;  %v1062_v49 = vrot.slane %v1054_v1, %v12296_v25  ;;  %v1114_v32 = vrot.slane %v1106_v22, %v12296_v25 }
  0x8a   : > { %v540_v26 = vld [vmem:[%s12579_s6 + $0xf8] sm:$0xf]  ;;  %v655_v17 = vmul.f32 0.17677669, %v527_v31  ;;  %v656_v42 = vmul.f32 0.17677669, %v528_v15  ;;  %11434 = vmatpush3.bf16.xpose.msra.mxu1 %v5185_v63  ;;  %v1130_v23 = vrot.slane %v1122_v13, %v12296_v25 }
  0x8b   : > { %v657_v51 = vmul.f32 0.17677669, %v529_v10  ;;  %v658_v12 = vmul.f32 0.17677669, %v530_v24  ;;  %v659_v56 = vmul.f32 0.17677669, %v531_v16  ;;  %v1070_v10 = vcombine.low %v12833_v2, %v1062_v49 }
  0x8c   : > { %v541_v31 = vld [vmem:[%s12579_s6 + $0xfc] sm:$0xf]  ;;  %v660_v15 = vmul.f32 0.17677669, %v532_v4  ;;  %v661_v39 = vmul.f32 0.17677669, %v533_v46  ;;  %v1138_v18 = vcombine.low %v1114_v32, %v1130_v23  ;;  %v1142_v9 = vcombine.low %v654_v27, %v656_v42 }
  0x8d   : > { %v662_v14 = vmul.f32 0.17677669, %v534_v53  ;;  %v663_v54 = vmul.f32 0.17677669, %v535_v48  ;;  %v664_v29 = vmul.f32 0.17677669, %v536_v41  ;;  %v11148_v1 = vpack.c.bf16 %v1070_v10, %v1070_v10 }
  0x8e   : > { %v665_v24 = vmul.f32 0.17677669, %v537_v62  ;;  %v666_v16 = vmul.f32 0.17677669, %v538_v57  ;;  %v667_v63 = vmul.f32 0.17677669, %v539_v52  ;;  %v1150_v8 = vcombine.low %v655_v17, %v657_v51 }
  0x8f   : > { %v668_v3 = vmul.f32 0.17677669, %v540_v26  ;;  %v669_v44 = vmul.f32 0.17677669, %v541_v31  ;;  %v1158_v22 = vcombine.low %v658_v12, %v660_v15  ;;  %v1166_v58 = vcombine.low %v659_v56, %v661_v39  ;;  %2083 = vst.msk [vmem:[#allocation5 + $0x10] sm:$0xf] %vm2078_vm1, %v11148_v1 }
  0x90   : > { %v11149_v4 = vpack.c.bf16 %v1138_v18, %v1138_v18  ;;  %v12862_v46 = vrot.slane %v1142_v9, %v12282_v7  ;;  %v1210_v53 = vcombine.low %v662_v14, %v664_v29  ;;  %v1218_v48 = vcombine.low %v663_v54, %v665_v24  ;;  %11404 = vmatpush3.bf16.xpose.msra.mxu0 %v12806_v45  ;;  %v543_v56 = vld [vmem:[%s12579_s6 + $0x104] sm:$0xf]  ;;  %v544_v15 = vld [vmem:[%s12579_s6 + $0x108] sm:$0xf]  ;;  %v546_v14 = vld [vmem:[%s12579_s6 + $0x110] sm:$0xf] }
  0x91   : > { %v12866_v41 = vrot.slane %v1150_v8, %v12282_v7  ;;  %v12869_v62 = vrot.slane %v1158_v22, %v12282_v7  ;;  %v12872_v57 = vrot.slane %v1166_v58, %v12282_v7  ;;  %v1226_v17 = vcombine.low %v666_v16, %v668_v3  ;;  %v548_v1 = vld [vmem:[%s12579_s6 + $0x118] sm:$0xf]  ;;  %v549_v22 = vld [vmem:[%s12579_s6 + $0x11c] sm:$0xf] }
  0x92   : > { %2084 = vst.msk [vmem:[#allocation5 + $0x14] sm:$0xf] %vm2078_vm1, %v11149_v4  ;;  %v12877_v9 = vrot.slane %v1210_v53, %v12282_v7  ;;  %v12880_v12 = vrot.slane %v1218_v48, %v12282_v7  ;;  %v1234_v29 = vcombine.low %v667_v63, %v669_v44  ;;  %v3281_v8 = vshrl.u32 %v12776_v47, 16  ;;  %v547_v44 = vld [vmem:[%s12579_s6 + $0x114] sm:$0xf] }
  0x93   : > { %v1174_v54 = vcombine.low %v12862_v46, %v12866_v41  ;;  %v1190_v58 = vcombine.low %v12869_v62, %v12872_v57  ;;  %v12888_v39 = vrot.slane %v1226_v17, %v12282_v7  ;;  %v2948_v45 = vcombine.high %v12387_v11, %v12400_v33 }
  0x94   : > { %v12893_v18 = vrot.slane %v1234_v29, %v12282_v7  ;;  %v1242_v47 = vcombine.low %v12877_v9, %v12880_v12  ;;  %v17458_v3 = vshrl.u32 %v12772_v6, 16  ;;  %v2998_v27 = vcombine.high %v12406_v37, %v12418_v50  ;;  %v542_v50 = vld [vmem:[%s12579_s6 + $0x100] sm:$0xf] }
  0x95   : > { %v1182_v26 = vrot.slane %v1174_v54, %v12296_v25  ;;  %v1198_v42 = vrot.slane %v1190_v58, %v12296_v25  ;;  %v1071_v11 = vcombine.high %v12833_v2, %v1062_v49  ;;  %v1139_v33 = vcombine.high %v1114_v32, %v1130_v23  ;;  %v545_v23 = vld [vmem:[%s12579_s6 + $0x10c] sm:$0xf]  ;;  %v551_v54 = vld [vmem:[%s12579_s6 + $0x124] sm:$0xf]  ;;  %v552_v58 = vld [vmem:[%s12579_s6 + $0x128] sm:$0xf] }
  0x96   : > { %v3282_v52 = vpack.i.b16 %v3281_v8, %v17458_v3  ;;  %v1250_v13 = vrot.slane %v1242_v47, %v12296_v25  ;;  %v1258_v51 = vcombine.low %v12888_v39, %v12893_v18  ;;  %v3267_v37 = vpack.i.b16 %v2998_v27, %v2948_v45  ;;  %v550_v8 = vld [vmem:[%s12579_s6 + $0x120] sm:$0xf] }
  0x97   : > { %v1206_v31 = vcombine.low %v1182_v26, %v1198_v42  ;;  %v11164_v49 = vpack.c.bf16 %v1071_v11, %v1071_v11  ;;  %v11165_v2 = vpack.c.bf16 %v1139_v33, %v1139_v33  ;;  %v1207_v32 = vcombine.high %v1182_v26, %v1198_v42  ;;  %v555_v26 = vld [vmem:[%s12579_s6 + $0x134] sm:$0xf] }
  0x98   : > { %11618 = vmatprep.subr.msk.bf16.mxu1 %vm413_vm0, %v3282_v52  ;;  %v5182_v6 = vsel %vm413_vm0, %v3282_v52, 0  ;;  %v1266_v10 = vrot.slane %v1258_v51, %v12296_v25  ;;  %11611 = vmatprep.subr.msk.bf16.mxu0 %vm413_vm0, %v3267_v37  ;;  %v4994_v24 = vsel %vm413_vm0, %v3267_v37, 0  ;;  %v3268_v16 = vshrl.u32 %v2948_v45, 16  ;;  %v553_v52 = vld [vmem:[%s12579_s6 + $0x12c] sm:$0xf] }
  0x99   : > { %11436 = vmatpush3.bf16.xpose.msra.mxu1 %v5182_v6  ;;  %v3269_v63 = vshrl.u32 %v2998_v27, 16  ;;  %v11696_v4 = vld [vmem:[#allocation5 + $0x10] sm:$0xff]   ;;  %v11150_v53 = vpack.c.bf16 %v1206_v31, %v1206_v31  ;;  %2099 = vst.msk [vmem:[#allocation5 + $0x50] sm:$0xf] %vm2078_vm1, %v11164_v49  ;;  %2100 = vst.msk [vmem:[#allocation5 + $0x54] sm:$0xf] %vm2078_vm1, %v11165_v2  ;;  %v11166_v48 = vpack.c.bf16 %v1207_v32, %v1207_v32  ;;  %11406 = vmatpush3.bf16.xpose.msra.mxu0 %v4994_v24 }
  0x9a   : > { %v12924_v17 = vcombine.high %v12431_v0, %v12443_v21  ;;  %v12928_v29 = vcombine.high %v12453_v34, %v12469_v55  ;;  %v1274_v45 = vcombine.low %v1250_v13, %v1266_v10  ;;  %v1275_v47 = vcombine.high %v1250_v13, %v1266_v10  ;;  %v554_v27 = vld [vmem:[%s12579_s6 + $0x130] sm:$0xf]  ;;  %11357 = vmatprep.mubr.msk.bf16.mxu0 %vm413_vm0, %v11696_v4  ;;  %v556_v51 = vld [vmem:[%s12579_s6 + $0x138] sm:$0xf]  ;;  %v557_v6 = vld [vmem:[%s12579_s6 + $0x13c] sm:$0xf] }
  0x9b   : > { %v3270_v3 = vpack.i.b16 %v3269_v63, %v3268_v16  ;;  %v670_v42 = vmul.f32 0.17677669, %v542_v50  ;;  %2085 = vst.msk [vmem:[#allocation5 + $0x18] sm:$0xf] %vm2078_vm1, %v11150_v53  ;;  %2101 = vst.msk [vmem:[#allocation5 + $0x58] sm:$0xf] %vm2078_vm1, %v11166_v48 }
  0x9c   : > { %v3255_v0 = vpack.i.b16 %v12928_v29, %v12924_v17  ;;  %v671_v21 = vmul.f32 0.17677669, %v543_v56  ;;  %v672_v34 = vmul.f32 0.17677669, %v544_v15  ;;  %v673_v55 = vmul.f32 0.17677669, %v545_v23 }
  0x9d   : > { %v11151_v11 = vpack.c.bf16 %v1274_v45, %v1274_v45  ;;  %v11167_v33 = vpack.c.bf16 %v1275_v47, %v1275_v47  ;;  %11619 = vmatprep.subr.msk.bf16.mxu1 %vm413_vm0, %v3270_v3  ;;  %v5179_v13 = vsel %vm413_vm0, %v3270_v3, 0  ;;  %v674_v37 = vmul.f32 0.17677669, %v546_v14  ;;  %v558_v10 = vld [vmem:[%s12579_s6 + $0x140] sm:$0xf] }
  0x9e   : > { %11612 = vmatprep.subr.msk.bf16.mxu0 %vm413_vm0, %v3255_v0  ;;  %v675_v50 = vmul.f32 0.17677669, %v547_v44  ;;  %v676_v31 = vmul.f32 0.17677669, %v548_v1  ;;  %v677_v49 = vmul.f32 0.17677669, %v549_v22  ;;  %v1278_v56 = vcombine.low %v670_v42, %v672_v34 }
  0x9f   : > { %2086 = vst.msk [vmem:[#allocation5 + $0x1c] sm:$0xf] %vm2078_vm1, %v11151_v11  ;;  %2102 = vst.msk [vmem:[#allocation5 + $0x5c] sm:$0xf] %vm2078_vm1, %v11167_v33  ;;  %v678_v2 = vmul.f32 0.17677669, %v550_v8  ;;  %v1286_v23 = vcombine.low %v671_v21, %v673_v55 }
  0xa0   : > { %v679_v32 = vmul.f32 0.17677669, %v551_v54  ;;  %v680_v15 = vmul.f32 0.17677669, %v552_v58  ;;  %v681_v14 = vmul.f32 0.17677669, %v553_v52  ;;  %v12950_v63 = vrot.slane %v1278_v56, %v12282_v7 }
  0xa1   : > { %11438 = vmatpush3.bf16.xpose.msra.mxu1 %v5179_v13  ;;  %v682_v24 = vmul.f32 0.17677669, %v554_v27  ;;  %v683_v16 = vmul.f32 0.17677669, %v555_v26  ;;  %v559_v44 = vld [vmem:[%s12579_s6 + $0x144] sm:$0xf]  ;;  %v12955_v4 = vrot.slane %v1286_v23, %v12282_v7  ;;  %v1294_v53 = vcombine.low %v674_v37, %v676_v31 }
  0xa2   : > { %v560_v1 = vld [vmem:[%s12579_s6 + $0x148] sm:$0xf]  ;;  %v11698_v22 = vld [vmem:[#allocation5 + $0x50] sm:$0xff]   ;;  %v1302_v48 = vcombine.low %v675_v50, %v677_v49  ;;  %v1346_v8 = vcombine.low %v678_v2, %v680_v15  ;;  %v684_v54 = vmul.f32 0.17677669, %v556_v51  ;;  %v1354_v45 = vcombine.low %v679_v32, %v681_v14 }
  0xa3   : > { %v685_v58 = vmul.f32 0.17677669, %v557_v6  ;;  %v4991_v47 = vsel %vm413_vm0, %v3255_v0, 0  ;;  %v561_v3 = vld [vmem:[%s12579_s6 + $0x14c] sm:$0xf]  ;;  %11389 = vmatprep.mubr.msk.bf16.mxu1 %vm413_vm0, %v11698_v22  ;;  %v12962_v27 = vrot.slane %v1294_v53, %v12282_v7  ;;  %v1310_v42 = vcombine.low %v12950_v63, %v12955_v4 }
  0xa4   : > { %v562_v52 = vld [vmem:[%s12579_s6 + $0x150] sm:$0xf]  ;;  %v12965_v26 = vrot.slane %v1302_v48, %v12282_v7  ;;  %v12970_v21 = vrot.slane %v1346_v8, %v12282_v7  ;;  %v563_v0 = vld [vmem:[%s12579_s6 + $0x154] sm:$0xf]  ;;  %v564_v34 = vld [vmem:[%s12579_s6 + $0x158] sm:$0xf]  ;;  %v12975_v55 = vrot.slane %v1354_v45, %v12282_v7  ;;  %v1362_v11 = vcombine.low %v682_v24, %v684_v54  ;;  %11408 = vmatpush3.bf16.xpose.msra.mxu0 %v4991_v47 }
  0xa5   : > { %17459 = vst [vmem:[#allocation34_spill] sm:$0xff] %v12962_v27  ;;  %v1370_v33 = vcombine.low %v683_v16, %v685_v58  ;;  %v565_v13 = vld [vmem:[%s12579_s6 + $0x15c] sm:$0xf]  ;;  %v566_v51 = vld [vmem:[%s12579_s6 + $0x160] sm:$0xf]  ;;  %v12981_v50 = vrot.slane %v1310_v42, %v12296_v25  ;;  %v3256_v53 = vshrl.u32 %v12924_v17, 16 }
  0xa6   : > { %17460 = vst [vmem:[#allocation35_spill] sm:$0xff] %v12970_v21  ;;  %17461 = vst [vmem:[#allocation36_spill] sm:$0xff] %v12975_v55  ;;  %v567_v6 = vld [vmem:[%s12579_s6 + $0x164] sm:$0xf]  ;;  %v686_v37 = vmul.f32 0.17677669, %v558_v10  ;;  %v1326_v31 = vcombine.low %v12962_v27, %v12965_v26  ;;  %v12989_v14 = vrot.slane %v1362_v11, %v12282_v7  ;;  %v1378_v10 = vcombine.low %v12970_v21, %v12975_v55 }
  0xa7   : > { %v568_v49 = vld [vmem:[%s12579_s6 + $0x168] sm:$0xf]  ;;  %v569_v56 = vld [vmem:[%s12579_s6 + $0x16c] sm:$0xf]  ;;  %v570_v2 = vld [vmem:[%s12579_s6 + $0x170] sm:$0xf]  ;;  %v12992_v24 = vrot.slane %v1370_v33, %v12282_v7 }
  0xa8   : > { %v687_v32 = vmul.f32 0.17677669, %v559_v44  ;;  %v688_v15 = vmul.f32 0.17677669, %v560_v1  ;;  %v11697_v23 = vld [vmem:[#allocation5 + $0x18] sm:$0xff]   ;;  %17462 = vst [vmem:[#allocation37_spill] sm:$0xff] %v12989_v14  ;;  %v1334_v8 = vrot.slane %v1326_v31, %v12296_v25  ;;  %v1386_v58 = vrot.slane %v1378_v10, %v12296_v25 }
  0xa9   : > { %17463 = vst [vmem:[#allocation38_spill] sm:$0xff] %v12992_v24  ;;  %v571_v16 = vld [vmem:[%s12579_s6 + $0x174] sm:$0xf]  ;;  %v572_v22 = vld [vmem:[%s12579_s6 + $0x178] sm:$0xf]  ;;  %11358 = vmatmul.mubr.msk.bf16.gmra.mxu0 %vm413_vm0, %v11697_v23  ;;  %v1394_v45 = vcombine.low %v12989_v14, %v12992_v24 }
  0xaa   : > { %v11699_v48 = vld [vmem:[#allocation5 + $0x58] sm:$0xff]   ;;  %v689_v44 = vmul.f32 0.17677669, %v561_v3  ;;  %v690_v1 = vmul.f32 0.17677669, %v562_v52  ;;  %v1414_v54 = vcombine.low %v686_v37, %v688_v15  ;;  %v1342_v17 = vcombine.low %v12981_v50, %v1334_v8 }
  0xab   : > { %v573_v47 = vld [vmem:[%s12579_s6 + $0x17c] sm:$0xf]  ;;  %v691_v42 = vmul.f32 0.17677669, %v563_v0  ;;  %v692_v11 = vmul.f32 0.17677669, %v564_v34  ;;  %11390 = vmatmul.mubr.msk.bf16.gmra.mxu1 %vm413_vm0, %v11699_v48  ;;  %v1402_v3 = vrot.slane %v1394_v45, %v12296_v25 }
  0xac   : > { %v693_v33 = vmul.f32 0.17677669, %v565_v13  ;;  %v694_v21 = vmul.f32 0.17677669, %v566_v51  ;;  %v695_v31 = vmul.f32 0.17677669, %v567_v6  ;;  %v11152_v23 = vpack.c.bf16 %v1342_v17, %v1342_v17 }
  0xad   : > { %v696_v52 = vmul.f32 0.17677669, %v568_v49  ;;  %v697_v37 = vmul.f32 0.17677669, %v569_v56  ;;  %v698_v15 = vmul.f32 0.17677669, %v570_v2  ;;  %v1410_v14 = vcombine.low %v1386_v58, %v1402_v3 }
  0xae   : > { %v699_v10 = vmul.f32 0.17677669, %v571_v16  ;;  %v700_v55 = vmul.f32 0.17677669, %v572_v22  ;;  %v701_v27 = vmul.f32 0.17677669, %v573_v47  ;;  %v13009_v0 = vrot.slane %v1414_v54, %v12282_v7 }
  0xaf   : > { %v1422_v34 = vcombine.low %v687_v32, %v689_v44  ;;  %v1430_v48 = vcombine.low %v690_v1, %v692_v11  ;;  %2087 = vst.msk [vmem:[#allocation5 + $0x20] sm:$0xf] %vm2078_vm1, %v11152_v23  ;;  %v1438_v13 = vcombine.low %v691_v42, %v693_v33  ;;  %v1482_v51 = vcombine.low %v694_v21, %v696_v52  ;;  %v574_v52 = vld [vmem:[%s12579_s6 + $0x180] sm:$0xf] }
  0xb0   : > { %v1490_v6 = vcombine.low %v695_v31, %v697_v37  ;;  %v1498_v24 = vcombine.low %v698_v15, %v700_v55  ;;  %v11153_v45 = vpack.c.bf16 %v1410_v14, %v1410_v14  ;;  %v1506_v2 = vcombine.low %v699_v10, %v701_v27 }
  0xb1   : > { %v13013_v49 = vrot.slane %v1422_v34, %v12282_v7  ;;  %v13016_v56 = vrot.slane %v1430_v48, %v12282_v7  ;;  %v13019_v16 = vrot.slane %v1438_v13, %v12282_v7  ;;  %v13022_v32 = vrot.slane %v1482_v51, %v12282_v7  ;;  %v578_v34 = vld [vmem:[%s12579_s6 + $0x190] sm:$0xf]  ;;  %v579_v48 = vld [vmem:[%s12579_s6 + $0x194] sm:$0xf]  ;;  %v580_v13 = vld [vmem:[%s12579_s6 + $0x198] sm:$0xf] }
  0xb2   : > { %v13025_v22 = vrot.slane %v1490_v6, %v12282_v7  ;;  %v13028_v21 = vrot.slane %v1498_v24, %v12282_v7  ;;  %2088 = vst.msk [vmem:[#allocation5 + $0x24] sm:$0xf] %vm2078_vm1, %v11153_v45  ;;  %v13034_v27 = vrot.slane %v1506_v2, %v12282_v7  ;;  %v3257_v14 = vshrl.u32 %v12928_v29, 16 }
  0xb3   : > { %v1446_v55 = vcombine.low %v13009_v0, %v13013_v49  ;;  %v2748_v44 = vcombine.high %v12475_v61, %v12488_v20  ;;  %v1462_v1 = vcombine.low %v13016_v56, %v13019_v16  ;;  %v2798_v54 = vcombine.high %v12494_v28, %v12506_v43  ;;  %v575_v28 = vld [vmem:[%s12579_s6 + $0x184] sm:$0xf] }
  0xb4   : > { %17464 = vst [vmem:[#allocation39_spill] sm:$0xff] %v13028_v21  ;;  %v1514_v24 = vcombine.low %v13022_v32, %v13025_v22  ;;  %v1343_v47 = vcombine.high %v12981_v50, %v1334_v8  ;;  %v1530_v29 = vcombine.low %v13028_v21, %v13034_v27  ;;  %v3258_v11 = vpack.i.b16 %v3257_v14, %v3256_v53  ;;  %v582_v14 = vld [vmem:[%s12579_s6 + $0x1a0] sm:$0xf] }
  0xb5   : > { %v1454_v42 = vrot.slane %v1446_v55, %v12296_v25  ;;  %v1411_v61 = vcombine.high %v1386_v58, %v1402_v3  ;;  %v1470_v20 = vrot.slane %v1462_v1, %v12296_v25  ;;  %v3243_v33 = vpack.i.b16 %v2798_v54, %v2748_v44  ;;  %v576_v58 = vld [vmem:[%s12579_s6 + $0x188] sm:$0xf]  ;;  %v577_v3 = vld [vmem:[%s12579_s6 + $0x18c] sm:$0xf]  ;;  %v581_v55 = vld [vmem:[%s12579_s6 + $0x19c] sm:$0xf] }
  0xb6   : > { %v1522_v17 = vrot.slane %v1514_v24, %v12296_v25  ;;  %v11168_v31 = vpack.c.bf16 %v1343_v47, %v1343_v47  ;;  %v1538_v43 = vrot.slane %v1530_v29, %v12296_v25  ;;  %11620 = vmatprep.subr.msk.bf16.mxu1 %vm413_vm0, %v3258_v11  ;;  %v5176_v50 = vsel %vm413_vm0, %v3258_v11, 0 }
  0xb7   : > { %v11169_v8 = vpack.c.bf16 %v1411_v61, %v1411_v61  ;;  %v3244_v53 = vshrl.u32 %v2748_v44, 16  ;;  %v1478_v37 = vcombine.low %v1454_v42, %v1470_v20  ;;  %11440 = vmatpush3.bf16.xpose.msra.mxu1 %v5176_v50  ;;  %11613 = vmatprep.subr.msk.bf16.mxu0 %vm413_vm0, %v3243_v33  ;;  %v4988_v15 = vsel %vm413_vm0, %v3243_v33, 0  ;;  %v583_v44 = vld [vmem:[%s12579_s6 + $0x1a4] sm:$0xf]  ;;  %v588_v33 = vld [vmem:[%s12579_s6 + $0x1b8] sm:$0xf] }
  0xb8   : > { %2103 = vst.msk [vmem:[#allocation5 + $0x60] sm:$0xf] %vm2078_vm1, %v11168_v31  ;;  %v1479_v23 = vcombine.high %v1454_v42, %v1470_v20  ;;  %v3245_v10 = vshrl.u32 %v2798_v54, 16  ;;  %v1546_v51 = vcombine.low %v1522_v17, %v1538_v43  ;;  %11410 = vmatpush3.bf16.xpose.msra.mxu0 %v4988_v15  ;;  %v1547_v6 = vcombine.high %v1522_v17, %v1538_v43  ;;  %v584_v42 = vld [vmem:[%s12579_s6 + $0x1a8] sm:$0xf] }
  0xb9   : > { %2104 = vst.msk [vmem:[#allocation5 + $0x64] sm:$0xf] %vm2078_vm1, %v11169_v8  ;;  %v13067_v45 = vcombine.high %v12519_v60, %v12531_v19  ;;  %v13071_v2 = vcombine.high %v12541_v36, %v12557_v59  ;;  %v11700_v1 = vld [vmem:[#allocation5 + $0x20] sm:$0xff]   ;;  %v11154_v24 = vpack.c.bf16 %v1478_v37, %v1478_v37  ;;  %v702_v29 = vmul.f32 0.17677669, %v574_v52 }
  0xba   : > { %v11170_v54 = vpack.c.bf16 %v1479_v23, %v1479_v23  ;;  %v3246_v47 = vpack.i.b16 %v3245_v10, %v3244_v53  ;;  %v11155_v11 = vpack.c.bf16 %v1546_v51, %v1546_v51  ;;  %v11171_v61 = vpack.c.bf16 %v1547_v6, %v1547_v6  ;;  %v585_v19 = vld [vmem:[%s12579_s6 + $0x1ac] sm:$0xf]  ;;  %v586_v36 = vld [vmem:[%s12579_s6 + $0x1b0] sm:$0xf]  ;;  %11361 = vmatprep.mubr.msk.bf16.mxu0 %vm413_vm0, %v11700_v1  ;;  %v587_v17 = vld [vmem:[%s12579_s6 + $0x1b4] sm:$0xf] }
  0xbb   : > { %v3231_v60 = vpack.i.b16 %v13071_v2, %v13067_v45  ;;  %v703_v59 = vmul.f32 0.17677669, %v575_v28  ;;  %2089 = vst.msk [vmem:[#allocation5 + $0x28] sm:$0xf] %vm2078_vm1, %v11154_v24  ;;  %v589_v31 = vld [vmem:[%s12579_s6 + $0x1bc] sm:$0xf]  ;;  %v13095_v37 = vcombine.high %v12563_v5, %v12582_v35 }
  0xbc   : > { %2105 = vst.msk [vmem:[#allocation5 + $0x68] sm:$0xf] %vm2078_vm1, %v11170_v54  ;;  %11621 = vmatprep.subr.msk.bf16.mxu1 %vm413_vm0, %v3246_v47  ;;  %v5173_v20 = vsel %vm413_vm0, %v3246_v47, 0  ;;  %v704_v52 = vmul.f32 0.17677669, %v576_v58 }
  0xbd   : > { %v705_v43 = vmul.f32 0.17677669, %v577_v3  ;;  %2090 = vst.msk [vmem:[#allocation5 + $0x2c] sm:$0xf] %vm2078_vm1, %v11155_v11  ;;  %2106 = vst.msk [vmem:[#allocation5 + $0x6c] sm:$0xf] %vm2078_vm1, %v11171_v61  ;;  %11614 = vmatprep.subr.msk.bf16.mxu0 %vm413_vm0, %v3231_v60 }
  0xbe   : > { %v706_v28 = vmul.f32 0.17677669, %v578_v34  ;;  %v707_v8 = vmul.f32 0.17677669, %v579_v48  ;;  %v708_v53 = vmul.f32 0.17677669, %v580_v13  ;;  %v1550_v3 = vcombine.low %v702_v29, %v704_v52 }
  0xbf   : > { %v709_v15 = vmul.f32 0.17677669, %v581_v55  ;;  %v710_v23 = vmul.f32 0.17677669, %v582_v14  ;;  %v711_v58 = vmul.f32 0.17677669, %v583_v44  ;;  %v1558_v1 = vcombine.low %v703_v59, %v705_v43  ;;  %11442 = vmatpush3.bf16.xpose.msra.mxu1 %v5173_v20 }
  0xc0   : > { %v590_v10 = vld [vmem:[%s12579_s6 + $0x1c0] sm:$0xf]  ;;  %v712_v51 = vmul.f32 0.17677669, %v584_v42  ;;  %v713_v6 = vmul.f32 0.17677669, %v585_v19  ;;  %v1566_v24 = vcombine.low %v706_v28, %v708_v53  ;;  %v13099_v48 = vrot.slane %v1550_v3, %v12282_v7 }
  0xc1   : > { %v11702_v54 = vld [vmem:[#allocation5 + $0x60] sm:$0xff]   ;;  %v714_v34 = vmul.f32 0.17677669, %v586_v36  ;;  %v1574_v5 = vcombine.low %v707_v8, %v709_v15  ;;  %v4985_v35 = vsel %vm413_vm0, %v3231_v60, 0  ;;  %v715_v55 = vmul.f32 0.17677669, %v587_v17 }
  0xc2   : > { %17465 = vst [vmem:[#allocation40_spill] sm:$0xff] %v13099_v48  ;;  %v591_v13 = vld [vmem:[%s12579_s6 + $0x1c4] sm:$0xf]  ;;  %v716_v14 = vmul.f32 0.17677669, %v588_v33  ;;  %v13104_v47 = vrot.slane %v1558_v1, %v12282_v7  ;;  %11412 = vmatpush3.bf16.xpose.msra.mxu0 %v4985_v35  ;;  %11393 = vmatprep.mubr.msk.bf16.mxu1 %vm413_vm0, %v11702_v54  ;;  %v13110_v11 = vrot.slane %v1566_v24, %v12282_v7 }
  0xc3   : > { %v717_v44 = vmul.f32 0.17677669, %v589_v31  ;;  %v592_v42 = vld [vmem:[%s12579_s6 + $0x1c8] sm:$0xf]  ;;  %v593_v29 = vld [vmem:[%s12579_s6 + $0x1cc] sm:$0xf]  ;;  %v13113_v61 = vrot.slane %v1574_v5, %v12282_v7  ;;  %v1618_v60 = vcombine.low %v710_v23, %v712_v51  ;;  %v1626_v19 = vcombine.low %v711_v58, %v713_v6 }
  0xc4   : > { %17466 = vst [vmem:[#allocation41_spill] sm:$0xff] %v13104_v47  ;;  %17467 = vst [vmem:[#allocation42_spill] sm:$0xff] %v13110_v11  ;;  %v594_v36 = vld [vmem:[%s12579_s6 + $0x1d0] sm:$0xf]  ;;  %v595_v59 = vld [vmem:[%s12579_s6 + $0x1d4] sm:$0xf]  ;;  %v1582_v17 = vcombine.low %v13099_v48, %v13104_v47  ;;  %v1634_v33 = vcombine.low %v714_v34, %v716_v14 }
  0xc5   : > { %17468 = vst [vmem:[#allocation43_spill] sm:$0xff] %v13113_v61  ;;  %v596_v20 = vld [vmem:[%s12579_s6 + $0x1d8] sm:$0xf]  ;;  %v1642_v31 = vcombine.low %v715_v55, %v717_v44  ;;  %v597_v52 = vld [vmem:[%s12579_s6 + $0x1dc] sm:$0xf]  ;;  %v11701_v8 = vld [vmem:[#allocation5 + $0x28] sm:$0xff]   ;;  %v1598_v53 = vcombine.low %v13110_v11, %v13113_v61  ;;  %v13125_v15 = vrot.slane %v1618_v60, %v12282_v7  ;;  %v13128_v23 = vrot.slane %v1626_v19, %v12282_v7 }
  0xc6   : > { %v598_v43 = vld [vmem:[%s12579_s6 + $0x1e0] sm:$0xf]  ;;  %v718_v28 = vmul.f32 0.17677669, %v590_v10  ;;  %v599_v58 = vld [vmem:[%s12579_s6 + $0x1e4] sm:$0xf]  ;;  %v1590_v24 = vrot.slane %v1582_v17, %v12296_v25  ;;  %v13136_v10 = vrot.slane %v1634_v33, %v12282_v7  ;;  %11362 = vmatmul.mubr.msk.bf16.gmra.mxu0 %vm413_vm0, %v11701_v8 }
  0xc7   : > { %17469 = vst [vmem:[#allocation44_spill] sm:$0xff] %v13125_v15  ;;  %17470 = vst [vmem:[#allocation45_spill] sm:$0xff] %v13128_v23  ;;  %v600_v3 = vld [vmem:[%s12579_s6 + $0x1e8] sm:$0xf]  ;;  %v601_v51 = vld [vmem:[%s12579_s6 + $0x1ec] sm:$0xf]  ;;  %v13139_v54 = vrot.slane %v1642_v31, %v12282_v7  ;;  %v1606_v55 = vrot.slane %v1598_v53, %v12296_v25 }
  0xc8   : > { %v3233_v6 = vshrl.u32 %v13071_v2, 16  ;;  %v11703_v1 = vld [vmem:[#allocation5 + $0x68] sm:$0xff]   ;;  %17471 = vst [vmem:[#allocation46_spill] sm:$0xff] %v13136_v10  ;;  %v602_v34 = vld [vmem:[%s12579_s6 + $0x1f0] sm:$0xf]  ;;  %v1650_v2 = vcombine.low %v13125_v15, %v13128_v23 }
  0xc9   : > { %17472 = vst [vmem:[#allocation47_spill] sm:$0xff] %v13139_v54  ;;  %v603_v5 = vld [vmem:[%s12579_s6 + $0x1f4] sm:$0xf]  ;;  %v719_v35 = vmul.f32 0.17677669, %v591_v13  ;;  %11394 = vmatmul.mubr.msk.bf16.gmra.mxu1 %vm413_vm0, %v11703_v1  ;;  %v1666_v19 = vcombine.low %v13136_v10, %v13139_v54  ;;  %v1614_v50 = vcombine.low %v1590_v24, %v1606_v55 }
  0xca   : > { %v604_v14 = vld [vmem:[%s12579_s6 + $0x1f8] sm:$0xf]  ;;  %v720_v44 = vmul.f32 0.17677669, %v592_v42  ;;  %v721_v60 = vmul.f32 0.17677669, %v593_v29  ;;  %v1658_v13 = vrot.slane %v1650_v2, %v12296_v25 }
  0xcb   : > { %v722_v17 = vmul.f32 0.17677669, %v594_v36  ;;  %v723_v33 = vmul.f32 0.17677669, %v595_v59  ;;  %v724_v31 = vmul.f32 0.17677669, %v596_v20  ;;  %v1674_v61 = vrot.slane %v1666_v19, %v12296_v25 }
  0xcc   : > { %v605_v8 = vld [vmem:[%s12579_s6 + $0x1fc] sm:$0xf]  ;;  %v725_v11 = vmul.f32 0.17677669, %v597_v52  ;;  %v726_v53 = vmul.f32 0.17677669, %v598_v43  ;;  %v11156_v29 = vpack.c.bf16 %v1614_v50, %v1614_v50  ;;  %v1686_v36 = vcombine.low %v718_v28, %v720_v44 }
  0xcd   : > { %v727_v15 = vmul.f32 0.17677669, %v599_v58  ;;  %v728_v23 = vmul.f32 0.17677669, %v600_v3  ;;  %v729_v42 = vmul.f32 0.17677669, %v601_v51  ;;  %v1682_v21 = vcombine.low %v1658_v13, %v1674_v61 }
  0xce   : > { %v730_v48 = vmul.f32 0.17677669, %v602_v34  ;;  %v731_v1 = vmul.f32 0.17677669, %v603_v5  ;;  %v732_v47 = vmul.f32 0.17677669, %v604_v14  ;;  %v1694_v59 = vcombine.low %v719_v35, %v721_v60 }
  0xcf   : > { %v733_v10 = vmul.f32 0.17677669, %v605_v8  ;;  %2091 = vst.msk [vmem:[#allocation5 + $0x30] sm:$0xf] %vm2078_vm1, %v11156_v29  ;;  %v1702_v20 = vcombine.low %v722_v17, %v724_v31  ;;  %v1710_v2 = vcombine.low %v723_v33, %v725_v11  ;;  %v1754_v54 = vcombine.low %v726_v53, %v728_v23  ;;  %v17474_v5 = vld [vmem:[#allocation12_spill] sm:$0xff]  ;;  %v17475_v35 = vld [vmem:[#allocation11_spill] sm:$0xff] }
  0xd0   : > { %v1762_v52 = vcombine.low %v727_v15, %v729_v42  ;;  %v11157_v43 = vpack.c.bf16 %v1682_v21, %v1682_v21  ;;  %v13156_v19 = vrot.slane %v1686_v36, %v12282_v7  ;;  %v13159_v58 = vrot.slane %v1694_v59, %v12282_v7  ;;  %v17477_v36 = vld [vmem:[#allocation13_spill] sm:$0xff]  ;;  %s12112_s6 = sshll.u32 %s12194_s5, 4  ;;  %s12113_s6 = int_to_ptr.vmem [resolvable:$false] %s12112_s6 }
  0xd1   : > { %v1770_v50 = vcombine.low %v730_v48, %v732_v47  ;;  %v13162_v3 = vrot.slane %v1702_v20, %v12282_v7  ;;  %v13165_v28 = vrot.slane %v1710_v2, %v12282_v7  ;;  %v13168_v51 = vrot.slane %v1754_v54, %v12282_v7  ;;  %s12114_s7 = scalar_lea.vmem %s12113_s6, 4096  ;;  %p12115_p1 = scmp.lt.s32.totalorder %s17112_s27, %s12113_s6 }
  0xd2   : > { %v13171_v11 = vrot.slane %v1762_v52, %v12282_v7  ;;  %2092 = vst.msk [vmem:[#allocation5 + $0x34] sm:$0xf] %vm2078_vm1, %v11157_v43  ;;  %v1718_v21 = vcombine.low %v13156_v19, %v13159_v58  ;;  %v1778_v48 = vcombine.low %v731_v1, %v733_v10  ;;  %v17473_v47 = vshrl.u32 %v13067_v45, 16  ;;  %v17476_v1 = vld [vmem:[#allocation14_spill] sm:$0xff]  ;;  %v17478_v52 = vld [vmem:[#allocation16_spill] sm:$0xff]  ;;  %p12116_p2 = scmp.lt.s32.totalorder %s12114_s7, %s12108_s4 }
  0xd3   : > { %v13177_v15 = vrot.slane %v1770_v50, %v12282_v7  ;;  %v1734_v34 = vcombine.low %v13162_v3, %v13165_v28  ;;  %v2598_v14 = vcombine.high %v17475_v35, %v17474_v5  ;;  %v1615_v44 = vcombine.high %v1590_v24, %v1606_v55  ;;  %v17480_v50 = vld [vmem:[#allocation17_spill] sm:$0xff]  ;;  %v17483_v35 = vld [vmem:[#allocation19_spill] sm:$0xff] }
  0xd4   : > { %v3234_v23 = vpack.i.b16 %v3233_v6, %v17473_v47  ;;  %v1786_v54 = vcombine.low %v13168_v51, %v13171_v11  ;;  %v1726_v60 = vrot.slane %v1718_v21, %v12296_v25  ;;  %v13189_v17 = vrot.slane %v1778_v48, %v12282_v7  ;;  %v17481_v21 = vld [vmem:[#allocation18_spill] sm:$0xff]  ;;  %p12117_p3 = por %p12116_p2, %p12115_p1 }
  0xd5   : > { %v1683_v6 = vcombine.high %v1658_v13, %v1674_v61  ;;  %v1742_v10 = vrot.slane %v1734_v34, %v12296_v25  ;;  %v3219_v31 = vpack.i.b16 %v2598_v14, %v13095_v37  ;;  %v11172_v8 = vpack.c.bf16 %v1615_v44, %v1615_v44 }
  0xd6   : > { %11622 = vmatprep.subr.msk.bf16.mxu1 %vm413_vm0, %v3234_v23  ;;  %v5170_v45 = vsel %vm413_vm0, %v3234_v23, 0  ;;  %v1794_v33 = vrot.slane %v1786_v54, %v12296_v25  ;;  %v1802_v24 = vcombine.low %v13177_v15, %v13189_v17  ;;  %v3220_v53 = vshrl.u32 %v13095_v37, 16  ;;  %v17479_v37 = vld [vmem:[#allocation15_spill] sm:$0xff]  ;;  %p12118_p5 = pnand %p12117_p3, %p12111_p0 }
  0xd7   : > { %11444 = vmatpush3.bf16.xpose.msra.mxu1 %v5170_v45  ;;  %v11173_v55 = vpack.c.bf16 %v1683_v6, %v1683_v6  ;;  %v3221_v42 = vshrl.u32 %v2598_v14, 16  ;;  %v1750_v29 = vcombine.low %v1726_v60, %v1742_v10  ;;  %11615 = vmatprep.subr.msk.bf16.mxu0 %vm413_vm0, %v3219_v31  ;;  %2107 = vst.msk [vmem:[#allocation5 + $0x70] sm:$0xf] %vm2078_vm1, %v11172_v8  ;;  %v4982_v61 = vsel %vm413_vm0, %v3219_v31, 0  ;;  %v17484_v14 = vld [vmem:[#allocation20_spill] sm:$0xff] }
  0xd8   : > { %v1751_v13 = vcombine.high %v1726_v60, %v1742_v10  ;;  %v2448_v59 = vcombine.high %v17477_v36, %v17476_v1  ;;  %v1810_v20 = vrot.slane %v1802_v24, %v12296_v25  ;;  %11414 = vmatpush3.bf16.xpose.msra.mxu0 %v4982_v61  ;;  %v2498_v43 = vcombine.high %v17479_v37, %v17478_v52 }
  0xd9   : > { %2108 = vst.msk [vmem:[#allocation5 + $0x74] sm:$0xf] %vm2078_vm1, %v11173_v55  ;;  %v3222_v2 = vpack.i.b16 %v3221_v42, %v3220_v53  ;;  %v17482_v48 = vcombine.high %v17480_v50, %v17481_v21  ;;  %v11704_v23 = vld [vmem:[#allocation5 + $0x30] sm:$0xff]   ;;  %v11158_v34 = vpack.c.bf16 %v1750_v29, %v1750_v29  ;;  %v17485_v44 = vcombine.high %v17483_v35, %v17484_v14  ;;  %v17486_v55 = vld [vmem:[#allocation21_spill] sm:$0xff]  ;;  %v17487_v53 = vld [vmem:[#allocation22_spill] sm:$0xff] }
  0xda   : > { %v11174_v54 = vpack.c.bf16 %v1751_v13, %v1751_v13  ;;  %v3208_v5 = vshrl.u32 %v2448_v59, 16  ;;  %v1818_v45 = vcombine.low %v1794_v33, %v1810_v20  ;;  %v1819_v6 = vcombine.high %v1794_v33, %v1810_v20  ;;  %11365 = vmatprep.mubr.msk.bf16.mxu0 %vm413_vm0, %v11704_v23  ;;  %v17492_v50 = vld [vmem:[#allocation24_spill] sm:$0xff] }
  0xdb   : > { %v781_v47 = vrot.slane %v17482_v48, %v12296_v25  ;;  %v797_v60 = vrot.slane %v17485_v44, %v12296_v25  ;;  %11623 = vmatprep.subr.msk.bf16.mxu1 %vm413_vm0, %v3222_v2  ;;  %v5167_v10 = vsel %vm413_vm0, %v3222_v2, 0  ;;  %v3207_v31 = vpack.i.b16 %v2498_v43, %v2448_v59  ;;  %2093 = vst.msk [vmem:[#allocation5 + $0x38] sm:$0xf] %vm2078_vm1, %v11158_v34  ;;  %v17490_v59 = vld [vmem:[#allocation23_spill] sm:$0xff] }
  0xdc   : > { %2109 = vst.msk [vmem:[#allocation5 + $0x78] sm:$0xf] %vm2078_vm1, %v11174_v54  ;;  %v3209_v8 = vshrl.u32 %v2498_v43, 16  ;;  %v17488_v42 = vcombine.high %v17486_v55, %v17487_v53  ;;  %v17489_v33 = vcombine.high %v12683_v40, %v12703_v38  ;;  %v11159_v13 = vpack.c.bf16 %v1818_v45, %v1818_v45  ;;  %v17491_v43 = vld [vmem:[#allocation25_spill] sm:$0xff]  ;;  %v17493_v45 = vld [vmem:[#allocation27_spill] sm:$0xff]  ;;  %v17498_v53 = vld [vmem:[#allocation30_spill] sm:$0xff] }
  0xdd   : > { %v800_v24 = vcombine.low %v781_v47, %v797_v60  ;;  %v11175_v1 = vpack.c.bf16 %v1819_v6, %v1819_v6  ;;  %11616 = vmatprep.subr.msk.bf16.mxu0 %vm413_vm0, %v3207_v31  ;;  %v4979_v36 = vsel %vm413_vm0, %v3207_v31, 0  ;;  %v936_v20 = vcombine.low %v17490_v59, %v12737_v30  ;;  %v17495_v31 = vld [vmem:[#allocation29_spill] sm:$0xff]  ;;  %v17497_v55 = vld [vmem:[#allocation31_spill] sm:$0xff] }
  0xde   : > { %v849_v29 = vrot.slane %v17488_v42, %v12296_v25  ;;  %v865_v61 = vrot.slane %v17489_v33, %v12296_v25  ;;  %v3210_v2 = vpack.i.b16 %v3209_v8, %v3208_v5  ;;  %v1004_v21 = vcombine.low %v17492_v50, %v17491_v43  ;;  %2094 = vst.msk [vmem:[#allocation5 + $0x3c] sm:$0xf] %vm2078_vm1, %v11159_v13  ;;  %v17496_v8 = vld [vmem:[#allocation28_spill] sm:$0xff] }
  0xdf   : > { %11446 = vmatpush3.bf16.xpose.msra.mxu1 %v5167_v10  ;;  %v11176_v37 = vpack.c.bf16 %v800_v24, %v800_v24  ;;  %2110 = vst.msk [vmem:[#allocation5 + $0x7c] sm:$0xf] %vm2078_vm1, %v11175_v1  ;;  %v11178_v40 = vpack.c.bf16 %v936_v20, %v936_v20  ;;  %v801_v38 = vcombine.high %v781_v47, %v797_v60  ;;  %v17500_v33 = vld [vmem:[#allocation32_spill] sm:$0xff] }
  0xe0   : > { %v868_v52 = vcombine.low %v849_v29, %v865_v61  ;;  %v869_v48 = vcombine.high %v849_v29, %v865_v61  ;;  %v937_v23 = vcombine.high %v17490_v59, %v12737_v30  ;;  %v11706_v34 = vld [vmem:[#allocation5 + $0x70] sm:$0xff]   ;;  %11624 = vmatprep.subr.msk.bf16.mxu1 %vm413_vm0, %v3210_v2  ;;  %v5164_v54 = vsel %vm413_vm0, %v3210_v2, 0  ;;  %11416 = vmatpush3.bf16.xpose.msra.mxu0 %v4979_v36  ;;  %v17494_v30 = vld [vmem:[#allocation26_spill] sm:$0xff]  ;;  %v17499_v29 = vld [vmem:[#allocation33_spill] sm:$0xff] }
  0xe1   : > { %2111 = vst.msk [vmem:[#allocation5 + $0x80] sm:$0xf] %vm2078_vm1, %v11176_v37  ;;  %v11179_v35 = vpack.c.bf16 %v1004_v21, %v1004_v21  ;;  %v1005_v14 = vcombine.high %v17492_v50, %v17491_v43  ;;  %2113 = vst.msk [vmem:[#allocation5 + $0x88] sm:$0xf] %vm2078_vm1, %v11178_v40  ;;  %v11192_v47 = vpack.c.bf16 %v801_v38, %v801_v38  ;;  %11397 = vmatprep.mubr.msk.bf16.mxu1 %vm413_vm0, %v11706_v34 }
  0xe2   : > { %v11177_v5 = vpack.c.bf16 %v868_v52, %v868_v52  ;;  %v11193_v44 = vpack.c.bf16 %v869_v48, %v869_v48  ;;  %v11194_v60 = vpack.c.bf16 %v937_v23, %v937_v23  ;;  %v1039_v6 = vcombine.high %v17494_v30, %v17493_v45  ;;  %v17502_v30 = vld [vmem:[#allocation36_spill] sm:$0xff] }
  0xe3   : > { %2114 = vst.msk [vmem:[#allocation5 + $0x8c] sm:$0xf] %vm2078_vm1, %v11179_v35  ;;  %v11195_v10 = vpack.c.bf16 %v1005_v14, %v1005_v14  ;;  %v1055_v24 = vcombine.high %v17496_v8, %v17495_v31  ;;  %v1107_v42 = vcombine.high %v17498_v53, %v17497_v55  ;;  %v1123_v61 = vcombine.high %v17500_v33, %v17499_v29  ;;  %v17504_v31 = vld [vmem:[#allocation38_spill] sm:$0xff]  ;;  %v17505_v8 = vld [vmem:[#allocation37_spill] sm:$0xff] }
  0xe4   : > { %2112 = vst.msk [vmem:[#allocation5 + $0x84] sm:$0xf] %vm2078_vm1, %v11177_v5  ;;  %2127 = vst.msk [vmem:[#allocation5 + $0xc0] sm:$0xf] %vm2078_vm1, %v11192_v47  ;;  %v1053_v13 = vrot.slane %v1039_v6, %v12296_v25  ;;  %v1175_v1 = vcombine.high %v12862_v46, %v12866_v41  ;;  %v1191_v36 = vcombine.high %v12869_v62, %v12872_v57  ;;  %v17503_v6 = vld [vmem:[#allocation35_spill] sm:$0xff] }
  0xe5   : > { %2128 = vst.msk [vmem:[#allocation5 + $0xc4] sm:$0xf] %vm2078_vm1, %v11193_v44  ;;  %2129 = vst.msk [vmem:[#allocation5 + $0xc8] sm:$0xf] %vm2078_vm1, %v11194_v60  ;;  %v1243_v59 = vcombine.high %v12877_v9, %v12880_v12  ;;  %v1069_v20 = vrot.slane %v1055_v24, %v12296_v25  ;;  %v1121_v2 = vrot.slane %v1107_v42, %v12296_v25  ;;  %v11705_v57 = vld [vmem:[#allocation5 + $0x38] sm:$0xff]   ;;  %v17501_v60 = vld [vmem:[#allocation34_spill] sm:$0xff] }
  0xe6   : > { %2130 = vst.msk [vmem:[#allocation5 + $0xcc] sm:$0xf] %vm2078_vm1, %v11195_v10  ;;  %v1137_v52 = vrot.slane %v1123_v61, %v12296_v25  ;;  %v1259_v37 = vcombine.high %v12888_v39, %v12893_v18  ;;  %v1189_v43 = vrot.slane %v1175_v1, %v12296_v25  ;;  %v1205_v46 = vrot.slane %v1191_v36, %v12296_v25  ;;  %v11707_v40 = vld [vmem:[#allocation5 + $0x78] sm:$0xff]   ;;  %v17506_v36 = vld [vmem:[#allocation39_spill] sm:$0xff] }
  0xe7   : > { %v1257_v41 = vrot.slane %v1243_v59, %v12296_v25  ;;  %v1311_v62 = vcombine.high %v12950_v63, %v12955_v4  ;;  %11448 = vmatpush3.bf16.xpose.msra.mxu1 %v5164_v54  ;;  %v1072_v9 = vcombine.low %v1053_v13, %v1069_v20  ;;  %v1073_v21 = vcombine.high %v1053_v13, %v1069_v20 }
  0xe8   : > { %v1140_v12 = vcombine.low %v1121_v2, %v1137_v52  ;;  %v1273_v50 = vrot.slane %v1259_v37, %v12296_v25  ;;  %v1208_v38 = vcombine.low %v1189_v43, %v1205_v46  ;;  %v1141_v48 = vcombine.high %v1121_v2, %v1137_v52  ;;  %11366 = vmatmul.mubr.msk.bf16.gmra.mxu0 %vm413_vm0, %v11705_v57 }
  0xe9   : > { %v1209_v39 = vcombine.high %v1189_v43, %v1205_v46  ;;  %v1325_v18 = vrot.slane %v1311_v62, %v12296_v25  ;;  %v11180_v23 = vpack.c.bf16 %v1072_v9, %v1072_v9  ;;  %v11196_v35 = vpack.c.bf16 %v1073_v21, %v1073_v21  ;;  %11398 = vmatmul.mubr.msk.bf16.gmra.mxu1 %vm413_vm0, %v11707_v40 }
  0xea   : > { %v11181_v34 = vpack.c.bf16 %v1140_v12, %v1140_v12  ;;  %v1276_v5 = vcombine.low %v1257_v41, %v1273_v50  ;;  %v11182_v4 = vpack.c.bf16 %v1208_v38, %v1208_v38  ;;  %v11197_v54 = vpack.c.bf16 %v1141_v48, %v1141_v48  ;;  %v11709_v33 = vld [vmem:[#allocation5 + $0x88] sm:$0xff]  }
  0xeb   : > { %v11708_v63 = vld [vmem:[#allocation5 + $0x80] sm:$0xff]   ;;  %v1277_v14 = vcombine.high %v1257_v41, %v1273_v50  ;;  %v11198_v47 = vpack.c.bf16 %v1209_v39, %v1209_v39  ;;  %2115 = vst.msk [vmem:[#allocation5 + $0x90] sm:$0xf] %vm2078_vm1, %v11180_v23  ;;  %2131 = vst.msk [vmem:[#allocation5 + $0xd0] sm:$0xf] %vm2078_vm1, %v11196_v35  ;;  %v1327_v45 = vcombine.high %v17501_v60, %v12965_v26  ;;  %v17509_v23 = vld [vmem:[#allocation43_spill] sm:$0xff] }
  0xec   : > { %2116 = vst.msk [vmem:[#allocation5 + $0x94] sm:$0xf] %vm2078_vm1, %v11181_v34  ;;  %v11183_v44 = vpack.c.bf16 %v1276_v5, %v1276_v5  ;;  %v1379_v10 = vcombine.high %v17503_v6, %v17502_v30  ;;  %v1395_v24 = vcombine.high %v17505_v8, %v17504_v31  ;;  %11417 = vmatprep.mubr.msk.bf16.mxu0 %vm413_vm0, %v11708_v63  ;;  %v11710_v55 = vld [vmem:[#allocation5 + $0xc0] sm:$0xff]   ;;  %2117 = vst.msk [vmem:[#allocation5 + $0x98] sm:$0xf] %vm2078_vm1, %v11182_v4  ;;  %v17510_v34 = vld [vmem:[#allocation42_spill] sm:$0xff] }
  0xed   : > { %2132 = vst.msk [vmem:[#allocation5 + $0xd4] sm:$0xf] %vm2078_vm1, %v11197_v54  ;;  %v11199_v53 = vpack.c.bf16 %v1277_v14, %v1277_v14  ;;  %2133 = vst.msk [vmem:[#allocation5 + $0xd8] sm:$0xf] %vm2078_vm1, %v11198_v47  ;;  %v1447_v42 = vcombine.high %v13009_v0, %v13013_v49  ;;  %v1463_v26 = vcombine.high %v13016_v56, %v13019_v16  ;;  %11449 = vmatprep.mubr.msk.bf16.mxu1 %vm413_vm0, %v11710_v55  ;;  %v11711_v0 = vld [vmem:[#allocation5 + $0xc8] sm:$0xff]   ;;  %v17511_v35 = vld [vmem:[#allocation45_spill] sm:$0xff] }
  0xee   : > { %v1515_v29 = vcombine.high %v13022_v32, %v13025_v22  ;;  %2118 = vst.msk [vmem:[#allocation5 + $0x9c] sm:$0xf] %vm2078_vm1, %v11183_v44  ;;  %v1341_v61 = vrot.slane %v1327_v45, %v12296_v25  ;;  %v1393_v13 = vrot.slane %v1379_v10, %v12296_v25  ;;  %v1409_v1 = vrot.slane %v1395_v24, %v12296_v25  ;;  %v17507_v32 = vld [vmem:[#allocation41_spill] sm:$0xff]  ;;  %v17508_v22 = vld [vmem:[#allocation40_spill] sm:$0xff]  ;;  %v17513_v54 = vld [vmem:[#allocation47_spill] sm:$0xff] }
  0xef   : > { %v1531_v59 = vcombine.high %v17506_v36, %v13034_v27  ;;  %2134 = vst.msk [vmem:[#allocation5 + $0xdc] sm:$0xf] %vm2078_vm1, %v11199_v53  ;;  %v1461_v49 = vrot.slane %v1447_v42, %v12296_v25  ;;  %v1477_v56 = vrot.slane %v1463_v26, %v12296_v25  ;;  %v1583_v20 = vcombine.high %v17508_v22, %v17507_v32  ;;  %v17512_v63 = vld [vmem:[#allocation44_spill] sm:$0xff]  ;;  %v17514_v14 = vld [vmem:[#allocation46_spill] sm:$0xff] }
  0xf0   : > { %v1529_v16 = vrot.slane %v1515_v29, %v12296_v25  ;;  %v1344_v2 = vcombine.low %v1325_v18, %v1341_v61  ;;  %v1412_v52 = vcombine.low %v1393_v13, %v1409_v1  ;;  %v1345_v43 = vcombine.high %v1325_v18, %v1341_v61  ;;  %11418 = vmatmul.mubr.msk.bf16.vlgmr.msra.gmra.mxu0 %vm413_vm0, %v11709_v33 }
  0xf1   : > { %v1545_v37 = vrot.slane %v1531_v59, %v12296_v25  ;;  %v1480_v27 = vcombine.low %v1461_v49, %v1477_v56  ;;  %v1413_v46 = vcombine.high %v1393_v13, %v1409_v1  ;;  %v1481_v41 = vcombine.high %v1461_v49, %v1477_v56  ;;  %11450 = vmatmul.mubr.msk.bf16.vlgmr.msra.gmra.mxu1 %vm413_vm0, %v11711_v0 }
  0xf2   : > { %v1597_v62 = vrot.slane %v1583_v20, %v12296_v25  ;;  %v11184_v57 = vpack.c.bf16 %v1344_v2, %v1344_v2  ;;  %v11185_v9 = vpack.c.bf16 %v1412_v52, %v1412_v52  ;;  %v11200_v50 = vpack.c.bf16 %v1345_v43, %v1345_v43 }
  0xf3   : > { %v1548_v12 = vcombine.low %v1529_v16, %v1545_v37  ;;  %v11712_v21 = vld [vmem:[#allocation5 + $0x90] sm:$0xff]   ;;  %v11186_v40 = vpack.c.bf16 %v1480_v27, %v1480_v27  ;;  %v11201_v38 = vpack.c.bf16 %v1413_v46, %v1413_v46  ;;  %v1549_v48 = vcombine.high %v1529_v16, %v1545_v37 }
  0xf4   : > { %v11202_v39 = vpack.c.bf16 %v1481_v41, %v1481_v41  ;;  %2119 = vst.msk [vmem:[#allocation5 + $0xa0] sm:$0xf] %vm2078_vm1, %v11184_v57  ;;  %2120 = vst.msk [vmem:[#allocation5 + $0xa4] sm:$0xf] %vm2078_vm1, %v11185_v9  ;;  %v1599_v5 = vcombine.high %v17510_v34, %v17509_v23  ;;  %v1651_v4 = vcombine.high %v17512_v63, %v17511_v35  ;;  %11421 = vmatprep.mubr.msk.bf16.mxu0 %vm413_vm0, %v11712_v21  ;;  %v11714_v44 = vld [vmem:[#allocation5 + $0xd0] sm:$0xff]   ;;  %v12188_v23 = vmov -inf  }
  0xf5   : > { %v11187_v18 = vpack.c.bf16 %v1548_v12, %v1548_v12  ;;  %2135 = vst.msk [vmem:[#allocation5 + $0xe0] sm:$0xf] %vm2078_vm1, %v11200_v50  ;;  %v1667_v47 = vcombine.high %v17514_v14, %v17513_v54  ;;  %2121 = vst.msk [vmem:[#allocation5 + $0xa8] sm:$0xf] %vm2078_vm1, %v11186_v40  ;;  %v11203_v60 = vpack.c.bf16 %v1549_v48, %v1549_v48  ;;  %v11713_v10 = vld [vmem:[#allocation5 + $0x98] sm:$0xff]   ;;  %11453 = vmatprep.mubr.msk.bf16.mxu1 %vm413_vm0, %v11714_v44  ;;  %v12189_v34 = vmov 0  }
  0xf6   : > { %2136 = vst.msk [vmem:[#allocation5 + $0xe4] sm:$0xf] %vm2078_vm1, %v11201_v38  ;;  %2137 = vst.msk [vmem:[#allocation5 + $0xe8] sm:$0xf] %vm2078_vm1, %v11202_v39  ;;  %v1719_v45 = vcombine.high %v13156_v19, %v13159_v58  ;;  %v1735_v30 = vcombine.high %v13162_v3, %v13165_v28  ;;  %v1787_v6 = vcombine.high %v13168_v51, %v13171_v11  ;;  %v11715_v19 = vld [vmem:[#allocation5 + $0xd8] sm:$0xff]   ;;  %11690 = vset.pattern.permute.xlu1 %v12189_v34 }
  0xf7   : > { %2122 = vst.msk [vmem:[#allocation5 + $0xac] sm:$0xf] %vm2078_vm1, %v11187_v18  ;;  %v1613_v31 = vrot.slane %v1599_v5, %v12296_v25  ;;  %v1665_v8 = vrot.slane %v1651_v4, %v12296_v25  ;;  %v1681_v24 = vrot.slane %v1667_v47, %v12296_v25  ;;  %v1803_v55 = vcombine.high %v13177_v15, %v13189_v17 }
  0xf8   : > { %2138 = vst.msk [vmem:[#allocation5 + $0xec] sm:$0xf] %vm2078_vm1, %v11203_v60  ;;  %v1733_v58 = vrot.slane %v1719_v45, %v12296_v25  ;;  %v1749_v3 = vrot.slane %v1735_v30, %v12296_v25  ;;  %v1801_v28 = vrot.slane %v1787_v6, %v12296_v25  ;;  %11422 = vmatmul.mubr.msk.bf16.gmra.mxu0 %vm413_vm0, %v11713_v10  ;;  %v12190_v45 = vmov 0.0  }
  0xf9   : > { %v1616_v51 = vcombine.low %v1597_v62, %v1613_v31  ;;  %v1684_v11 = vcombine.low %v1665_v8, %v1681_v24  ;;  %v1817_v53 = vrot.slane %v1803_v55, %v12296_v25  ;;  %v1617_v42 = vcombine.high %v1597_v62, %v1613_v31  ;;  %11454 = vmatmul.mubr.msk.bf16.gmra.mxu1 %vm413_vm0, %v11715_v19 }
  0xfa   : > { %v1752_v26 = vcombine.low %v1733_v58, %v1749_v3  ;;  %v1685_v29 = vcombine.high %v1665_v8, %v1681_v24  ;;  %v1753_v33 = vcombine.high %v1733_v58, %v1749_v3  ;;  %287 = vst.msk [vmem:[#allocation2 + $0x10] sm:$0xff] %vm284_vm2, %v12188_v23  ;;  %285 = vst.msk [vmem:[#allocation2] sm:$0xff] %vm284_vm2, %v12188_v23  ;;  %11691 = vset.pattern.permute.xlu0 %v12189_v34 }
  0xfb   : > { %v11188_v15 = vpack.c.bf16 %v1616_v51, %v1616_v51  ;;  %v11189_v17 = vpack.c.bf16 %v1684_v11, %v1684_v11  ;;  %v1820_v61 = vcombine.low %v1801_v28, %v1817_v53  ;;  %v11204_v13 = vpack.c.bf16 %v1617_v42, %v1617_v42  ;;  %v11716_v1 = vld [vmem:[#allocation5 + $0xa0] sm:$0xff]   ;;  %286 = vst.msk [vmem:[#allocation2 + $0x8] sm:$0xff] %vm284_vm2, %v12188_v23 }
  0xfc   : > { %v11190_v36 = vpack.c.bf16 %v1752_v26, %v1752_v26  ;;  %v11205_v59 = vpack.c.bf16 %v1685_v29, %v1685_v29  ;;  %v1821_v0 = vcombine.high %v1801_v28, %v1817_v53  ;;  %v11206_v49 = vpack.c.bf16 %v1753_v33, %v1753_v33  ;;  %11425 = vmatprep.mubr.msk.bf16.mxu0 %vm413_vm0, %v11716_v1 }
  0xfd   : > { %2123 = vst.msk [vmem:[#allocation5 + $0xb0] sm:$0xf] %vm2078_vm1, %v11188_v15  ;;  %2124 = vst.msk [vmem:[#allocation5 + $0xb4] sm:$0xf] %vm2078_vm1, %v11189_v17  ;;  %v11191_v56 = vpack.c.bf16 %v1820_v61, %v1820_v61  ;;  %v11718_v16 = vld [vmem:[#allocation5 + $0xe0] sm:$0xff]  }
  0xfe   : > { %2139 = vst.msk [vmem:[#allocation5 + $0xf0] sm:$0xf] %vm2078_vm1, %v11204_v13  ;;  %2125 = vst.msk [vmem:[#allocation5 + $0xb8] sm:$0xf] %vm2078_vm1, %v11190_v36  ;;  %v11207_v32 = vpack.c.bf16 %v1821_v0, %v1821_v0  ;;  %v11717_v22 = vld [vmem:[#allocation5 + $0xa8] sm:$0xff]   ;;  %11457 = vmatprep.mubr.msk.bf16.mxu1 %vm413_vm0, %v11718_v16 }
  0xff   : > { %2140 = vst.msk [vmem:[#allocation5 + $0xf4] sm:$0xf] %vm2078_vm1, %v11205_v59  ;;  %2141 = vst.msk [vmem:[#allocation5 + $0xf8] sm:$0xf] %vm2078_vm1, %v11206_v49  ;;  %v11719_v20 = vld [vmem:[#allocation5 + $0xe8] sm:$0xff]  }
 0x100   : > { %2126 = vst.msk [vmem:[#allocation5 + $0xbc] sm:$0xf] %vm2078_vm1, %v11191_v56  ;;  %2142 = vst.msk [vmem:[#allocation5 + $0xfc] sm:$0xf] %vm2078_vm1, %v11207_v32  ;;  %11426 = vmatmul.mubr.msk.bf16.gmra.mxu0 %vm413_vm0, %v11717_v22 }
 0x101   : > { %11458 = vmatmul.mubr.msk.bf16.gmra.mxu1 %vm413_vm0, %v11719_v20  ;;  %288 = vst.msk [vmem:[#allocation2 + $0x18] sm:$0xff] %vm284_vm2, %v12188_v23  ;;  %289 = vst.msk [vmem:[#allocation2 + $0x20] sm:$0xff] %vm284_vm2, %v12188_v23  ;;  %v13899_v56 = vld [vmem:[#allocation2 + $0x10] sm:$0xff]  ;;  %v13901_v32 = vld [vmem:[#allocation2] sm:$0xff] }
 0x102   : > { %290 = vst.msk [vmem:[#allocation2 + $0x28] sm:$0xff] %vm284_vm2, %v12188_v23  ;;  %291 = vst.msk [vmem:[#allocation2 + $0x30] sm:$0xff] %vm284_vm2, %v12188_v23 }
 0x103   : > { %292 = vst.msk [vmem:[#allocation2 + $0x38] sm:$0xff] %vm284_vm2, %v12188_v23  ;;  %293 = vst.msk [vmem:[#allocation2 + $0x40] sm:$0xff] %vm284_vm2, %v12188_v23 }
 0x104   : > { %v11720_v2 = vld [vmem:[#allocation5 + $0xb0] sm:$0xff]   ;;  %294 = vst.msk [vmem:[#allocation2 + $0x48] sm:$0xff] %vm284_vm2, %v12188_v23  ;;  %295 = vst.msk [vmem:[#allocation2 + $0x50] sm:$0xff] %vm284_vm2, %v12188_v23 }
 0x105   : > { %11429 = vmatprep.mubr.msk.bf16.mxu0 %vm413_vm0, %v11720_v2  ;;  %296 = vst.msk [vmem:[#allocation2 + $0x58] sm:$0xff] %vm284_vm2, %v12188_v23  ;;  %297 = vst.msk [vmem:[#allocation2 + $0x60] sm:$0xff] %vm284_vm2, %v12188_v23 }
 0x106   : > { %v11722_v52 = vld [vmem:[#allocation5 + $0xf0] sm:$0xff]   ;;  %298 = vst.msk [vmem:[#allocation2 + $0x68] sm:$0xff] %vm284_vm2, %v12188_v23  ;;  %299 = vst.msk [vmem:[#allocation2 + $0x70] sm:$0xff] %vm284_vm2, %v12188_v23 }
 0x107   : > { %v11721_v37 = vld [vmem:[#allocation5 + $0xb8] sm:$0xff]   ;;  %11461 = vmatprep.mubr.msk.bf16.mxu1 %vm413_vm0, %v11722_v52  ;;  %300 = vst.msk [vmem:[#allocation2 + $0x78] sm:$0xff] %vm284_vm2, %v12188_v23  ;;  %301 = vst.msk [vmem:[#allocation2 + $0x80] sm:$0xff] %vm284_vm2, %v12188_v23 }
 0x108   : > { %v11723_v43 = vld [vmem:[#allocation5 + $0xf8] sm:$0xff]   ;;  %11430 = vmatmul.mubr.msk.bf16.gmra.mxu0 %vm413_vm0, %v11721_v37  ;;  %302 = vst.msk [vmem:[#allocation2 + $0x88] sm:$0xff] %vm284_vm2, %v12188_v23  ;;  %303 = vst.msk [vmem:[#allocation2 + $0x90] sm:$0xff] %vm284_vm2, %v12188_v23 }
 0x109   : > { %11462 = vmatmul.mubr.msk.bf16.gmra.mxu1 %vm413_vm0, %v11723_v43  ;;  %304 = vst.msk [vmem:[#allocation2 + $0x98] sm:$0xff] %vm284_vm2, %v12188_v23  ;;  %305 = vst.msk [vmem:[#allocation2 + $0xa0] sm:$0xff] %vm284_vm2, %v12188_v23  ;;  %v13912_v37 = vld [vmem:[#allocation2 + $0x18] sm:$0xff] }
 0x10a   : > { %306 = vst.msk [vmem:[#allocation2 + $0xa8] sm:$0xff] %vm284_vm2, %v12188_v23  ;;  %307 = vst.msk [vmem:[#allocation2 + $0xb0] sm:$0xff] %vm284_vm2, %v12188_v23 }
 0x10b   : > { %308 = vst.msk [vmem:[#allocation2 + $0xb8] sm:$0xff] %vm284_vm2, %v12188_v23  ;;  %309 = vst.msk [vmem:[#allocation2 + $0xc0] sm:$0xff] %vm284_vm2, %v12188_v23 }
 0x10c   : > { %310 = vst.msk [vmem:[#allocation2 + $0xc8] sm:$0xff] %vm284_vm2, %v12188_v23  ;;  %311 = vst.msk [vmem:[#allocation2 + $0xd0] sm:$0xff] %vm284_vm2, %v12188_v23 }
 0x10d   : > { %312 = vst.msk [vmem:[#allocation2 + $0xd8] sm:$0xff] %vm284_vm2, %v12188_v23  ;;  %313 = vst.msk [vmem:[#allocation2 + $0xe0] sm:$0xff] %vm284_vm2, %v12188_v23 }
 0x10e   : > { %314 = vst.msk [vmem:[#allocation2 + $0xe8] sm:$0xff] %vm284_vm2, %v12188_v23  ;;  %315 = vst.msk [vmem:[#allocation2 + $0xf0] sm:$0xff] %vm284_vm2, %v12188_v23 }
 0x10f   : > { %316 = vst.msk [vmem:[#allocation2 + $0xf8] sm:$0xff] %vm284_vm2, %v12188_v23  ;;  %317 = vst.msk [vmem:[#allocation2 + $0x100] sm:$0xff] %vm284_vm2, %v12188_v23 }
 0x110   : > { %318 = vst.msk [vmem:[#allocation2 + $0x108] sm:$0xff] %vm284_vm2, %v12188_v23  ;;  %319 = vst.msk [vmem:[#allocation2 + $0x110] sm:$0xff] %vm284_vm2, %v12188_v23 }
 0x111   : > { %320 = vst.msk [vmem:[#allocation2 + $0x118] sm:$0xff] %vm284_vm2, %v12188_v23  ;;  %321 = vst.msk [vmem:[#allocation2 + $0x120] sm:$0xff] %vm284_vm2, %v12188_v23 }
 0x112   : > { %322 = vst.msk [vmem:[#allocation2 + $0x128] sm:$0xff] %vm284_vm2, %v12188_v23  ;;  %323 = vst.msk [vmem:[#allocation2 + $0x130] sm:$0xff] %vm284_vm2, %v12188_v23 }
 0x113   : > { %324 = vst.msk [vmem:[#allocation2 + $0x138] sm:$0xff] %vm284_vm2, %v12188_v23  ;;  %325 = vst.msk [vmem:[#allocation2 + $0x140] sm:$0xff] %vm284_vm2, %v12188_v23 }
 0x114   : > { %326 = vst.msk [vmem:[#allocation2 + $0x148] sm:$0xff] %vm284_vm2, %v12188_v23  ;;  %327 = vst.msk [vmem:[#allocation2 + $0x150] sm:$0xff] %vm284_vm2, %v12188_v23 }
 0x115   : > { %328 = vst.msk [vmem:[#allocation2 + $0x158] sm:$0xff] %vm284_vm2, %v12188_v23  ;;  %329 = vst.msk [vmem:[#allocation2 + $0x160] sm:$0xff] %vm284_vm2, %v12188_v23 }
 0x116   : > { %330 = vst.msk [vmem:[#allocation2 + $0x168] sm:$0xff] %vm284_vm2, %v12188_v23  ;;  %331 = vst.msk [vmem:[#allocation2 + $0x170] sm:$0xff] %vm284_vm2, %v12188_v23 }
 0x117   : > { %332 = vst.msk [vmem:[#allocation2 + $0x178] sm:$0xff] %vm284_vm2, %v12188_v23  ;;  %333 = vst.msk [vmem:[#allocation2 + $0x180] sm:$0xff] %vm284_vm2, %v12188_v23 }
 0x118   : > { %334 = vst.msk [vmem:[#allocation2 + $0x188] sm:$0xff] %vm284_vm2, %v12188_v23  ;;  %335 = vst.msk [vmem:[#allocation2 + $0x190] sm:$0xff] %vm284_vm2, %v12188_v23 }
 0x119   : > { %336 = vst.msk [vmem:[#allocation2 + $0x198] sm:$0xff] %vm284_vm2, %v12188_v23  ;;  %337 = vst.msk [vmem:[#allocation2 + $0x1a0] sm:$0xff] %vm284_vm2, %v12188_v23 }
 0x11a   : > { %338 = vst.msk [vmem:[#allocation2 + $0x1a8] sm:$0xff] %vm284_vm2, %v12188_v23  ;;  %339 = vst.msk [vmem:[#allocation2 + $0x1b0] sm:$0xff] %vm284_vm2, %v12188_v23 }
 0x11b   : > { %340 = vst.msk [vmem:[#allocation2 + $0x1b8] sm:$0xff] %vm284_vm2, %v12188_v23  ;;  %341 = vst.msk [vmem:[#allocation2 + $0x1c0] sm:$0xff] %vm284_vm2, %v12188_v23 }
 0x11c   : > { %342 = vst.msk [vmem:[#allocation2 + $0x1c8] sm:$0xff] %vm284_vm2, %v12188_v23  ;;  %343 = vst.msk [vmem:[#allocation2 + $0x1d0] sm:$0xff] %vm284_vm2, %v12188_v23 }
 0x11d   : > { %344 = vst.msk [vmem:[#allocation2 + $0x1d8] sm:$0xff] %vm284_vm2, %v12188_v23  ;;  %345 = vst.msk [vmem:[#allocation2 + $0x1e0] sm:$0xff] %vm284_vm2, %v12188_v23 }
 0x11e   : > { %346 = vst.msk [vmem:[#allocation2 + $0x1e8] sm:$0xff] %vm284_vm2, %v12188_v23  ;;  %347 = vst.msk [vmem:[#allocation2 + $0x1f0] sm:$0xff] %vm284_vm2, %v12188_v23 }
 0x11f   : > { %348 = vst.msk [vmem:[#allocation2 + $0x1f8] sm:$0xff] %vm284_vm2, %v12188_v23  ;;  %349 = vst.msk [vmem:[#allocation3] sm:$0xff] %vm284_vm2, %v12190_v45 }
 0x120   : > { %414 = vst.msk [vmem:[#allocation4] sm:$0xff] %vm413_vm0, %v12190_v45  ;;  %415 = vst.msk [vmem:[#allocation4 + $0x8] sm:$0xff] %vm413_vm0, %v12190_v45 }
 0x121   : > { %350 = vst.msk [vmem:[#allocation3 + $0x8] sm:$0xff] %vm284_vm2, %v12190_v45  ;;  %351 = vst.msk [vmem:[#allocation3 + $0x10] sm:$0xff] %vm284_vm2, %v12190_v45 }
 0x122   : > { %352 = vst.msk [vmem:[#allocation3 + $0x18] sm:$0xff] %vm284_vm2, %v12190_v45  ;;  %353 = vst.msk [vmem:[#allocation3 + $0x20] sm:$0xff] %vm284_vm2, %v12190_v45 }
 0x123   : > { %354 = vst.msk [vmem:[#allocation3 + $0x28] sm:$0xff] %vm284_vm2, %v12190_v45  ;;  %355 = vst.msk [vmem:[#allocation3 + $0x30] sm:$0xff] %vm284_vm2, %v12190_v45 }
 0x124   : > { %356 = vst.msk [vmem:[#allocation3 + $0x38] sm:$0xff] %vm284_vm2, %v12190_v45  ;;  %357 = vst.msk [vmem:[#allocation3 + $0x40] sm:$0xff] %vm284_vm2, %v12190_v45 }
 0x125   : > { %358 = vst.msk [vmem:[#allocation3 + $0x48] sm:$0xff] %vm284_vm2, %v12190_v45  ;;  %359 = vst.msk [vmem:[#allocation3 + $0x50] sm:$0xff] %vm284_vm2, %v12190_v45 }
 0x126   : > { %360 = vst.msk [vmem:[#allocation3 + $0x58] sm:$0xff] %vm284_vm2, %v12190_v45  ;;  %361 = vst.msk [vmem:[#allocation3 + $0x60] sm:$0xff] %vm284_vm2, %v12190_v45 }
 0x127   : > { %362 = vst.msk [vmem:[#allocation3 + $0x68] sm:$0xff] %vm284_vm2, %v12190_v45  ;;  %363 = vst.msk [vmem:[#allocation3 + $0x70] sm:$0xff] %vm284_vm2, %v12190_v45 }
 0x128   : > { %364 = vst.msk [vmem:[#allocation3 + $0x78] sm:$0xff] %vm284_vm2, %v12190_v45  ;;  %365 = vst.msk [vmem:[#allocation3 + $0x80] sm:$0xff] %vm284_vm2, %v12190_v45 }
 0x129   : > { %366 = vst.msk [vmem:[#allocation3 + $0x88] sm:$0xff] %vm284_vm2, %v12190_v45  ;;  %367 = vst.msk [vmem:[#allocation3 + $0x90] sm:$0xff] %vm284_vm2, %v12190_v45 }
 0x12a   : > { %368 = vst.msk [vmem:[#allocation3 + $0x98] sm:$0xff] %vm284_vm2, %v12190_v45  ;;  %369 = vst.msk [vmem:[#allocation3 + $0xa0] sm:$0xff] %vm284_vm2, %v12190_v45 }
 0x12b   : > { %370 = vst.msk [vmem:[#allocation3 + $0xa8] sm:$0xff] %vm284_vm2, %v12190_v45  ;;  %371 = vst.msk [vmem:[#allocation3 + $0xb0] sm:$0xff] %vm284_vm2, %v12190_v45 }
 0x12c   : > { %372 = vst.msk [vmem:[#allocation3 + $0xb8] sm:$0xff] %vm284_vm2, %v12190_v45  ;;  %373 = vst.msk [vmem:[#allocation3 + $0xc0] sm:$0xff] %vm284_vm2, %v12190_v45 }
 0x12d   : > { %374 = vst.msk [vmem:[#allocation3 + $0xc8] sm:$0xff] %vm284_vm2, %v12190_v45  ;;  %375 = vst.msk [vmem:[#allocation3 + $0xd0] sm:$0xff] %vm284_vm2, %v12190_v45 }
 0x12e   : > { %376 = vst.msk [vmem:[#allocation3 + $0xd8] sm:$0xff] %vm284_vm2, %v12190_v45  ;;  %377 = vst.msk [vmem:[#allocation3 + $0xe0] sm:$0xff] %vm284_vm2, %v12190_v45 }
 0x12f   : > { %378 = vst.msk [vmem:[#allocation3 + $0xe8] sm:$0xff] %vm284_vm2, %v12190_v45  ;;  %379 = vst.msk [vmem:[#allocation3 + $0xf0] sm:$0xff] %vm284_vm2, %v12190_v45 }
 0x130   : > { %380 = vst.msk [vmem:[#allocation3 + $0xf8] sm:$0xff] %vm284_vm2, %v12190_v45  ;;  %381 = vst.msk [vmem:[#allocation3 + $0x100] sm:$0xff] %vm284_vm2, %v12190_v45 }
 0x131   : > { %382 = vst.msk [vmem:[#allocation3 + $0x108] sm:$0xff] %vm284_vm2, %v12190_v45  ;;  %383 = vst.msk [vmem:[#allocation3 + $0x110] sm:$0xff] %vm284_vm2, %v12190_v45 }
 0x132   : > { %384 = vst.msk [vmem:[#allocation3 + $0x118] sm:$0xff] %vm284_vm2, %v12190_v45  ;;  %385 = vst.msk [vmem:[#allocation3 + $0x120] sm:$0xff] %vm284_vm2, %v12190_v45 }
 0x133   : > { %386 = vst.msk [vmem:[#allocation3 + $0x128] sm:$0xff] %vm284_vm2, %v12190_v45  ;;  %387 = vst.msk [vmem:[#allocation3 + $0x130] sm:$0xff] %vm284_vm2, %v12190_v45 }
 0x134   : > { %388 = vst.msk [vmem:[#allocation3 + $0x138] sm:$0xff] %vm284_vm2, %v12190_v45  ;;  %389 = vst.msk [vmem:[#allocation3 + $0x140] sm:$0xff] %vm284_vm2, %v12190_v45 }
 0x135   : > { %390 = vst.msk [vmem:[#allocation3 + $0x148] sm:$0xff] %vm284_vm2, %v12190_v45  ;;  %391 = vst.msk [vmem:[#allocation3 + $0x150] sm:$0xff] %vm284_vm2, %v12190_v45 }
 0x136   : > { %392 = vst.msk [vmem:[#allocation3 + $0x158] sm:$0xff] %vm284_vm2, %v12190_v45  ;;  %393 = vst.msk [vmem:[#allocation3 + $0x160] sm:$0xff] %vm284_vm2, %v12190_v45 }
 0x137   : > { %394 = vst.msk [vmem:[#allocation3 + $0x168] sm:$0xff] %vm284_vm2, %v12190_v45  ;;  %395 = vst.msk [vmem:[#allocation3 + $0x170] sm:$0xff] %vm284_vm2, %v12190_v45 }
 0x138   : > { %396 = vst.msk [vmem:[#allocation3 + $0x178] sm:$0xff] %vm284_vm2, %v12190_v45  ;;  %397 = vst.msk [vmem:[#allocation3 + $0x180] sm:$0xff] %vm284_vm2, %v12190_v45 }
 0x139   : > { %398 = vst.msk [vmem:[#allocation3 + $0x188] sm:$0xff] %vm284_vm2, %v12190_v45  ;;  %399 = vst.msk [vmem:[#allocation3 + $0x190] sm:$0xff] %vm284_vm2, %v12190_v45 }
 0x13a   : > { %400 = vst.msk [vmem:[#allocation3 + $0x198] sm:$0xff] %vm284_vm2, %v12190_v45  ;;  %401 = vst.msk [vmem:[#allocation3 + $0x1a0] sm:$0xff] %vm284_vm2, %v12190_v45 }
 0x13b   : > { %402 = vst.msk [vmem:[#allocation3 + $0x1a8] sm:$0xff] %vm284_vm2, %v12190_v45  ;;  %403 = vst.msk [vmem:[#allocation3 + $0x1b0] sm:$0xff] %vm284_vm2, %v12190_v45 }
 0x13c   : > { %404 = vst.msk [vmem:[#allocation3 + $0x1b8] sm:$0xff] %vm284_vm2, %v12190_v45  ;;  %405 = vst.msk [vmem:[#allocation3 + $0x1c0] sm:$0xff] %vm284_vm2, %v12190_v45 }
 0x13d   : > { %406 = vst.msk [vmem:[#allocation3 + $0x1c8] sm:$0xff] %vm284_vm2, %v12190_v45  ;;  %407 = vst.msk [vmem:[#allocation3 + $0x1d0] sm:$0xff] %vm284_vm2, %v12190_v45 }
 0x13e   : > { %408 = vst.msk [vmem:[#allocation3 + $0x1d8] sm:$0xff] %vm284_vm2, %v12190_v45  ;;  %409 = vst.msk [vmem:[#allocation3 + $0x1e0] sm:$0xff] %vm284_vm2, %v12190_v45 }
 0x13f   : > { %410 = vst.msk [vmem:[#allocation3 + $0x1e8] sm:$0xff] %vm284_vm2, %v12190_v45  ;;  %411 = vst.msk [vmem:[#allocation3 + $0x1f0] sm:$0xff] %vm284_vm2, %v12190_v45 }
 0x140   : > { %412 = vst.msk [vmem:[#allocation3 + $0x1f8] sm:$0xff] %vm284_vm2, %v12190_v45 }
 0x141   : > { %416 = vst.msk [vmem:[#allocation4 + $0x10] sm:$0xff] %vm413_vm0, %v12190_v45  ;;  %417 = vst.msk [vmem:[#allocation4 + $0x18] sm:$0xff] %vm413_vm0, %v12190_v45 }
 0x142   : > { %418 = vst.msk [vmem:[#allocation4 + $0x20] sm:$0xff] %vm413_vm0, %v12190_v45  ;;  %419 = vst.msk [vmem:[#allocation4 + $0x28] sm:$0xff] %vm413_vm0, %v12190_v45 }
 0x143   : > { %420 = vst.msk [vmem:[#allocation4 + $0x30] sm:$0xff] %vm413_vm0, %v12190_v45  ;;  %421 = vst.msk [vmem:[#allocation4 + $0x38] sm:$0xff] %vm413_vm0, %v12190_v45 }
 0x144   : > { %422 = vst.msk [vmem:[#allocation4 + $0x40] sm:$0xff] %vm413_vm0, %v12190_v45  ;;  %423 = vst.msk [vmem:[#allocation4 + $0x48] sm:$0xff] %vm413_vm0, %v12190_v45 }
 0x145   : > { %424 = vst.msk [vmem:[#allocation4 + $0x50] sm:$0xff] %vm413_vm0, %v12190_v45  ;;  %425 = vst.msk [vmem:[#allocation4 + $0x58] sm:$0xff] %vm413_vm0, %v12190_v45 }
 0x146   : > { %426 = vst.msk [vmem:[#allocation4 + $0x60] sm:$0xff] %vm413_vm0, %v12190_v45  ;;  %427 = vst.msk [vmem:[#allocation4 + $0x68] sm:$0xff] %vm413_vm0, %v12190_v45 }
 0x147   : > { %v13366_v27 = vpop.f32.mrf.mxu0  ;;  %428 = vst.msk [vmem:[#allocation4 + $0x70] sm:$0xff] %vm413_vm0, %v12190_v45  ;;  %429 = vst.msk [vmem:[#allocation4 + $0x78] sm:$0xff] %vm413_vm0, %v12190_v45 }
 0x148   : > { %17515 = vst [vmem:[#allocation12_spill] sm:$0xff] %v13366_v27  ;;  %5352 = vmax.xlane.f32.xlu1 %v13366_v27  ;;  %430 = vst.msk [vmem:[#allocation4 + $0x80] sm:$0xff] %vm413_vm0, %v12190_v45  ;;  %v3401_v27 = vld [vmem:[%s14037_s9 + $0x1a8] sm:$0xf] }
 0x149   : > { %v13369_v46 = vpop.f32.mrf.mxu1  ;;  %v13371_v41 = vpop.f32.mrf.mxu0  ;;  %431 = vst.msk [vmem:[#allocation4 + $0x88] sm:$0xff] %vm413_vm0, %v12190_v45  ;;  %432 = vst.msk [vmem:[#allocation4 + $0x90] sm:$0xff] %vm413_vm0, %v12190_v45 }
 0x14a   : > { %17516 = vst [vmem:[#allocation11_spill] sm:$0xff] %v13369_v46  ;;  %17517 = vst [vmem:[#allocation14_spill] sm:$0xff] %v13371_v41  ;;  %5348 = vmax.xlane.f32.xlu0 %v13371_v41  ;;  %v3381_v41 = vld [vmem:[%s14037_s9 + $0x158] sm:$0xf] }
 0x14b   : > { %v13374_v62 = vpop.f32.mrf.mxu0  ;;  %v13376_v57 = vpop.f32.mrf.mxu1  ;;  %433 = vst.msk [vmem:[#allocation4 + $0x98] sm:$0xff] %vm413_vm0, %v12190_v45  ;;  %434 = vst.msk [vmem:[#allocation4 + $0xa0] sm:$0xff] %vm413_vm0, %v12190_v45 }
 0x14c   : > { %17518 = vst [vmem:[#allocation13_spill] sm:$0xff] %v13374_v62  ;;  %17519 = vst [vmem:[#allocation16_spill] sm:$0xff] %v13376_v57  ;;  %5354 = vmax.xlane.f32.xlu1 %v13374_v62 }
 0x14d   : > { %v13380_v9 = vpop.f32.mrf.mxu1  ;;  %v13387_v50 = vpop.f32.mrf.mxu0  ;;  %435 = vst.msk [vmem:[#allocation4 + $0xa8] sm:$0xff] %vm413_vm0, %v12190_v45  ;;  %436 = vst.msk [vmem:[#allocation4 + $0xb0] sm:$0xff] %vm413_vm0, %v12190_v45 }
 0x14e   : > { %5384 = vmax.xlane.f32.xlu0 %v13369_v46  ;;  %17520 = vst [vmem:[#allocation15_spill] sm:$0xff] %v13380_v9  ;;  %17522 = vst [vmem:[#allocation18_spill] sm:$0xff] %v13387_v50  ;;  %v3383_v46 = vld [vmem:[%s14037_s9 + $0x160] sm:$0xf] }
 0x14f   : > { %v13384_v12 = vpop.f32.mrf.mxu1  ;;  %437 = vst.msk [vmem:[#allocation4 + $0xb8] sm:$0xff] %vm413_vm0, %v12190_v45  ;;  %438 = vst.msk [vmem:[#allocation4 + $0xc0] sm:$0xff] %vm413_vm0, %v12190_v45 }
 0x150   : > { %5386 = vmax.xlane.f32.xlu1 %v13380_v9  ;;  %17521 = vst [vmem:[#allocation17_spill] sm:$0xff] %v13384_v12  ;;  %439 = vst.msk [vmem:[#allocation4 + $0xc8] sm:$0xff] %vm413_vm0, %v12190_v45 }
 0x151   : > { %440 = vst.msk [vmem:[#allocation4 + $0xd0] sm:$0xff] %vm413_vm0, %v12190_v45  ;;  %441 = vst.msk [vmem:[#allocation4 + $0xd8] sm:$0xff] %vm413_vm0, %v12190_v45 }
 0x152   : > { %5380 = vmax.xlane.f32.xlu0 %v13376_v57  ;;  %442 = vst.msk [vmem:[#allocation4 + $0xe0] sm:$0xff] %vm413_vm0, %v12190_v45  ;;  %443 = vst.msk [vmem:[#allocation4 + $0xe8] sm:$0xff] %vm413_vm0, %v12190_v45 }
 0x153   : > { %444 = vst.msk [vmem:[#allocation4 + $0xf0] sm:$0xff] %vm413_vm0, %v12190_v45  ;;  %445 = vst.msk [vmem:[#allocation4 + $0xf8] sm:$0xff] %vm413_vm0, %v12190_v45 }
 0x154   : > { %5382 = vmax.xlane.f32.xlu1 %v13384_v12  ;;  %446 = vst.msk [vmem:[#allocation4 + $0x100] sm:$0xff] %vm413_vm0, %v12190_v45  ;;  %447 = vst.msk [vmem:[#allocation4 + $0x108] sm:$0xff] %vm413_vm0, %v12190_v45 }
 0x155   : > { %448 = vst.msk [vmem:[#allocation4 + $0x110] sm:$0xff] %vm413_vm0, %v12190_v45  ;;  %449 = vst.msk [vmem:[#allocation4 + $0x118] sm:$0xff] %vm413_vm0, %v12190_v45 }
 0x156   : > { %5350 = vmax.xlane.f32.xlu0 %v13387_v50  ;;  %450 = vst.msk [vmem:[#allocation4 + $0x120] sm:$0xff] %vm413_vm0, %v12190_v45  ;;  %451 = vst.msk [vmem:[#allocation4 + $0x128] sm:$0xff] %vm413_vm0, %v12190_v45  ;;  %v3398_v50 = vld [vmem:[%s14037_s9 + $0x19c] sm:$0xf] }
 0x157   : > { %452 = vst.msk [vmem:[#allocation4 + $0x130] sm:$0xff] %vm413_vm0, %v12190_v45  ;;  %453 = vst.msk [vmem:[#allocation4 + $0x138] sm:$0xff] %vm413_vm0, %v12190_v45 }
 0x158   : > { %454 = vst.msk [vmem:[#allocation4 + $0x140] sm:$0xff] %vm413_vm0, %v12190_v45  ;;  %455 = vst.msk [vmem:[#allocation4 + $0x148] sm:$0xff] %vm413_vm0, %v12190_v45 }
 0x159   : > { %456 = vst.msk [vmem:[#allocation4 + $0x150] sm:$0xff] %vm413_vm0, %v12190_v45  ;;  %457 = vst.msk [vmem:[#allocation4 + $0x158] sm:$0xff] %vm413_vm0, %v12190_v45 }
 0x15a   : > { %458 = vst.msk [vmem:[#allocation4 + $0x160] sm:$0xff] %vm413_vm0, %v12190_v45  ;;  %459 = vst.msk [vmem:[#allocation4 + $0x168] sm:$0xff] %vm413_vm0, %v12190_v45 }
 0x15b   : > { %460 = vst.msk [vmem:[#allocation4 + $0x170] sm:$0xff] %vm413_vm0, %v12190_v45  ;;  %461 = vst.msk [vmem:[#allocation4 + $0x178] sm:$0xff] %vm413_vm0, %v12190_v45 }
 0x15c   : > { %462 = vst.msk [vmem:[#allocation4 + $0x180] sm:$0xff] %vm413_vm0, %v12190_v45  ;;  %463 = vst.msk [vmem:[#allocation4 + $0x188] sm:$0xff] %vm413_vm0, %v12190_v45 }
 0x15d   : > { %464 = vst.msk [vmem:[#allocation4 + $0x190] sm:$0xff] %vm413_vm0, %v12190_v45  ;;  %465 = vst.msk [vmem:[#allocation4 + $0x198] sm:$0xff] %vm413_vm0, %v12190_v45 }
 0x15e   : > { %466 = vst.msk [vmem:[#allocation4 + $0x1a0] sm:$0xff] %vm413_vm0, %v12190_v45  ;;  %467 = vst.msk [vmem:[#allocation4 + $0x1a8] sm:$0xff] %vm413_vm0, %v12190_v45 }
 0x15f   : > { %468 = vst.msk [vmem:[#allocation4 + $0x1b0] sm:$0xff] %vm413_vm0, %v12190_v45  ;;  %469 = vst.msk [vmem:[#allocation4 + $0x1b8] sm:$0xff] %vm413_vm0, %v12190_v45 }
 0x160   : > { %470 = vst.msk [vmem:[#allocation4 + $0x1c0] sm:$0xff] %vm413_vm0, %v12190_v45  ;;  %471 = vst.msk [vmem:[#allocation4 + $0x1c8] sm:$0xff] %vm413_vm0, %v12190_v45 }
 0x161   : > { %472 = vst.msk [vmem:[#allocation4 + $0x1d0] sm:$0xff] %vm413_vm0, %v12190_v45  ;;  %473 = vst.msk [vmem:[#allocation4 + $0x1d8] sm:$0xff] %vm413_vm0, %v12190_v45 }
 0x162   : > { %474 = vst.msk [vmem:[#allocation4 + $0x1e0] sm:$0xff] %vm413_vm0, %v12190_v45  ;;  %475 = vst.msk [vmem:[#allocation4 + $0x1e8] sm:$0xff] %vm413_vm0, %v12190_v45 }
 0x163   : > { %476 = vst.msk [vmem:[#allocation4 + $0x1f0] sm:$0xff] %vm413_vm0, %v12190_v45  ;;  %477 = vst.msk [vmem:[#allocation4 + $0x1f8] sm:$0xff] %vm413_vm0, %v12190_v45  ;;  %v13921_v45 = vld [vmem:[#allocation2 + $0x90] sm:$0xff] }
 0x169   : > { %v13390_v21 = vpop.f32.mrf.mxu0 }
 0x16a   : > { %17523 = vst [vmem:[#allocation19_spill] sm:$0xff] %v13390_v21  ;;  %5360 = vmax.xlane.f32.xlu0 %v13390_v21 }
 0x16b   : > { %v13393_v40 = vpop.f32.mrf.mxu0  ;;  %v13397_v48 = vpop.f32.mrf.mxu1 }
 0x16c   : > { %17524 = vst [vmem:[#allocation20_spill] sm:$0xff] %v13393_v40  ;;  %17526 = vst [vmem:[#allocation22_spill] sm:$0xff] %v13397_v48 }
 0x16d   : > { %v13395_v38 = vpop.f32.mrf.mxu0  ;;  %v13403_v18 = vpop.f32.mrf.mxu1 }
 0x16e   : > { %17525 = vst [vmem:[#allocation21_spill] sm:$0xff] %v13395_v38  ;;  %5362 = vmax.xlane.f32.xlu1 %v13395_v38  ;;  %5356 = vmax.xlane.f32.xlu0 %v13393_v40  ;;  %17528 = vst [vmem:[#allocation25_spill] sm:$0xff] %v13403_v18 }
 0x16f   : > { %v13401_v39 = vpop.f32.mrf.mxu0  ;;  %v13535_v5 = vpop.f32.mrf.mxu1 }
 0x170   : > { %17527 = vst [vmem:[#allocation23_spill] sm:$0xff] %v13401_v39  ;;  %17529 = vst [vmem:[#allocation24_spill] sm:$0xff] %v13535_v5 }
 0x171   : > { %v13539_v35 = vpop.f32.mrf.mxu1 }
 0x172   : > { %5358 = vmax.xlane.f32.xlu1 %v13401_v39  ;;  %5392 = vmax.xlane.f32.xlu0 %v13397_v48  ;;  %17530 = vst [vmem:[#allocation27_spill] sm:$0xff] %v13539_v35  ;;  %v3403_v48 = vld [vmem:[%s14037_s9 + $0x1b0] sm:$0xf] }
 0x176   : > { %5394 = vmax.xlane.f32.xlu1 %v13535_v5  ;;  %5388 = vmax.xlane.f32.xlu0 %v13403_v18  ;;  %v14089_v18 = vld [vmem:[#allocation2 + $0xa8] sm:$0xff]  ;;  %v3396_v5 = vld [vmem:[%s14037_s9 + $0x194] sm:$0xf] }
 0x17a   : > { %5390 = vmax.xlane.f32.xlu1 %v13539_v35 }
 0x186   : > { %v13542_v63 = vpop.f32.mrf.mxu0 }
 0x187   : > { %17531 = vst [vmem:[#allocation26_spill] sm:$0xff] %v13542_v63  ;;  %5368 = vmax.xlane.f32.xlu0 %v13542_v63 }
 0x188   : > { %v13545_v4 = vpop.f32.mrf.mxu0 }
 0x189   : > { %17532 = vst [vmem:[#allocation29_spill] sm:$0xff] %v13545_v4  ;;  %v13549_v14 = vpop.f32.mrf.mxu1 }
 0x18a   : > { %v13547_v54 = vpop.f32.mrf.mxu0  ;;  %17534 = vst [vmem:[#allocation31_spill] sm:$0xff] %v13549_v14 }
 0x18b   : > { %17533 = vst [vmem:[#allocation28_spill] sm:$0xff] %v13547_v54  ;;  %5370 = vmax.xlane.f32.xlu1 %v13547_v54  ;;  %5364 = vmax.xlane.f32.xlu0 %v13545_v4  ;;  %v13555_v44 = vpop.f32.mrf.mxu1 }
 0x18c   : > { %v13553_v47 = vpop.f32.mrf.mxu0  ;;  %17536 = vst [vmem:[#allocation33_spill] sm:$0xff] %v13555_v44 }
 0x18d   : > { %17535 = vst [vmem:[#allocation30_spill] sm:$0xff] %v13553_v47  ;;  %v13559_v60 = vpop.f32.mrf.mxu1 }
 0x18e   : > { %17537 = vst [vmem:[#allocation32_spill] sm:$0xff] %v13559_v60 }
 0x18f   : > { %5366 = vmax.xlane.f32.xlu1 %v13553_v47  ;;  %5400 = vmax.xlane.f32.xlu0 %v13549_v14  ;;  %v13819_v30 = vpop.f32.mrf.mxu1  ;;  %v3415_v14 = vld [vmem:[%s14037_s9 + $0x1e0] sm:$0xf] }
 0x190   : > { %17538 = vst [vmem:[#allocation34_spill] sm:$0xff] %v13819_v30 }
 0x193   : > { %5402 = vmax.xlane.f32.xlu1 %v13559_v60  ;;  %5396 = vmax.xlane.f32.xlu0 %v13555_v44  ;;  %v14061_v60 = vld [vmem:[#allocation2 + $0xa0] sm:$0xff] }
 0x194   : > { %17579 = vst [vmem:[#allocation75_spill] sm:$0xff] %v14061_v60 }
 0x197   : > { %5398 = vmax.xlane.f32.xlu1 %v13819_v30  ;;  %v3416_v30 = vld [vmem:[%s14037_s9 + $0x1e4] sm:$0xf] }
 0x1a8   : > { %v13822_v6 = vpop.f32.mrf.mxu0 }
 0x1a9   : > { %17539 = vst [vmem:[#allocation36_spill] sm:$0xff] %v13822_v6  ;;  %5376 = vmax.xlane.f32.xlu0 %v13822_v6  ;;  %v13829_v8 = vpop.f32.mrf.mxu1 }
 0x1aa   : > { %v13825_v10 = vpop.f32.mrf.mxu0  ;;  %17542 = vst [vmem:[#allocation37_spill] sm:$0xff] %v13829_v8 }
 0x1ab   : > { %17540 = vst [vmem:[#allocation35_spill] sm:$0xff] %v13825_v10  ;;  %v13835_v55 = vpop.f32.mrf.mxu1 }
 0x1ac   : > { %v13827_v31 = vpop.f32.mrf.mxu0  ;;  %17544 = vst [vmem:[#allocation41_spill] sm:$0xff] %v13835_v55 }
 0x1ad   : > { %17541 = vst [vmem:[#allocation38_spill] sm:$0xff] %v13827_v31  ;;  %5378 = vmax.xlane.f32.xlu1 %v13827_v31  ;;  %5372 = vmax.xlane.f32.xlu0 %v13825_v10  ;;  %v13841_v58 = vpop.f32.mrf.mxu1  ;;  %v3414_v10 = vld [vmem:[%s14037_s9 + $0x1dc] sm:$0xf] }
 0x1ae   : > { %v13833_v24 = vpop.f32.mrf.mxu0  ;;  %17546 = vst [vmem:[#allocation43_spill] sm:$0xff] %v13841_v58 }
 0x1af   : > { %17543 = vst [vmem:[#allocation39_spill] sm:$0xff] %v13833_v24  ;;  %v13847_v28 = vpop.f32.mrf.mxu1 }
 0x1b0   : > { %v13839_v19 = vpop.f32.mrf.mxu0  ;;  %17548 = vst [vmem:[#allocation45_spill] sm:$0xff] %v13847_v28 }
 0x1b1   : > { %5374 = vmax.xlane.f32.xlu1 %v13833_v24  ;;  %5408 = vmax.xlane.f32.xlu0 %v13829_v8  ;;  %17545 = vst [vmem:[#allocation40_spill] sm:$0xff] %v13839_v19  ;;  %v13853_v11 = vpop.f32.mrf.mxu1  ;;  %v14056_v24 = vld [vmem:[#allocation2 + $0xb8] sm:$0xff] }
 0x1b2   : > { %v13845_v3 = vpop.f32.mrf.mxu0  ;;  %17550 = vst [vmem:[#allocation47_spill] sm:$0xff] %v13853_v11 }
 0x1b3   : > { %17547 = vst [vmem:[#allocation42_spill] sm:$0xff] %v13845_v3  ;;  %v13857_v53 = vpop.f32.mrf.mxu1 }
 0x1b4   : > { %v13851_v51 = vpop.f32.mrf.mxu0  ;;  %17551 = vst [vmem:[#allocation46_spill] sm:$0xff] %v13857_v53 }
 0x1b5   : > { %5410 = vmax.xlane.f32.xlu1 %v13841_v58  ;;  %5404 = vmax.xlane.f32.xlu0 %v13835_v55  ;;  %17549 = vst [vmem:[#allocation44_spill] sm:$0xff] %v13851_v51  ;;  %v13863_v26 = vpop.f32.mrf.mxu1  ;;  %v3412_v55 = vld [vmem:[%s14037_s9 + $0x1d4] sm:$0xf] }
 0x1b6   : > { %v13859_v42 = vpop.f32.mrf.mxu0  ;;  %17553 = vst [vmem:[#allocation49_spill] sm:$0xff] %v13863_v26 }
 0x1b7   : > { %17552 = vst [vmem:[#allocation48_spill] sm:$0xff] %v13859_v42  ;;  %v13869_v33 = vpop.f32.mrf.mxu1 }
 0x1b8   : > { %v13865_v29 = vpop.f32.mrf.mxu0  ;;  %17555 = vst [vmem:[#allocation51_spill] sm:$0xff] %v13869_v33 }
 0x1b9   : > { %5406 = vmax.xlane.f32.xlu1 %v13847_v28  ;;  %5416 = vmax.xlane.f32.xlu0 %v13839_v19  ;;  %17554 = vst [vmem:[#allocation50_spill] sm:$0xff] %v13865_v29  ;;  %v13877_v61 = vpop.f32.mrf.mxu1  ;;  %v3410_v19 = vld [vmem:[%s14037_s9 + $0x1cc] sm:$0xf]  ;;  %v3413_v28 = vld [vmem:[%s14037_s9 + $0x1d8] sm:$0xf] }
 0x1ba   : > { %v13871_v15 = vpop.f32.mrf.mxu0  ;;  %17558 = vst [vmem:[#allocation54_spill] sm:$0xff] %v13877_v61 }
 0x1bb   : > { %17556 = vst [vmem:[#allocation52_spill] sm:$0xff] %v13871_v15  ;;  %v13883_v1 = vpop.f32.mrf.mxu1 }
 0x1bc   : > { %v13875_v17 = vpop.f32.mrf.mxu0  ;;  %17560 = vst [vmem:[#allocation56_spill] sm:$0xff] %v13883_v1 }
 0x1bd   : > { %5418 = vmax.xlane.f32.xlu1 %v13851_v51  ;;  %5412 = vmax.xlane.f32.xlu0 %v13845_v3  ;;  %17557 = vst [vmem:[#allocation53_spill] sm:$0xff] %v13875_v17  ;;  %v13887_v36 = vpop.f32.mrf.mxu1  ;;  %v14031_v3 = vld [vmem:[#allocation2 + $0xb0] sm:$0xff]  ;;  %v3409_v51 = vld [vmem:[%s14037_s9 + $0x1c8] sm:$0xf] }
 0x1be   : > { %v13881_v13 = vpop.f32.mrf.mxu0  ;;  %17561 = vst [vmem:[#allocation57_spill] sm:$0xff] %v13887_v36 }
 0x1bf   : > { %17559 = vst [vmem:[#allocation55_spill] sm:$0xff] %v13881_v13  ;;  %v13893_v0 = vpop.f32.mrf.mxu1 }
 0x1c0   : > { %v13889_v59 = vpop.f32.mrf.mxu0  ;;  %17563 = vst [vmem:[#allocation59_spill] sm:$0xff] %v13893_v0 }
 0x1c1   : > { %5414 = vmax.xlane.f32.xlu1 %v13859_v42  ;;  %5448 = vmax.xlane.f32.xlu0 %v13853_v11  ;;  %17562 = vst [vmem:[#allocation58_spill] sm:$0xff] %v13889_v59  ;;  %v13905_v20 = vpop.f32.mrf.mxu1  ;;  %v3411_v42 = vld [vmem:[%s14037_s9 + $0x1d0] sm:$0xf] }
 0x1c2   : > { %v13895_v49 = vpop.f32.mrf.mxu0  ;;  %17566 = vst [vmem:[#allocation62_spill] sm:$0xff] %v13905_v20 }
 0x1c3   : > { %17564 = vst [vmem:[#allocation60_spill] sm:$0xff] %v13895_v49 }
 0x1c4   : > { %v13903_v22 = vpop.f32.mrf.mxu0 }
 0x1c5   : > { %5450 = vmax.xlane.f32.xlu1 %v13863_v26  ;;  %5444 = vmax.xlane.f32.xlu0 %v13857_v53  ;;  %17565 = vst [vmem:[#allocation61_spill] sm:$0xff] %v13903_v22 }
 0x1c9   : > { %5446 = vmax.xlane.f32.xlu1 %v13869_v33  ;;  %5424 = vmax.xlane.f32.xlu0 %v13865_v29  ;;  %v13965_v29 = vld [vmem:[#allocation2 + $0x8] sm:$0xff] }
 0x1cd   : > { %5426 = vmax.xlane.f32.xlu1 %v13875_v17  ;;  %5420 = vmax.xlane.f32.xlu0 %v13871_v15 }
 0x1d1   : > { %5422 = vmax.xlane.f32.xlu1 %v13881_v13  ;;  %5456 = vmax.xlane.f32.xlu0 %v13877_v61  ;;  %v5353_v16 = vpop.xlane.xlu1 %5352 }
 0x1d2   : > { %v13908_v2 = vmax.f32 %v13899_v56, %v5353_v16  ;;  %v13923_v16 = vpop.f32.mrf.mxu0 }
 0x1d3   : > { %v5349_v52 = vpop.xlane.xlu0 %5348  ;;  %17567 = vst [vmem:[#allocation63_spill] sm:$0xff] %v13923_v16 }
 0x1d4   : > { %7627 = vst.msk [vmem:[#allocation2 + $0x10] sm:$0xff] %vm284_vm2, %v13908_v2  ;;  %v13919_v23 = vmax.f32 %v13901_v32, %v5349_v52  ;;  %v13934_v52 = vld [vmem:[#allocation2 + $0x98] sm:$0xff] }
 0x1d5   : > { %5458 = vmax.xlane.f32.xlu1 %v13887_v36  ;;  %5452 = vmax.xlane.f32.xlu0 %v13883_v1  ;;  %v5355_v34 = vpop.xlane.xlu1 %5354  ;;  %v13941_v36 = vld [vmem:[#allocation2 + $0x80] sm:$0xff] }
 0x1d6   : > { %7625 = vst.msk [vmem:[#allocation2] sm:$0xff] %vm284_vm2, %v13919_v23  ;;  %v5540_v54 = vsub.f32 %v13901_v32, %v13919_v23 }
 0x1d7   : > { %v5385_v43 = vpop.xlane.xlu0 %5384 }
 0x1d9   : > { %5454 = vmax.xlane.f32.xlu1 %v13893_v0  ;;  %5432 = vmax.xlane.f32.xlu0 %v13889_v59  ;;  %v13939_v59 = vmax.f32 %v13921_v45, %v5385_v43  ;;  %v5387_v1 = vpop.xlane.xlu1 %5386  ;;  %v13956_v0 = vld [vmem:[#allocation2 + $0x88] sm:$0xff] }
 0x1db   : > { %7643 = vst.msk [vmem:[#allocation2 + $0x90] sm:$0xff] %vm284_vm2, %v13939_v59  ;;  %v5381_v43 = vpop.xlane.xlu0 %5380 }
 0x1dd   : > { %5434 = vmax.xlane.f32.xlu1 %v13903_v22  ;;  %5428 = vmax.xlane.f32.xlu0 %v13895_v49  ;;  %v13925_v22 = vpop.f32.mrf.mxu1  ;;  %v13930_v49 = vmax.f32 %v13912_v37, %v5355_v34  ;;  %v13945_v34 = vpop.f32.mrf.mxu0 }
 0x1de   : > { %17568 = vst [vmem:[#allocation64_spill] sm:$0xff] %v13925_v22  ;;  %17570 = vst [vmem:[#allocation66_spill] sm:$0xff] %v13945_v34  ;;  %v5383_v17 = vpop.xlane.xlu1 %5382 }
 0x1df   : > { %7628 = vst.msk [vmem:[#allocation2 + $0x18] sm:$0xff] %vm284_vm2, %v13930_v49  ;;  %v13943_v61 = vpop.f32.mrf.mxu1  ;;  %v13976_v15 = vmax.f32 %v13956_v0, %v5383_v17  ;;  %v14007_v17 = vld [vmem:[#allocation2 + $0x30] sm:$0xff] }
 0x1e0   : > { %17569 = vst [vmem:[#allocation65_spill] sm:$0xff] %v13943_v61 }
 0x1e1   : > { %5430 = vmax.xlane.f32.xlu1 %v13923_v16  ;;  %5464 = vmax.xlane.f32.xlu0 %v13905_v20  ;;  %v13952_v20 = vmax.f32 %v13934_v52, %v5387_v1  ;;  %v13963_v16 = vmax.f32 %v13941_v36, %v5381_v43  ;;  %v13967_v1 = vpop.f32.mrf.mxu1  ;;  %v5351_v43 = vpop.xlane.xlu0 %5350  ;;  %7642 = vst.msk [vmem:[#allocation2 + $0x88] sm:$0xff] %vm284_vm2, %v13976_v15 }
 0x1e2   : > { %17571 = vst [vmem:[#allocation67_spill] sm:$0xff] %v13967_v1  ;;  %v13985_v53 = vmax.f32 %v13965_v29, %v5351_v43 }
 0x1e3   : > { %7644 = vst.msk [vmem:[#allocation2 + $0x98] sm:$0xff] %vm284_vm2, %v13952_v20  ;;  %7641 = vst.msk [vmem:[#allocation2 + $0x80] sm:$0xff] %vm284_vm2, %v13963_v16  ;;  %v13989_v26 = vpop.f32.mrf.mxu1 }
 0x1e4   : > { %17574 = vst [vmem:[#allocation70_spill] sm:$0xff] %v13989_v26  ;;  %7626 = vst.msk [vmem:[#allocation2 + $0x8] sm:$0xff] %vm284_vm2, %v13985_v53 }
 0x1e5   : > { %5466 = vmax.xlane.f32.xlu1 %v13943_v61  ;;  %5460 = vmax.xlane.f32.xlu0 %v13925_v22  ;;  %v13969_v61 = vpop.f32.mrf.mxu0 }
 0x1e6   : > { %17572 = vst [vmem:[#allocation68_spill] sm:$0xff] %v13969_v61 }
 0x1e7   : > { %v13987_v22 = vpop.f32.mrf.mxu0 }
 0x1e8   : > { %17573 = vst [vmem:[#allocation69_spill] sm:$0xff] %v13987_v22 }
 0x1e9   : > { %5462 = vmax.xlane.f32.xlu1 %v13967_v1  ;;  %5440 = vmax.xlane.f32.xlu0 %v13945_v34  ;;  %v13997_v13 = vpop.f32.mrf.mxu0  ;;  %v13999_v34 = vpop.f32.mrf.mxu1 }
 0x1ea   : > { %17575 = vst [vmem:[#allocation71_spill] sm:$0xff] %v13997_v13  ;;  %17576 = vst [vmem:[#allocation72_spill] sm:$0xff] %v13999_v34 }
 0x1eb   : > { %v14003_v43 = vpop.f32.mrf.mxu1 }
 0x1ec   : > { %17577 = vst [vmem:[#allocation73_spill] sm:$0xff] %v14003_v43 }
 0x1ed   : > { %5442 = vmax.xlane.f32.xlu1 %v13987_v22  ;;  %5436 = vmax.xlane.f32.xlu0 %v13969_v61  ;;  %v14009_v22 = vpop.f32.mrf.mxu1 }
 0x1ee   : > { %17578 = vst [vmem:[#allocation74_spill] sm:$0xff] %v14009_v22 }
 0x1f1   : > { %5438 = vmax.xlane.f32.xlu1 %v13997_v13  ;;  %5472 = vmax.xlane.f32.xlu0 %v13989_v26  ;;  %v14015_v13 = vld [vmem:[#allocation2 + $0x38] sm:$0xff]  ;;  %v14017_v26 = vld [vmem:[#allocation2 + $0x20] sm:$0xff] }
 0x1f3   : > { %v5361_v61 = vpop.xlane.xlu0 %5360 }
 0x1f4   : > { %v14013_v1 = vmax.f32 %v14007_v17, %v5361_v61 }
 0x1f5   : > { %5474 = vmax.xlane.f32.xlu1 %v14003_v43  ;;  %5468 = vmax.xlane.f32.xlu0 %v13999_v34  ;;  %v3408_v43 = vld [vmem:[%s14037_s9 + $0x1c4] sm:$0xf] }
 0x1f6   : > { %7631 = vst.msk [vmem:[#allocation2 + $0x30] sm:$0xff] %vm284_vm2, %v14013_v1  ;;  %v11036_v44 = vpack.c.bf16 %v3412_v55, %v3408_v43  ;;  %v3419_v55 = vld [vmem:[%s14037_s9 + $0x1f0] sm:$0xf]  ;;  %v3420_v43 = vld [vmem:[%s14037_s9 + $0x1f4] sm:$0xf] }
 0x1f7   : > { %v5363_v34 = vpop.xlane.xlu1 %5362  ;;  %v5357_v11 = vpop.xlane.xlu0 %5356 }
 0x1f8   : > { %v14024_v33 = vmax.f32 %v14015_v13, %v5363_v34  ;;  %v14029_v61 = vmax.f32 %v14017_v26, %v5357_v11  ;;  %v3407_v34 = vld [vmem:[%s14037_s9 + $0x1c0] sm:$0xf]  ;;  %v4308_v21 = vrot.slane %v11036_v44, %v12282_v7 }
 0x1f9   : > { %5470 = vmax.xlane.f32.xlu1 %v14009_v22  ;;  %v14026_v22 = vld [vmem:[#allocation2 + $0x28] sm:$0xff]  ;;  %v11032_v31 = vpack.c.bf16 %v3411_v42, %v3407_v34  ;;  %v11033_v42 = vpack.c.bf16 %v3413_v28, %v3409_v51  ;;  %v11037_v34 = vpack.c.bf16 %v3414_v10, %v3410_v19  ;;  %v3421_v28 = vld [vmem:[%s14037_s9 + $0x1f8] sm:$0xf]  ;;  %v3422_v10 = vld [vmem:[%s14037_s9 + $0x1fc] sm:$0xf]  ;;  %v11034_v51 = vpack.c.bf16 %v3419_v55, %v3415_v14 }
 0x1fa   : > { %7632 = vst.msk [vmem:[#allocation2 + $0x38] sm:$0xff] %vm284_vm2, %v14024_v33  ;;  %7629 = vst.msk [vmem:[#allocation2 + $0x20] sm:$0xff] %vm284_vm2, %v14029_v61  ;;  %v11038_v14 = vpack.c.bf16 %v3420_v43, %v3416_v30  ;;  %v3391_v44 = vld [vmem:[%s14037_s9 + $0x180] sm:$0xf]  ;;  %v3395_v55 = vld [vmem:[%s14037_s9 + $0x190] sm:$0xf] }
 0x1fb   : > { %v5359_v58 = vpop.xlane.xlu1 %5358  ;;  %v5393_v8 = vpop.xlane.xlu0 %5392  ;;  %v4258_v4 = vrot.slane %v11032_v31, %v12282_v7  ;;  %v3418_v31 = vld [vmem:[%s14037_s9 + $0x1ec] sm:$0xf]  ;;  %v4266_v19 = vrot.slane %v11033_v42, %v12282_v7  ;;  %v4316_v32 = vrot.slane %v11037_v34, %v12282_v7  ;;  %v4274_v38 = vrot.slane %v11034_v51, %v12282_v7  ;;  %v3393_v34 = vld [vmem:[%s14037_s9 + $0x188] sm:$0xf]  ;;  %v3399_v43 = vld [vmem:[%s14037_s9 + $0x1a0] sm:$0xf] }
 0x1fc   : > { %v14054_v6 = vmax.f32 %v14026_v22, %v5359_v58  ;;  %v14059_v11 = vmax.f32 %v14031_v3, %v5393_v8  ;;  %v3417_v8 = vld [vmem:[%s14037_s9 + $0x1e8] sm:$0xf]  ;;  %v4324_v30 = vrot.slane %v11038_v14, %v12282_v7  ;;  %v3394_v14 = vld [vmem:[%s14037_s9 + $0x18c] sm:$0xf]  ;;  %v11024_v35 = vpack.c.bf16 %v3395_v55, %v3391_v44 }
 0x1fd   : > { %v11035_v42 = vpack.c.bf16 %v3421_v28, %v3417_v8  ;;  %v4283_v40 = vcombine.low %v4258_v4, %v4266_v19  ;;  %v3397_v8 = vld [vmem:[%s14037_s9 + $0x198] sm:$0xf]  ;;  %v5604_v28 = vmul.f32 1.442695, %v5540_v54  ;;  %v4333_v54 = vcombine.low %v4308_v21, %v4316_v32  ;;  %v3404_v32 = vld [vmem:[%s14037_s9 + $0x1b4] sm:$0xf] }
 0x1fe   : > { %7630 = vst.msk [vmem:[#allocation2 + $0x28] sm:$0xff] %vm284_vm2, %v14054_v6  ;;  %7647 = vst.msk [vmem:[#allocation2 + $0xb0] sm:$0xff] %vm284_vm2, %v14059_v11  ;;  %v11026_v57 = vpack.c.bf16 %v3403_v48, %v3399_v43  ;;  %v4158_v44 = vrot.slane %v11024_v35, %v12282_v7  ;;  %v3402_v48 = vld [vmem:[%s14037_s9 + $0x1ac] sm:$0xf] }
 0x1ff   : > { %v5395_v63 = vpop.xlane.xlu1 %5394  ;;  %v5389_v47 = vpop.xlane.xlu0 %5388  ;;  %v4282_v4 = vrot.slane %v11035_v42, %v12282_v7  ;;  %v14127_v21 = vrot.slane %v4333_v54, %v12296_v25  ;;  %v3375_v54 = vld [vmem:[%s14037_s9 + $0x140] sm:$0xf]  ;;  %11724 = vpow2.f32 %v5604_v28  ;;  %v14158_v28 = vld [vmem:[#allocation2 + $0x50] sm:$0xff] }
 0x200   : > { %v14082_v58 = vmax.f32 %v14056_v24, %v5395_v63  ;;  %v14085_v39 = vmax.f32 %v14061_v60, %v5389_v47  ;;  %v11039_v47 = vpack.c.bf16 %v3422_v10, %v3418_v31  ;;  %v14110_v10 = vrot.slane %v4283_v40, %v12296_v25  ;;  %v3392_v63 = vld [vmem:[%s14037_s9 + $0x184] sm:$0xf]  ;;  %17585 = vst [vmem:[#allocation81_spill] sm:$0xff] %v14158_v28  ;;  %v3348_v60 = vld [vmem:[%s14037_s9 + $0xd4] sm:$0xf] }
 0x201   : > { %v4291_v42 = vcombine.low %v4274_v38, %v4282_v4  ;;  %17583 = vst [vmem:[#allocation79_spill] sm:$0xff] %v14127_v21  ;;  %v3400_v38 = vld [vmem:[%s14037_s9 + $0x1a4] sm:$0xf] }
 0x202   : > { %17580 = vst [vmem:[#allocation76_spill] sm:$0xff] %v14085_v39  ;;  %7648 = vst.msk [vmem:[#allocation2 + $0xb8] sm:$0xff] %vm284_vm2, %v14082_v58  ;;  %v4332_v19 = vrot.slane %v11039_v47, %v12282_v7  ;;  %v3405_v47 = vld [vmem:[%s14037_s9 + $0x1b8] sm:$0xf]  ;;  %v11030_v62 = vpack.c.bf16 %v3404_v32, %v3400_v38 }
 0x203   : > { %7645 = vst.msk [vmem:[#allocation2 + $0xa0] sm:$0xff] %vm284_vm2, %v14085_v39  ;;  %v5391_v51 = vpop.xlane.xlu1 %5390  ;;  %17581 = vst [vmem:[#allocation77_spill] sm:$0xff] %v14110_v10  ;;  %v11027_v43 = vpack.c.bf16 %v3405_v47, %v3401_v27 }
 0x204   : > { %v14107_v31 = vmax.f32 %v14089_v18, %v5391_v51  ;;  %v11025_v51 = vpack.c.bf16 %v3397_v8, %v3393_v34  ;;  %v4341_v40 = vcombine.low %v4324_v30, %v4332_v19  ;;  %v4174_v30 = vrot.slane %v11026_v57, %v12282_v7  ;;  %v3406_v8 = vld [vmem:[%s14037_s9 + $0x1bc] sm:$0xf]  ;;  %v3379_v57 = vld [vmem:[%s14037_s9 + $0x150] sm:$0xf] }
 0x205   : > { %v11028_v19 = vpack.c.bf16 %v3396_v5, %v3392_v63  ;;  %v4182_v9 = vrot.slane %v11027_v43, %v12282_v7  ;;  %v3387_v63 = vld [vmem:[%s14037_s9 + $0x170] sm:$0xf]  ;;  %v4224_v32 = vrot.slane %v11030_v62, %v12282_v7  ;;  %v11031_v43 = vpack.c.bf16 %v3406_v8, %v3402_v48  ;;  %v3380_v8 = vld [vmem:[%s14037_s9 + $0x154] sm:$0xf] }
 0x206   : > { %7646 = vst.msk [vmem:[#allocation2 + $0xa8] sm:$0xff] %vm284_vm2, %v14107_v31  ;;  %v14136_v55 = vrot.slane %v4341_v40, %v12296_v25  ;;  %v4166_v4 = vrot.slane %v11025_v51, %v12282_v7  ;;  %v3377_v40 = vld [vmem:[%s14037_s9 + $0x148] sm:$0xf] }
 0x207   : > { %v4208_v27 = vrot.slane %v11028_v19, %v12282_v7 }
 0x208   : > { %17584 = vst [vmem:[#allocation80_spill] sm:$0xff] %v14136_v55  ;;  %v4349_v51 = vcombine.low %v14127_v21, %v14136_v55  ;;  %v4183_v34 = vcombine.low %v4158_v44, %v4166_v4  ;;  %v3389_v44 = vld [vmem:[%s14037_s9 + $0x178] sm:$0xf]  ;;  %v4191_v4 = vcombine.low %v4174_v30, %v4182_v9  ;;  %v4232_v9 = vrot.slane %v11031_v43, %v12282_v7  ;;  %v3378_v30 = vld [vmem:[%s14037_s9 + $0x14c] sm:$0xf] }
 0x20a   : > { %5744 = vperm.xlu1 %11690, %v13908_v2   ;;  %v14161_v38 = vrot.slane %v4183_v34, %v12296_v25  ;;  %v14171_v62 = vrot.slane %v4191_v4, %v12296_v25 }
 0x20b   : > { %5734 = vperm.xlu0 %11691, %v13919_v23   ;;  %v14124_v23 = vrot.slane %v4291_v42, %v12296_v25  ;;  %v11029_v42 = vpack.c.bf16 %v3398_v50, %v3394_v14  ;;  %v3385_v50 = vld [vmem:[%s14037_s9 + $0x168] sm:$0xf]  ;;  %v4468_v14 = vshrl.u32 %v4349_v51, 16 }
 0x20c   : > { %17586 = vst [vmem:[#allocation82_spill] sm:$0xff] %v14161_v38  ;;  %v11019_v34 = vpack.c.bf16 %v3389_v44, %v3385_v50  ;;  %17587 = vst [vmem:[#allocation83_spill] sm:$0xff] %v14171_v62 }
 0x20d   : > { %17582 = vst [vmem:[#allocation78_spill] sm:$0xff] %v14124_v23  ;;  %v4299_v35 = vcombine.low %v14110_v10, %v14124_v23  ;;  %v4216_v5 = vrot.slane %v11029_v42, %v12282_v7  ;;  %v11016_v42 = vpack.c.bf16 %v3379_v57, %v3375_v54  ;;  %v3376_v10 = vld [vmem:[%s14037_s9 + $0x144] sm:$0xf] }
 0x20e   : > { %5824 = vperm.xlu1 %11690, %v13939_v59   ;;  %v11020_v44 = vpack.c.bf16 %v3380_v8, %v3376_v10 }
 0x20f   : > { %5829 = vperm.xlu0 %11691, %v13952_v20   ;;  %v4467_v12 = vshrl.u32 %v4299_v35, 16  ;;  %v4465_v47 = vpack.i.b16 %v4349_v51, %v4299_v35  ;;  %v4233_v19 = vcombine.low %v4208_v27, %v4216_v5  ;;  %v11017_v35 = vpack.c.bf16 %v3381_v41, %v3377_v40  ;;  %v14183_v41 = vld [vmem:[#allocation2 + $0x40] sm:$0xff] }
 0x210   : > { %v5369_v21 = vpop.xlane.xlu0 %5368  ;;  %v11018_v51 = vpack.c.bf16 %v3387_v63, %v3383_v46  ;;  %v14181_v46 = vld [vmem:[#allocation2 + $0x58] sm:$0xff]  ;;  %17589 = vst [vmem:[#allocation85_spill] sm:$0xff] %v14183_v41  ;;  %v4199_v27 = vcombine.low %v14161_v38, %v14171_v62  ;;  %v4241_v5 = vcombine.low %v4224_v32, %v4232_v9  ;;  %v14210_v9 = vld [vmem:[#allocation2 + $0x48] sm:$0xff] }
 0x211   : > { %v4469_v55 = vpack.i.b16 %v4468_v14, %v4467_v12  ;;  %11465 = vmatprep.subr.bf16.mxu0 %v4465_v47  ;;  %v14168_v23 = vmax.f32 %v14158_v28, %v5369_v21  ;;  %v14175_v48 = vrot.slane %v4233_v19, %v12296_v25  ;;  %v3382_v12 = vld [vmem:[%s14037_s9 + $0x15c] sm:$0xf]  ;;  %v4058_v21 = vrot.slane %v11016_v42, %v12282_v7  ;;  %v3384_v14 = vld [vmem:[%s14037_s9 + $0x164] sm:$0xf]  ;;  %v3365_v38 = vld [vmem:[%s14037_s9 + $0x118] sm:$0xf] }
 0x212   : > { %5749 = vperm.xlu1 %11690, %v13930_v49   ;;  %11466 = vmatpush3.bf16.msra.mxu0 %v4465_v47  ;;  %v4066_v54 = vrot.slane %v11017_v35, %v12282_v7  ;;  %v4074_v40 = vrot.slane %v11018_v51, %v12282_v7  ;;  %v4082_v47 = vrot.slane %v11019_v34, %v12282_v7  ;;  %v3388_v35 = vld [vmem:[%s14037_s9 + $0x174] sm:$0xf]  ;;  %v3390_v51 = vld [vmem:[%s14037_s9 + $0x17c] sm:$0xf] }
 0x213   : > { %5819 = vperm.xlu0 %11691, %v13976_v15   ;;  %17588 = vst [vmem:[#allocation84_spill] sm:$0xff] %v14175_v48  ;;  %11497 = vmatprep.subr.bf16.mxu1 %v4469_v55  ;;  %7635 = vst.msk [vmem:[#allocation2 + $0x50] sm:$0xff] %vm284_vm2, %v14168_v23  ;;  %v11021_v4 = vpack.c.bf16 %v3382_v12, %v3378_v30  ;;  %v14204_v42 = vrot.slane %v4241_v5, %v12296_v25  ;;  %v14212_v34 = vld [vmem:[#allocation2 + $0xd0] sm:$0xff] }
 0x214   : > { %11498 = vmatpush3.bf16.msra.mxu1 %v4469_v55  ;;  %v5371_v50 = vpop.xlane.xlu1 %5370  ;;  %v5365_v63 = vpop.xlane.xlu0 %5364  ;;  %v3386_v55 = vld [vmem:[%s14037_s9 + $0x16c] sm:$0xf]  ;;  %v4083_v32 = vcombine.low %v4058_v21, %v4066_v54  ;;  %17591 = vst [vmem:[#allocation87_spill] sm:$0xff] %v14212_v34  ;;  %v4091_v10 = vcombine.low %v4074_v40, %v4082_v47  ;;  %v17592_v30 = vsub.f32 %v13912_v37, %v13930_v49  ;;  %v4451_v54 = vshrl.u32 %v4199_v27, 16 }
 0x215   : > { %v14198_v43 = vmax.f32 %v14181_v46, %v5371_v50  ;;  %v14201_v19 = vmax.f32 %v14183_v41, %v5365_v63  ;;  %17590 = vst [vmem:[#allocation86_spill] sm:$0xff] %v14204_v42  ;;  %v4249_v21 = vcombine.low %v14175_v48, %v14204_v42  ;;  %v4108_v49 = vrot.slane %v11020_v44, %v12282_v7  ;;  %v14228_v47 = vpop.eup %11724  ;;  %v14245_v44 = vld [vmem:[#allocation2 + $0xc0] sm:$0xff]  ;;  %v3361_v42 = vld [vmem:[%s14037_s9 + $0x108] sm:$0xf] }
 0x216   : > { %5814 = vperm.xlu1 %11690, %v13963_v16   ;;  %v5610_v8 = vmul.f32 1.442695, %v17592_v30  ;;  %v4116_v37 = vrot.slane %v11021_v4, %v12282_v7  ;;  %v11022_v50 = vpack.c.bf16 %v3388_v35, %v3384_v14  ;;  %v11023_v63 = vpack.c.bf16 %v3390_v51, %v3386_v55  ;;  %17593 = vst [vmem:[#allocation88_spill] sm:$0xff] %v14228_v47  ;;  %v14243_v14 = vld [vmem:[#allocation2 + $0xd8] sm:$0xff] }
 0x217   : > { %5849 = vperm.xlu0 %11691, %v14082_v58   ;;  %7636 = vst.msk [vmem:[#allocation2 + $0x58] sm:$0xff] %vm284_vm2, %v14198_v43  ;;  %7633 = vst.msk [vmem:[#allocation2 + $0x40] sm:$0xff] %vm284_vm2, %v14201_v19  ;;  %v14237_v57 = vrot.slane %v4083_v32, %v12296_v25  ;;  %v14240_v48 = vrot.slane %v4091_v10, %v12296_v25  ;;  %v4452_v4 = vshrl.u32 %v4249_v21, 16  ;;  %v3359_v10 = vld [vmem:[%s14037_s9 + $0x100] sm:$0xf] }
 0x218   : > { %v5367_v40 = vpop.xlane.xlu1 %5366  ;;  %v5401_v5 = vpop.xlane.xlu0 %5400  ;;  %17596 = vst [vmem:[#allocation91_spill] sm:$0xff] %v14245_v44  ;;  %v4449_v55 = vpack.i.b16 %v4249_v21, %v4199_v27  ;;  %v4124_v35 = vrot.slane %v11022_v50, %v12282_v7  ;;  %v4132_v32 = vrot.slane %v11023_v63, %v12282_v7  ;;  %v4133_v50 = vcombine.low %v4108_v49, %v4116_v37 }
 0x219   : > { %v14231_v30 = vmax.f32 %v14210_v9, %v5367_v40  ;;  %v14234_v12 = vmax.f32 %v14212_v34, %v5401_v5  ;;  %17594 = vst [vmem:[#allocation89_spill] sm:$0xff] %v14237_v57  ;;  %17595 = vst [vmem:[#allocation90_spill] sm:$0xff] %v14240_v48  ;;  %v3363_v40 = vld [vmem:[%s14037_s9 + $0x110] sm:$0xf]  ;;  %v4453_v5 = vpack.i.b16 %v4452_v4, %v4451_v54  ;;  %11726 = vpow2.f32 %v5610_v8  ;;  %v3367_v34 = vld [vmem:[%s14037_s9 + $0x120] sm:$0xf] }
 0x21a   : > { %5739 = vperm.xlu1 %11690, %v13985_v53   ;;  %11467 = vmatprep.subr.bf16.mxu0 %v4449_v55  ;;  %v4099_v63 = vcombine.low %v14237_v57, %v14240_v48  ;;  %v3371_v54 = vld [vmem:[%s14037_s9 + $0x130] sm:$0xf]  ;;  %v17597_v49 = vsub.f32 %v13899_v56, %v13908_v2  ;;  %v14274_v8 = vld [vmem:[#allocation2 + $0xc8] sm:$0xff]  ;;  %v14277_v4 = vrot.slane %v4133_v50, %v12296_v25  ;;  %v3364_v2 = vld [vmem:[%s14037_s9 + $0x114] sm:$0xf] }
 0x21b   : > { %5839 = vperm.xlu0 %11691, %v14107_v31   ;;  %7634 = vst.msk [vmem:[#allocation2 + $0x48] sm:$0xff] %vm284_vm2, %v14231_v30  ;;  %7651 = vst.msk [vmem:[#allocation2 + $0xd0] sm:$0xff] %vm284_vm2, %v14234_v12  ;;  %11468 = vmatpush3.bf16.msra.mxu0 %v4449_v55  ;;  %v3360_v55 = vld [vmem:[%s14037_s9 + $0x104] sm:$0xf]  ;;  %v3369_v50 = vld [vmem:[%s14037_s9 + $0x128] sm:$0xf] }
 0x21c   : > { %v5403_v27 = vpop.xlane.xlu1 %5402  ;;  %v5397_v21 = vpop.xlane.xlu0 %5396  ;;  %v5608_v37 = vmul.f32 1.442695, %v17597_v49  ;;  %11499 = vmatprep.subr.bf16.mxu1 %v4453_v5  ;;  %17598 = vst [vmem:[#allocation92_spill] sm:$0xff] %v14277_v4  ;;  %v3373_v49 = vld [vmem:[%s14037_s9 + $0x138] sm:$0xf] }
 0x21d   : > { %v14261_v51 = vmax.f32 %v14243_v14, %v5403_v27  ;;  %v14264_v62 = vmax.f32 %v14245_v44, %v5397_v21  ;;  %v4141_v27 = vcombine.low %v4124_v35, %v4132_v32  ;;  %v11008_v21 = vpack.c.bf16 %v3363_v40, %v3359_v10  ;;  %11500 = vmatpush3.bf16.msra.mxu1 %v4453_v5  ;;  %v3362_v57 = vld [vmem:[%s14037_s9 + $0x10c] sm:$0xf]  ;;  %v3366_v56 = vld [vmem:[%s14037_s9 + $0x11c] sm:$0xf] }
 0x21e   : > { %5764 = vperm.xlu1 %11690, %v14013_v1   ;;  %v11009_v35 = vpack.c.bf16 %v3365_v38, %v3361_v42  ;;  %v17599_v32 = vsub.f32 %v13934_v52, %v13952_v20  ;;  %v11010_v5 = vpack.c.bf16 %v3371_v54, %v3367_v34  ;;  %v17601_v44 = vsub.f32 %v13956_v0, %v13976_v15  ;;  %v3374_v54 = vld [vmem:[%s14037_s9 + $0x13c] sm:$0xf] }
 0x21f   : > { %5789 = vperm.xlu0 %11691, %v14198_v43   ;;  %7652 = vst.msk [vmem:[#allocation2 + $0xd8] sm:$0xff] %vm284_vm2, %v14261_v51  ;;  %7649 = vst.msk [vmem:[#allocation2 + $0xc0] sm:$0xff] %vm284_vm2, %v14264_v62  ;;  %v3958_v48 = vrot.slane %v11008_v21, %v12282_v7  ;;  %v4435_v20 = vshrl.u32 %v4099_v63, 16  ;;  %v3370_v21 = vld [vmem:[%s14037_s9 + $0x12c] sm:$0xf]  ;;  %v11011_v15 = vpack.c.bf16 %v3373_v49, %v3369_v50 }
 0x220   : > { %v5642_v10 = vmul.f32 1.442695, %v17599_v32  ;;  %v5399_v40 = vpop.xlane.xlu1 %5398  ;;  %v5638_v41 = vmul.f32 1.442695, %v17601_v44  ;;  %v3966_v52 = vrot.slane %v11009_v35, %v12282_v7  ;;  %v3974_v34 = vrot.slane %v11010_v5, %v12282_v7  ;;  %v3372_v44 = vld [vmem:[%s14037_s9 + $0x134] sm:$0xf] }
 0x221   : > { %v14303_v38 = vmax.f32 %v14274_v8, %v5399_v40  ;;  %v11012_v0 = vpack.c.bf16 %v3364_v2, %v3360_v55  ;;  %v11013_v32 = vpack.c.bf16 %v3366_v56, %v3362_v57  ;;  %v3343_v40 = vld [vmem:[%s14037_s9 + $0xc0] sm:$0xf]  ;;  %v3982_v5 = vrot.slane %v11011_v15, %v12282_v7  ;;  %v3345_v55 = vld [vmem:[%s14037_s9 + $0xc8] sm:$0xf]  ;;  %v3347_v2 = vld [vmem:[%s14037_s9 + $0xd0] sm:$0xf] }
 0x222   : > { %5754 = vperm.xlu1 %11690, %v14029_v61   ;;  %v3983_v35 = vcombine.low %v3958_v48, %v3966_v52  ;;  %11728 = vpow2.f32 %v5642_v10  ;;  %v3349_v57 = vld [vmem:[%s14037_s9 + $0xd8] sm:$0xf]  ;;  %v3351_v56 = vld [vmem:[%s14037_s9 + $0xe0] sm:$0xf]  ;;  %v3353_v15 = vld [vmem:[%s14037_s9 + $0xe8] sm:$0xf] }
 0x223   : > { %6695 = vperm.xlu0 %11691, %v14228_v47   ;;  %v14294_v47 = vrot.slane %v4141_v27, %v12296_v25  ;;  %v3368_v27 = vld [vmem:[%s14037_s9 + $0x124] sm:$0xf]  ;;  %7650 = vst.msk [vmem:[#allocation2 + $0xc8] sm:$0xff] %vm284_vm2, %v14303_v38  ;;  %v4008_v28 = vrot.slane %v11012_v0, %v12282_v7  ;;  %v4016_v48 = vrot.slane %v11013_v32, %v12282_v7  ;;  %11730 = vpow2.f32 %v5608_v37  ;;  %v3357_v0 = vld [vmem:[%s14037_s9 + $0xf8] sm:$0xf] }
 0x224   : > { %v14324_v49 = vrot.slane %v3983_v35, %v12296_v25  ;;  %v3991_v52 = vcombine.low %v3974_v34, %v3982_v5  ;;  %11732 = vpow2.f32 %v5638_v41  ;;  %v11015_v35 = vpack.c.bf16 %v3374_v54, %v3370_v21  ;;  %v3344_v50 = vld [vmem:[%s14037_s9 + $0xc4] sm:$0xf]  ;;  %v3346_v37 = vld [vmem:[%s14037_s9 + $0xcc] sm:$0xf]  ;;  %v3350_v34 = vld [vmem:[%s14037_s9 + $0xdc] sm:$0xf] }
 0x225   : > { %17600 = vst [vmem:[#allocation93_spill] sm:$0xff] %v14294_v47  ;;  %v4149_v42 = vcombine.low %v14277_v4, %v14294_v47  ;;  %v4033_v32 = vcombine.low %v4008_v28, %v4016_v48  ;;  %v3356_v41 = vld [vmem:[%s14037_s9 + $0xf4] sm:$0xf]  ;;  %v11001_v5 = vpack.c.bf16 %v3349_v57, %v3345_v55  ;;  %v3354_v54 = vld [vmem:[%s14037_s9 + $0xec] sm:$0xf]  ;;  %v11003_v48 = vpack.c.bf16 %v3357_v0, %v3353_v15 }
 0x226   : > { %5844 = vperm.xlu1 %11690, %v14059_v11   ;;  %17602 = vst [vmem:[#allocation94_spill] sm:$0xff] %v14324_v49  ;;  %v4032_v28 = vrot.slane %v11015_v35, %v12282_v7  ;;  %v11005_v0 = vpack.c.bf16 %v3350_v34, %v3346_v37  ;;  %v3335_v34 = vld [vmem:[%s14037_s9 + $0xa0] sm:$0xf] }
 0x227   : > { %5779 = vperm.xlu0 %11691, %v14231_v30   ;;  %v4436_v4 = vshrl.u32 %v4149_v42, 16  ;;  %v4433_v47 = vpack.i.b16 %v4149_v42, %v4099_v63  ;;  %v3355_v63 = vld [vmem:[%s14037_s9 + $0xf0] sm:$0xf]  ;;  %v11014_v42 = vpack.c.bf16 %v3372_v44, %v3368_v27  ;;  %v3352_v44 = vld [vmem:[%s14037_s9 + $0xe4] sm:$0xf]  ;;  %v3866_v57 = vrot.slane %v11001_v5, %v12282_v7 }
 0x228   : > { %v11002_v21 = vpack.c.bf16 %v3355_v63, %v3351_v56  ;;  %v11004_v63 = vpack.c.bf16 %v3348_v60, %v3344_v50  ;;  %v3882_v15 = vrot.slane %v11003_v48, %v12282_v7  ;;  %v11006_v35 = vpack.c.bf16 %v3356_v41, %v3352_v44  ;;  %v3339_v44 = vld [vmem:[%s14037_s9 + $0xb0] sm:$0xf] }
 0x229   : > { %v4437_v10 = vpack.i.b16 %v4436_v4, %v4435_v20  ;;  %11469 = vmatprep.subr.bf16.mxu0 %v4433_v47  ;;  %v11000_v4 = vpack.c.bf16 %v3347_v2, %v3343_v40  ;;  %v14339_v20 = vrot.slane %v3991_v52, %v12296_v25  ;;  %v4024_v27 = vrot.slane %v11014_v42, %v12282_v7  ;;  %v3358_v40 = vld [vmem:[%s14037_s9 + $0xfc] sm:$0xf]  ;;  %v14352_v52 = vpop.eup %11726 }
 0x22a   : > { %5769 = vperm.xlu1 %11690, %v14024_v33   ;;  %11470 = vmatpush3.bf16.msra.mxu0 %v4433_v47  ;;  %v14347_v47 = vrot.slane %v4033_v32, %v12296_v25  ;;  %17605 = vst [vmem:[#allocation97_spill] sm:$0xff] %v14352_v52  ;;  %v3874_v56 = vrot.slane %v11002_v21, %v12282_v7  ;;  %v3329_v32 = vld [vmem:[%s14037_s9 + $0x88] sm:$0xf] }
 0x22b   : > { %5869 = vperm.xlu0 %11691, %v14261_v51   ;;  %11501 = vmatprep.subr.bf16.mxu1 %v4437_v10  ;;  %17603 = vst [vmem:[#allocation95_spill] sm:$0xff] %v14339_v20  ;;  %v3858_v2 = vrot.slane %v11000_v4, %v12282_v7  ;;  %v14357_v55 = vcombine.low %v14324_v49, %v14339_v20  ;;  %v3331_v4 = vld [vmem:[%s14037_s9 + $0x90] sm:$0xf] }
 0x22c   : > { %11502 = vmatpush3.bf16.msra.mxu1 %v4437_v10  ;;  %17604 = vst [vmem:[#allocation96_spill] sm:$0xff] %v14347_v47  ;;  %v3327_v10 = vld [vmem:[%s14037_s9 + $0x80] sm:$0xf]  ;;  %v4041_v42 = vcombine.low %v4024_v27, %v4032_v28  ;;  %v14367_v49 = vld [vmem:[#allocation2 + $0x70] sm:$0xff]  ;;  %v3908_v60 = vrot.slane %v11004_v63, %v12282_v7  ;;  %v11007_v50 = vpack.c.bf16 %v3358_v40, %v3354_v54 }
 0x22d   : > { %v4419_v5 = vshrl.u32 %v14357_v55, 16  ;;  %v3883_v20 = vcombine.low %v3858_v2, %v3866_v57  ;;  %v3891_v27 = vcombine.low %v3874_v56, %v3882_v15  ;;  %v3916_v28 = vrot.slane %v11005_v0, %v12282_v7  ;;  %v3337_v15 = vld [vmem:[%s14037_s9 + $0xa8] sm:$0xf]  ;;  %v3341_v0 = vld [vmem:[%s14037_s9 + $0xb8] sm:$0xf] }
 0x22e   : > { %5834 = vperm.xlu1 %11690, %v14085_v39   ;;  %v3333_v39 = vld [vmem:[%s14037_s9 + $0x98] sm:$0xf]  ;;  %v14372_v21 = vrot.slane %v4041_v42, %v12296_v25  ;;  %v3924_v37 = vrot.slane %v11006_v35, %v12282_v7  ;;  %v3932_v54 = vrot.slane %v11007_v50, %v12282_v7  ;;  %v10992_v40 = vpack.c.bf16 %v3331_v4, %v3327_v10  ;;  %v14396_v35 = vld [vmem:[#allocation2 + $0x60] sm:$0xff] }
 0x22f   : > { %6710 = vperm.xlu0 %11691, %v14352_v52   ;;  %v14380_v2 = vrot.slane %v3883_v20, %v12296_v25  ;;  %v10993_v48 = vpack.c.bf16 %v3333_v39, %v3329_v32  ;;  %v14390_v63 = vrot.slane %v3891_v27, %v12296_v25  ;;  %v3933_v42 = vcombine.low %v3908_v60, %v3916_v28  ;;  %v14394_v20 = vld [vmem:[#allocation2 + $0x78] sm:$0xff]  ;;  %v14404_v50 = vpop.eup %11728 }
 0x230   : > { %17606 = vst [vmem:[#allocation98_spill] sm:$0xff] %v14372_v21  ;;  %v4049_v56 = vcombine.low %v14347_v47, %v14372_v21  ;;  %17609 = vst [vmem:[#allocation101_spill] sm:$0xff] %v14396_v35  ;;  %v3941_v39 = vcombine.low %v3924_v37, %v3932_v54  ;;  %v14399_v10 = vrot.slane %v10992_v40, %v12282_v7  ;;  %v3328_v40 = vld [vmem:[%s14037_s9 + $0x84] sm:$0xf]  ;;  %v14423_v47 = vpop.eup %11730 }
 0x231   : > { %17607 = vst [vmem:[#allocation99_spill] sm:$0xff] %v14380_v2  ;;  %17608 = vst [vmem:[#allocation100_spill] sm:$0xff] %v14390_v63  ;;  %v14402_v32 = vrot.slane %v10993_v48, %v12282_v7  ;;  %v10994_v4 = vpack.c.bf16 %v3339_v44, %v3335_v34  ;;  %v3899_v37 = vcombine.low %v14380_v2, %v14390_v63  ;;  %v3332_v48 = vld [vmem:[%s14037_s9 + $0x94] sm:$0xf] }
 0x232   : > { %5759 = vperm.xlu1 %11690, %v14054_v6   ;;  %v5377_v41 = vpop.xlane.xlu0 %5376  ;;  %17610 = vst [vmem:[#allocation102_spill] sm:$0xff] %v14404_v50  ;;  %v4420_v27 = vshrl.u32 %v4049_v56, 16  ;;  %v4417_v28 = vpack.i.b16 %v4049_v56, %v14357_v55  ;;  %v14415_v34 = vrot.slane %v3933_v42, %v12296_v25  ;;  %v14418_v44 = vrot.slane %v3941_v39, %v12296_v25 }
 0x233   : > { %v14384_v57 = vmax.f32 %v14367_v49, %v5377_v41  ;;  %5859 = vperm.xlu0 %11691, %v14303_v38   ;;  %v3774_v60 = vrot.slane %v10994_v4, %v12282_v7  ;;  %v10995_v52 = vpack.c.bf16 %v3341_v0, %v3337_v15  ;;  %17613 = vst [vmem:[#allocation105_spill] sm:$0xff] %v14423_v47  ;;  %v14435_v4 = vpop.eup %11732  ;;  %v14437_v15 = vld [vmem:[#allocation2 + $0x68] sm:$0xff]  ;;  %v14439_v0 = vld [vmem:[#allocation2 + $0xf0] sm:$0xff] }
 0x234   : > { %17611 = vst [vmem:[#allocation103_spill] sm:$0xff] %v14415_v34  ;;  %17612 = vst [vmem:[#allocation104_spill] sm:$0xff] %v14418_v44  ;;  %v17614_v55 = vsub.f32 %v13921_v45, %v13939_v59  ;;  %v4421_v39 = vpack.i.b16 %v4420_v27, %v4419_v5  ;;  %11471 = vmatprep.subr.bf16.mxu0 %v4417_v28  ;;  %v3949_v59 = vcombine.low %v14415_v34, %v14418_v44  ;;  %v3330_v27 = vld [vmem:[%s14037_s9 + $0x8c] sm:$0xf]  ;;  %v3336_v5 = vld [vmem:[%s14037_s9 + $0xa4] sm:$0xf] }
 0x235   : > { %7639 = vst.msk [vmem:[#allocation2 + $0x70] sm:$0xff] %vm284_vm2, %v14384_v57  ;;  %17615 = vst [vmem:[#allocation106_spill] sm:$0xff] %v14435_v4  ;;  %v4403_v45 = vshrl.u32 %v3899_v37, 16  ;;  %11472 = vmatpush3.bf16.msra.mxu0 %v4417_v28  ;;  %v3334_v28 = vld [vmem:[%s14037_s9 + $0x9c] sm:$0xf]  ;;  %v17617_v21 = vsub.f32 %v13941_v36, %v13963_v16 }
 0x236   : > { %v5379_v41 = vpop.xlane.xlu1 %5378  ;;  %5784 = vperm.xlu1 %11690, %v14168_v23   ;;  %v5373_v54 = vpop.xlane.xlu0 %5372  ;;  %v5640_v56 = vmul.f32 1.442695, %v17614_v55  ;;  %11503 = vmatprep.subr.bf16.mxu1 %v4421_v39  ;;  %v4401_v34 = vpack.i.b16 %v3949_v59, %v3899_v37  ;;  %v3340_v44 = vld [vmem:[%s14037_s9 + $0xb4] sm:$0xf]  ;;  %v5545_v37 = vsub.f32 %v14026_v22, %v14054_v6  ;;  %v10997_v16 = vpack.c.bf16 %v3334_v28, %v3330_v27  ;;  %v3311_v27 = vld [vmem:[%s14037_s9 + $0x40] sm:$0xf] }
 0x237   : > { %v14429_v2 = vmax.f32 %v14394_v20, %v5379_v41  ;;  %v14432_v42 = vmax.f32 %v14396_v35, %v5373_v54  ;;  %6790 = vperm.xlu0 %11691, %v14404_v50   ;;  %v3782_v41 = vrot.slane %v10995_v52, %v12282_v7  ;;  %v17616_v54 = vsub.f32 %v14015_v13, %v14024_v33  ;;  %v3315_v28 = vld [vmem:[%s14037_s9 + $0x50] sm:$0xf] }
 0x238   : > { %v3783_v52 = vcombine.low %v14399_v10, %v14402_v32  ;;  %v10996_v33 = vpack.c.bf16 %v3332_v48, %v3328_v40  ;;  %11504 = vmatpush3.bf16.msra.mxu1 %v4421_v39  ;;  %v4404_v50 = vshrl.u32 %v3949_v59, 16  ;;  %11734 = vpow2.f32 %v5640_v56  ;;  %v3338_v40 = vld [vmem:[%s14037_s9 + $0xac] sm:$0xf]  ;;  %v3342_v48 = vld [vmem:[%s14037_s9 + $0xbc] sm:$0xf]  ;;  %11473 = vmatprep.subr.bf16.mxu0 %v4401_v34 }
 0x239   : > { %v5618_v55 = vmul.f32 1.442695, %v17616_v54  ;;  %7640 = vst.msk [vmem:[#allocation2 + $0x78] sm:$0xff] %vm284_vm2, %v14429_v2  ;;  %7637 = vst.msk [vmem:[#allocation2 + $0x60] sm:$0xff] %vm284_vm2, %v14432_v42  ;;  %v3791_v63 = vcombine.low %v3774_v60, %v3782_v41  ;;  %v5636_v35 = vmul.f32 1.442695, %v17617_v21  ;;  %v10998_v22 = vpack.c.bf16 %v3340_v44, %v3336_v5  ;;  %11474 = vmatpush3.bf16.msra.mxu0 %v4401_v34 }
 0x23a   : > { %v5375_v13 = vpop.xlane.xlu1 %5374  ;;  %5774 = vperm.xlu1 %11690, %v14201_v19   ;;  %v5409_v54 = vpop.xlane.xlu0 %5408  ;;  %v14474_v39 = vld [vmem:[#allocation2 + $0xf8] sm:$0xff]  ;;  %v14476_v60 = vld [vmem:[#allocation2 + $0xe0] sm:$0xff]  ;;  %v4405_v56 = vpack.i.b16 %v4404_v50, %v4403_v45  ;;  %v3808_v36 = vrot.slane %v10996_v33, %v12282_v7  ;;  %v14486_v6 = vrot.slane %v3783_v52, %v12296_v25  ;;  %v3816_v41 = vrot.slane %v10997_v16, %v12282_v7  ;;  %v3323_v16 = vld [vmem:[%s14037_s9 + $0x70] sm:$0xf] }
 0x23b   : > { %v14464_v10 = vmax.f32 %v14437_v15, %v5375_v13  ;;  %v14467_v32 = vmax.f32 %v14439_v0, %v5409_v54  ;;  %6780 = vperm.xlu0 %11691, %v14435_v4   ;;  %17618 = vst [vmem:[#allocation107_spill] sm:$0xff] %v14476_v60  ;;  %11736 = vpow2.f32 %v5618_v55  ;;  %v14490_v45 = vrot.slane %v3791_v63, %v12296_v25  ;;  %v3313_v63 = vld [vmem:[%s14037_s9 + $0x48] sm:$0xf]  ;;  %v3317_v52 = vld [vmem:[%s14037_s9 + $0x58] sm:$0xf]  ;;  %v14540_v4 = vld [vmem:[#allocation2 + $0x100] sm:$0xff] }
 0x23c   : > { %17619 = vst [vmem:[#allocation108_spill] sm:$0xff] %v14486_v6  ;;  %11505 = vmatprep.subr.bf16.mxu1 %v4405_v56  ;;  %v10999_v55 = vpack.c.bf16 %v3342_v48, %v3338_v40  ;;  %11738 = vpow2.f32 %v5636_v35  ;;  %v5563_v44 = vsub.f32 %v14056_v24, %v14082_v58  ;;  %v5614_v33 = vmul.f32 1.442695, %v5545_v37  ;;  %v14506_v13 = vld [vmem:[#allocation2 + $0xe8] sm:$0xff]  ;;  %v14508_v35 = vld [vmem:[#allocation2 + $0x110] sm:$0xff]  ;;  %17626 = vst [vmem:[#allocation114_spill] sm:$0xff] %v14540_v4 }
 0x23d   : > { %7638 = vst.msk [vmem:[#allocation2 + $0x68] sm:$0xff] %vm284_vm2, %v14464_v10  ;;  %7655 = vst.msk [vmem:[#allocation2 + $0xf0] sm:$0xff] %vm284_vm2, %v14467_v32  ;;  %11506 = vmatpush3.bf16.msra.mxu1 %v4405_v56  ;;  %v3824_v24 = vrot.slane %v10998_v22, %v12282_v7  ;;  %v3833_v54 = vcombine.low %v3808_v36, %v3816_v41  ;;  %v17622_v40 = vsub.f32 %v13965_v29, %v13985_v53  ;;  %v3319_v56 = vld [vmem:[%s14037_s9 + $0x60] sm:$0xf]  ;;  %v3321_v41 = vld [vmem:[%s14037_s9 + $0x68] sm:$0xf] }
 0x23e   : > { %v5411_v50 = vpop.xlane.xlu1 %5410  ;;  %5864 = vperm.xlu1 %11690, %v14234_v12   ;;  %v5405_v59 = vpop.xlane.xlu0 %5404  ;;  %17620 = vst [vmem:[#allocation109_spill] sm:$0xff] %v14490_v45  ;;  %17621 = vst [vmem:[#allocation110_spill] sm:$0xff] %v14508_v35  ;;  %v3832_v58 = vrot.slane %v10999_v55, %v12282_v7  ;;  %v10984_v22 = vpack.c.bf16 %v3315_v28, %v3311_v27  ;;  %v3799_v53 = vcombine.low %v14486_v6, %v14490_v45  ;;  %v3325_v55 = vld [vmem:[%s14037_s9 + $0x78] sm:$0xf] }
 0x23f   : > { %v14498_v34 = vmax.f32 %v14474_v39, %v5411_v50  ;;  %v14501_v5 = vmax.f32 %v14476_v60, %v5405_v59  ;;  %5809 = vperm.xlu0 %11691, %v14429_v2   ;;  %v5606_v48 = vmul.f32 1.442695, %v17622_v40  ;;  %v14527_v29 = vrot.slane %v3833_v54, %v12296_v25  ;;  %v14538_v28 = vld [vmem:[#allocation2 + $0x118] sm:$0xff] }
 0x240   : > { %v3841_v59 = vcombine.low %v3824_v24, %v3832_v58  ;;  %v10985_v40 = vpack.c.bf16 %v3317_v52, %v3313_v63  ;;  %v5650_v37 = vmul.f32 1.442695, %v5563_v44  ;;  %11740 = vpow2.f32 %v5614_v33  ;;  %17625 = vst [vmem:[#allocation113_spill] sm:$0xff] %v14538_v28 }
 0x241   : > { %7656 = vst.msk [vmem:[#allocation2 + $0xf8] sm:$0xff] %vm284_vm2, %v14498_v34  ;;  %7653 = vst.msk [vmem:[#allocation2 + $0xe0] sm:$0xff] %vm284_vm2, %v14501_v5  ;;  %v10986_v63 = vpack.c.bf16 %v3323_v16, %v3319_v56  ;;  %v5561_v44 = vsub.f32 %v14089_v18, %v14107_v31  ;;  %v14552_v52 = vrot.slane %v10984_v22, %v12282_v7  ;;  %11742 = vpow2.f32 %v5606_v48  ;;  %v3312_v16 = vld [vmem:[%s14037_s9 + $0x44] sm:$0xf]  ;;  %v3314_v48 = vld [vmem:[%s14037_s9 + $0x4c] sm:$0xf] }
 0x242   : > { %v5407_v50 = vpop.xlane.xlu1 %5406  ;;  %6705 = vperm.xlu1 %11690, %v14423_v47   ;;  %v5417_v36 = vpop.xlane.xlu0 %5416  ;;  %17623 = vst [vmem:[#allocation111_spill] sm:$0xff] %v14527_v29  ;;  %v14543_v24 = vrot.slane %v3841_v59, %v12296_v25  ;;  %v14555_v33 = vrot.slane %v10985_v40, %v12282_v7  ;;  %v10987_v58 = vpack.c.bf16 %v3325_v55, %v3321_v41  ;;  %v4387_v56 = vshrl.u32 %v3799_v53, 16  ;;  %v3318_v41 = vld [vmem:[%s14037_s9 + $0x5c] sm:$0xf]  ;;  %v14576_v47 = vld [vmem:[#allocation2 + $0x108] sm:$0xff] }
 0x243   : > { %v14532_v21 = vmax.f32 %v14506_v13, %v5407_v50  ;;  %v14535_v27 = vmax.f32 %v14508_v35, %v5417_v36  ;;  %5799 = vperm.xlu0 %11691, %v14464_v10   ;;  %v3316_v50 = vld [vmem:[%s14037_s9 + $0x54] sm:$0xf]  ;;  %v3674_v22 = vrot.slane %v10986_v63, %v12282_v7  ;;  %11744 = vpow2.f32 %v5650_v37 }
 0x244   : > { %17627 = vst [vmem:[#allocation115_spill] sm:$0xff] %v14543_v24  ;;  %v3849_v31 = vcombine.low %v14527_v29, %v14543_v24  ;;  %v5551_v40 = vsub.f32 %v14181_v46, %v14198_v43  ;;  %v14578_v37 = vld [vmem:[#allocation2 + $0x190] sm:$0xff]  ;;  %v5646_v29 = vmul.f32 1.442695, %v5561_v44  ;;  %v3320_v46 = vld [vmem:[%s14037_s9 + $0x64] sm:$0xf]  ;;  %v3683_v6 = vcombine.low %v14552_v52, %v14555_v33 }
 0x245   : > { %17624 = vst [vmem:[#allocation112_spill] sm:$0xff] %v14535_v27  ;;  %7654 = vst.msk [vmem:[#allocation2 + $0xe8] sm:$0xff] %vm284_vm2, %v14532_v21  ;;  %v14572_v55 = vpop.eup %11734  ;;  %v3324_v43 = vld [vmem:[%s14037_s9 + $0x74] sm:$0xf]  ;;  %v3322_v24 = vld [vmem:[%s14037_s9 + $0x6c] sm:$0xf] }
 0x246   : > { %7659 = vst.msk [vmem:[#allocation2 + $0x110] sm:$0xff] %vm284_vm2, %v14535_v27  ;;  %v5419_v54 = vpop.xlane.xlu1 %5418  ;;  %5854 = vperm.xlu1 %11690, %v14264_v62   ;;  %v5413_v18 = vpop.xlane.xlu0 %5412  ;;  %17629 = vst [vmem:[#allocation117_spill] sm:$0xff] %v14572_v55  ;;  %v4388_v63 = vshrl.u32 %v3849_v31, 16  ;;  %11746 = vpow2.f32 %v5646_v29  ;;  %v3299_v29 = vld [vmem:[%s14037_s9 + $0x10] sm:$0xf] }
 0x247   : > { %v14564_v36 = vmax.f32 %v14538_v28, %v5419_v54  ;;  %v14567_v59 = vmax.f32 %v14540_v4, %v5413_v18  ;;  %5889 = vperm.xlu0 %11691, %v14498_v34   ;;  %v4385_v54 = vpack.i.b16 %v3849_v31, %v3799_v53  ;;  %v3682_v18 = vrot.slane %v10987_v58, %v12282_v7  ;;  %v3326_v4 = vld [vmem:[%s14037_s9 + $0x7c] sm:$0xf] }
 0x248   : > { %v10988_v53 = vpack.c.bf16 %v3316_v50, %v3312_v16  ;;  %v14591_v31 = vpop.eup %11736  ;;  %v4389_v45 = vpack.i.b16 %v4388_v63, %v4387_v56  ;;  %v10989_v28 = vpack.c.bf16 %v3318_v41, %v3314_v48  ;;  %v5626_v56 = vmul.f32 1.442695, %v5551_v40  ;;  %v14608_v16 = vld [vmem:[#allocation2 + $0x198] sm:$0xff]  ;;  %v14610_v50 = vld [vmem:[#allocation2 + $0x180] sm:$0xff] }
 0x249   : > { %17628 = vst [vmem:[#allocation116_spill] sm:$0xff] %v14567_v59  ;;  %7660 = vst.msk [vmem:[#allocation2 + $0x118] sm:$0xff] %vm284_vm2, %v14564_v36  ;;  %11475 = vmatprep.subr.bf16.mxu0 %v4385_v54  ;;  %v3691_v35 = vcombine.low %v3674_v22, %v3682_v18  ;;  %v14606_v33 = vpop.eup %11738  ;;  %v10990_v22 = vpack.c.bf16 %v3324_v43, %v3320_v46  ;;  %v10991_v41 = vpack.c.bf16 %v3326_v4, %v3322_v24  ;;  %v3297_v46 = vld [vmem:[%s14037_s9 + $0x8] sm:$0xf]  ;;  %v3307_v43 = vld [vmem:[%s14037_s9 + $0x30] sm:$0xf] }
 0x24a   : > { %7657 = vst.msk [vmem:[#allocation2 + $0x100] sm:$0xff] %vm284_vm2, %v14567_v59  ;;  %17630 = vst [vmem:[#allocation118_spill] sm:$0xff] %v14591_v31  ;;  %v5415_v58 = vpop.xlane.xlu1 %5414  ;;  %6785 = vperm.xlu1 %11690, %v14572_v55   ;;  %v5449_v44 = vpop.xlane.xlu0 %5448  ;;  %v17631_v59 = vsub.f32 %v14007_v17, %v14013_v1  ;;  %11476 = vmatpush3.bf16.msra.mxu0 %v4385_v54  ;;  %v3708_v1 = vrot.slane %v10988_v53, %v12282_v7  ;;  %v14645_v53 = vld [vmem:[#allocation2 + $0x130] sm:$0xff] }
 0x24b   : > { %v14600_v60 = vmax.f32 %v14576_v47, %v5415_v58  ;;  %v14603_v52 = vmax.f32 %v14578_v37, %v5449_v44  ;;  %6730 = vperm.xlu0 %11691, %v14591_v31   ;;  %17632 = vst [vmem:[#allocation119_spill] sm:$0xff] %v14606_v33  ;;  %17633 = vst [vmem:[#allocation120_spill] sm:$0xff] %v14610_v50  ;;  %11507 = vmatprep.subr.bf16.mxu1 %v4389_v45 }
 0x24c   : > { %v5616_v27 = vmul.f32 1.442695, %v17631_v59  ;;  %v3716_v17 = vrot.slane %v10989_v28, %v12282_v7  ;;  %v5549_v59 = vsub.f32 %v14210_v9, %v14231_v30  ;;  %11508 = vmatpush3.bf16.msra.mxu1 %v4389_v45  ;;  %v3295_v28 = vld [vmem:[%s14037_s9] sm:$0xf]  ;;  %v14626_v30 = vrot.slane %v3683_v6, %v12296_v25  ;;  %v3301_v45 = vld [vmem:[%s14037_s9 + $0x18] sm:$0xf] }
 0x24d   : > { %7658 = vst.msk [vmem:[#allocation2 + $0x108] sm:$0xff] %vm284_vm2, %v14600_v60  ;;  %7675 = vst.msk [vmem:[#allocation2 + $0x190] sm:$0xff] %vm284_vm2, %v14603_v52  ;;  %v14629_v63 = vrot.slane %v3691_v35, %v12296_v25  ;;  %v3724_v54 = vrot.slane %v10990_v22, %v12282_v7  ;;  %v3303_v6 = vld [vmem:[%s14037_s9 + $0x20] sm:$0xf]  ;;  %v14643_v35 = vld [vmem:[#allocation2 + $0x188] sm:$0xff]  ;;  %v3732_v58 = vrot.slane %v10991_v41, %v12282_v7  ;;  %v14648_v44 = vpop.eup %11740 }
 0x24e   : > { %v5451_v40 = vpop.xlane.xlu1 %5450  ;;  %6775 = vperm.xlu1 %11690, %v14606_v33   ;;  %v5445_v9 = vpop.xlane.xlu0 %5444  ;;  %v3733_v18 = vcombine.low %v3708_v1, %v3716_v17  ;;  %11748 = vpow2.f32 %v5616_v27  ;;  %17634 = vst [vmem:[#allocation121_spill] sm:$0xff] %v14645_v53  ;;  %v10976_v27 = vpack.c.bf16 %v3299_v29, %v3295_v28  ;;  %17635 = vst [vmem:[#allocation122_spill] sm:$0xff] %v14648_v44  ;;  %v5622_v1 = vmul.f32 1.442695, %v5549_v59  ;;  %v3309_v41 = vld [vmem:[%s14037_s9 + $0x38] sm:$0xf] }
 0x24f   : > { %v14635_v4 = vmax.f32 %v14608_v16, %v5451_v40  ;;  %v14638_v24 = vmax.f32 %v14610_v50, %v5445_v9  ;;  %5879 = vperm.xlu0 %11691, %v14532_v21   ;;  %11750 = vpow2.f32 %v5626_v56  ;;  %v5567_v17 = vsub.f32 %v14243_v14, %v14261_v51  ;;  %v3305_v56 = vld [vmem:[%s14037_s9 + $0x28] sm:$0xf]  ;;  %v14666_v22 = vpop.eup %11742  ;;  %v3300_v33 = vld [vmem:[%s14037_s9 + $0x14] sm:$0xf] }
 0x250   : > { %v10977_v28 = vpack.c.bf16 %v3301_v45, %v3297_v46  ;;  %v3699_v14 = vcombine.low %v14626_v30, %v14629_v63  ;;  %v14664_v51 = vrot.slane %v3733_v18, %v12296_v25  ;;  %v3741_v40 = vcombine.low %v3724_v54, %v3732_v58  ;;  %17636 = vst [vmem:[#allocation123_spill] sm:$0xff] %v14666_v22  ;;  %v3296_v45 = vld [vmem:[%s14037_s9 + $0x4] sm:$0xf]  ;;  %v14680_v55 = vpop.eup %11744  ;;  %v14682_v54 = vld [vmem:[#allocation2 + $0x138] sm:$0xff]  ;;  %v14715_v50 = vld [vmem:[#allocation2 + $0x1b0] sm:$0xff] }
 0x251   : > { %7676 = vst.msk [vmem:[#allocation2 + $0x198] sm:$0xff] %vm284_vm2, %v14635_v4  ;;  %7673 = vst.msk [vmem:[#allocation2 + $0x180] sm:$0xff] %vm284_vm2, %v14638_v24  ;;  %v10978_v9 = vpack.c.bf16 %v3307_v43, %v3303_v6  ;;  %v5565_v48 = vsub.f32 %v14274_v8, %v14303_v38  ;;  %v3558_v18 = vrot.slane %v10976_v27, %v12282_v7  ;;  %v14684_v6 = vld [vmem:[#allocation2 + $0x120] sm:$0xff]  ;;  %11752 = vpow2.f32 %v5622_v1 }
 0x252   : > { %v5447_v29 = vpop.xlane.xlu1 %5446  ;;  %5804 = vperm.xlu1 %11690, %v14384_v57   ;;  %v5425_v59 = vpop.xlane.xlu0 %5424  ;;  %17638 = vst [vmem:[#allocation125_spill] sm:$0xff] %v14680_v55  ;;  %17639 = vst [vmem:[#allocation126_spill] sm:$0xff] %v14682_v54  ;;  %v14687_v8 = vrot.slane %v3741_v40, %v12296_v25  ;;  %v3566_v38 = vrot.slane %v10977_v28, %v12282_v7  ;;  %v10979_v58 = vpack.c.bf16 %v3309_v41, %v3305_v56 }
 0x253   : > { %v14671_v31 = vmax.f32 %v14643_v35, %v5447_v29  ;;  %v14674_v46 = vmax.f32 %v14645_v53, %v5425_v59  ;;  %6720 = vperm.xlu0 %11691, %v14648_v44   ;;  %17640 = vst [vmem:[#allocation127_spill] sm:$0xff] %v14684_v6  ;;  %v3574_v43 = vrot.slane %v10978_v9, %v12282_v7  ;;  %v5658_v27 = vmul.f32 1.442695, %v5567_v17  ;;  %v14710_v9 = vld [vmem:[#allocation2 + $0x128] sm:$0xff]  ;;  %v3302_v44 = vld [vmem:[%s14037_s9 + $0x1c] sm:$0xf] }
 0x254   : > { %v17641_v29 = vsub.f32 %v14017_v26, %v14029_v61  ;;  %v3749_v26 = vcombine.low %v14664_v51, %v14687_v8  ;;  %v4371_v61 = vshrl.u32 %v3699_v14, 16  ;;  %v3582_v1 = vrot.slane %v10979_v58, %v12282_v7  ;;  %17643 = vst [vmem:[#allocation129_spill] sm:$0xff] %v14715_v50  ;;  %v3304_v58 = vld [vmem:[%s14037_s9 + $0x24] sm:$0xf] }
 0x255   : > { %17637 = vst [vmem:[#allocation124_spill] sm:$0xff] %v14674_v46  ;;  %7674 = vst.msk [vmem:[#allocation2 + $0x188] sm:$0xff] %vm284_vm2, %v14671_v31  ;;  %v10980_v17 = vpack.c.bf16 %v3300_v33, %v3296_v45  ;;  %v5654_v53 = vmul.f32 1.442695, %v5565_v48  ;;  %11754 = vpow2.f32 %v5658_v27  ;;  %v3306_v48 = vld [vmem:[%s14037_s9 + $0x2c] sm:$0xf] }
 0x256   : > { %v5612_v59 = vmul.f32 1.442695, %v17641_v29  ;;  %7663 = vst.msk [vmem:[#allocation2 + $0x130] sm:$0xff] %vm284_vm2, %v14674_v46  ;;  %v5427_v28 = vpop.xlane.xlu1 %5426  ;;  %6700 = vperm.xlu1 %11690, %v14666_v22   ;;  %v5421_v56 = vpop.xlane.xlu0 %5420  ;;  %v3298_v29 = vld [vmem:[%s14037_s9 + $0xc] sm:$0xf]  ;;  %v3583_v22 = vcombine.low %v3558_v18, %v3566_v38  ;;  %v4372_v33 = vshrl.u32 %v3749_v26, 16  ;;  %v4369_v45 = vpack.i.b16 %v3749_v26, %v3699_v14 }
 0x257   : > { %v14705_v41 = vmax.f32 %v14682_v54, %v5427_v28  ;;  %v14708_v40 = vmax.f32 %v14684_v6, %v5421_v56  ;;  %6810 = vperm.xlu0 %11691, %v14680_v55   ;;  %v3591_v28 = vcombine.low %v3574_v43, %v3582_v1  ;;  %v5555_v56 = vsub.f32 %v14394_v20, %v14429_v2  ;;  %v3308_v18 = vld [vmem:[%s14037_s9 + $0x34] sm:$0xf]  ;;  %v3310_v38 = vld [vmem:[%s14037_s9 + $0x3c] sm:$0xf]  ;;  %v14729_v55 = vpop.eup %11746 }
 0x258   : > { %17644 = vst [vmem:[#allocation130_spill] sm:$0xff] %v14729_v55  ;;  %11756 = vpow2.f32 %v5612_v59  ;;  %v4373_v2 = vpack.i.b16 %v4372_v33, %v4371_v61  ;;  %11477 = vmatprep.subr.bf16.mxu0 %v4369_v45  ;;  %v3608_v20 = vrot.slane %v10980_v17, %v12282_v7  ;;  %v10981_v27 = vpack.c.bf16 %v3302_v44, %v3298_v29  ;;  %v14748_v17 = vld [vmem:[#allocation2 + $0x1b8] sm:$0xff]  ;;  %v14750_v44 = vld [vmem:[#allocation2 + $0x1a0] sm:$0xff] }
 0x259   : > { %17642 = vst [vmem:[#allocation128_spill] sm:$0xff] %v14708_v40  ;;  %7664 = vst.msk [vmem:[#allocation2 + $0x138] sm:$0xff] %vm284_vm2, %v14705_v41  ;;  %v17645_v26 = vsub.f32 %v14031_v3, %v14059_v11  ;;  %v14744_v59 = vrot.slane %v3583_v22, %v12296_v25  ;;  %11478 = vmatpush3.bf16.msra.mxu0 %v4369_v45  ;;  %v14753_v3 = vrot.slane %v3591_v28, %v12296_v25 }
 0x25a   : > { %7661 = vst.msk [vmem:[#allocation2 + $0x120] sm:$0xff] %vm284_vm2, %v14708_v40  ;;  %v5423_v14 = vpop.xlane.xlu1 %5422  ;;  %5794 = vperm.xlu1 %11690, %v14432_v42   ;;  %v5457_v43 = vpop.xlane.xlu0 %5456  ;;  %17647 = vst [vmem:[#allocation132_spill] sm:$0xff] %v14750_v44  ;;  %11509 = vmatprep.subr.bf16.mxu1 %v4373_v2  ;;  %v3616_v11 = vrot.slane %v10981_v27, %v12282_v7  ;;  %v10982_v29 = vpack.c.bf16 %v3308_v18, %v3304_v58  ;;  %11758 = vpow2.f32 %v5654_v53  ;;  %v17649_v18 = vld [vmem:[#allocation75_spill] sm:$0xff] }
 0x25b   : > { %v5648_v1 = vmul.f32 1.442695, %v17645_v26  ;;  %v14737_v6 = vmax.f32 %v14710_v9, %v5423_v14  ;;  %v14740_v54 = vmax.f32 %v14715_v50, %v5457_v43  ;;  %6800 = vperm.xlu0 %11691, %v14729_v55   ;;  %v14746_v61 = vpop.eup %11748  ;;  %v10983_v33 = vpack.c.bf16 %v3310_v38, %v3306_v48  ;;  %11510 = vmatpush3.bf16.msra.mxu1 %v4373_v2  ;;  %v17650_v38 = vld [vmem:[#allocation76_spill] sm:$0xff]  ;;  %v14779_v26 = vld [vmem:[#allocation2 + $0x1a8] sm:$0xff]  ;;  %v14781_v43 = vld [vmem:[#allocation2 + $0x150] sm:$0xff] }
 0x25c   : > { %17646 = vst [vmem:[#allocation131_spill] sm:$0xff] %v14746_v61  ;;  %v14756_v14 = vpop.eup %11750  ;;  %v5634_v22 = vmul.f32 1.442695, %v5555_v56  ;;  %v5553_v45 = vsub.f32 %v14437_v15, %v14464_v10  ;;  %v3624_v53 = vrot.slane %v10982_v29, %v12282_v7  ;;  %v3633_v48 = vcombine.low %v3608_v20, %v3616_v11  ;;  %17652 = vst [vmem:[#allocation75_spill] sm:$0xff] %v14779_v26  ;;  %v14843_v55 = vld [vmem:[#allocation2 + $0x1d0] sm:$0xff] }
 0x25d   : > { %17648 = vst [vmem:[#allocation133_spill] sm:$0xff] %v14756_v14  ;;  %7662 = vst.msk [vmem:[#allocation2 + $0x128] sm:$0xff] %vm284_vm2, %v14737_v6  ;;  %v3632_v56 = vrot.slane %v10983_v33, %v12282_v7  ;;  %11760 = vpow2.f32 %v5648_v1  ;;  %v17651_v2 = vsub.f32 %v17649_v18, %v17650_v38  ;;  %v3599_v20 = vcombine.low %v14744_v59, %v14753_v3  ;;  %v14812_v38 = vld [vmem:[#allocation2 + $0x158] sm:$0xff]  ;;  %v17715_v50 = vld [vmem:[#allocation11_spill] sm:$0xff] }
 0x25e   : > { %7679 = vst.msk [vmem:[#allocation2 + $0x1b0] sm:$0xff] %vm284_vm2, %v14740_v54  ;;  %v5459_v28 = vpop.xlane.xlu1 %5458  ;;  %5884 = vperm.xlu1 %11690, %v14467_v32   ;;  %v5453_v58 = vpop.xlane.xlu0 %5452  ;;  %17653 = vst [vmem:[#allocation76_spill] sm:$0xff] %v14781_v43  ;;  %v14786_v1 = vrot.slane %v3633_v48, %v12296_v25  ;;  %11762 = vpow2.f32 %v5634_v22  ;;  %v5630_v29 = vmul.f32 1.442695, %v5553_v45  ;;  %v5571_v33 = vsub.f32 %v14474_v39, %v14498_v34  ;;  %v17656_v45 = vld [vmem:[#allocation81_spill] sm:$0xff] }
 0x25f   : > { %v14770_v15 = vmax.f32 %v14748_v17, %v5459_v28  ;;  %v14773_v10 = vmax.f32 %v14750_v44, %v5453_v58  ;;  %6750 = vperm.xlu0 %11691, %v14756_v14   ;;  %v5644_v27 = vmul.f32 1.442695, %v17651_v2  ;;  %v3641_v11 = vcombine.low %v3624_v53, %v3632_v56  ;;  %v14796_v58 = vpop.eup %11752  ;;  %17658 = vst [vmem:[#allocation81_spill] sm:$0xff] %v14812_v38  ;;  %v14814_v2 = vld [vmem:[#allocation2 + $0x140] sm:$0xff]  ;;  %v14841_v14 = vld [vmem:[#allocation2 + $0x148] sm:$0xff] }
 0x260   : > { %17654 = vst [vmem:[#allocation134_spill] sm:$0xff] %v14796_v58  ;;  %v17657_v56 = vsub.f32 %v17656_v45, %v14168_v23  ;;  %17659 = vst [vmem:[#allocation136_spill] sm:$0xff] %v14814_v2  ;;  %v4355_v28 = vshrl.u32 %v3599_v20, 16 }
 0x261   : > { %7680 = vst.msk [vmem:[#allocation2 + $0x1b8] sm:$0xff] %vm284_vm2, %v14770_v15  ;;  %7677 = vst.msk [vmem:[#allocation2 + $0x1a0] sm:$0xff] %vm284_vm2, %v14773_v10  ;;  %v14800_v22 = vrot.slane %v3641_v11, %v12296_v25  ;;  %11764 = vpow2.f32 %v5644_v27  ;;  %v17663_v27 = vld [vmem:[#allocation85_spill] sm:$0xff] }
 0x262   : > { %v5455_v18 = vpop.xlane.xlu1 %5454  ;;  %6725 = vperm.xlu1 %11690, %v14746_v61   ;;  %v5433_v53 = vpop.xlane.xlu0 %5432  ;;  %v5624_v48 = vmul.f32 1.442695, %v17657_v56  ;;  %11766 = vpow2.f32 %v5630_v29  ;;  %v17664_v7 = vsub.f32 %v17663_v27, %v14201_v19  ;;  %17665 = vst [vmem:[#allocation85_spill] sm:$0xff] %v14841_v14  ;;  %17666 = vst [vmem:[#allocation140_spill] sm:$0xff] %v14843_v55  ;;  %v17670_v27 = vld [vmem:[#allocation87_spill] sm:$0xff]  ;;  %v14916_v61 = vld [vmem:[#allocation2 + $0x160] sm:$0xff] }
 0x263   : > { %v14803_v39 = vmax.f32 %v14779_v26, %v5455_v18  ;;  %v14806_v34 = vmax.f32 %v14781_v43, %v5433_v53  ;;  %6740 = vperm.xlu0 %11691, %v14796_v58   ;;  %v3649_v11 = vcombine.low %v14786_v1, %v14800_v22  ;;  %v5666_v18 = vmul.f32 1.442695, %v5571_v33  ;;  %v14826_v23 = vpop.eup %11754  ;;  %17685 = vst [vmem:[#allocation152_spill] sm:$0xff] %v14916_v61 }
 0x264   : > { %v5569_v53 = vsub.f32 %v14506_v13, %v14532_v21  ;;  %17660 = vst [vmem:[#allocation137_spill] sm:$0xff] %v14826_v23  ;;  %11768 = vpow2.f32 %v5624_v48  ;;  %v5620_v58 = vmul.f32 1.442695, %v17664_v7 }
 0x265   : > { %17655 = vst [vmem:[#allocation135_spill] sm:$0xff] %v14803_v39  ;;  %7678 = vst.msk [vmem:[#allocation2 + $0x1a8] sm:$0xff] %vm284_vm2, %v14803_v39  ;;  %v4356_v29 = vshrl.u32 %v3649_v11, 16  ;;  %v4353_v33 = vpack.i.b16 %v3649_v11, %v3599_v20  ;;  %v14829_v25 = vpop.eup %11756  ;;  %11770 = vpow2.f32 %v5666_v18 }
 0x266   : > { %7667 = vst.msk [vmem:[#allocation2 + $0x150] sm:$0xff] %vm284_vm2, %v14806_v34  ;;  %v5435_v45 = vpop.xlane.xlu1 %5434  ;;  %5874 = vperm.xlu1 %11690, %v14501_v5   ;;  %v5429_v56 = vpop.xlane.xlu0 %5428  ;;  %17661 = vst [vmem:[#allocation138_spill] sm:$0xff] %v14829_v25  ;;  %v5662_v11 = vmul.f32 1.442695, %v5569_v53  ;;  %11772 = vpow2.f32 %v5620_v58 }
 0x267   : > { %v14832_v21 = vmax.f32 %v14812_v38, %v5435_v45  ;;  %v14835_v13 = vmax.f32 %v14814_v2, %v5429_v56  ;;  %6830 = vperm.xlu0 %11691, %v14826_v23   ;;  %v4357_v20 = vpack.i.b16 %v4356_v29, %v4355_v28  ;;  %11479 = vmatprep.subr.bf16.mxu0 %v4353_v33  ;;  %v14851_v19 = vpop.eup %11758  ;;  %v14868_v45 = vld [vmem:[#allocation2 + $0x1c0] sm:$0xff]  ;;  %v14891_v23 = vld [vmem:[#allocation2 + $0x170] sm:$0xff] }
 0x268   : > { %11480 = vmatpush3.bf16.msra.mxu0 %v4353_v33  ;;  %17667 = vst [vmem:[#allocation141_spill] sm:$0xff] %v14851_v19  ;;  %v17671_v56 = vsub.f32 %v17670_v27, %v14234_v12  ;;  %v14866_v33 = vld [vmem:[#allocation2 + $0x1d8] sm:$0xff]  ;;  %17673 = vst [vmem:[#allocation144_spill] sm:$0xff] %v14868_v45  ;;  %11774 = vpow2.f32 %v5662_v11  ;;  %v17676_v27 = vld [vmem:[#allocation91_spill] sm:$0xff] }
 0x269   : > { %17662 = vst [vmem:[#allocation139_spill] sm:$0xff] %v14832_v21  ;;  %7668 = vst.msk [vmem:[#allocation2 + $0x158] sm:$0xff] %vm284_vm2, %v14832_v21  ;;  %11511 = vmatprep.subr.bf16.mxu1 %v4357_v20 }
 0x26a   : > { %7665 = vst.msk [vmem:[#allocation2 + $0x140] sm:$0xff] %vm284_vm2, %v14835_v13  ;;  %v5431_v7 = vpop.xlane.xlu1 %5430  ;;  %6715 = vperm.xlu1 %11690, %v14829_v25   ;;  %v5465_v48 = vpop.xlane.xlu0 %5464  ;;  %11512 = vmatpush3.bf16.msra.mxu1 %v4357_v20  ;;  %v5656_v29 = vmul.f32 1.442695, %v17671_v56  ;;  %17672 = vst [vmem:[#allocation87_spill] sm:$0xff] %v14866_v33  ;;  %v17677_v56 = vsub.f32 %v17676_v27, %v14264_v62 }
 0x26b   : > { %v14855_v28 = vmax.f32 %v14841_v14, %v5431_v7  ;;  %v14858_v18 = vmax.f32 %v14843_v55, %v5465_v48  ;;  %6820 = vperm.xlu0 %11691, %v14851_v19   ;;  %v14861_v53 = vpop.eup %11760  ;;  %v14889_v19 = vld [vmem:[#allocation2 + $0x1c8] sm:$0xff]  ;;  %17679 = vst [vmem:[#allocation147_spill] sm:$0xff] %v14891_v23  ;;  %v14941_v55 = vld [vmem:[#allocation2 + $0x1f0] sm:$0xff] }
 0x26c   : > { %17669 = vst [vmem:[#allocation143_spill] sm:$0xff] %v14861_v53  ;;  %v14876_v20 = vpop.eup %11762  ;;  %11776 = vpow2.f32 %v5656_v29  ;;  %v5652_v7 = vmul.f32 1.442695, %v17677_v56  ;;  %17678 = vst [vmem:[#allocation91_spill] sm:$0xff] %v14889_v19 }
 0x26d   : > { %17668 = vst [vmem:[#allocation142_spill] sm:$0xff] %v14855_v28  ;;  %7666 = vst.msk [vmem:[#allocation2 + $0x148] sm:$0xff] %vm284_vm2, %v14855_v28 }
 0x26e   : > { %7683 = vst.msk [vmem:[#allocation2 + $0x1d0] sm:$0xff] %vm284_vm2, %v14858_v18  ;;  %17674 = vst [vmem:[#allocation145_spill] sm:$0xff] %v14876_v20  ;;  %v5467_v58 = vpop.xlane.xlu1 %5466  ;;  %6805 = vperm.xlu1 %11690, %v14861_v53   ;;  %v5461_v12 = vpop.xlane.xlu0 %5460  ;;  %11778 = vpow2.f32 %v5652_v7  ;;  %v14914_v53 = vld [vmem:[#allocation2 + $0x178] sm:$0xff] }
 0x26f   : > { %v14880_v48 = vmax.f32 %v14866_v33, %v5467_v58  ;;  %v14883_v11 = vmax.f32 %v14868_v45, %v5461_v12  ;;  %6770 = vperm.xlu0 %11691, %v14876_v20   ;;  %v14893_v25 = vpop.eup %11764  ;;  %v17683_v58 = vsub.f32 %v14367_v49, %v14384_v57  ;;  %17684 = vst [vmem:[#allocation151_spill] sm:$0xff] %v14914_v53  ;;  %17692 = vst [vmem:[#allocation156_spill] sm:$0xff] %v14941_v55 }
 0x270   : > { %17680 = vst [vmem:[#allocation148_spill] sm:$0xff] %v14893_v25  ;;  %v14901_v29 = vpop.eup %11766 }
 0x271   : > { %17675 = vst [vmem:[#allocation146_spill] sm:$0xff] %v14880_v48  ;;  %7684 = vst.msk [vmem:[#allocation2 + $0x1d8] sm:$0xff] %vm284_vm2, %v14880_v48  ;;  %v5632_v20 = vmul.f32 1.442695, %v17683_v58  ;;  %v14918_v45 = vpop.eup %11768 }
 0x272   : > { %7681 = vst.msk [vmem:[#allocation2 + $0x1c0] sm:$0xff] %vm284_vm2, %v14883_v11  ;;  %17681 = vst [vmem:[#allocation149_spill] sm:$0xff] %v14901_v29  ;;  %v5463_v12 = vpop.xlane.xlu1 %5462  ;;  %6795 = vperm.xlu1 %11690, %v14893_v25   ;;  %v5441_v62 = vpop.xlane.xlu0 %5440 }
 0x273   : > { %v14905_v27 = vmax.f32 %v14889_v19, %v5463_v12  ;;  %v14908_v56 = vmax.f32 %v14891_v23, %v5441_v62  ;;  %6760 = vperm.xlu0 %11691, %v14901_v29   ;;  %17686 = vst [vmem:[#allocation153_spill] sm:$0xff] %v14918_v45  ;;  %v14926_v7 = vpop.eup %11770  ;;  %11780 = vpow2.f32 %v5632_v20  ;;  %v17689_v12 = vld [vmem:[#allocation101_spill] sm:$0xff]  ;;  %v14939_v23 = vld [vmem:[#allocation2 + $0x168] sm:$0xff] }
 0x274   : > { %17687 = vst [vmem:[#allocation154_spill] sm:$0xff] %v14926_v7  ;;  %v17690_v29 = vsub.f32 %v17689_v12, %v14432_v42  ;;  %17691 = vst [vmem:[#allocation101_spill] sm:$0xff] %v14939_v23  ;;  %v14943_v2 = vpop.eup %11772  ;;  %v17696_v12 = vsub.f32 %v14439_v0, %v14467_v32  ;;  %v17701_v32 = vld [vmem:[#allocation107_spill] sm:$0xff] }
 0x275   : > { %17682 = vst [vmem:[#allocation150_spill] sm:$0xff] %v14908_v56  ;;  %7682 = vst.msk [vmem:[#allocation2 + $0x1c8] sm:$0xff] %vm284_vm2, %v14905_v27 }
 0x276   : > { %7671 = vst.msk [vmem:[#allocation2 + $0x170] sm:$0xff] %vm284_vm2, %v14908_v56  ;;  %v5443_v62 = vpop.xlane.xlu1 %5442  ;;  %6745 = vperm.xlu1 %11690, %v14918_v45   ;;  %v5437_v49 = vpop.xlane.xlu0 %5436  ;;  %v5628_v25 = vmul.f32 1.442695, %v17690_v29  ;;  %17693 = vst [vmem:[#allocation157_spill] sm:$0xff] %v14943_v2  ;;  %v14962_v45 = vld [vmem:[#allocation2 + $0x1f8] sm:$0xff] }
 0x277   : > { %v14930_v57 = vmax.f32 %v14914_v53, %v5443_v62  ;;  %v14933_v58 = vmax.f32 %v14916_v61, %v5437_v49  ;;  %6850 = vperm.xlu0 %11691, %v14926_v7   ;;  %v14949_v62 = vpop.eup %11774  ;;  %v5664_v7 = vmul.f32 1.442695, %v17696_v12  ;;  %17697 = vst [vmem:[#allocation160_spill] sm:$0xff] %v14962_v45  ;;  %v14964_v61 = vld [vmem:[#allocation2 + $0x1e0] sm:$0xff]  ;;  %v17702_v12 = vsub.f32 %v17701_v32, %v14501_v5 }
 0x278   : > { %17694 = vst [vmem:[#allocation158_spill] sm:$0xff] %v14949_v62  ;;  %11782 = vpow2.f32 %v5628_v25  ;;  %17698 = vst [vmem:[#allocation161_spill] sm:$0xff] %v14964_v61 }
 0x279   : > { %17688 = vst [vmem:[#allocation155_spill] sm:$0xff] %v14933_v58  ;;  %7672 = vst.msk [vmem:[#allocation2 + $0x178] sm:$0xff] %vm284_vm2, %v14930_v57  ;;  %11784 = vpow2.f32 %v5664_v7 }
 0x27a   : > { %7669 = vst.msk [vmem:[#allocation2 + $0x160] sm:$0xff] %vm284_vm2, %v14933_v58  ;;  %6735 = vperm.xlu1 %11690, %v14943_v2   ;;  %v5439_v20 = vpop.xlane.xlu1 %5438  ;;  %v5473_v49 = vpop.xlane.xlu0 %5472 }
 0x27b   : > { %v14953_v42 = vmax.f32 %v14939_v23, %v5439_v20  ;;  %v14956_v29 = vmax.f32 %v14941_v55, %v5473_v49  ;;  %6840 = vperm.xlu0 %11691, %v14949_v62   ;;  %v14966_v2 = vpop.eup %11776  ;;  %v5660_v62 = vmul.f32 1.442695, %v17702_v12  ;;  %v14983_v55 = vld [vmem:[#allocation2 + $0x1e8] sm:$0xff] }
 0x27c   : > { %17699 = vst [vmem:[#allocation162_spill] sm:$0xff] %v14966_v2  ;;  %17703 = vst [vmem:[#allocation107_spill] sm:$0xff] %v14983_v55 }
 0x27d   : > { %17695 = vst [vmem:[#allocation159_spill] sm:$0xff] %v14956_v29  ;;  %7670 = vst.msk [vmem:[#allocation2 + $0x168] sm:$0xff] %vm284_vm2, %v14953_v42  ;;  %11786 = vpow2.f32 %v5660_v62  ;;  %v17708_v62 = vld [vmem:[#allocation78_spill] sm:$0xff] }
 0x27e   : > { %7687 = vst.msk [vmem:[#allocation2 + $0x1f0] sm:$0xff] %vm284_vm2, %v14956_v29  ;;  %6825 = vperm.xlu1 %11690, %v14966_v2   ;;  %v5475_v20 = vpop.xlane.xlu1 %5474  ;;  %v5469_v25 = vpop.xlane.xlu0 %5468  ;;  %v17709_v2 = vld [vmem:[#allocation77_spill] sm:$0xff] }
 0x27f   : > { %v14974_v49 = vmax.f32 %v14962_v45, %v5475_v20  ;;  %v14977_v0 = vmax.f32 %v14964_v61, %v5469_v25  ;;  %5909 = vperm.xlu0 %11691, %v14564_v36   ;;  %v14985_v29 = vpop.eup %11778  ;;  %v4300_v61 = vcombine.high %v17709_v2, %v17708_v62 }
 0x280   : > { %17704 = vst [vmem:[#allocation164_spill] sm:$0xff] %v14985_v29  ;;  %v14996_v5 = vpop.eup %11780 }
 0x281   : > { %17700 = vst [vmem:[#allocation163_spill] sm:$0xff] %v14977_v0  ;;  %7688 = vst.msk [vmem:[#allocation2 + $0x1f8] sm:$0xff] %vm284_vm2, %v14974_v49 }
 0x282   : > { %7685 = vst.msk [vmem:[#allocation2 + $0x1e0] sm:$0xff] %vm284_vm2, %v14977_v0  ;;  %6815 = vperm.xlu1 %11690, %v14985_v29   ;;  %v5471_v20 = vpop.xlane.xlu1 %5470  ;;  %17706 = vst [vmem:[#allocation166_spill] sm:$0xff] %v14996_v5  ;;  %v17710_v0 = vld [vmem:[#allocation80_spill] sm:$0xff] }
 0x283   : > { %v14993_v25 = vmax.f32 %v14983_v55, %v5471_v20  ;;  %5899 = vperm.xlu0 %11691, %v14600_v60   ;;  %v17711_v55 = vld [vmem:[#allocation79_spill] sm:$0xff] }
 0x284   : > { %v4350_v45 = vcombine.high %v17711_v55, %v17710_v0  ;;  %v17717_v55 = vld [vmem:[#allocation14_spill] sm:$0xff] }
 0x285   : > { %17705 = vst [vmem:[#allocation165_spill] sm:$0xff] %v14993_v25  ;;  %7686 = vst.msk [vmem:[#allocation2 + $0x1e8] sm:$0xff] %vm284_vm2, %v14993_v25  ;;  %v15002_v12 = vpop.eup %11782 }
 0x286   : > { %6765 = vperm.xlu1 %11690, %v14996_v5   ;;  %v5745_v7 = vpop.permute.xlu1 %5744  ;;  %v5735_v32 = vpop.permute.xlu0 %5734  ;;  %17707 = vst [vmem:[#allocation167_spill] sm:$0xff] %v15002_v12  ;;  %v17713_v5 = vld [vmem:[#allocation15_spill] sm:$0xff]  ;;  %v15014_v53 = vpack.i.b16 %v4350_v45, %v4300_v61 }
 0x287   : > { %5989 = vperm.xlu0 %11691, %v14635_v4   ;;  %v15010_v23 = vpop.eup %11784  ;;  %v6052_v0 = vsub.f32 %v17717_v55, %v5735_v32  ;;  %v4475_v55 = vshrl.u32 %v4300_v61, 16 }
 0x288   : > { %17712 = vst [vmem:[#allocation78_spill] sm:$0xff] %v15010_v23  ;;  %11529 = vmatprep.subr.bf16.mxu0 %v15014_v53 }
 0x289   : > { %v6116_v38 = vmul.f32 1.442695, %v6052_v0 }
 0x28a   : > { %6755 = vperm.xlu1 %11690, %v15002_v12   ;;  %v5825_v20 = vpop.permute.xlu1 %5824  ;;  %v5830_v29 = vpop.permute.xlu0 %5829  ;;  %v17714_v12 = vld [vmem:[#allocation17_spill] sm:$0xff] }
 0x28b   : > { %5979 = vperm.xlu0 %11691, %v14671_v31   ;;  %v6071_v43 = vsub.f32 %v17713_v5, %v5830_v29  ;;  %v6070_v56 = vsub.f32 %v17715_v50, %v5825_v20  ;;  %v15020_v2 = vpop.eup %11786  ;;  %v17718_v29 = vld [vmem:[#allocation13_spill] sm:$0xff]  ;;  %v17720_v50 = vld [vmem:[#allocation12_spill] sm:$0xff] }
 0x28c   : > { %17716 = vst [vmem:[#allocation77_spill] sm:$0xff] %v15020_v2  ;;  %v6054_v20 = vsub.f32 %v17720_v50, %v5745_v7  ;;  %v17723_v7 = vld [vmem:[#allocation113_spill] sm:$0xff] }
 0x28d   : > { %v6154_v62 = vmul.f32 1.442695, %v6071_v43  ;;  %v6152_v25 = vmul.f32 1.442695, %v6070_v56  ;;  %v17721_v43 = vld [vmem:[#allocation112_spill] sm:$0xff]  ;;  %v17724_v0 = vsub.f32 %v17723_v7, %v14564_v36 }
 0x28e   : > { %6845 = vperm.xlu1 %11690, %v15010_v23   ;;  %v5750_v58 = vpop.permute.xlu1 %5749  ;;  %v5820_v44 = vpop.permute.xlu0 %5819 }
 0x28f   : > { %v6069_v19 = vsub.f32 %v17714_v12, %v5820_v44  ;;  %5929 = vperm.xlu0 %11691, %v14705_v41   ;;  %v6055_v5 = vsub.f32 %v17718_v29, %v5750_v58  ;;  %v17719_v44 = vld [vmem:[#allocation16_spill] sm:$0xff]  ;;  %11788 = vpow2.f32 %v6154_v62  ;;  %v4476_v29 = vshrl.u32 %v4350_v45, 16 }
 0x290   : > { %v5674_v62 = vmul.f32 1.442695, %v17724_v0 }
 0x291   : > { %v6150_v23 = vmul.f32 1.442695, %v6069_v19  ;;  %v6122_v32 = vmul.f32 1.442695, %v6055_v5  ;;  %v4477_v56 = vpack.i.b16 %v4476_v29, %v4475_v55  ;;  %v17725_v5 = vld [vmem:[#allocation116_spill] sm:$0xff]  ;;  %v17732_v55 = vsub.f32 %v14576_v47, %v14600_v60 }
 0x292   : > { %6835 = vperm.xlu1 %11690, %v15020_v2   ;;  %v5815_v33 = vpop.permute.xlu1 %5814  ;;  %v15025_v14 = vpop.permute.xlu0 %5849  ;;  %v17722_v2 = vld [vmem:[#allocation18_spill] sm:$0xff]  ;;  %v17737_v60 = vsub.f32 %v14643_v35, %v14671_v31 }
 0x293   : > { %v6068_v12 = vsub.f32 %v17719_v44, %v5815_v33  ;;  %5919 = vperm.xlu0 %11691, %v14737_v6   ;;  %11790 = vpow2.f32 %v6150_v23  ;;  %v6120_v44 = vmul.f32 1.442695, %v6054_v20  ;;  %11561 = vmatprep.subr.bf16.mxu1 %v4477_v56  ;;  %v17730_v20 = vld [vmem:[#allocation86_spill] sm:$0xff]  ;;  %v5670_v29 = vmul.f32 1.442695, %v17732_v55 }
 0x294   : > { %v17745_v31 = vld [vmem:[#allocation22_spill] sm:$0xff] }
 0x295   : > { %v6148_v26 = vmul.f32 1.442695, %v6068_v12 }
 0x296   : > { %5904 = vperm.xlu1 %11690, %v17721_v43   ;;  %v5740_v19 = vpop.permute.xlu1 %5739  ;;  %v15031_v58 = vpop.permute.xlu0 %5839 }
 0x297   : > { %11792 = vpow2.f32 %v6148_v26  ;;  %v6053_v33 = vsub.f32 %v17722_v2, %v5740_v19  ;;  %6009 = vperm.xlu0 %11691, %v14770_v15   ;;  %v17726_v26 = vld [vmem:[#allocation110_spill] sm:$0xff] }
 0x298   : > { %11794 = vpow2.f32 %v6152_v25  ;;  %v5574_v45 = vsub.f32 %v17726_v26, %v17721_v43  ;;  %v17728_v25 = vld [vmem:[#allocation83_spill] sm:$0xff]  ;;  %v17729_v2 = vld [vmem:[#allocation82_spill] sm:$0xff]  ;;  %v17735_v26 = vsub.f32 %v14608_v16, %v14635_v4  ;;  %v17741_v16 = vld [vmem:[#allocation89_spill] sm:$0xff] }
 0x299   : > { %11796 = vpow2.f32 %v6116_v38  ;;  %v6118_v23 = vmul.f32 1.442695, %v6053_v33  ;;  %v4200_v50 = vcombine.high %v17729_v2, %v17728_v25  ;;  %v17738_v2 = vld [vmem:[#allocation27_spill] sm:$0xff] }
 0x29a   : > { %11798 = vpow2.f32 %v6122_v32  ;;  %5894 = vperm.xlu1 %11690, %v17725_v5   ;;  %v15039_v12 = vpop.permute.xlu1 %5764  ;;  %v15041_v61 = vpop.permute.xlu0 %5789  ;;  %v17731_v32 = vld [vmem:[#allocation84_spill] sm:$0xff]  ;;  %v5672_v43 = vmul.f32 1.442695, %v5574_v45  ;;  %v5706_v25 = vmul.f32 1.442695, %v17735_v26  ;;  %v17742_v26 = vld [vmem:[#allocation93_spill] sm:$0xff] }
 0x29b   : > { %11800 = vpow2.f32 %v6118_v23  ;;  %5999 = vperm.xlu0 %11691, %v14803_v39   ;;  %v4250_v19 = vcombine.high %v17731_v32, %v17730_v20  ;;  %v4459_v0 = vshrl.u32 %v4200_v50, 16  ;;  %v5702_v45 = vmul.f32 1.442695, %v17737_v60 }
 0x29c   : > { %11802 = vpow2.f32 %v6120_v44  ;;  %v15059_v33 = vpop.eup %11788  ;;  %v6073_v20 = vsub.f32 %v17738_v2, %v15031_v58 }
 0x29d   : > { %11804 = vpow2.f32 %v5674_v62  ;;  %17733 = vst [vmem:[#allocation79_spill] sm:$0xff] %v15059_v33  ;;  %v4460_v62 = vshrl.u32 %v4250_v19, 16 }
 0x29e   : > { %5984 = vperm.xlu1 %11690, %v14603_v52   ;;  %v15047_v36 = vpop.permute.xlu1 %5754  ;;  %v15049_v38 = vpop.permute.xlu0 %6695  ;;  %11806 = vpow2.f32 %v5670_v29 }
 0x29f   : > { %17727 = vst [vmem:[#allocation80_spill] sm:$0xff] %v15049_v38  ;;  %5949 = vperm.xlu0 %11691, %v14832_v21   ;;  %v17740_v38 = vld [vmem:[#allocation90_spill] sm:$0xff]  ;;  %11808 = vpow2.f32 %v5672_v43  ;;  %v4461_v2 = vpack.i.b16 %v4460_v62, %v4459_v0  ;;  %v17750_v0 = vld [vmem:[#allocation20_spill] sm:$0xff] }
 0x2a0   : > { %v15064_v23 = vpop.eup %11790  ;;  %v4100_v4 = vcombine.high %v17741_v16, %v17740_v38  ;;  %11810 = vpow2.f32 %v5706_v25  ;;  %v6056_v62 = vsub.f32 %v17750_v0, %v15047_v36 }
 0x2a1   : > { %17734 = vst [vmem:[#allocation15_spill] sm:$0xff] %v15064_v23  ;;  %11812 = vpow2.f32 %v5702_v45 }
 0x2a2   : > { %5974 = vperm.xlu1 %11690, %v14638_v24   ;;  %v5845_v44 = vpop.permute.xlu1 %5844  ;;  %v15062_v7 = vpop.permute.xlu0 %5779 }
 0x2a3   : > { %5939 = vperm.xlu0 %11691, %v14855_v28   ;;  %v17743_v28 = vld [vmem:[#allocation92_spill] sm:$0xff]  ;;  %v6074_v35 = vsub.f32 %v17745_v31, %v5845_v44 }
 0x2a4   : > { %v15070_v47 = vpop.eup %11792  ;;  %v4150_v21 = vcombine.high %v17743_v28, %v17742_v26  ;;  %v4443_v28 = vshrl.u32 %v4100_v4, 16  ;;  %v17748_v44 = vld [vmem:[#allocation24_spill] sm:$0xff]  ;;  %v6158_v26 = vmul.f32 1.442695, %v6073_v20  ;;  %v17756_v20 = vld [vmem:[#allocation21_spill] sm:$0xff] }
 0x2a5   : > { %17736 = vst [vmem:[#allocation17_spill] sm:$0xff] %v15070_v47  ;;  %v15077_v32 = vpop.eup %11794  ;;  %v7085_v55 = vpack.c.bf16 %v15064_v23, %v15070_v47  ;;  %v6075_v16 = vsub.f32 %v17748_v44, %v15025_v14  ;;  %v6160_v14 = vmul.f32 1.442695, %v6074_v35 }
 0x2a6   : > { %17739 = vst [vmem:[#allocation11_spill] sm:$0xff] %v15077_v32  ;;  %v15085_v39 = vpop.eup %11796  ;;  %5924 = vperm.xlu1 %11690, %v14674_v46   ;;  %v5770_v58 = vpop.permute.xlu1 %5769  ;;  %v7086_v29 = vpack.c.bf16 %v15059_v33, %v15077_v32  ;;  %v4444_v38 = vshrl.u32 %v4150_v21, 16  ;;  %v17752_v33 = vld [vmem:[#allocation94_spill] sm:$0xff]  ;;  %11814 = vpow2.f32 %v6158_v26 }
 0x2a7   : > { %17744 = vst [vmem:[#allocation14_spill] sm:$0xff] %v15085_v39  ;;  %v15091_v60 = vpop.permute.xlu0 %5869  ;;  %v15093_v23 = vpop.eup %11798  ;;  %11513 = vmatprep.mubr.bf16.mxu1 %v7085_v55  ;;  %6029 = vperm.xlu0 %11691, %v14880_v48   ;;  %v17751_v55 = vld [vmem:[#allocation95_spill] sm:$0xff]  ;;  %v17753_v32 = vld [vmem:[#allocation98_spill] sm:$0xff]  ;;  %v17754_v48 = vld [vmem:[#allocation96_spill] sm:$0xff]  ;;  %11816 = vpow2.f32 %v6160_v14 }
 0x2a8   : > { %17746 = vst [vmem:[#allocation13_spill] sm:$0xff] %v15093_v23  ;;  %v15096_v43 = vpop.eup %11800  ;;  %11514 = vmatmul.mubr.bf16.vlgmr.msra.gmra.mxu1 %v7086_v29  ;;  %v4000_v47 = vcombine.high %v17752_v33, %v17751_v55  ;;  %v4050_v45 = vcombine.high %v17754_v48, %v17753_v32  ;;  %v6059_v29 = vsub.f32 %v17756_v20, %v5770_v58  ;;  %v6162_v55 = vmul.f32 1.442695, %v6075_v16  ;;  %v17759_v58 = vld [vmem:[#allocation19_spill] sm:$0xff] }
 0x2a9   : > { %17747 = vst [vmem:[#allocation16_spill] sm:$0xff] %v15096_v43  ;;  %v15100_v31 = vpop.eup %11802  ;;  %v7077_v25 = vpack.c.bf16 %v15096_v43, %v15085_v39  ;;  %11562 = vmatpush3.bf16.msra.mxu1 %v4477_v56  ;;  %v4457_v56 = vpack.i.b16 %v4250_v19, %v4200_v50  ;;  %v17758_v39 = vld [vmem:[#allocation25_spill] sm:$0xff]  ;;  %v4445_v48 = vpack.i.b16 %v4444_v38, %v4443_v28  ;;  %v17760_v43 = vld [vmem:[#allocation100_spill] sm:$0xff]  ;;  %v6124_v19 = vmul.f32 1.442695, %v6056_v62 }
 0x2aa   : > { %17749 = vst [vmem:[#allocation12_spill] sm:$0xff] %v15100_v31  ;;  %v15110_v46 = vpop.eup %11804  ;;  %5914 = vperm.xlu1 %11690, %v14708_v40   ;;  %v5835_v44 = vpop.permute.xlu1 %5834  ;;  %v7078_v36 = vpack.c.bf16 %v15093_v23, %v15100_v31  ;;  %11563 = vmatprep.subr.bf16.mxu1 %v4461_v2  ;;  %v4427_v32 = vshrl.u32 %v4000_v47, 16  ;;  %v4428_v35 = vshrl.u32 %v4050_v45, 16  ;;  %v6058_v20 = vsub.f32 %v17759_v58, %v15039_v12  ;;  %v17761_v40 = vld [vmem:[#allocation99_spill] sm:$0xff]  ;;  %v17762_v31 = vld [vmem:[#allocation104_spill] sm:$0xff] }
 0x2ab   : > { %17755 = vst [vmem:[#allocation112_spill] sm:$0xff] %v15110_v46  ;;  %v15116_v0 = vpop.permute.xlu0 %6710  ;;  %v6072_v33 = vsub.f32 %v17758_v39, %v5835_v44  ;;  %11481 = vmatprep.mubr.bf16.mxu0 %v7077_v25  ;;  %6870 = vperm.xlu0 %11691, %v15110_v46   ;;  %v3900_v23 = vcombine.high %v17761_v40, %v17760_v43  ;;  %v6130_v28 = vmul.f32 1.442695, %v6059_v29  ;;  %v17764_v43 = vld [vmem:[#allocation23_spill] sm:$0xff]  ;;  %v17767_v62 = vld [vmem:[#allocation108_spill] sm:$0xff]  ;;  %v17768_v29 = vld [vmem:[#allocation30_spill] sm:$0xff] }
 0x2ac   : > { %17757 = vst [vmem:[#allocation18_spill] sm:$0xff] %v15116_v0  ;;  %11482 = vmatmul.mubr.bf16.vlgmr.msra.gmra.mxu0 %v7078_v36  ;;  %v17763_v0 = vld [vmem:[#allocation103_spill] sm:$0xff]  ;;  %v4441_v25 = vpack.i.b16 %v4150_v21, %v4100_v4  ;;  %v4429_v26 = vpack.i.b16 %v4428_v35, %v4427_v32  ;;  %v17765_v21 = vld [vmem:[#allocation114_spill] sm:$0xff]  ;;  %v6128_v4 = vmul.f32 1.442695, %v6058_v20  ;;  %v6061_v44 = vsub.f32 %v17768_v29, %v15062_v7 }
 0x2ad   : > { %v3950_v50 = vcombine.high %v17763_v0, %v17762_v31  ;;  %v6156_v39 = vmul.f32 1.442695, %v6072_v33  ;;  %11530 = vmatpush3.bf16.msra.mxu0 %v15014_v53  ;;  %11564 = vmatpush3.bf16.msra.mxu1 %v4461_v2  ;;  %v4411_v16 = vshrl.u32 %v3900_v23, 16  ;;  %v5572_v53 = vsub.f32 %v17765_v21, %v17725_v5  ;;  %v17766_v2 = vld [vmem:[#allocation109_spill] sm:$0xff]  ;;  %v17769_v0 = vld [vmem:[#allocation115_spill] sm:$0xff]  ;;  %v17773_v7 = vld [vmem:[#allocation26_spill] sm:$0xff] }
 0x2ae   : > { %6004 = vperm.xlu1 %11690, %v14740_v54   ;;  %v5760_v38 = vpop.permute.xlu1 %5759  ;;  %11531 = vmatprep.subr.bf16.mxu0 %v4457_v56  ;;  %v3800_v14 = vcombine.high %v17767_v62, %v17766_v2  ;;  %v17770_v33 = vld [vmem:[#allocation111_spill] sm:$0xff]  ;;  %v4425_v35 = vpack.i.b16 %v4050_v45, %v4000_v47  ;;  %v6134_v47 = vmul.f32 1.442695, %v6061_v44  ;;  %v17777_v62 = vld [vmem:[#allocation29_spill] sm:$0xff] }
 0x2af   : > { %v15128_v12 = vpop.permute.xlu0 %5859  ;;  %v4412_v40 = vshrl.u32 %v3950_v50, 16  ;;  %11818 = vpow2.f32 %v6156_v39  ;;  %v6057_v31 = vsub.f32 %v17764_v43, %v5760_v38  ;;  %6019 = vperm.xlu0 %11691, %v14905_v27   ;;  %11565 = vmatprep.subr.bf16.mxu1 %v4445_v48  ;;  %v3850_v58 = vcombine.high %v17770_v33, %v17769_v0  ;;  %v15140_v39 = vpop.eup %11806  ;;  %v17775_v43 = vld [vmem:[#allocation28_spill] sm:$0xff] }
 0x2b0   : > { %11820 = vpow2.f32 %v6162_v55  ;;  %17771 = vst [vmem:[#allocation113_spill] sm:$0xff] %v15140_v39  ;;  %v15145_v20 = vpop.eup %11808  ;;  %v4409_v2 = vpack.i.b16 %v3950_v50, %v3900_v23  ;;  %v17778_v23 = vld [vmem:[#allocation126_spill] sm:$0xff]  ;;  %v3600_v0 = vcombine.high %v14744_v59, %v14753_v3 }
 0x2b1   : > { %11822 = vpow2.f32 %v6124_v19  ;;  %v6126_v36 = vmul.f32 1.442695, %v6057_v31  ;;  %11532 = vmatpush3.bf16.msra.mxu0 %v4457_v56  ;;  %11566 = vmatpush3.bf16.msra.mxu1 %v4445_v48  ;;  %v4413_v55 = vpack.i.b16 %v4412_v40, %v4411_v16  ;;  %17772 = vst [vmem:[#allocation116_spill] sm:$0xff] %v15145_v20  ;;  %v4395_v48 = vshrl.u32 %v3800_v14, 16  ;;  %v15149_v38 = vpop.eup %11810  ;;  %v17781_v3 = vld [vmem:[#allocation34_spill] sm:$0xff] }
 0x2b2   : > { %11824 = vpow2.f32 %v6130_v28  ;;  %5994 = vperm.xlu1 %11690, %v14773_v10   ;;  %v5785_v5 = vpop.permute.xlu1 %5784  ;;  %11533 = vmatprep.subr.bf16.mxu0 %v4441_v25  ;;  %v4396_v19 = vshrl.u32 %v3850_v58, 16  ;;  %17774 = vst [vmem:[#allocation110_spill] sm:$0xff] %v15149_v38  ;;  %v5668_v28 = vmul.f32 1.442695, %v5572_v53  ;;  %v6063_v31 = vsub.f32 %v17775_v43, %v15041_v61  ;;  %v15153_v21 = vpop.eup %11812 }
 0x2b3   : > { %v15143_v32 = vpop.permute.xlu0 %6790  ;;  %11826 = vpow2.f32 %v6126_v36  ;;  %v6062_v56 = vsub.f32 %v17773_v7, %v5785_v5  ;;  %6860 = vperm.xlu0 %11691, %v15140_v39   ;;  %11567 = vmatprep.subr.bf16.mxu1 %v4429_v26  ;;  %17776 = vst [vmem:[#allocation83_spill] sm:$0xff] %v15153_v21  ;;  %v3700_v53 = vcombine.high %v14626_v30, %v14629_v63 }
 0x2b4   : > { %11828 = vpow2.f32 %v6128_v4  ;;  %v3750_v4 = vcombine.high %v14664_v51, %v14687_v8  ;;  %v5590_v61 = vsub.f32 %v14578_v37, %v14603_v52  ;;  %v6138_v29 = vmul.f32 1.442695, %v6063_v31  ;;  %v15169_v51 = vpop.eup %11814 }
 0x2b5   : > { %11534 = vmatpush3.bf16.msra.mxu0 %v4441_v25  ;;  %11568 = vmatpush3.bf16.msra.mxu1 %v4429_v26  ;;  %v6136_v45 = vmul.f32 1.442695, %v6062_v56  ;;  %v4397_v26 = vpack.i.b16 %v4396_v19, %v4395_v48  ;;  %11830 = vpow2.f32 %v5668_v28  ;;  %v4379_v44 = vshrl.u32 %v3700_v53, 16  ;;  %v15178_v33 = vpop.eup %11816  ;;  %v17782_v48 = vld [vmem:[#allocation31_spill] sm:$0xff] }
 0x2b6   : > { %5944 = vperm.xlu1 %11690, %v14806_v34   ;;  %v5775_v16 = vpop.permute.xlu1 %5774  ;;  %11535 = vmatprep.subr.bf16.mxu0 %v4425_v35  ;;  %v4380_v36 = vshrl.u32 %v3750_v4, 16  ;;  %v17779_v50 = vsub.f32 %v17778_v23, %v14705_v41  ;;  %11832 = vpow2.f32 %v6134_v47  ;;  %v4393_v8 = vpack.i.b16 %v3850_v58, %v3800_v14  ;;  %v17785_v23 = vld [vmem:[#allocation33_spill] sm:$0xff] }
 0x2b7   : > { %v15156_v40 = vpop.permute.xlu0 %6780  ;;  %v6060_v25 = vsub.f32 %v17777_v62, %v5775_v16  ;;  %6950 = vperm.xlu0 %11691, %v15149_v38   ;;  %11569 = vmatprep.subr.bf16.mxu1 %v4413_v55  ;;  %11834 = vpow2.f32 %v6136_v45  ;;  %v3650_v41 = vcombine.high %v14786_v1, %v14800_v22  ;;  %v5704_v5 = vmul.f32 1.442695, %v5590_v61  ;;  %v17784_v62 = vld [vmem:[#allocation32_spill] sm:$0xff]  ;;  %v17818_v38 = vld [vmem:[#allocation151_spill] sm:$0xff] }
 0x2b8   : > { %v5682_v30 = vmul.f32 1.442695, %v17779_v50  ;;  %v4381_v14 = vpack.i.b16 %v4380_v36, %v4379_v44  ;;  %v4363_v58 = vshrl.u32 %v3600_v0, 16  ;;  %v6077_v1 = vsub.f32 %v17781_v3, %v15128_v12 }
 0x2b9   : > { %v6132_v63 = vmul.f32 1.442695, %v6060_v25  ;;  %11536 = vmatpush3.bf16.msra.mxu0 %v4425_v35  ;;  %11570 = vmatpush3.bf16.msra.mxu1 %v4413_v55  ;;  %v17780_v35 = vld [vmem:[#allocation120_spill] sm:$0xff]  ;;  %v4364_v56 = vshrl.u32 %v3650_v41, 16  ;;  %v4377_v12 = vpack.i.b16 %v3750_v4, %v3700_v53  ;;  %v6079_v25 = vsub.f32 %v17784_v62, %v15091_v60  ;;  %v17795_v62 = vld [vmem:[#allocation81_spill] sm:$0xff] }
 0x2ba   : > { %5934 = vperm.xlu1 %11690, %v14835_v13   ;;  %v5865_v37 = vpop.permute.xlu1 %5864  ;;  %11537 = vmatprep.subr.bf16.mxu0 %v4409_v2  ;;  %v5588_v55 = vsub.f32 %v17780_v35, %v14638_v24  ;;  %v6166_v4 = vmul.f32 1.442695, %v6077_v1  ;;  %v4361_v60 = vpack.i.b16 %v3650_v41, %v3600_v0  ;;  %v5587_v39 = vsub.f32 %v17818_v38, %v14930_v57  ;;  %v17824_v38 = vld [vmem:[#allocation101_spill] sm:$0xff] }
 0x2bb   : > { %v15172_v52 = vpop.permute.xlu0 %5809  ;;  %11836 = vpow2.f32 %v6132_v63  ;;  %6940 = vperm.xlu0 %11691, %v15153_v21   ;;  %11571 = vmatprep.subr.bf16.mxu1 %v4397_v26  ;;  %v6078_v19 = vsub.f32 %v17782_v48, %v5865_v37  ;;  %v17787_v37 = vsub.f32 %v14748_v17, %v14770_v15 }
 0x2bc   : > { %v15183_v7 = vpop.eup %11818  ;;  %11838 = vpow2.f32 %v6138_v29  ;;  %v5700_v45 = vmul.f32 1.442695, %v5588_v55 }
 0x2bd   : > { %v15185_v59 = vpop.eup %11820  ;;  %11840 = vpow2.f32 %v5682_v30  ;;  %v7087_v22 = vpack.c.bf16 %v15169_v51, %v15183_v7  ;;  %11538 = vmatpush3.bf16.msra.mxu0 %v4409_v2  ;;  %11572 = vmatpush3.bf16.msra.mxu1 %v4397_v26  ;;  %v17783_v2 = vsub.f32 %v14710_v9, %v14737_v6  ;;  %v4365_v26 = vpack.i.b16 %v4364_v56, %v4363_v58  ;;  %v17789_v58 = vld [vmem:[#allocation135_spill] sm:$0xff] }
 0x2be   : > { %v15191_v24 = vpop.eup %11822  ;;  %6024 = vperm.xlu1 %11690, %v14858_v18   ;;  %v15195_v28 = vpop.permute.xlu1 %6705  ;;  %v7088_v43 = vpack.c.bf16 %v15185_v59, %v15178_v33  ;;  %11539 = vmatprep.subr.bf16.mxu0 %v4393_v8  ;;  %11842 = vpow2.f32 %v5704_v5  ;;  %v6168_v44 = vmul.f32 1.442695, %v6078_v19  ;;  %v6170_v30 = vmul.f32 1.442695, %v6079_v25  ;;  %v17796_v25 = vld [vmem:[#allocation139_spill] sm:$0xff] }
 0x2bf   : > { %v15199_v31 = vpop.permute.xlu0 %5799  ;;  %v15201_v47 = vpop.eup %11824  ;;  %11517 = vmatprep.mubr.bf16.mxu1 %v7087_v22  ;;  %5969 = vperm.xlu0 %11691, %v14930_v57   ;;  %v5678_v61 = vmul.f32 1.442695, %v17783_v2  ;;  %11844 = vpow2.f32 %v5700_v45  ;;  %v17793_v45 = vld [vmem:[#allocation121_spill] sm:$0xff] }
 0x2c0   : > { %v15204_v16 = vpop.eup %11826  ;;  %11518 = vmatmul.mubr.bf16.gmra.mxu1 %v7088_v43  ;;  %11573 = vmatprep.subr.bf16.mxu1 %v4381_v14 }
 0x2c1   : > { %v15211_v53 = vpop.eup %11828  ;;  %v7079_v29 = vpack.c.bf16 %v15204_v16, %v15191_v24  ;;  %11540 = vmatpush3.bf16.msra.mxu0 %v4393_v8  ;;  %11574 = vmatpush3.bf16.msra.mxu1 %v4381_v14  ;;  %11846 = vpow2.f32 %v5678_v61  ;;  %v5714_v8 = vmul.f32 1.442695, %v17787_v37  ;;  %v17788_v14 = vld [vmem:[#allocation75_spill] sm:$0xff] }
 0x2c2   : > { %6865 = vperm.xlu1 %11690, %v15145_v20   ;;  %v5855_v36 = vpop.permute.xlu1 %5854  ;;  %v7080_v6 = vpack.c.bf16 %v15201_v47, %v15211_v53  ;;  %11541 = vmatprep.subr.bf16.mxu0 %v4377_v12  ;;  %v15222_v63 = vpop.eup %11830  ;;  %11848 = vpow2.f32 %v6166_v4  ;;  %v17790_v56 = vsub.f32 %v17788_v14, %v17789_v58 }
 0x2c3   : > { %v15218_v9 = vpop.permute.xlu0 %5889  ;;  %v6076_v50 = vsub.f32 %v17785_v23, %v5855_v36  ;;  %11485 = vmatprep.mubr.bf16.mxu0 %v7079_v29  ;;  %5959 = vperm.xlu0 %11691, %v14953_v42   ;;  %17786 = vst [vmem:[#allocation82_spill] sm:$0xff] %v15222_v63  ;;  %v15227_v0 = vpop.eup %11832  ;;  %11850 = vpow2.f32 %v6168_v44  ;;  %v17798_v36 = vld [vmem:[#allocation128_spill] sm:$0xff]  ;;  %v17800_v23 = vld [vmem:[#allocation165_spill] sm:$0xff] }
 0x2c4   : > { %11486 = vmatmul.mubr.bf16.gmra.mxu0 %v7080_v6  ;;  %11575 = vmatprep.subr.bf16.mxu1 %v4365_v26  ;;  %v15234_v55 = vpop.eup %11834  ;;  %v5710_v3 = vmul.f32 1.442695, %v17790_v56  ;;  %v17799_v6 = vld [vmem:[#allocation127_spill] sm:$0xff] }
 0x2c5   : > { %v6164_v5 = vmul.f32 1.442695, %v6076_v50  ;;  %11542 = vmatpush3.bf16.msra.mxu0 %v4377_v12  ;;  %11576 = vmatpush3.bf16.msra.mxu1 %v4365_v26  ;;  %v17792_v12 = vld [vmem:[#allocation124_spill] sm:$0xff]  ;;  %v17797_v26 = vsub.f32 %v17795_v62, %v17796_v25  ;;  %v17806_v56 = vld [vmem:[#allocation39_spill] sm:$0xff] }
 0x2c6   : > { %6014 = vperm.xlu1 %11690, %v14883_v11   ;;  %v15230_v41 = vpop.permute.xlu1 %6785  ;;  %11543 = vmatprep.subr.bf16.mxu0 %v4361_v60  ;;  %v5578_v2 = vsub.f32 %v17793_v45, %v17792_v12 }
 0x2c7   : > { %v15232_v35 = vpop.permute.xlu0 %6730  ;;  %11852 = vpow2.f32 %v6164_v5  ;;  %6049 = vperm.xlu0 %11691, %v14974_v49   ;;  %v5690_v4 = vmul.f32 1.442695, %v17797_v26  ;;  %v17804_v5 = vld [vmem:[#allocation142_spill] sm:$0xff] }
 0x2c8   : > { %v15237_v17 = vpop.eup %11836  ;;  %11854 = vpow2.f32 %v6170_v30  ;;  %v5680_v30 = vmul.f32 1.442695, %v5578_v2 }
 0x2c9   : > { %v15239_v15 = vpop.eup %11838  ;;  %11856 = vpow2.f32 %v5714_v8  ;;  %v7081_v1 = vpack.c.bf16 %v15227_v0, %v15237_v17  ;;  %11544 = vmatpush3.bf16.msra.mxu0 %v4361_v60  ;;  %v5576_v60 = vsub.f32 %v17799_v6, %v17798_v36  ;;  %v17803_v8 = vld [vmem:[#allocation85_spill] sm:$0xff] }
 0x2ca   : > { %v15246_v22 = vpop.eup %11840  ;;  %6855 = vperm.xlu1 %11690, %v15222_v63   ;;  %v15249_v48 = vpop.permute.xlu1 %6775  ;;  %v7082_v19 = vpack.c.bf16 %v15239_v15, %v15234_v55  ;;  %11858 = vpow2.f32 %v5710_v3  ;;  %v17805_v14 = vsub.f32 %v17803_v8, %v17804_v5  ;;  %v6065_v3 = vsub.f32 %v17806_v56, %v15199_v31  ;;  %v17809_v31 = vld [vmem:[#allocation146_spill] sm:$0xff] }
 0x2cb   : > { %17791 = vst [vmem:[#allocation86_spill] sm:$0xff] %v15246_v22  ;;  %v15253_v43 = vpop.permute.xlu0 %5879  ;;  %11489 = vmatprep.mubr.bf16.mxu0 %v7081_v1  ;;  %6890 = vperm.xlu0 %11691, %v15246_v22   ;;  %v15258_v61 = vpop.eup %11842  ;;  %11860 = vpow2.f32 %v5690_v4  ;;  %v5676_v25 = vmul.f32 1.442695, %v5576_v60  ;;  %v17808_v4 = vld [vmem:[#allocation87_spill] sm:$0xff] }
 0x2cc   : > { %11490 = vmatmul.mubr.bf16.gmra.mxu0 %v7082_v19  ;;  %17794 = vst [vmem:[#allocation84_spill] sm:$0xff] %v15258_v61  ;;  %v15269_v50 = vpop.eup %11844  ;;  %v5686_v58 = vmul.f32 1.442695, %v17805_v14  ;;  %v17807_v19 = vld [vmem:[#allocation36_spill] sm:$0xff]  ;;  %11862 = vpow2.f32 %v5680_v30  ;;  %v17810_v36 = vsub.f32 %v17808_v4, %v17809_v31  ;;  %v6142_v14 = vmul.f32 1.442695, %v6065_v3 }
 0x2cd   : > { %17801 = vst [vmem:[#allocation27_spill] sm:$0xff] %v15269_v50 }
 0x2ce   : > { %6945 = vperm.xlu1 %11690, %v15258_v61   ;;  %v5805_v29 = vpop.permute.xlu1 %5804  ;;  %v15271_v37 = vpop.eup %11846  ;;  %v5722_v6 = vmul.f32 1.442695, %v17810_v36  ;;  %11864 = vpow2.f32 %v5686_v58  ;;  %v17815_v58 = vld [vmem:[#allocation129_spill] sm:$0xff] }
 0x2cf   : > { %v15264_v44 = vpop.permute.xlu0 %6720  ;;  %6039 = vperm.xlu0 %11691, %v17800_v23   ;;  %17802 = vst [vmem:[#allocation90_spill] sm:$0xff] %v15271_v37  ;;  %v15278_v1 = vpop.eup %11848  ;;  %v6066_v12 = vsub.f32 %v17807_v19, %v5805_v29  ;;  %v17811_v29 = vld [vmem:[#allocation38_spill] sm:$0xff]  ;;  %11866 = vpow2.f32 %v5676_v25  ;;  %v5594_v3 = vsub.f32 %v17815_v58, %v14740_v54  ;;  %v17827_v58 = vld [vmem:[#allocation37_spill] sm:$0xff] }
 0x2d0   : > { %v15286_v2 = vpop.eup %11850  ;;  %v6067_v8 = vsub.f32 %v17811_v29, %v15172_v52  ;;  %v17814_v52 = vld [vmem:[#allocation35_spill] sm:$0xff]  ;;  %11868 = vpow2.f32 %v5722_v6 }
 0x2d1   : > { %v6144_v19 = vmul.f32 1.442695, %v6066_v12  ;;  %v17816_v12 = vld [vmem:[#allocation91_spill] sm:$0xff]  ;;  %11870 = vpow2.f32 %v6142_v14  ;;  %v5712_v57 = vmul.f32 1.442695, %v5594_v3 }
 0x2d2   : > { %6935 = vperm.xlu1 %11690, %v15269_v50   ;;  %v15282_v45 = vpop.permute.xlu1 %6700  ;;  %v6146_v29 = vmul.f32 1.442695, %v6067_v8  ;;  %v17817_v22 = vsub.f32 %v17816_v12, %v14905_v27  ;;  %v17823_v8 = vld [vmem:[#allocation76_spill] sm:$0xff]  ;;  %v5698_v14 = vmul.f32 1.442695, %v5587_v39  ;;  %v17830_v39 = vld [vmem:[#allocation43_spill] sm:$0xff] }
 0x2d3   : > { %v15284_v62 = vpop.permute.xlu0 %6810  ;;  %6880 = vperm.xlu0 %11691, %v15271_v37   ;;  %v17813_v37 = vld [vmem:[#allocation150_spill] sm:$0xff]  ;;  %11872 = vpow2.f32 %v6144_v19  ;;  %v5582_v27 = vsub.f32 %v17823_v8, %v14806_v34 }
 0x2d4   : > { %v15289_v26 = vpop.eup %11852  ;;  %v5718_v21 = vmul.f32 1.442695, %v17817_v22  ;;  %v5585_v22 = vsub.f32 %v17824_v38, %v14953_v42 }
 0x2d5   : > { %v15296_v5 = vpop.eup %11854  ;;  %v7089_v56 = vpack.c.bf16 %v15278_v1, %v15289_v26  ;;  %v5688_v3 = vmul.f32 1.442695, %v5582_v27 }
 0x2d6   : > { %v15300_v60 = vpop.eup %11856  ;;  %5964 = vperm.xlu1 %11690, %v17813_v37   ;;  %v5795_v30 = vpop.permute.xlu1 %5794  ;;  %v7090_v4 = vpack.c.bf16 %v15296_v5, %v15286_v2  ;;  %v5694_v42 = vmul.f32 1.442695, %v5585_v22 }
 0x2d7   : > { %17812 = vst [vmem:[#allocation89_spill] sm:$0xff] %v15300_v60  ;;  %v15305_v31 = vpop.permute.xlu0 %6800  ;;  %v6064_v36 = vsub.f32 %v17814_v52, %v5795_v30  ;;  %11521 = vmatprep.mubr.bf16.mxu1 %v7089_v56  ;;  %6970 = vperm.xlu0 %11691, %v15300_v60   ;;  %v15316_v46 = vpop.eup %11858  ;;  %v17820_v56 = vld [vmem:[#allocation132_spill] sm:$0xff]  ;;  %v17821_v52 = vld [vmem:[#allocation155_spill] sm:$0xff] }
 0x2d8   : > { %11522 = vmatmul.mubr.bf16.gmra.mxu1 %v7090_v4  ;;  %17819 = vst [vmem:[#allocation93_spill] sm:$0xff] %v15316_v46  ;;  %v5592_v30 = vsub.f32 %v17820_v56, %v14773_v10  ;;  %v17825_v10 = vld [vmem:[#allocation45_spill] sm:$0xff]  ;;  %v15330_v4 = vpop.eup %11860  ;;  %v17828_v56 = vld [vmem:[#allocation159_spill] sm:$0xff] }
 0x2d9   : > { %v6140_v25 = vmul.f32 1.442695, %v6064_v36  ;;  %v6081_v19 = vsub.f32 %v17825_v10, %v15253_v43  ;;  %17826 = vst [vmem:[#allocation22_spill] sm:$0xff] %v15330_v4  ;;  %v15341_v43 = vpop.eup %11862 }
 0x2da   : > { %5954 = vperm.xlu1 %11690, %v17821_v52   ;;  %v5885_v54 = vpop.permute.xlu1 %5884  ;;  %v5708_v36 = vmul.f32 1.442695, %v5592_v30  ;;  %17831 = vst [vmem:[#allocation20_spill] sm:$0xff] %v15341_v43 }
 0x2db   : > { %v15321_v6 = vpop.permute.xlu0 %6750  ;;  %11874 = vpow2.f32 %v6140_v25  ;;  %6960 = vperm.xlu0 %11691, %v15316_v46   ;;  %v6082_v12 = vsub.f32 %v17827_v58, %v5885_v54  ;;  %v6174_v54 = vmul.f32 1.442695, %v6081_v19  ;;  %v15345_v8 = vpop.eup %11864 }
 0x2dc   : > { %17822 = vst [vmem:[#allocation92_spill] sm:$0xff] %v15321_v6  ;;  %11876 = vpow2.f32 %v6146_v29  ;;  %v17832_v29 = vld [vmem:[#allocation160_spill] sm:$0xff]  ;;  %17833 = vst [vmem:[#allocation95_spill] sm:$0xff] %v15345_v8 }
 0x2dd   : > { %11878 = vpow2.f32 %v5718_v21  ;;  %v6083_v21 = vsub.f32 %v17830_v39, %v15218_v9  ;;  %v5603_v30 = vsub.f32 %v17832_v29, %v14974_v49  ;;  %v6176_v38 = vmul.f32 1.442695, %v6082_v12  ;;  %v15352_v9 = vpop.eup %11866  ;;  %v17839_v12 = vld [vmem:[#allocation107_spill] sm:$0xff] }
 0x2de   : > { %6044 = vperm.xlu1 %11690, %v17828_v56   ;;  %v15334_v34 = vpop.permute.xlu1 %6725  ;;  %11880 = vpow2.f32 %v5712_v57  ;;  %v17835_v57 = vld [vmem:[#allocation41_spill] sm:$0xff]  ;;  %17836 = vst [vmem:[#allocation98_spill] sm:$0xff] %v15352_v9  ;;  %v15356_v58 = vpop.eup %11868  ;;  %v5601_v39 = vsub.f32 %v17839_v12, %v17800_v23  ;;  %v17842_v23 = vld [vmem:[#allocation140_spill] sm:$0xff] }
 0x2df   : > { %v15336_v25 = vpop.permute.xlu0 %6740  ;;  %6910 = vperm.xlu0 %11691, %v15330_v4   ;;  %11882 = vpow2.f32 %v5698_v14  ;;  %v17837_v14 = vld [vmem:[#allocation136_spill] sm:$0xff]  ;;  %v6178_v19 = vmul.f32 1.442695, %v6083_v21  ;;  %17838 = vst [vmem:[#allocation96_spill] sm:$0xff] %v15356_v58 }
 0x2e0   : > { %17829 = vst [vmem:[#allocation24_spill] sm:$0xff] %v15336_v25  ;;  %11884 = vpow2.f32 %v5708_v36  ;;  %v5580_v49 = vsub.f32 %v17837_v14, %v14835_v13  ;;  %v5730_v36 = vmul.f32 1.442695, %v5603_v30  ;;  %v5598_v30 = vsub.f32 %v17842_v23, %v14858_v18  ;;  %v17878_v25 = vld [vmem:[#allocation51_spill] sm:$0xff] }
 0x2e1   : > { %11886 = vpow2.f32 %v5688_v3  ;;  %v15360_v3 = vpop.eup %11870 }
 0x2e2   : > { %6885 = vperm.xlu1 %11690, %v15341_v43   ;;  %v5875_v27 = vpop.permute.xlu1 %5874  ;;  %11888 = vpow2.f32 %v5694_v42  ;;  %v15367_v13 = vpop.eup %11872  ;;  %v5684_v21 = vmul.f32 1.442695, %v5580_v49  ;;  %v5720_v18 = vmul.f32 1.442695, %v5598_v30  ;;  %v17851_v30 = vld [vmem:[#allocation147_spill] sm:$0xff] }
 0x2e3   : > { %v15348_v10 = vpop.permute.xlu0 %6830  ;;  %v6080_v22 = vsub.f32 %v17835_v57, %v5875_v27  ;;  %6900 = vperm.xlu0 %11691, %v15345_v8   ;;  %11890 = vpow2.f32 %v6174_v54  ;;  %v17840_v27 = vld [vmem:[#allocation163_spill] sm:$0xff] }
 0x2e4   : > { %17834 = vst [vmem:[#allocation94_spill] sm:$0xff] %v15348_v10  ;;  %11892 = vpow2.f32 %v6176_v38  ;;  %v5726_v38 = vmul.f32 1.442695, %v5601_v39 }
 0x2e5   : > { %v6172_v29 = vmul.f32 1.442695, %v6080_v22 }
 0x2e6   : > { %6034 = vperm.xlu1 %11690, %v17840_v27   ;;  %v15363_v57 = vpop.permute.xlu1 %6715 }
 0x2e7   : > { %v15365_v8 = vpop.permute.xlu0 %6820  ;;  %11894 = vpow2.f32 %v6172_v29  ;;  %6990 = vperm.xlu0 %11691, %v15356_v58  }
 0x2e8   : > { %17841 = vst [vmem:[#allocation21_spill] sm:$0xff] %v15365_v8  ;;  %v15370_v42 = vpop.eup %11874  ;;  %11896 = vpow2.f32 %v6178_v19  ;;  %v17845_v19 = vld [vmem:[#allocation144_spill] sm:$0xff] }
 0x2e9   : > { %v15374_v54 = vpop.eup %11876  ;;  %11898 = vpow2.f32 %v5730_v36  ;;  %v7083_v22 = vpack.c.bf16 %v15360_v3, %v15370_v42  ;;  %v5596_v36 = vsub.f32 %v17845_v19, %v14883_v11 }
 0x2ea   : > { %v15378_v14 = vpop.eup %11878  ;;  %6875 = vperm.xlu1 %11690, %v15352_v9   ;;  %v15381_v12 = vpop.permute.xlu1 %6805  ;;  %v7084_v49 = vpack.c.bf16 %v15374_v54, %v15367_v13  ;;  %11900 = vpow2.f32 %v5684_v21 }
 0x2eb   : > { %17843 = vst [vmem:[#allocation25_spill] sm:$0xff] %v15378_v14  ;;  %v15385_v29 = vpop.permute.xlu0 %6770  ;;  %11493 = vmatprep.mubr.bf16.mxu0 %v7083_v22  ;;  %6980 = vperm.xlu0 %11691, %v15378_v14   ;;  %v15390_v39 = vpop.eup %11880  ;;  %11902 = vpow2.f32 %v5726_v38  ;;  %v5716_v11 = vmul.f32 1.442695, %v5596_v36 }
 0x2ec   : > { %17844 = vst [vmem:[#allocation19_spill] sm:$0xff] %v15385_v29  ;;  %11494 = vmatmul.mubr.bf16.gmra.mxu0 %v7084_v49  ;;  %17846 = vst [vmem:[#allocation100_spill] sm:$0xff] %v15390_v39  ;;  %v15392_v23 = vpop.eup %11882  ;;  %11904 = vpow2.f32 %v5720_v18  ;;  %v5586_v49 = vsub.f32 %v17851_v30, %v17813_v37  ;;  %v17854_v37 = vld [vmem:[#allocation152_spill] sm:$0xff] }
 0x2ed   : > { %17847 = vst [vmem:[#allocation99_spill] sm:$0xff] %v15392_v23  ;;  %v15399_v22 = vpop.eup %11884  ;;  %11906 = vpow2.f32 %v5716_v11  ;;  %v5584_v36 = vsub.f32 %v17854_v37, %v17821_v52  ;;  %v17858_v11 = vld [vmem:[#allocation156_spill] sm:$0xff] }
 0x2ee   : > { %6965 = vperm.xlu1 %11690, %v15390_v39   ;;  %v15395_v58 = vpop.permute.xlu1 %6795  ;;  %17849 = vst [vmem:[#allocation103_spill] sm:$0xff] %v15399_v22  ;;  %v15402_v21 = vpop.eup %11886  ;;  %v5696_v18 = vmul.f32 1.442695, %v5586_v49  ;;  %v5602_v49 = vsub.f32 %v17858_v11, %v17828_v56 }
 0x2ef   : > { %v15397_v4 = vpop.permute.xlu0 %6760  ;;  %6930 = vperm.xlu0 %11691, %v15392_v23   ;;  %17850 = vst [vmem:[#allocation23_spill] sm:$0xff] %v15402_v21  ;;  %v15406_v38 = vpop.eup %11888  ;;  %v5692_v52 = vmul.f32 1.442695, %v5584_v36 }
 0x2f0   : > { %17848 = vst [vmem:[#allocation104_spill] sm:$0xff] %v15397_v4  ;;  %17852 = vst [vmem:[#allocation114_spill] sm:$0xff] %v15406_v38  ;;  %v15408_v19 = vpop.eup %11890  ;;  %11908 = vpow2.f32 %v5696_v18  ;;  %v17862_v18 = vld [vmem:[#allocation161_spill] sm:$0xff] }
 0x2f1   : > { %v15415_v60 = vpop.eup %11892  ;;  %11910 = vpow2.f32 %v5692_v52  ;;  %v5600_v36 = vsub.f32 %v17862_v18, %v17840_v27 }
 0x2f2   : > { %6955 = vperm.xlu1 %11690, %v15399_v22   ;;  %v15411_v14 = vpop.permute.xlu1 %6745 }
 0x2f3   : > { %v15413_v46 = vpop.permute.xlu0 %6850  ;;  %6920 = vperm.xlu0 %11691, %v15406_v38   ;;  %v5724_v11 = vmul.f32 1.442695, %v5600_v36 }
 0x2f4   : > { %17853 = vst [vmem:[#allocation109_spill] sm:$0xff] %v15413_v46  ;;  %v15418_v23 = vpop.eup %11894 }
 0x2f5   : > { %v15422_v30 = vpop.eup %11896  ;;  %v7091_v22 = vpack.c.bf16 %v15408_v19, %v15418_v23 }
 0x2f6   : > { %v15426_v39 = vpop.eup %11898  ;;  %6905 = vperm.xlu1 %11690, %v15402_v21   ;;  %v15429_v9 = vpop.permute.xlu1 %6735  ;;  %v7092_v38 = vpack.c.bf16 %v15422_v30, %v15415_v60 }
 0x2f7   : > { %17855 = vst [vmem:[#allocation108_spill] sm:$0xff] %v15426_v39  ;;  %17856 = vst [vmem:[#allocation30_spill] sm:$0xff] %v15429_v9  ;;  %v15433_v43 = vpop.permute.xlu0 %6840  ;;  %11525 = vmatprep.mubr.bf16.mxu1 %v7091_v22  ;;  %7010 = vperm.xlu0 %11691, %v15426_v39   ;;  %v15438_v37 = vpop.eup %11900  ;;  %v5728_v22 = vmul.f32 1.442695, %v5602_v49  ;;  %v17879_v9 = vld [vmem:[#allocation12_spill] sm:$0xff] }
 0x2f8   : > { %17857 = vst [vmem:[#allocation115_spill] sm:$0xff] %v15433_v43  ;;  %11526 = vmatmul.mubr.bf16.gmra.mxu1 %v7092_v38  ;;  %17859 = vst [vmem:[#allocation111_spill] sm:$0xff] %v15438_v37  ;;  %v15440_v50 = vpop.eup %11902 }
 0x2f9   : > { %17860 = vst [vmem:[#allocation26_spill] sm:$0xff] %v15440_v50  ;;  %v15448_v39 = vpop.eup %11904  ;;  %11912 = vpow2.f32 %v5728_v22 }
 0x2fa   : > { %6895 = vperm.xlu1 %11690, %v15438_v37   ;;  %v15443_v21 = vpop.permute.xlu1 %6825  ;;  %17863 = vst [vmem:[#allocation29_spill] sm:$0xff] %v15448_v39  ;;  %v15453_v37 = vpop.eup %11906  ;;  %11914 = vpow2.f32 %v5724_v11 }
 0x2fb   : > { %17861 = vst [vmem:[#allocation28_spill] sm:$0xff] %v15443_v21  ;;  %v5910_v61 = vpop.permute.xlu0 %5909  ;;  %7000 = vperm.xlu0 %11691, %v15440_v50   ;;  %17865 = vst [vmem:[#allocation120_spill] sm:$0xff] %v15453_v37 }
 0x2fd   : > { %v15458_v49 = vpop.eup %11908 }
 0x2fe   : > { %6985 = vperm.xlu1 %11690, %v15448_v39   ;;  %v15451_v56 = vpop.permute.xlu1 %6815  ;;  %17867 = vst [vmem:[#allocation31_spill] sm:$0xff] %v15458_v49  ;;  %v15463_v50 = vpop.eup %11910 }
 0x2ff   : > { %17864 = vst [vmem:[#allocation126_spill] sm:$0xff] %v15451_v56  ;;  %v5900_v38 = vpop.permute.xlu0 %5899  ;;  %17869 = vst [vmem:[#allocation33_spill] sm:$0xff] %v15463_v50  ;;  %v17877_v56 = vld [vmem:[#allocation42_spill] sm:$0xff] }
 0x302   : > { %6975 = vperm.xlu1 %11690, %v15453_v37   ;;  %v15456_v63 = vpop.permute.xlu1 %6765 }
 0x303   : > { %17866 = vst [vmem:[#allocation34_spill] sm:$0xff] %v15456_v63  ;;  %v5990_v52 = vpop.permute.xlu0 %5989 }
 0x306   : > { %6925 = vperm.xlu1 %11690, %v15458_v49   ;;  %v15461_v27 = vpop.permute.xlu1 %6755  ;;  %v15468_v39 = vpop.eup %11912  ;;  %v17874_v49 = vld [vmem:[#allocation48_spill] sm:$0xff] }
 0x307   : > { %17868 = vst [vmem:[#allocation32_spill] sm:$0xff] %v15461_v27  ;;  %v5980_v18 = vpop.permute.xlu0 %5979  ;;  %17871 = vst [vmem:[#allocation135_spill] sm:$0xff] %v15468_v39  ;;  %v15473_v20 = vpop.eup %11914  ;;  %v6085_v43 = vsub.f32 %v17874_v49, %v5900_v38 }
 0x308   : > { %17873 = vst [vmem:[#allocation121_spill] sm:$0xff] %v15473_v20  ;;  %v6101_v6 = vsub.f32 %v17878_v25, %v5980_v18  ;;  %v17883_v25 = vld [vmem:[#allocation46_spill] sm:$0xff] }
 0x309   : > { %v6182_v63 = vmul.f32 1.442695, %v6085_v43 }
 0x30a   : > { %6915 = vperm.xlu1 %11690, %v15463_v50   ;;  %v15466_v22 = vpop.permute.xlu1 %6845  ;;  %v17875_v50 = vld [vmem:[#allocation40_spill] sm:$0xff] }
 0x30b   : > { %17870 = vst [vmem:[#allocation75_spill] sm:$0xff] %v15466_v22  ;;  %v5930_v36 = vpop.permute.xlu0 %5929  ;;  %v17876_v22 = vld [vmem:[#allocation44_spill] sm:$0xff]  ;;  %11916 = vpow2.f32 %v6182_v63  ;;  %v17882_v63 = vld [vmem:[#allocation11_spill] sm:$0xff] }
 0x30c   : > { %v6087_v27 = vsub.f32 %v17876_v22, %v5910_v61 }
 0x30e   : > { %7005 = vperm.xlu1 %11690, %v15468_v39   ;;  %v15471_v37 = vpop.permute.xlu1 %6835  ;;  %v6186_v21 = vmul.f32 1.442695, %v6087_v27  ;;  %v17884_v27 = vld [vmem:[#allocation55_spill] sm:$0xff] }
 0x30f   : > { %17872 = vst [vmem:[#allocation124_spill] sm:$0xff] %v15471_v37  ;;  %v5920_v11 = vpop.permute.xlu0 %5919 }
 0x310   : > { %v6089_v18 = vsub.f32 %v17884_v27, %v5920_v11  ;;  %v17889_v11 = vld [vmem:[#allocation16_spill] sm:$0xff] }
 0x312   : > { %6995 = vperm.xlu1 %11690, %v15473_v20   ;;  %v5905_v46 = vpop.permute.xlu1 %5904 }
 0x313   : > { %v15477_v4 = vpop.permute.xlu0 %6009  ;;  %v6086_v29 = vsub.f32 %v17875_v50, %v5905_v46  ;;  %v17880_v46 = vld [vmem:[#allocation47_spill] sm:$0xff]  ;;  %v17881_v50 = vld [vmem:[#allocation49_spill] sm:$0xff] }
 0x314   : > { %v6103_v43 = vsub.f32 %v17881_v50, %v5990_v52  ;;  %v6190_v50 = vmul.f32 1.442695, %v6089_v18 }
 0x315   : > { %v6184_v8 = vmul.f32 1.442695, %v6086_v29  ;;  %v6214_v29 = vmul.f32 1.442695, %v6101_v6  ;;  %v17886_v6 = vld [vmem:[#allocation50_spill] sm:$0xff] }
 0x316   : > { %v5895_v10 = vpop.permute.xlu1 %5894 }
 0x317   : > { %v6000_v39 = vpop.permute.xlu0 %5999  ;;  %v6084_v37 = vsub.f32 %v17877_v56, %v5895_v10  ;;  %11918 = vpow2.f32 %v6184_v8 }
 0x319   : > { %v6180_v38 = vmul.f32 1.442695, %v6084_v37  ;;  %v6218_v37 = vmul.f32 1.442695, %v6103_v43 }
 0x31a   : > { %v5985_v49 = vpop.permute.xlu1 %5984  ;;  %6376 = vadd.xlane.f32.xlu0 %v17879_v9 }
 0x31b   : > { %v15483_v20 = vpop.permute.xlu0 %5949  ;;  %11920 = vpow2.f32 %v6180_v38  ;;  %v6102_v61 = vsub.f32 %v17880_v46, %v5985_v49  ;;  %v17887_v46 = vld [vmem:[#allocation53_spill] sm:$0xff] }
 0x31c   : > { %11922 = vpow2.f32 %v6186_v21  ;;  %v17885_v21 = vld [vmem:[#allocation17_spill] sm:$0xff] }
 0x31d   : > { %v6216_v22 = vmul.f32 1.442695, %v6102_v61  ;;  %11924 = vpow2.f32 %v6214_v29  ;;  %v6091_v61 = vsub.f32 %v17887_v46, %v5930_v36  ;;  %v17891_v36 = vld [vmem:[#allocation59_spill] sm:$0xff] }
 0x31e   : > { %v5975_v10 = vpop.permute.xlu1 %5974  ;;  %6408 = vadd.xlane.f32.xlu0 %v17882_v63  ;;  %v15498_v63 = vpop.eup %11916 }
 0x31f   : > { %v15488_v56 = vpop.permute.xlu0 %5939  ;;  %v6100_v8 = vsub.f32 %v17883_v25, %v5975_v10  ;;  %11926 = vpow2.f32 %v6216_v22  ;;  %v17890_v25 = vld [vmem:[#allocation52_spill] sm:$0xff] }
 0x321   : > { %v6212_v9 = vmul.f32 1.442695, %v6100_v8 }
 0x322   : > { %v5925_v38 = vpop.permute.xlu1 %5924  ;;  %6404 = vadd.xlane.f32.xlu0 %v17885_v21 }
 0x323   : > { %v15493_v49 = vpop.permute.xlu0 %6029  ;;  %11928 = vpow2.f32 %v6212_v9  ;;  %v6090_v52 = vsub.f32 %v17886_v6, %v5925_v38  ;;  %v6194_v9 = vmul.f32 1.442695, %v6091_v61  ;;  %v17892_v61 = vld [vmem:[#allocation54_spill] sm:$0xff] }
 0x324   : > { %11930 = vpow2.f32 %v6218_v37  ;;  %v15503_v22 = vpop.eup %11918  ;;  %v6105_v37 = vsub.f32 %v17891_v36, %v6000_v39  ;;  %v17893_v39 = vld [vmem:[#allocation57_spill] sm:$0xff] }
 0x325   : > { %v6192_v43 = vmul.f32 1.442695, %v6090_v52  ;;  %11932 = vpow2.f32 %v6190_v50  ;;  %v6107_v50 = vsub.f32 %v17893_v39, %v15477_v4  ;;  %v17896_v4 = vld [vmem:[#allocation63_spill] sm:$0xff] }
 0x326   : > { %v5915_v29 = vpop.permute.xlu1 %5914  ;;  %6374 = vadd.xlane.f32.xlu0 %v17889_v11  ;;  %v6222_v11 = vmul.f32 1.442695, %v6105_v37  ;;  %v6093_v37 = vsub.f32 %v17896_v4, %v15488_v56 }
 0x327   : > { %v15500_v10 = vpop.permute.xlu0 %6870  ;;  %v6088_v8 = vsub.f32 %v17890_v25, %v5915_v29  ;;  %11934 = vpow2.f32 %v6192_v43 }
 0x328   : > { %17888 = vst [vmem:[#allocation81_spill] sm:$0xff] %v15500_v10  ;;  %v15506_v27 = vpop.eup %11920  ;;  %v17894_v10 = vld [vmem:[#allocation56_spill] sm:$0xff]  ;;  %v6198_v56 = vmul.f32 1.442695, %v6093_v37 }
 0x329   : > { %v15508_v38 = vpop.eup %11922  ;;  %v6188_v18 = vmul.f32 1.442695, %v6088_v8  ;;  %v7093_v21 = vpack.c.bf16 %v15498_v63, %v15506_v27 }
 0x32a   : > { %v6005_v6 = vpop.permute.xlu1 %6004  ;;  %v7094_v52 = vpack.c.bf16 %v15508_v38, %v15503_v22  ;;  %6384 = vadd.xlane.f32.xlu0 %v15211_v53  ;;  %v15521_v25 = vpop.eup %11924 }
 0x32b   : > { %v15515_v46 = vpop.permute.xlu0 %6019  ;;  %11936 = vpow2.f32 %v6188_v18  ;;  %v6106_v29 = vsub.f32 %v17892_v61, %v6005_v6  ;;  %11545 = vmatprep.mubr.bf16.mxu0 %v7093_v21  ;;  %v6226_v6 = vmul.f32 1.442695, %v6107_v50  ;;  %v17898_v50 = vld [vmem:[#allocation61_spill] sm:$0xff] }
 0x32c   : > { %11938 = vpow2.f32 %v6194_v9  ;;  %11546 = vmatmul.mubr.bf16.vlgmr.msra.gmra.mxu0 %v7094_v52  ;;  %v15524_v36 = vpop.eup %11926 }
 0x32d   : > { %v6224_v43 = vmul.f32 1.442695, %v6106_v29  ;;  %11940 = vpow2.f32 %v6222_v11  ;;  %v17897_v29 = vld [vmem:[#allocation58_spill] sm:$0xff]  ;;  %v6095_v11 = vsub.f32 %v17898_v50, %v15483_v20 }
 0x32e   : > { %v5995_v8 = vpop.permute.xlu1 %5994  ;;  %6380 = vadd.xlane.f32.xlu0 %v15191_v24 }
 0x32f   : > { %v6104_v53 = vsub.f32 %v17894_v10, %v5995_v8  ;;  %v15529_v21 = vpop.permute.xlu0 %6860  ;;  %11942 = vpow2.f32 %v6224_v43  ;;  %v17899_v43 = vld [vmem:[#allocation14_spill] sm:$0xff] }
 0x330   : > { %v15527_v18 = vpop.eup %11928  ;;  %17895 = vst [vmem:[#allocation139_spill] sm:$0xff] %v15529_v21 }
 0x331   : > { %v15531_v9 = vpop.eup %11930  ;;  %v6220_v52 = vmul.f32 1.442695, %v6104_v53  ;;  %v7101_v61 = vpack.c.bf16 %v15521_v25, %v15527_v18 }
 0x332   : > { %v5945_v24 = vpop.permute.xlu1 %5944  ;;  %v7102_v10 = vpack.c.bf16 %v15531_v9, %v15524_v36  ;;  %6416 = vadd.xlane.f32.xlu0 %v15178_v33  ;;  %v15543_v8 = vpop.eup %11932 }
 0x333   : > { %11944 = vpow2.f32 %v6220_v52  ;;  %v6094_v39 = vsub.f32 %v17897_v29, %v5945_v24  ;;  %11577 = vmatprep.mubr.bf16.mxu1 %v7101_v61  ;;  %v15546_v21 = vpop.permute.xlu0 %6950  ;;  %v17901_v52 = vld [vmem:[#allocation60_spill] sm:$0xff]  ;;  %v6202_v24 = vmul.f32 1.442695, %v6095_v11  ;;  %v17902_v29 = vld [vmem:[#allocation13_spill] sm:$0xff]  ;;  %v17904_v11 = vld [vmem:[#allocation67_spill] sm:$0xff] }
 0x334   : > { %11946 = vpow2.f32 %v6226_v6  ;;  %11578 = vmatmul.mubr.bf16.vlgmr.msra.gmra.mxu1 %v7102_v10  ;;  %17900 = vst [vmem:[#allocation128_spill] sm:$0xff] %v15546_v21  ;;  %v15549_v33 = vpop.eup %11934 }
 0x335   : > { %v6200_v53 = vmul.f32 1.442695, %v6094_v39  ;;  %11948 = vpow2.f32 %v6198_v56  ;;  %v6109_v56 = vsub.f32 %v17904_v11, %v15515_v46 }
 0x336   : > { %6372 = vadd.xlane.f32.xlu1 %v17899_v43  ;;  %v5935_v4 = vpop.permute.xlu1 %5934  ;;  %6412 = vadd.xlane.f32.xlu0 %v15183_v7 }
 0x337   : > { %v6092_v61 = vsub.f32 %v17901_v52, %v5935_v4  ;;  %11950 = vpow2.f32 %v6200_v53  ;;  %v15562_v50 = vpop.permute.xlu0 %6940  ;;  %v17905_v53 = vld [vmem:[#allocation62_spill] sm:$0xff]  ;;  %v17906_v52 = vld [vmem:[#allocation79_spill] sm:$0xff]  ;;  %v6230_v46 = vmul.f32 1.442695, %v6109_v56 }
 0x338   : > { %v15552_v6 = vpop.eup %11936  ;;  %17903 = vst [vmem:[#allocation127_spill] sm:$0xff] %v15562_v50  ;;  %v17909_v50 = vld [vmem:[#allocation64_spill] sm:$0xff] }
 0x339   : > { %v15554_v20 = vpop.eup %11938  ;;  %v6196_v37 = vmul.f32 1.442695, %v6092_v61  ;;  %v7095_v10 = vpack.c.bf16 %v15543_v8, %v15552_v6 }
 0x33a   : > { %6378 = vadd.xlane.f32.xlu1 %v17902_v29  ;;  %v6025_v39 = vpop.permute.xlu1 %6024  ;;  %v7096_v7 = vpack.c.bf16 %v15554_v20, %v15549_v33  ;;  %6392 = vadd.xlane.f32.xlu0 %v15234_v55  ;;  %v15566_v43 = vpop.eup %11940 }
 0x33b   : > { %11952 = vpow2.f32 %v6196_v37  ;;  %11549 = vmatprep.mubr.bf16.mxu0 %v7095_v10  ;;  %v6110_v4 = vsub.f32 %v17905_v53, %v6025_v39  ;;  %v5970_v11 = vpop.permute.xlu0 %5969  ;;  %v17908_v53 = vld [vmem:[#allocation15_spill] sm:$0xff] }
 0x33c   : > { %11954 = vpow2.f32 %v6202_v24  ;;  %11550 = vmatmul.mubr.bf16.gmra.mxu0 %v7096_v7  ;;  %v15573_v55 = vpop.eup %11942  ;;  %v17907_v24 = vld [vmem:[#allocation65_spill] sm:$0xff] }
 0x33d   : > { %v6111_v10 = vsub.f32 %v17907_v24, %v15493_v49  ;;  %v6232_v39 = vmul.f32 1.442695, %v6110_v4  ;;  %11956 = vpow2.f32 %v6230_v46 }
 0x33e   : > { %6410 = vadd.xlane.f32.xlu1 %v17906_v52  ;;  %v15570_v61 = vpop.permute.xlu1 %6865  ;;  %6388 = vadd.xlane.f32.xlu0 %v15237_v17 }
 0x33f   : > { %v6234_v49 = vmul.f32 1.442695, %v6111_v10  ;;  %11958 = vpow2.f32 %v6232_v39  ;;  %v17913_v39 = vld [vmem:[#allocation71_spill] sm:$0xff] }
 0x340   : > { %v15575_v37 = vpop.eup %11944 }
 0x341   : > { %v15579_v29 = vpop.eup %11946  ;;  %v7103_v7 = vpack.c.bf16 %v15566_v43, %v15575_v37 }
 0x342   : > { %6406 = vadd.xlane.f32.xlu1 %v17908_v53  ;;  %v6015_v52 = vpop.permute.xlu1 %6014  ;;  %v7104_v17 = vpack.c.bf16 %v15579_v29, %v15573_v55  ;;  %6424 = vadd.xlane.f32.xlu0 %v15286_v2  ;;  %v15588_v24 = vpop.eup %11948 }
 0x343   : > { %v6108_v21 = vsub.f32 %v17909_v50, %v6015_v52  ;;  %11581 = vmatprep.mubr.bf16.mxu1 %v7103_v7  ;;  %v5960_v50 = vpop.permute.xlu0 %5959 }
 0x344   : > { %11582 = vmatmul.mubr.bf16.gmra.mxu1 %v7104_v17  ;;  %v15594_v53 = vpop.eup %11950  ;;  %v6097_v52 = vsub.f32 %v17913_v39, %v5960_v50 }
 0x345   : > { %v6228_v56 = vmul.f32 1.442695, %v6108_v21 }
 0x346   : > { %6386 = vadd.xlane.f32.xlu1 %v15201_v47  ;;  %v15591_v4 = vpop.permute.xlu1 %6855  ;;  %6420 = vadd.xlane.f32.xlu0 %v15289_v26  ;;  %v6206_v50 = vmul.f32 1.442695, %v6097_v52 }
 0x347   : > { %17910 = vst [vmem:[#allocation165_spill] sm:$0xff] %v15591_v4  ;;  %11960 = vpow2.f32 %v6228_v56  ;;  %v6050_v26 = vpop.permute.xlu0 %6049  ;;  %v17919_v4 = vld [vmem:[#allocation70_spill] sm:$0xff] }
 0x348   : > { %v15596_v2 = vpop.eup %11952  ;;  %11962 = vpow2.f32 %v6234_v49 }
 0x349   : > { %v15598_v10 = vpop.eup %11954  ;;  %v7097_v21 = vpack.c.bf16 %v15588_v24, %v15596_v2  ;;  %11964 = vpow2.f32 %v6206_v50 }
 0x34a   : > { %6382 = vadd.xlane.f32.xlu1 %v15204_v16  ;;  %v15603_v46 = vpop.permute.xlu1 %6945  ;;  %v7098_v47 = vpack.c.bf16 %v15598_v10, %v15594_v53  ;;  %6400 = vadd.xlane.f32.xlu0 %v15367_v13  ;;  %v15613_v17 = vpop.eup %11956  ;;  %v17914_v13 = vld [vmem:[#allocation66_spill] sm:$0xff] }
 0x34b   : > { %17911 = vst [vmem:[#allocation85_spill] sm:$0xff] %v15603_v46  ;;  %11553 = vmatprep.mubr.bf16.mxu0 %v7097_v21 }
 0x34c   : > { %11554 = vmatmul.mubr.bf16.gmra.mxu0 %v7098_v47  ;;  %v15617_v49 = vpop.eup %11958 }
 0x34e   : > { %6418 = vadd.xlane.f32.xlu1 %v15185_v59  ;;  %v15609_v7 = vpop.permute.xlu1 %6935  ;;  %6396 = vadd.xlane.f32.xlu0 %v15370_v42  ;;  %v17915_v59 = vld [vmem:[#allocation69_spill] sm:$0xff] }
 0x34f   : > { %17912 = vst [vmem:[#allocation142_spill] sm:$0xff] %v15609_v7  ;;  %v6099_v47 = vsub.f32 %v17915_v59, %v5970_v11  ;;  %v15623_v7 = vpop.permute.xlu0 %6890 }
 0x350   : > { %17916 = vst [vmem:[#allocation39_spill] sm:$0xff] %v15623_v7 }
 0x351   : > { %v6210_v11 = vmul.f32 1.442695, %v6099_v47 }
 0x352   : > { %6414 = vadd.xlane.f32.xlu1 %v15169_v51  ;;  %v5965_v16 = vpop.permute.xlu1 %5964  ;;  %6432 = vadd.xlane.f32.xlu0 %v15415_v60 }
 0x353   : > { %v6098_v56 = vsub.f32 %v17914_v13, %v5965_v16  ;;  %v17917_v16 = vld [vmem:[#allocation68_spill] sm:$0xff]  ;;  %v6040_v52 = vpop.permute.xlu0 %6039 }
 0x354   : > { %v15620_v21 = vpop.eup %11960 }
 0x355   : > { %v15625_v42 = vpop.eup %11962  ;;  %v7105_v39 = vpack.c.bf16 %v15613_v17, %v15620_v21  ;;  %v6208_v51 = vmul.f32 1.442695, %v6098_v56 }
 0x356   : > { %6394 = vadd.xlane.f32.xlu1 %v15239_v15  ;;  %v5955_v60 = vpop.permute.xlu1 %5954  ;;  %v7106_v46 = vpack.c.bf16 %v15625_v42, %v15617_v49  ;;  %6428 = vadd.xlane.f32.xlu0 %v15418_v23  ;;  %v17918_v15 = vld [vmem:[#allocation74_spill] sm:$0xff] }
 0x357   : > { %v6096_v13 = vsub.f32 %v17917_v16, %v5955_v60  ;;  %11585 = vmatprep.mubr.bf16.mxu1 %v7105_v39  ;;  %11966 = vpow2.f32 %v6208_v51  ;;  %v6113_v7 = vsub.f32 %v17918_v15, %v6040_v52  ;;  %v17921_v60 = vld [vmem:[#allocation72_spill] sm:$0xff] }
 0x358   : > { %11586 = vmatmul.mubr.bf16.gmra.mxu1 %v7106_v46  ;;  %v17920_v46 = vld [vmem:[#allocation73_spill] sm:$0xff] }
 0x359   : > { %v6204_v59 = vmul.f32 1.442695, %v6096_v13  ;;  %v6115_v47 = vsub.f32 %v17920_v46, %v6050_v26  ;;  %v6238_v50 = vmul.f32 1.442695, %v6113_v7  ;;  %v6648_v7 = vld [vmem:[#allocation4 + $0x98] sm:$0xff]  ;;  %v6629_v46 = vld [vmem:[#allocation4] sm:$0xff] }
 0x35a   : > { %6390 = vadd.xlane.f32.xlu1 %v15227_v0  ;;  %v6045_v56 = vpop.permute.xlu1 %6044  ;;  %6440 = vadd.xlane.f32.xlu0 %v15503_v22  ;;  %v15645_v22 = vpop.permute.xlu0 %6880 }
 0x35b   : > { %11968 = vpow2.f32 %v6204_v59  ;;  %v6114_v23 = vsub.f32 %v17919_v4, %v6045_v56  ;;  %v6647_v4 = vld [vmem:[#allocation4 + $0x90] sm:$0xff]  ;;  %v6242_v13 = vmul.f32 1.442695, %v6115_v47  ;;  %v6646_v47 = vld [vmem:[#allocation4 + $0x88] sm:$0xff] }
 0x35c   : > { %11970 = vpow2.f32 %v6210_v11  ;;  %v15648_v11 = vpop.eup %11964  ;;  %v6631_v59 = vld [vmem:[#allocation4 + $0x10] sm:$0xff] }
 0x35d   : > { %v6240_v51 = vmul.f32 1.442695, %v6114_v23  ;;  %11972 = vpow2.f32 %v6238_v50 }
 0x35e   : > { %6426 = vadd.xlane.f32.xlu1 %v15296_v5  ;;  %v15639_v39 = vpop.permute.xlu1 %6885  ;;  %6436 = vadd.xlane.f32.xlu0 %v15506_v27  ;;  %v6645_v27 = vld [vmem:[#allocation4 + $0x80] sm:$0xff]  ;;  %v15660_v23 = vpop.permute.xlu0 %6970 }
 0x35f   : > { %11974 = vpow2.f32 %v6240_v51  ;;  %v7029_v15 = vmul.f32 %v15249_v48, %v6645_v27  ;;  %v7032_v51 = vmul.f32 %v15143_v32, %v6648_v7  ;;  %v7015_v48 = vmul.f32 %v15195_v28, %v6631_v59  ;;  %v17923_v28 = vld [vmem:[#allocation18_spill] sm:$0xff] }
 0x362   : > { %6422 = vadd.xlane.f32.xlu1 %v15278_v1  ;;  %v6035_v0 = vpop.permute.xlu1 %6034  ;;  %6472 = vadd.xlane.f32.xlu0 %v15524_v36  ;;  %v7031_v36 = vmul.f32 %v15230_v41, %v6647_v4 }
 0x363   : > { %v6112_v16 = vsub.f32 %v17921_v60, %v6035_v0  ;;  %v6632_v60 = vld [vmem:[#allocation4 + $0x18] sm:$0xff] }
 0x364   : > { %v15652_v1 = vpop.eup %11966  ;;  %v7016_v59 = vmul.f32 %v17923_v28, %v6632_v60  ;;  %v6649_v60 = vld [vmem:[#allocation4 + $0xa0] sm:$0xff] }
 0x365   : > { %v6236_v5 = vmul.f32 1.442695, %v6112_v16 }
 0x366   : > { %6402 = vadd.xlane.f32.xlu1 %v15374_v54  ;;  %6468 = vadd.xlane.f32.xlu0 %v15527_v18 }
 0x367   : > { %11976 = vpow2.f32 %v6236_v5 }
 0x368   : > { %v15655_v26 = vpop.eup %11968  ;;  %11978 = vpow2.f32 %v6242_v13  ;;  %v11515_v52 = vpop.f32.mrf.mxu1  ;;  %v17922_v13 = vld [vmem:[#allocation80_spill] sm:$0xff] }
 0x369   : > { %v15657_v56 = vpop.eup %11970  ;;  %v7515_v54 = vadd.f32 %v11515_v52, %v7031_v36  ;;  %v7099_v18 = vpack.c.bf16 %v15648_v11, %v15655_v26  ;;  %v7013_v5 = vmul.f32 %v17922_v13, %v6629_v46  ;;  %v6630_v36 = vld [vmem:[#allocation4 + $0x8] sm:$0xff]  ;;  %v15677_v52 = vpop.permute.xlu0 %6960 }
 0x36a   : > { %v7240_v41 = vpop.f32.mrf.mxu1  ;;  %6398 = vadd.xlane.f32.xlu1 %v15360_v3  ;;  %v7100_v50 = vpack.c.bf16 %v15657_v56, %v15652_v1  ;;  %6448 = vadd.xlane.f32.xlu0 %v15549_v33  ;;  %v7030_v3 = vmul.f32 %v15156_v40, %v6646_v47  ;;  %v15684_v46 = vpop.eup %11972 }
 0x36b   : > { %7579 = vst.msk [vmem:[#allocation4 + $0x90] sm:$0xff] %vm413_vm0, %v7515_v54  ;;  %v7513_v0 = vadd.f32 %v7240_v41, %v7029_v15  ;;  %11557 = vmatprep.mubr.bf16.mxu0 %v7099_v18  ;;  %v7014_v18 = vmul.f32 %v15282_v45, %v6630_v36  ;;  %v6636_v36 = vld [vmem:[#allocation4 + $0x38] sm:$0xff] }
 0x36c   : > { %v11483_v16 = vpop.f32.mrf.mxu0  ;;  %v11516_v4 = vpop.f32.mrf.mxu1  ;;  %11558 = vmatmul.mubr.bf16.gmra.mxu0 %v7100_v50 }
 0x36d   : > { %7577 = vst.msk [vmem:[#allocation4 + $0x80] sm:$0xff] %vm413_vm0, %v7513_v0  ;;  %v7499_v27 = vadd.f32 %v11483_v16, %v7015_v48  ;;  %v7516_v33 = vadd.f32 %v11516_v4, %v7032_v51  ;;  %v15688_v47 = vpop.eup %11974  ;;  %v15695_v51 = vpop.permute.xlu0 %6910  ;;  %v6651_v0 = vld [vmem:[#allocation4 + $0xb0] sm:$0xff]  ;;  %v6652_v4 = vld [vmem:[#allocation4 + $0xb8] sm:$0xff] }
 0x36e   : > { %v7143_v32 = vpop.f32.mrf.mxu0  ;;  %v7243_v7 = vpop.f32.mrf.mxu1  ;;  %6434 = vadd.xlane.f32.xlu1 %v15422_v30  ;;  %6444 = vadd.xlane.f32.xlu0 %v15552_v6 }
 0x36f   : > { %7563 = vst.msk [vmem:[#allocation4 + $0x10] sm:$0xff] %vm413_vm0, %v7499_v27  ;;  %7580 = vst.msk [vmem:[#allocation4 + $0x98] sm:$0xff] %vm413_vm0, %v7516_v33  ;;  %v7497_v40 = vadd.f32 %v7143_v32, %v7013_v5  ;;  %v7514_v15 = vadd.f32 %v7243_v7, %v7030_v3  ;;  %v15711_v16 = vpop.permute.xlu1 %6875  ;;  %v7033_v5 = vmul.f32 %v15395_v58, %v6649_v60  ;;  %v6650_v3 = vld [vmem:[#allocation4 + $0xa8] sm:$0xff]  ;;  %v6633_v27 = vld [vmem:[#allocation4 + $0x20] sm:$0xff] }
 0x370   : > { %v11484_v54 = vpop.f32.mrf.mxu0  ;;  %v7034_v7 = vmul.f32 %v15305_v31, %v6650_v3  ;;  %v7017_v28 = vmul.f32 %v15363_v57, %v6633_v27  ;;  %v17924_v60 = vld [vmem:[#allocation30_spill] sm:$0xff]  ;;  %v17926_v3 = vld [vmem:[#allocation24_spill] sm:$0xff] }
 0x371   : > { %7561 = vst.msk [vmem:[#allocation4] sm:$0xff] %vm413_vm0, %v7497_v40  ;;  %7578 = vst.msk [vmem:[#allocation4 + $0x88] sm:$0xff] %vm413_vm0, %v7514_v15  ;;  %v7500_v30 = vadd.f32 %v11484_v54, %v7016_v59  ;;  %v6634_v40 = vld [vmem:[#allocation4 + $0x28] sm:$0xff] }
 0x372   : > { %v7146_v6 = vpop.f32.mrf.mxu0  ;;  %6430 = vadd.xlane.f32.xlu1 %v15408_v19  ;;  %6480 = vadd.xlane.f32.xlu0 %v15573_v55  ;;  %v15706_v55 = vpop.permute.xlu0 %6900 }
 0x373   : > { %7564 = vst.msk [vmem:[#allocation4 + $0x18] sm:$0xff] %vm413_vm0, %v7500_v30  ;;  %v7498_v41 = vadd.f32 %v7146_v6, %v7014_v18  ;;  %v15723_v59 = vpop.permute.xlu1 %6965  ;;  %v6639_v18 = vld [vmem:[#allocation4 + $0x50] sm:$0xff]  ;;  %v7018_v6 = vmul.f32 %v15264_v44, %v6634_v40 }
 0x374   : > { %v15691_v50 = vpop.eup %11976 }
 0x375   : > { %v15693_v45 = vpop.eup %11978  ;;  %7562 = vst.msk [vmem:[#allocation4 + $0x8] sm:$0xff] %vm413_vm0, %v7498_v41  ;;  %v7107_v48 = vpack.c.bf16 %v15684_v46, %v15691_v50 }
 0x376   : > { %6442 = vadd.xlane.f32.xlu1 %v15508_v38  ;;  %v7108_v19 = vpack.c.bf16 %v15693_v45, %v15688_v47  ;;  %6476 = vadd.xlane.f32.xlu0 %v15575_v37  ;;  %v7035_v38 = vmul.f32 %v15381_v12, %v6651_v0  ;;  %v6635_v37 = vld [vmem:[#allocation4 + $0x30] sm:$0xff]  ;;  %v6640_v0 = vld [vmem:[#allocation4 + $0x58] sm:$0xff] }
 0x377   : > { %11589 = vmatprep.mubr.bf16.mxu1 %v7107_v48  ;;  %v7019_v12 = vmul.f32 %v15334_v34, %v6635_v37  ;;  %v7020_v34 = vmul.f32 %v15232_v35, %v6636_v36  ;;  %v7023_v35 = vmul.f32 %v15411_v14, %v6639_v18  ;;  %v15739_v48 = vpop.permute.xlu1 %6955  ;;  %v17925_v14 = vld [vmem:[#allocation92_spill] sm:$0xff]  ;;  %v6653_v36 = vld [vmem:[#allocation4 + $0xc0] sm:$0xff] }
 0x378   : > { %11590 = vmatmul.mubr.bf16.gmra.mxu1 %v7108_v19 }
 0x37a   : > { %6438 = vadd.xlane.f32.xlu1 %v15498_v63  ;;  %6456 = vadd.xlane.f32.xlu0 %v15594_v53  ;;  %v15714_v63 = vpop.permute.xlu0 %6990 }
 0x37e   : > { %6474 = vadd.xlane.f32.xlu1 %v15531_v9  ;;  %6452 = vadd.xlane.f32.xlu0 %v15596_v2  ;;  %v7036_v9 = vmul.f32 %v15284_v62, %v6652_v4  ;;  %v15729_v54 = vpop.permute.xlu0 %6980 }
 0x380   : > { %v11519_v13 = vpop.f32.mrf.mxu1 }
 0x381   : > { %v7519_v53 = vadd.f32 %v11519_v13, %v7035_v38  ;;  %v6638_v13 = vld [vmem:[#allocation4 + $0x48] sm:$0xff] }
 0x382   : > { %v7256_v33 = vpop.f32.mrf.mxu1  ;;  %6470 = vadd.xlane.f32.xlu1 %v15521_v25  ;;  %6488 = vadd.xlane.f32.xlu0 %v15617_v49  ;;  %v15743_v4 = vpop.permute.xlu0 %6930  ;;  %v7022_v27 = vmul.f32 %v17926_v3, %v6638_v13 }
 0x383   : > { %7583 = vst.msk [vmem:[#allocation4 + $0xb0] sm:$0xff] %vm413_vm0, %v7519_v53  ;;  %v7517_v2 = vadd.f32 %v7256_v33, %v7033_v5  ;;  %v15751_v33 = vpop.permute.xlu1 %6905 }
 0x384   : > { %v11487_v32 = vpop.f32.mrf.mxu0  ;;  %v11520_v58 = vpop.f32.mrf.mxu1 }
 0x385   : > { %7581 = vst.msk [vmem:[#allocation4 + $0xa0] sm:$0xff] %vm413_vm0, %v7517_v2  ;;  %v7503_v25 = vadd.f32 %v11487_v32, %v7019_v12  ;;  %v7520_v49 = vadd.f32 %v11520_v58, %v7036_v9  ;;  %v6655_v2 = vld [vmem:[#allocation4 + $0xd0] sm:$0xff]  ;;  %v17927_v32 = vld [vmem:[#allocation28_spill] sm:$0xff] }
 0x386   : > { %v7159_v62 = vpop.f32.mrf.mxu0  ;;  %v7259_v15 = vpop.f32.mrf.mxu1  ;;  %6450 = vadd.xlane.f32.xlu1 %v15554_v20  ;;  %6484 = vadd.xlane.f32.xlu0 %v15620_v21  ;;  %v6637_v21 = vld [vmem:[#allocation4 + $0x40] sm:$0xff]  ;;  %v7039_v58 = vmul.f32 %v17927_v32, %v6655_v2  ;;  %v17935_v32 = vld [vmem:[#allocation32_spill] sm:$0xff] }
 0x387   : > { %7567 = vst.msk [vmem:[#allocation4 + $0x30] sm:$0xff] %vm413_vm0, %v7503_v25  ;;  %7584 = vst.msk [vmem:[#allocation4 + $0xb8] sm:$0xff] %vm413_vm0, %v7520_v49  ;;  %v7501_v31 = vadd.f32 %v7159_v62, %v7017_v28  ;;  %v7518_v57 = vadd.f32 %v7259_v15, %v7034_v7  ;;  %v7021_v38 = vmul.f32 %v17924_v60, %v6637_v21  ;;  %v15763_v7 = vpop.permute.xlu1 %6895  ;;  %v6654_v62 = vld [vmem:[#allocation4 + $0xc8] sm:$0xff]  ;;  %v6262_v60 = vld [vmem:[#allocation3 + $0x90] sm:$0xff] }
 0x388   : > { %v11488_v30 = vpop.f32.mrf.mxu0 }
 0x389   : > { %7565 = vst.msk [vmem:[#allocation4 + $0x20] sm:$0xff] %vm413_vm0, %v7501_v31  ;;  %7582 = vst.msk [vmem:[#allocation4 + $0xa8] sm:$0xff] %vm413_vm0, %v7518_v57  ;;  %v7504_v20 = vadd.f32 %v11488_v30, %v7020_v34  ;;  %v17929_v34 = vld [vmem:[#allocation94_spill] sm:$0xff]  ;;  %v17930_v57 = vld [vmem:[#allocation21_spill] sm:$0xff] }
 0x38a   : > { %v7162_v41 = vpop.f32.mrf.mxu0  ;;  %6446 = vadd.xlane.f32.xlu1 %v15543_v8  ;;  %6464 = vadd.xlane.f32.xlu0 %v15652_v1  ;;  %v7024_v1 = vmul.f32 %v17925_v14, %v6640_v0  ;;  %v7038_v18 = vmul.f32 %v17930_v57, %v6654_v62  ;;  %v6643_v14 = vld [vmem:[#allocation4 + $0x70] sm:$0xff] }
 0x38b   : > { %7568 = vst.msk [vmem:[#allocation4 + $0x38] sm:$0xff] %vm413_vm0, %v7504_v20  ;;  %v7502_v19 = vadd.f32 %v7162_v41, %v7018_v6  ;;  %v15772_v30 = vpop.permute.xlu1 %6985  ;;  %v6246_v41 = vld [vmem:[#allocation3 + $0x10] sm:$0xff] }
 0x38c   : > { %v11491_v44 = vpop.f32.mrf.mxu0 }
 0x38d   : > { %7566 = vst.msk [vmem:[#allocation4 + $0x28] sm:$0xff] %vm413_vm0, %v7502_v19  ;;  %v7507_v37 = vadd.f32 %v11491_v44, %v7023_v35  ;;  %v17931_v35 = vld [vmem:[#allocation105_spill] sm:$0xff] }
 0x38e   : > { %v7175_v8 = vpop.f32.mrf.mxu0  ;;  %6482 = vadd.xlane.f32.xlu1 %v15579_v29  ;;  %6460 = vadd.xlane.f32.xlu0 %v15655_v26  ;;  %v15756_v29 = vpop.permute.xlu0 %6920  ;;  %v6310_v19 = vmul.f32 %v17931_v35, %v6246_v41  ;;  %v17939_v41 = vld [vmem:[#allocation131_spill] sm:$0xff] }
 0x38f   : > { %7571 = vst.msk [vmem:[#allocation4 + $0x50] sm:$0xff] %vm413_vm0, %v7507_v37  ;;  %v7505_v5 = vadd.f32 %v7175_v8, %v7021_v38  ;;  %v15782_v0 = vpop.permute.xlu1 %6975  ;;  %v6260_v8 = vld [vmem:[#allocation3 + $0x80] sm:$0xff] }
 0x390   : > { %v11492_v53 = vpop.f32.mrf.mxu0 }
 0x391   : > { %7569 = vst.msk [vmem:[#allocation4 + $0x40] sm:$0xff] %vm413_vm0, %v7505_v5  ;;  %v7508_v9 = vadd.f32 %v11492_v53, %v7024_v1  ;;  %v17933_v53 = vld [vmem:[#allocation119_spill] sm:$0xff] }
 0x392   : > { %v7178_v12 = vpop.f32.mrf.mxu0  ;;  %6478 = vadd.xlane.f32.xlu1 %v15566_v43  ;;  %6496 = vadd.xlane.f32.xlu0 %v15688_v47  ;;  %v6656_v43 = vld [vmem:[#allocation4 + $0xd8] sm:$0xff]  ;;  %v17928_v47 = vld [vmem:[#allocation126_spill] sm:$0xff]  ;;  %v15766_v49 = vpop.permute.xlu0 %7010  ;;  %v6324_v3 = vmul.f32 %v17933_v53, %v6260_v8  ;;  %v6266_v53 = vld [vmem:[#allocation3 + $0xb0] sm:$0xff] }
 0x393   : > { %7572 = vst.msk [vmem:[#allocation4 + $0x58] sm:$0xff] %vm413_vm0, %v7508_v9  ;;  %v7506_v26 = vadd.f32 %v7178_v12, %v7022_v27  ;;  %v7037_v25 = vmul.f32 %v17928_v47, %v6653_v36  ;;  %v7040_v31 = vmul.f32 %v17929_v34, %v6656_v43  ;;  %v15787_v5 = vpop.permute.xlu1 %6925  ;;  %v17934_v27 = vld [vmem:[#allocation34_spill] sm:$0xff] }
 0x394   : > { %v7027_v9 = vmul.f32 %v17934_v27, %v6643_v14  ;;  %v6245_v12 = vld [vmem:[#allocation3 + $0x8] sm:$0xff]  ;;  %v17941_v14 = vld [vmem:[#allocation75_spill] sm:$0xff] }
 0x395   : > { %7570 = vst.msk [vmem:[#allocation4 + $0x48] sm:$0xff] %vm413_vm0, %v7506_v26  ;;  %v6644_v26 = vld [vmem:[#allocation4 + $0x78] sm:$0xff] }
 0x396   : > { %6458 = vadd.xlane.f32.xlu1 %v15598_v10  ;;  %6492 = vadd.xlane.f32.xlu0 %v15691_v50  ;;  %v15776_v21 = vpop.permute.xlu0 %7000 }
 0x398   : > { %v11523_v28 = vpop.f32.mrf.mxu1 }
 0x399   : > { %v7523_v40 = vadd.f32 %v11523_v28, %v7039_v58  ;;  %v6642_v28 = vld [vmem:[#allocation4 + $0x68] sm:$0xff] }
 0x39a   : > { %v7272_v15 = vpop.f32.mrf.mxu1  ;;  %6454 = vadd.xlane.f32.xlu1 %v15588_v24 }
 0x39b   : > { %7587 = vst.msk [vmem:[#allocation4 + $0xd0] sm:$0xff] %vm413_vm0, %v7523_v40  ;;  %v7521_v10 = vadd.f32 %v7272_v15, %v7037_v25  ;;  %v17937_v40 = vld [vmem:[#allocation19_spill] sm:$0xff]  ;;  %v15798_v15 = vpop.permute.xlu1 %6915 }
 0x39c   : > { %v11524_v50 = vpop.f32.mrf.mxu1  ;;  %v7028_v62 = vmul.f32 %v17937_v40, %v6644_v26 }
 0x39d   : > { %7585 = vst.msk [vmem:[#allocation4 + $0xc0] sm:$0xff] %vm413_vm0, %v7521_v10  ;;  %v7524_v6 = vadd.f32 %v11524_v50, %v7040_v31  ;;  %v6250_v10 = vld [vmem:[#allocation3 + $0x30] sm:$0xff] }
 0x39e   : > { %v7275_v20 = vpop.f32.mrf.mxu1  ;;  %6490 = vadd.xlane.f32.xlu1 %v15625_v42  ;;  %v17932_v42 = vld [vmem:[#allocation117_spill] sm:$0xff]  ;;  %v6314_v35 = vmul.f32 %v17939_v41, %v6250_v10  ;;  %v17945_v10 = vld [vmem:[#allocation115_spill] sm:$0xff] }
 0x39f   : > { %7588 = vst.msk [vmem:[#allocation4 + $0xd8] sm:$0xff] %vm413_vm0, %v7524_v6  ;;  %v7522_v24 = vadd.f32 %v7275_v20, %v7038_v18  ;;  %v6326_v37 = vmul.f32 %v17932_v42, %v6262_v60  ;;  %v17938_v6 = vld [vmem:[#allocation104_spill] sm:$0xff]  ;;  %v6248_v60 = vld [vmem:[#allocation3 + $0x20] sm:$0xff] }
 0x3a0   : > { %v7026_v20 = vmul.f32 %v17938_v6, %v6642_v28  ;;  %v17946_v6 = vld [vmem:[#allocation88_spill] sm:$0xff] }
 0x3a1   : > { %7586 = vst.msk [vmem:[#allocation4 + $0xc8] sm:$0xff] %vm413_vm0, %v7522_v24 }
 0x3a2   : > { %6486 = vadd.xlane.f32.xlu1 %v15613_v17  ;;  %v6641_v17 = vld [vmem:[#allocation4 + $0x60] sm:$0xff] }
 0x3a3   : > { %v6377_v44 = vpop.xlane.xlu0 %6376  ;;  %v7025_v58 = vmul.f32 %v17935_v32, %v6641_v17  ;;  %v17943_v32 = vld [vmem:[#allocation143_spill] sm:$0xff] }
 0x3a4   : > { %v6502_v38 = vadd.f32 %v6377_v44, %v6310_v19 }
 0x3a6   : > { %6466 = vadd.xlane.f32.xlu1 %v15657_v56  ;;  %6567 = vst.msk [vmem:[#allocation3 + $0x10] sm:$0xff] %vm284_vm2, %v6502_v38  ;;  %v6659_v38 = vld [vmem:[#allocation4 + $0xf0] sm:$0xff] }
 0x3a7   : > { %v6409_v13 = vpop.xlane.xlu0 %6408 }
 0x3a8   : > { %v6518_v1 = vadd.f32 %v6409_v13, %v6326_v37  ;;  %v15807_v37 = vpop.permute.xlu1 %7005  ;;  %v6657_v13 = vld [vmem:[#allocation4 + $0xe0] sm:$0xff] }
 0x3aa   : > { %6462 = vadd.xlane.f32.xlu1 %v15648_v11  ;;  %6583 = vst.msk [vmem:[#allocation3 + $0x90] sm:$0xff] %vm284_vm2, %v6518_v1  ;;  %v17936_v11 = vld [vmem:[#allocation123_spill] sm:$0xff]  ;;  %v7043_v1 = vmul.f32 %v17941_v14, %v6659_v38  ;;  %v17949_v14 = vld [vmem:[#allocation153_spill] sm:$0xff] }
 0x3ab   : > { %v6405_v56 = vpop.xlane.xlu0 %6404  ;;  %v6309_v25 = vmul.f32 %v17936_v11, %v6245_v12 }
 0x3ac   : > { %v11495_v2 = vpop.f32.mrf.mxu0  ;;  %v6516_v36 = vadd.f32 %v6405_v56, %v6324_v3  ;;  %v6660_v3 = vld [vmem:[#allocation4 + $0xf8] sm:$0xff] }
 0x3ad   : > { %v7511_v43 = vadd.f32 %v11495_v2, %v7027_v9  ;;  %v7694_v50 = vld [vmem:[#allocation3 + $0x10] sm:$0xff]  ;;  %v17942_v56 = vld [vmem:[#allocation124_spill] sm:$0xff]  ;;  %v6658_v2 = vld [vmem:[#allocation4 + $0xe8] sm:$0xff] }
 0x3ae   : > { %v7191_v47 = vpop.f32.mrf.mxu0  ;;  %6498 = vadd.xlane.f32.xlu1 %v15693_v45  ;;  %6581 = vst.msk [vmem:[#allocation3 + $0x80] sm:$0xff] %vm284_vm2, %v6516_v36  ;;  %11980 = vrcp.f32 %v7694_v50  ;;  %v7041_v12 = vmul.f32 %v17942_v56, %v6657_v13  ;;  %v7042_v50 = vmul.f32 %v17945_v10, %v6658_v2  ;;  %v17951_v2 = vld [vmem:[#allocation157_spill] sm:$0xff]  ;;  %v17953_v10 = vld [vmem:[#allocation162_spill] sm:$0xff] }
 0x3af   : > { %7575 = vst.msk [vmem:[#allocation4 + $0x70] sm:$0xff] %vm413_vm0, %v7511_v43  ;;  %v7509_v34 = vadd.f32 %v7191_v47, %v7025_v58  ;;  %v6375_v31 = vpop.xlane.xlu0 %6374  ;;  %v6330_v58 = vmul.f32 %v17943_v32, %v6266_v53  ;;  %v17944_v43 = vld [vmem:[#allocation109_spill] sm:$0xff]  ;;  %v15817_v47 = vpop.permute.xlu1 %6995  ;;  %v6263_v53 = vld [vmem:[#allocation3 + $0x98] sm:$0xff] }
 0x3b0   : > { %v11496_v57 = vpop.f32.mrf.mxu0  ;;  %v6501_v18 = vadd.f32 %v6375_v31, %v6309_v25  ;;  %v7044_v28 = vmul.f32 %v17944_v43, %v6660_v3  ;;  %v6244_v25 = vld [vmem:[#allocation3] sm:$0xff] }
 0x3b1   : > { %7573 = vst.msk [vmem:[#allocation4 + $0x60] sm:$0xff] %vm413_vm0, %v7509_v34  ;;  %v7512_v45 = vadd.f32 %v11496_v57, %v7028_v62  ;;  %v6264_v62 = vld [vmem:[#allocation3 + $0xa0] sm:$0xff] }
 0x3b2   : > { %v7194_v24 = vpop.f32.mrf.mxu0  ;;  %6494 = vadd.xlane.f32.xlu1 %v15684_v46  ;;  %6566 = vst.msk [vmem:[#allocation3 + $0x8] sm:$0xff] %vm284_vm2, %v6501_v18  ;;  %v17940_v46 = vld [vmem:[#allocation138_spill] sm:$0xff] }
 0x3b3   : > { %7576 = vst.msk [vmem:[#allocation4 + $0x78] sm:$0xff] %vm413_vm0, %v7512_v45  ;;  %v7510_v19 = vadd.f32 %v7194_v24, %v7026_v20  ;;  %v6385_v44 = vpop.xlane.xlu0 %6384  ;;  %v6312_v8 = vmul.f32 %v17940_v46, %v6248_v60  ;;  %v6308_v20 = vmul.f32 %v17946_v6, %v6244_v25  ;;  %v17947_v45 = vld [vmem:[#allocation148_spill] sm:$0xff]  ;;  %v6254_v60 = vld [vmem:[#allocation3 + $0x50] sm:$0xff]  ;;  %v17948_v46 = vld [vmem:[#allocation97_spill] sm:$0xff] }
 0x3b4   : > { %v6506_v42 = vadd.f32 %v6385_v44, %v6314_v35  ;;  %v6328_v24 = vmul.f32 %v17947_v45, %v6264_v62  ;;  %v7710_v62 = vld [vmem:[#allocation3 + $0x90] sm:$0xff] }
 0x3b5   : > { %7574 = vst.msk [vmem:[#allocation4 + $0x68] sm:$0xff] %vm413_vm0, %v7510_v19  ;;  %v6247_v19 = vld [vmem:[#allocation3 + $0x18] sm:$0xff] }
 0x3b6   : > { %6571 = vst.msk [vmem:[#allocation3 + $0x30] sm:$0xff] %vm284_vm2, %v6506_v42 }
 0x3b7   : > { %v6381_v17 = vpop.xlane.xlu0 %6380 }
 0x3b8   : > { %v11527_v27 = vpop.f32.mrf.mxu1  ;;  %v6504_v9 = vadd.f32 %v6381_v17, %v6312_v8  ;;  %v6311_v8 = vmul.f32 %v17948_v46, %v6247_v19  ;;  %v17954_v19 = vld [vmem:[#allocation118_spill] sm:$0xff] }
 0x3b9   : > { %v7527_v26 = vadd.f32 %v11527_v27, %v7043_v1  ;;  %v6318_v1 = vmul.f32 %v17949_v14, %v6254_v60  ;;  %v6252_v27 = vld [vmem:[#allocation3 + $0x40] sm:$0xff]  ;;  %v17955_v60 = vld [vmem:[#allocation164_spill] sm:$0xff]  ;;  %v6249_v46 = vld [vmem:[#allocation3 + $0x28] sm:$0xff] }
 0x3ba   : > { %v7288_v36 = vpop.f32.mrf.mxu1  ;;  %6569 = vst.msk [vmem:[#allocation3 + $0x20] sm:$0xff] %vm284_vm2, %v6504_v9  ;;  %v6258_v14 = vld [vmem:[#allocation3 + $0x70] sm:$0xff] }
 0x3bb   : > { %7591 = vst.msk [vmem:[#allocation4 + $0xf0] sm:$0xff] %vm413_vm0, %v7527_v26  ;;  %v7525_v11 = vadd.f32 %v7288_v36, %v7041_v12  ;;  %v6417_v40 = vpop.xlane.xlu0 %6416  ;;  %v11981_v38 = vpop.eup %11980  ;;  %v17950_v12 = vld [vmem:[#allocation102_spill] sm:$0xff]  ;;  %v6316_v36 = vmul.f32 %v17951_v2, %v6252_v27  ;;  %v6267_v2 = vld [vmem:[#allocation3 + $0xb8] sm:$0xff] }
 0x3bc   : > { %v11528_v34 = vpop.f32.mrf.mxu1  ;;  %v6522_v31 = vadd.f32 %v6417_v40, %v6330_v58  ;;  %v6327_v26 = vmul.f32 %v17950_v12, %v6263_v53  ;;  %v6261_v58 = vld [vmem:[#allocation3 + $0x88] sm:$0xff] }
 0x3bd   : > { %7589 = vst.msk [vmem:[#allocation4 + $0xe0] sm:$0xff] %vm413_vm0, %v7525_v11  ;;  %v7528_v57 = vadd.f32 %v11528_v34, %v7044_v28  ;;  %v6270_v28 = vld [vmem:[#allocation3 + $0xd0] sm:$0xff]  ;;  %v17952_v34 = vld [vmem:[#allocation106_spill] sm:$0xff] }
 0x3be   : > { %v7291_v18 = vpop.f32.mrf.mxu1  ;;  %6587 = vst.msk [vmem:[#allocation3 + $0xb0] sm:$0xff] %vm284_vm2, %v6522_v31  ;;  %v6325_v31 = vmul.f32 %v17952_v34, %v6261_v58  ;;  %v7698_v53 = vld [vmem:[#allocation3 + $0x30] sm:$0xff] }
 0x3bf   : > { %7592 = vst.msk [vmem:[#allocation4 + $0xf8] sm:$0xff] %vm413_vm0, %v7528_v57  ;;  %v7526_v41 = vadd.f32 %v7291_v18, %v7042_v50  ;;  %v6373_v35 = vpop.xlane.xlu1 %6372  ;;  %v6413_v44 = vpop.xlane.xlu0 %6412  ;;  %v6334_v50 = vmul.f32 %v17953_v10, %v6270_v28  ;;  %v6251_v18 = vld [vmem:[#allocation3 + $0x38] sm:$0xff] }
 0x3c0   : > { %v6500_v42 = vadd.f32 %v6373_v35, %v6308_v20  ;;  %v6520_v13 = vadd.f32 %v6413_v44, %v6328_v24  ;;  %v6268_v20 = vld [vmem:[#allocation3 + $0xc0] sm:$0xff]  ;;  %v6315_v44 = vmul.f32 %v17954_v19, %v6251_v18  ;;  %v6274_v18 = vld [vmem:[#allocation3 + $0xf0] sm:$0xff]  ;;  %v17961_v19 = vld [vmem:[#allocation78_spill] sm:$0xff] }
 0x3c1   : > { %7590 = vst.msk [vmem:[#allocation4 + $0xe8] sm:$0xff] %vm413_vm0, %v7526_v41  ;;  %v7708_v35 = vld [vmem:[#allocation3 + $0x80] sm:$0xff] }
 0x3c2   : > { %6565 = vst.msk [vmem:[#allocation3] sm:$0xff] %vm284_vm2, %v6500_v42  ;;  %6585 = vst.msk [vmem:[#allocation3 + $0xa0] sm:$0xff] %vm284_vm2, %v6520_v13  ;;  %v7693_v42 = vld [vmem:[#allocation3 + $0x8] sm:$0xff]  ;;  %v7696_v28 = vld [vmem:[#allocation3 + $0x20] sm:$0xff] }
 0x3c3   : > { %7896 = vperm.xlu1 %11690, %v11981_v38   ;;  %v6379_v17 = vpop.xlane.xlu1 %6378  ;;  %v6393_v3 = vpop.xlane.xlu0 %6392  ;;  %v6332_v38 = vmul.f32 %v17955_v60, %v6268_v20 }
 0x3c4   : > { %v6503_v9 = vadd.f32 %v6379_v17, %v6311_v8  ;;  %v6510_v56 = vadd.f32 %v6393_v3, %v6318_v1  ;;  %v17956_v3 = vld [vmem:[#allocation122_spill] sm:$0xff] }
 0x3c5   : > { %v6313_v27 = vmul.f32 %v17956_v3, %v6249_v46  ;;  %v17962_v3 = vld [vmem:[#allocation133_spill] sm:$0xff] }
 0x3c6   : > { %6568 = vst.msk [vmem:[#allocation3 + $0x18] sm:$0xff] %vm284_vm2, %v6503_v9  ;;  %6575 = vst.msk [vmem:[#allocation3 + $0x50] sm:$0xff] %vm284_vm2, %v6510_v56  ;;  %v17957_v9 = vld [vmem:[#allocation166_spill] sm:$0xff] }
 0x3c7   : > { %v6411_v32 = vpop.xlane.xlu1 %6410  ;;  %v6389_v43 = vpop.xlane.xlu0 %6388  ;;  %v6322_v56 = vmul.f32 %v17957_v9, %v6258_v14  ;;  %v17963_v9 = vld [vmem:[#allocation77_spill] sm:$0xff] }
 0x3c8   : > { %v6519_v11 = vadd.f32 %v6411_v32, %v6327_v26  ;;  %v6508_v25 = vadd.f32 %v6389_v43, %v6316_v36  ;;  %v6256_v32 = vld [vmem:[#allocation3 + $0x60] sm:$0xff] }
 0x3c9   : > { %v7692_v40 = vld [vmem:[#allocation3] sm:$0xff] }
 0x3ca   : > { %11982 = vrcp.f32 %v7692_v40  ;;  %6584 = vst.msk [vmem:[#allocation3 + $0x98] sm:$0xff] %vm284_vm2, %v6519_v11  ;;  %6573 = vst.msk [vmem:[#allocation3 + $0x40] sm:$0xff] %vm284_vm2, %v6508_v25  ;;  %v17958_v11 = vld [vmem:[#allocation125_spill] sm:$0xff]  ;;  %v17959_v40 = vld [vmem:[#allocation167_spill] sm:$0xff] }
 0x3cb   : > { %v6407_v57 = vpop.xlane.xlu1 %6406  ;;  %v6425_v6 = vpop.xlane.xlu0 %6424  ;;  %11984 = vrcp.f32 %v7710_v62  ;;  %v6331_v25 = vmul.f32 %v17958_v11, %v6267_v2  ;;  %v6320_v62 = vmul.f32 %v17959_v40, %v6256_v32  ;;  %v17964_v40 = vld [vmem:[#allocation134_spill] sm:$0xff] }
 0x3cc   : > { %v6517_v45 = vadd.f32 %v6407_v57, %v6325_v31  ;;  %v6526_v24 = vadd.f32 %v6425_v6, %v6334_v50  ;;  %v6265_v50 = vld [vmem:[#allocation3 + $0xa8] sm:$0xff] }
 0x3cd   : > { %v7695_v41 = vld [vmem:[#allocation3 + $0x18] sm:$0xff] }
 0x3ce   : > { %11986 = vrcp.f32 %v7695_v41  ;;  %6582 = vst.msk [vmem:[#allocation3 + $0x88] sm:$0xff] %vm284_vm2, %v6517_v45  ;;  %6591 = vst.msk [vmem:[#allocation3 + $0xd0] sm:$0xff] %vm284_vm2, %v6526_v24  ;;  %v7714_v24 = vld [vmem:[#allocation3 + $0xb0] sm:$0xff]  ;;  %v17960_v41 = vld [vmem:[#allocation130_spill] sm:$0xff] }
 0x3cf   : > { %v6387_v13 = vpop.xlane.xlu1 %6386  ;;  %v6421_v8 = vpop.xlane.xlu0 %6420  ;;  %11988 = vrcp.f32 %v7708_v35  ;;  %v6329_v35 = vmul.f32 %v17960_v41, %v6265_v50 }
 0x3d0   : > { %v6507_v1 = vadd.f32 %v6387_v13, %v6315_v44  ;;  %v6524_v17 = vadd.f32 %v6421_v8, %v6332_v38  ;;  %11990 = vrcp.f32 %v7693_v42  ;;  %v6338_v44 = vmul.f32 %v17961_v19, %v6274_v18  ;;  %v6255_v13 = vld [vmem:[#allocation3 + $0x58] sm:$0xff]  ;;  %v6272_v8 = vld [vmem:[#allocation3 + $0xe0] sm:$0xff] }
 0x3d1   : > { %v7711_v12 = vld [vmem:[#allocation3 + $0x98] sm:$0xff]  ;;  %11992 = vrcp.f32 %v7698_v53  ;;  %v7712_v53 = vld [vmem:[#allocation3 + $0xa0] sm:$0xff] }
 0x3d2   : > { %6572 = vst.msk [vmem:[#allocation3 + $0x38] sm:$0xff] %vm284_vm2, %v6507_v1  ;;  %6589 = vst.msk [vmem:[#allocation3 + $0xc0] sm:$0xff] %vm284_vm2, %v6524_v17  ;;  %11994 = vrcp.f32 %v7711_v12  ;;  %v6271_v18 = vld [vmem:[#allocation3 + $0xd8] sm:$0xff]  ;;  %v17966_v19 = vld [vmem:[#allocation137_spill] sm:$0xff] }
 0x3d3   : > { %v6383_v26 = vpop.xlane.xlu1 %6382  ;;  %v6401_v36 = vpop.xlane.xlu0 %6400  ;;  %11996 = vrcp.f32 %v7696_v28 }
 0x3d4   : > { %v6505_v58 = vadd.f32 %v6383_v26, %v6313_v27  ;;  %v6514_v43 = vadd.f32 %v6401_v36, %v6322_v56  ;;  %v6319_v27 = vmul.f32 %v17962_v3, %v6255_v13  ;;  %v6336_v56 = vmul.f32 %v17963_v9, %v6272_v8  ;;  %v6253_v36 = vld [vmem:[#allocation3 + $0x48] sm:$0xff]  ;;  %v6661_v9 = vld [vmem:[#allocation4 + $0x100] sm:$0xff] }
 0x3d5   : > { %v7709_v31 = vld [vmem:[#allocation3 + $0x88] sm:$0xff] }
 0x3d6   : > { %6570 = vst.msk [vmem:[#allocation3 + $0x28] sm:$0xff] %vm284_vm2, %v6505_v58  ;;  %6579 = vst.msk [vmem:[#allocation3 + $0x70] sm:$0xff] %vm284_vm2, %v6514_v43  ;;  %11998 = vrcp.f32 %v7709_v31  ;;  %v6278_v58 = vld [vmem:[#allocation3 + $0x110] sm:$0xff]  ;;  %v6269_v8 = vld [vmem:[#allocation3 + $0xc8] sm:$0xff] }
 0x3d7   : > { %v11983_v34 = vpop.eup %11982  ;;  %v6419_v10 = vpop.xlane.xlu1 %6418  ;;  %12000 = vrcp.f32 %v7714_v24 }
 0x3d8   : > { %v6397_v57 = vpop.xlane.xlu0 %6396  ;;  %v6523_v6 = vadd.f32 %v6419_v10, %v6331_v25  ;;  %7886 = vperm.xlu1 %11690, %v11983_v34   ;;  %v11985_v45 = vpop.eup %11984  ;;  %v7702_v25 = vld [vmem:[#allocation3 + $0x50] sm:$0xff]  ;;  %v17965_v34 = vld [vmem:[#allocation116_spill] sm:$0xff] }
 0x3d9   : > { %v6512_v20 = vadd.f32 %v6397_v57, %v6320_v62  ;;  %v7699_v38 = vld [vmem:[#allocation3 + $0x38] sm:$0xff]  ;;  %v6317_v62 = vmul.f32 %v17964_v40, %v6253_v36  ;;  %v6342_v31 = vmul.f32 %v17965_v34, %v6278_v58  ;;  %v6292_v40 = vld [vmem:[#allocation3 + $0x180] sm:$0xff] }
 0x3da   : > { %6588 = vst.msk [vmem:[#allocation3 + $0xb8] sm:$0xff] %vm284_vm2, %v6523_v6  ;;  %12002 = vrcp.f32 %v7699_v38 }
 0x3db   : > { %6577 = vst.msk [vmem:[#allocation3 + $0x60] sm:$0xff] %vm284_vm2, %v6512_v20  ;;  %v11987_v60 = vpop.eup %11986  ;;  %v6415_v42 = vpop.xlane.xlu1 %6414  ;;  %12004 = vrcp.f32 %v7712_v53  ;;  %v6276_v20 = vld [vmem:[#allocation3 + $0x100] sm:$0xff] }
 0x3dc   : > { %v6433_v46 = vpop.xlane.xlu0 %6432  ;;  %v6521_v14 = vadd.f32 %v6415_v42, %v6329_v35  ;;  %7976 = vperm.xlu1 %11690, %v11985_v45   ;;  %7901 = vperm.xlu0 %11691, %v11987_v60   ;;  %v11989_v17 = vpop.eup %11988  ;;  %v7700_v35 = vld [vmem:[#allocation3 + $0x40] sm:$0xff]  ;;  %v17967_v60 = vld [vmem:[#allocation82_spill] sm:$0xff] }
 0x3dd   : > { %v6530_v1 = vadd.f32 %v6433_v46, %v6338_v44  ;;  %v11991_v12 = vpop.eup %11990  ;;  %v7697_v26 = vld [vmem:[#allocation3 + $0x28] sm:$0xff]  ;;  %v6335_v44 = vmul.f32 %v17966_v19, %v6271_v18  ;;  %v6340_v38 = vmul.f32 %v17967_v60, %v6276_v20  ;;  %v17973_v60 = vld [vmem:[#allocation81_spill] sm:$0xff] }
 0x3de   : > { %6586 = vst.msk [vmem:[#allocation3 + $0xa8] sm:$0xff] %vm284_vm2, %v6521_v14  ;;  %v11993_v11 = vpop.eup %11992  ;;  %12006 = vrcp.f32 %v7697_v26  ;;  %v6662_v20 = vld [vmem:[#allocation4 + $0x108] sm:$0xff] }
 0x3df   : > { %6595 = vst.msk [vmem:[#allocation3 + $0xf0] sm:$0xff] %vm284_vm2, %v6530_v1  ;;  %v6395_v2 = vpop.xlane.xlu1 %6394  ;;  %v11995_v10 = vpop.eup %11994  ;;  %12008 = vrcp.f32 %v7702_v25  ;;  %v6294_v1 = vld [vmem:[#allocation3 + $0x190] sm:$0xff] }
 0x3e0   : > { %v6429_v32 = vpop.xlane.xlu0 %6428  ;;  %v6511_v43 = vadd.f32 %v6395_v2, %v6319_v27  ;;  %7966 = vperm.xlu1 %11690, %v11989_v17   ;;  %7891 = vperm.xlu0 %11691, %v11991_v12   ;;  %v11997_v41 = vpop.eup %11996  ;;  %v6663_v17 = vld [vmem:[#allocation4 + $0x110] sm:$0xff]  ;;  %v17968_v12 = vld [vmem:[#allocation141_spill] sm:$0xff]  ;;  %v17969_v2 = vld [vmem:[#allocation84_spill] sm:$0xff] }
 0x3e1   : > { %v6528_v28 = vadd.f32 %v6429_v32, %v6336_v56  ;;  %v7715_v50 = vld [vmem:[#allocation3 + $0xb8] sm:$0xff]  ;;  %v7718_v56 = vld [vmem:[#allocation3 + $0xd0] sm:$0xff]  ;;  %v6333_v26 = vmul.f32 %v17968_v12, %v6269_v8  ;;  %v6358_v36 = vmul.f32 %v17969_v2, %v6294_v1  ;;  %v7047_v58 = vmul.f32 %v15570_v61, %v6663_v17  ;;  %v6257_v8 = vld [vmem:[#allocation3 + $0x68] sm:$0xff] }
 0x3e2   : > { %6576 = vst.msk [vmem:[#allocation3 + $0x58] sm:$0xff] %vm284_vm2, %v6511_v43  ;;  %12010 = vrcp.f32 %v7715_v50  ;;  %v17970_v50 = vld [vmem:[#allocation165_spill] sm:$0xff]  ;;  %v6282_v1 = vld [vmem:[#allocation3 + $0x130] sm:$0xff] }
 0x3e3   : > { %6593 = vst.msk [vmem:[#allocation3 + $0xe0] sm:$0xff] %vm284_vm2, %v6528_v28  ;;  %v6391_v57 = vpop.xlane.xlu1 %6390  ;;  %v11999_v42 = vpop.eup %11998  ;;  %12012 = vrcp.f32 %v7700_v35  ;;  %v17972_v35 = vld [vmem:[#allocation27_spill] sm:$0xff]  ;;  %v6677_v2 = vld [vmem:[#allocation4 + $0x180] sm:$0xff] }
 0x3e4   : > { %v6441_v6 = vpop.xlane.xlu0 %6440  ;;  %v6509_v45 = vadd.f32 %v6391_v57, %v6317_v62  ;;  %7916 = vperm.xlu1 %11690, %v11993_v11   ;;  %7981 = vperm.xlu0 %11691, %v11995_v10   ;;  %v12001_v27 = vpop.eup %12000  ;;  %v6259_v11 = vld [vmem:[#allocation3 + $0x78] sm:$0xff]  ;;  %v7045_v57 = vmul.f32 %v17970_v50, %v6661_v9  ;;  %v6356_v19 = vmul.f32 %v17972_v35, %v6292_v40  ;;  %v6679_v17 = vld [vmem:[#allocation4 + $0x190] sm:$0xff]  ;;  %v17977_v40 = vld [vmem:[#allocation85_spill] sm:$0xff] }
 0x3e5   : > { %v6534_v24 = vadd.f32 %v6441_v6, %v6342_v31  ;;  %v7713_v13 = vld [vmem:[#allocation3 + $0xa8] sm:$0xff]  ;;  %v6664_v62 = vld [vmem:[#allocation4 + $0x118] sm:$0xff]  ;;  %v17974_v9 = vld [vmem:[#allocation139_spill] sm:$0xff] }
 0x3e6   : > { %6574 = vst.msk [vmem:[#allocation3 + $0x48] sm:$0xff] %vm284_vm2, %v6509_v45  ;;  %12014 = vrcp.f32 %v7713_v13  ;;  %v7716_v45 = vld [vmem:[#allocation3 + $0xc0] sm:$0xff]  ;;  %v6275_v50 = vld [vmem:[#allocation3 + $0xf8] sm:$0xff] }
 0x3e7   : > { %6599 = vst.msk [vmem:[#allocation3 + $0x110] sm:$0xff] %vm284_vm2, %v6534_v24  ;;  %v6427_v46 = vpop.xlane.xlu1 %6426  ;;  %v12003_v32 = vpop.eup %12002  ;;  %12016 = vrcp.f32 %v7718_v56  ;;  %v17971_v24 = vld [vmem:[#allocation145_spill] sm:$0xff]  ;;  %v7046_v56 = vmul.f32 %v17974_v9, %v6662_v20  ;;  %v6273_v9 = vld [vmem:[#allocation3 + $0xe8] sm:$0xff] }
 0x3e8   : > { %v6437_v14 = vpop.xlane.xlu0 %6436  ;;  %v6527_v53 = vadd.f32 %v6427_v46, %v6335_v44  ;;  %7906 = vperm.xlu1 %11690, %v11997_v41   ;;  %7971 = vperm.xlu0 %11691, %v11999_v42   ;;  %v12005_v6 = vpop.eup %12004  ;;  %v6323_v41 = vmul.f32 %v17971_v24, %v6259_v11  ;;  %v17978_v24 = vld [vmem:[#allocation142_spill] sm:$0xff] }
 0x3e9   : > { %v6532_v3 = vadd.f32 %v6437_v14, %v6340_v38  ;;  %v7703_v43 = vld [vmem:[#allocation3 + $0x58] sm:$0xff]  ;;  %v7048_v38 = vmul.f32 %v17973_v60, %v6664_v62  ;;  %v7063_v62 = vmul.f32 %v17977_v40, %v6679_v17  ;;  %v7704_v60 = vld [vmem:[#allocation3 + $0x60] sm:$0xff]  ;;  %v7722_v40 = vld [vmem:[#allocation3 + $0xf0] sm:$0xff] }
 0x3ea   : > { %6592 = vst.msk [vmem:[#allocation3 + $0xd8] sm:$0xff] %vm284_vm2, %v6527_v53  ;;  %12018 = vrcp.f32 %v7703_v43 }
 0x3eb   : > { %6597 = vst.msk [vmem:[#allocation3 + $0x100] sm:$0xff] %vm284_vm2, %v6532_v3  ;;  %v6423_v28 = vpop.xlane.xlu1 %6422  ;;  %v12007_v44 = vpop.eup %12006  ;;  %12020 = vrcp.f32 %v7716_v45 }
 0x3ec   : > { %v6473_v25 = vpop.xlane.xlu0 %6472  ;;  %v6525_v34 = vadd.f32 %v6423_v28, %v6333_v26  ;;  %v11547_v31 = vpop.f32.mrf.mxu0  ;;  %7996 = vperm.xlu1 %11690, %v12001_v27   ;;  %7921 = vperm.xlu0 %11691, %v12003_v32   ;;  %v17976_v28 = vld [vmem:[#allocation20_spill] sm:$0xff] }
 0x3ed   : > { %v6550_v10 = vadd.f32 %v6473_v25, %v6358_v36  ;;  %v7531_v18 = vadd.f32 %v11547_v31, %v7047_v58  ;;  %v7701_v42 = vld [vmem:[#allocation3 + $0x48] sm:$0xff]  ;;  %v12009_v26 = vpop.eup %12008  ;;  %v7706_v36 = vld [vmem:[#allocation3 + $0x70] sm:$0xff]  ;;  %v17975_v58 = vld [vmem:[#allocation149_spill] sm:$0xff]  ;;  %v6346_v11 = vmul.f32 %v17976_v28, %v6282_v1 }
 0x3ee   : > { %6590 = vst.msk [vmem:[#allocation3 + $0xc8] sm:$0xff] %vm284_vm2, %v6525_v34  ;;  %v7337_v61 = vpop.f32.mrf.mxu0  ;;  %12022 = vrcp.f32 %v7701_v42  ;;  %v6321_v43 = vmul.f32 %v17975_v58, %v6257_v8  ;;  %v17979_v42 = vld [vmem:[#allocation154_spill] sm:$0xff]  ;;  %v17981_v1 = vld [vmem:[#allocation128_spill] sm:$0xff]  ;;  %v17982_v58 = vld [vmem:[#allocation127_spill] sm:$0xff] }
 0x3ef   : > { %6615 = vst.msk [vmem:[#allocation3 + $0x190] sm:$0xff] %vm284_vm2, %v6550_v10  ;;  %v7529_v13 = vadd.f32 %v7337_v61, %v7045_v57  ;;  %v6403_v46 = vpop.xlane.xlu1 %6402  ;;  %v12011_v25 = vpop.eup %12010  ;;  %12024 = vrcp.f32 %v7706_v36 }
 0x3f0   : > { %7595 = vst.msk [vmem:[#allocation4 + $0x110] sm:$0xff] %vm413_vm0, %v7531_v18  ;;  %v6469_v14 = vpop.xlane.xlu0 %6468  ;;  %v6515_v53 = vadd.f32 %v6403_v46, %v6323_v41  ;;  %v11548_v3 = vpop.f32.mrf.mxu0  ;;  %7986 = vperm.xlu1 %11690, %v12005_v6   ;;  %7911 = vperm.xlu0 %11691, %v12007_v44   ;;  %v6280_v18 = vld [vmem:[#allocation3 + $0x120] sm:$0xff]  ;;  %v6680_v6 = vld [vmem:[#allocation4 + $0x198] sm:$0xff]  ;;  %v7061_v41 = vmul.f32 %v17978_v24, %v6677_v2  ;;  %v6678_v44 = vld [vmem:[#allocation4 + $0x188] sm:$0xff] }
 0x3f1   : > { %v6548_v27 = vadd.f32 %v6469_v14, %v6356_v19  ;;  %7593 = vst.msk [vmem:[#allocation4 + $0x100] sm:$0xff] %vm413_vm0, %v7529_v13  ;;  %v7532_v12 = vadd.f32 %v11548_v3, %v7048_v38  ;;  %v7719_v34 = vld [vmem:[#allocation3 + $0xd8] sm:$0xff]  ;;  %v12013_v19 = vpop.eup %12012  ;;  %v6339_v13 = vmul.f32 %v17979_v42, %v6275_v50  ;;  %v17980_v46 = vld [vmem:[#allocation98_spill] sm:$0xff]  ;;  %v7064_v17 = vmul.f32 %v17981_v1, %v6680_v6 }
 0x3f2   : > { %6580 = vst.msk [vmem:[#allocation3 + $0x78] sm:$0xff] %vm284_vm2, %v6515_v53  ;;  %v7340_v32 = vpop.f32.mrf.mxu0  ;;  %12026 = vrcp.f32 %v7719_v34  ;;  %v6344_v8 = vmul.f32 %v17980_v46, %v6280_v18  ;;  %v17983_v34 = vld [vmem:[#allocation158_spill] sm:$0xff]  ;;  %v7720_v46 = vld [vmem:[#allocation3 + $0xe0] sm:$0xff] }
 0x3f3   : > { %6613 = vst.msk [vmem:[#allocation3 + $0x180] sm:$0xff] %vm284_vm2, %v6548_v27  ;;  %v7530_v31 = vadd.f32 %v7340_v32, %v7046_v56  ;;  %v6399_v10 = vpop.xlane.xlu1 %6398  ;;  %v12015_v14 = vpop.eup %12014  ;;  %12028 = vrcp.f32 %v7704_v60 }
 0x3f4   : > { %7596 = vst.msk [vmem:[#allocation4 + $0x118] sm:$0xff] %vm413_vm0, %v7532_v12  ;;  %v6449_v57 = vpop.xlane.xlu0 %6448  ;;  %v6513_v20 = vadd.f32 %v6399_v10, %v6321_v43  ;;  %v11579_v45 = vpop.f32.mrf.mxu1  ;;  %7936 = vperm.xlu1 %11690, %v12009_v26   ;;  %8001 = vperm.xlu0 %11691, %v12011_v25   ;;  %v6298_v12 = vld [vmem:[#allocation3 + $0x1b0] sm:$0xff]  ;;  %v7062_v43 = vmul.f32 %v17982_v58, %v6678_v44  ;;  %v6665_v25 = vld [vmem:[#allocation4 + $0x120] sm:$0xff]  ;;  %v17984_v10 = vld [vmem:[#allocation100_spill] sm:$0xff] }
 0x3f5   : > { %v6538_v61 = vadd.f32 %v6449_v57, %v6346_v11  ;;  %7594 = vst.msk [vmem:[#allocation4 + $0x108] sm:$0xff] %vm413_vm0, %v7530_v31  ;;  %v7547_v35 = vadd.f32 %v11579_v45, %v7063_v62  ;;  %v7717_v53 = vld [vmem:[#allocation3 + $0xc8] sm:$0xff]  ;;  %v6667_v26 = vld [vmem:[#allocation4 + $0x130] sm:$0xff]  ;;  %v12017_v11 = vpop.eup %12016  ;;  %v6337_v31 = vmul.f32 %v17983_v34, %v6273_v9  ;;  %v6362_v50 = vmul.f32 %v17984_v10, %v6298_v12  ;;  %v17988_v10 = vld [vmem:[#allocation113_spill] sm:$0xff] }
 0x3f6   : > { %6578 = vst.msk [vmem:[#allocation3 + $0x68] sm:$0xff] %vm284_vm2, %v6513_v20  ;;  %v7434_v38 = vpop.f32.mrf.mxu1  ;;  %12030 = vrcp.f32 %v7717_v53  ;;  %v7051_v18 = vmul.f32 %v15639_v39, %v6667_v26  ;;  %v6277_v26 = vld [vmem:[#allocation3 + $0x108] sm:$0xff]  ;;  %v7726_v34 = vld [vmem:[#allocation3 + $0x110] sm:$0xff] }
 0x3f7   : > { %6603 = vst.msk [vmem:[#allocation3 + $0x130] sm:$0xff] %vm284_vm2, %v6538_v61  ;;  %v7545_v3 = vadd.f32 %v7434_v38, %v7061_v41  ;;  %v6435_v27 = vpop.xlane.xlu1 %6434  ;;  %v12019_v57 = vpop.eup %12018  ;;  %v6279_v61 = vld [vmem:[#allocation3 + $0x118] sm:$0xff]  ;;  %v6296_v41 = vld [vmem:[#allocation3 + $0x1a0] sm:$0xff]  ;;  %v7049_v38 = vmul.f32 %v15711_v16, %v6665_v25  ;;  %12032 = vrcp.f32 %v7722_v40 }
 0x3f8   : > { %7611 = vst.msk [vmem:[#allocation4 + $0x190] sm:$0xff] %vm413_vm0, %v7547_v35  ;;  %v6445_v56 = vpop.xlane.xlu0 %6444  ;;  %v6531_v2 = vadd.f32 %v6435_v27, %v6339_v13  ;;  %v11580_v36 = vpop.f32.mrf.mxu1  ;;  %7926 = vperm.xlu1 %11690, %v12013_v19   ;;  %7991 = vperm.xlu0 %11691, %v12015_v14   ;;  %v6668_v35 = vld [vmem:[#allocation4 + $0x138] sm:$0xff]  ;;  %v6666_v13 = vld [vmem:[#allocation4 + $0x128] sm:$0xff]  ;;  %v17987_v27 = vld [vmem:[#allocation39_spill] sm:$0xff] }
 0x3f9   : > { %v6536_v32 = vadd.f32 %v6445_v56, %v6344_v8  ;;  %7609 = vst.msk [vmem:[#allocation4 + $0x180] sm:$0xff] %vm413_vm0, %v7545_v3  ;;  %v7548_v28 = vadd.f32 %v11580_v36, %v7064_v17  ;;  %v7707_v6 = vld [vmem:[#allocation3 + $0x78] sm:$0xff]  ;;  %v12021_v42 = vpop.eup %12020  ;;  %v17986_v17 = vld [vmem:[#allocation103_spill] sm:$0xff]  ;;  %v7052_v16 = vmul.f32 %v17987_v27, %v6668_v35  ;;  %v6284_v35 = vld [vmem:[#allocation3 + $0x140] sm:$0xff] }
 0x3fa   : > { %6596 = vst.msk [vmem:[#allocation3 + $0xf8] sm:$0xff] %vm284_vm2, %v6531_v2  ;;  %v7437_v62 = vpop.f32.mrf.mxu1  ;;  %12034 = vrcp.f32 %v7707_v6  ;;  %v17985_v14 = vld [vmem:[#allocation112_spill] sm:$0xff]  ;;  %v6360_v53 = vmul.f32 %v17986_v17, %v6296_v41  ;;  %v6286_v36 = vld [vmem:[#allocation3 + $0x150] sm:$0xff] }
 0x3fb   : > { %6601 = vst.msk [vmem:[#allocation3 + $0x120] sm:$0xff] %vm284_vm2, %v6536_v32  ;;  %v7546_v20 = vadd.f32 %v7437_v62, %v7062_v43  ;;  %v6431_v45 = vpop.xlane.xlu1 %6430  ;;  %v6343_v1 = vmul.f32 %v17985_v14, %v6279_v61  ;;  %v12023_v3 = vpop.eup %12022  ;;  %v6683_v32 = vld [vmem:[#allocation4 + $0x1b0] sm:$0xff]  ;;  %12036 = vrcp.f32 %v7720_v46  ;;  %v6681_v62 = vld [vmem:[#allocation4 + $0x1a0] sm:$0xff]  ;;  %v17990_v14 = vld [vmem:[#allocation110_spill] sm:$0xff] }
 0x3fc   : > { %7612 = vst.msk [vmem:[#allocation4 + $0x198] sm:$0xff] %vm413_vm0, %v7548_v28  ;;  %v6481_v24 = vpop.xlane.xlu0 %6480  ;;  %v6529_v19 = vadd.f32 %v6431_v45, %v6337_v31  ;;  %v11551_v44 = vpop.f32.mrf.mxu0  ;;  %8016 = vperm.xlu1 %11690, %v12017_v11   ;;  %7941 = vperm.xlu0 %11691, %v12019_v57   ;;  %v7050_v11 = vmul.f32 %v15645_v22, %v6666_v13  ;;  %v17989_v57 = vld [vmem:[#allocation23_spill] sm:$0xff]  ;;  %v6682_v13 = vld [vmem:[#allocation4 + $0x1a8] sm:$0xff]  ;;  %v7724_v46 = vld [vmem:[#allocation3 + $0x100] sm:$0xff] }
 0x3fd   : > { %v6554_v60 = vadd.f32 %v6481_v24, %v6362_v50  ;;  %7610 = vst.msk [vmem:[#allocation4 + $0x188] sm:$0xff] %vm413_vm0, %v7546_v20  ;;  %v7535_v39 = vadd.f32 %v11551_v44, %v7051_v18  ;;  %v7705_v9 = vld [vmem:[#allocation3 + $0x68] sm:$0xff]  ;;  %v12025_v40 = vpop.eup %12024  ;;  %v6341_v50 = vmul.f32 %v17988_v10, %v6277_v26  ;;  %v6350_v18 = vmul.f32 %v17989_v57, %v6286_v36  ;;  %v6295_v24 = vld [vmem:[#allocation3 + $0x198] sm:$0xff]  ;;  %v17991_v17 = vld [vmem:[#allocation111_spill] sm:$0xff] }
 0x3fe   : > { %6594 = vst.msk [vmem:[#allocation3 + $0xe8] sm:$0xff] %vm284_vm2, %v6529_v19  ;;  %v7353_v8 = vpop.f32.mrf.mxu0  ;;  %12038 = vrcp.f32 %v7705_v9  ;;  %v7067_v22 = vmul.f32 %v15723_v59, %v6683_v32  ;;  %v6684_v19 = vld [vmem:[#allocation4 + $0x1b8] sm:$0xff]  ;;  %v6302_v26 = vld [vmem:[#allocation3 + $0x1d0] sm:$0xff] }
 0x3ff   : > { %6619 = vst.msk [vmem:[#allocation3 + $0x1b0] sm:$0xff] %vm284_vm2, %v6554_v60  ;;  %v7533_v56 = vadd.f32 %v7353_v8, %v7049_v38  ;;  %v6443_v12 = vpop.xlane.xlu1 %6442  ;;  %v12027_v6 = vpop.eup %12026  ;;  %12040 = vrcp.f32 %v7726_v34 }
 0x400   : > { %7599 = vst.msk [vmem:[#allocation4 + $0x130] sm:$0xff] %vm413_vm0, %v7535_v39  ;;  %v6477_v2 = vpop.xlane.xlu0 %6476  ;;  %v6535_v58 = vadd.f32 %v6443_v12, %v6343_v1  ;;  %v11552_v43 = vpop.f32.mrf.mxu0  ;;  %8006 = vperm.xlu1 %11690, %v12021_v42   ;;  %7931 = vperm.xlu0 %11691, %v12023_v3   ;;  %v7065_v39 = vmul.f32 %v15739_v48, %v6681_v62  ;;  %v17992_v62 = vld [vmem:[#allocation83_spill] sm:$0xff] }
 0x401   : > { %v6552_v28 = vadd.f32 %v6477_v2, %v6360_v53  ;;  %7597 = vst.msk [vmem:[#allocation4 + $0x120] sm:$0xff] %vm413_vm0, %v7533_v56  ;;  %v7536_v25 = vadd.f32 %v11552_v43, %v7052_v16  ;;  %v7723_v20 = vld [vmem:[#allocation3 + $0xf8] sm:$0xff]  ;;  %v12029_v42 = vpop.eup %12028  ;;  %v6359_v1 = vmul.f32 %v17990_v14, %v6295_v24  ;;  %v6348_v53 = vmul.f32 %v17991_v17, %v6284_v35  ;;  %v6293_v56 = vld [vmem:[#allocation3 + $0x188] sm:$0xff]  ;;  %v6671_v2 = vld [vmem:[#allocation4 + $0x150] sm:$0xff] }
 0x402   : > { %6600 = vst.msk [vmem:[#allocation3 + $0x118] sm:$0xff] %vm284_vm2, %v6535_v58  ;;  %v7356_v31 = vpop.f32.mrf.mxu0  ;;  %12042 = vrcp.f32 %v7723_v20  ;;  %v7068_v48 = vmul.f32 %v15660_v23, %v6684_v19  ;;  %v7066_v43 = vmul.f32 %v15677_v52, %v6682_v13  ;;  %v6357_v34 = vmul.f32 %v17992_v62, %v6293_v56  ;;  %v17995_v13 = vld [vmem:[#allocation120_spill] sm:$0xff]  ;;  %v6288_v62 = vld [vmem:[#allocation3 + $0x160] sm:$0xff] }
 0x403   : > { %6617 = vst.msk [vmem:[#allocation3 + $0x1a0] sm:$0xff] %vm284_vm2, %v6552_v28  ;;  %v7534_v45 = vadd.f32 %v7356_v31, %v7050_v11  ;;  %v6439_v61 = vpop.xlane.xlu1 %6438  ;;  %v12031_v3 = vpop.eup %12030  ;;  %12044 = vrcp.f32 %v7724_v46  ;;  %v6669_v11 = vld [vmem:[#allocation4 + $0x140] sm:$0xff]  ;;  %v7055_v52 = vmul.f32 %v15751_v33, %v6671_v2 }
 0x404   : > { %7600 = vst.msk [vmem:[#allocation4 + $0x138] sm:$0xff] %vm413_vm0, %v7536_v25  ;;  %v6457_v41 = vpop.xlane.xlu0 %6456  ;;  %v6533_v44 = vadd.f32 %v6439_v61, %v6341_v50  ;;  %v11583_v60 = vpop.f32.mrf.mxu1  ;;  %7956 = vperm.xlu1 %11690, %v12025_v40   ;;  %8021 = vperm.xlu0 %11691, %v12027_v6   ;;  %v7742_v25 = vld [vmem:[#allocation3 + $0x190] sm:$0xff]  ;;  %v17993_v31 = vld [vmem:[#allocation29_spill] sm:$0xff]  ;;  %v6672_v61 = vld [vmem:[#allocation4 + $0x158] sm:$0xff]  ;;  %v7053_v19 = vmul.f32 %v15763_v7, %v6669_v11 }
 0x405   : > { %v6542_v38 = vadd.f32 %v6457_v41, %v6350_v18  ;;  %7598 = vst.msk [vmem:[#allocation4 + $0x128] sm:$0xff] %vm413_vm0, %v7534_v45  ;;  %v7551_v59 = vadd.f32 %v11583_v60, %v7067_v22  ;;  %v7721_v27 = vld [vmem:[#allocation3 + $0xe8] sm:$0xff]  ;;  %v12033_v28 = vpop.eup %12032  ;;  %v6366_v10 = vmul.f32 %v17993_v31, %v6302_v26  ;;  %v6283_v22 = vld [vmem:[#allocation3 + $0x138] sm:$0xff]  ;;  %v6300_v45 = vld [vmem:[#allocation3 + $0x1c0] sm:$0xff]  ;;  %v7056_v7 = vmul.f32 %v15695_v51, %v6672_v61 }
 0x406   : > { %6598 = vst.msk [vmem:[#allocation3 + $0x108] sm:$0xff] %vm284_vm2, %v6533_v44  ;;  %v7450_v8 = vpop.f32.mrf.mxu1  ;;  %12046 = vrcp.f32 %v7721_v27  ;;  %v6670_v60 = vld [vmem:[#allocation4 + $0x148] sm:$0xff]  ;;  %v6364_v46 = vmul.f32 %v17995_v13, %v6300_v45  ;;  %v7730_v26 = vld [vmem:[#allocation3 + $0x130] sm:$0xff] }
 0x407   : > { %6607 = vst.msk [vmem:[#allocation3 + $0x150] sm:$0xff] %vm284_vm2, %v6542_v38  ;;  %v7549_v16 = vadd.f32 %v7450_v8, %v7065_v39  ;;  %v6475_v9 = vpop.xlane.xlu1 %6474  ;;  %v12035_v50 = vpop.eup %12034  ;;  %12048 = vrcp.f32 %v7742_v25  ;;  %v7740_v38 = vld [vmem:[#allocation3 + $0x180] sm:$0xff]  ;;  %v7054_v56 = vmul.f32 %v15706_v55, %v6670_v60  ;;  %v6299_v25 = vld [vmem:[#allocation3 + $0x1b8] sm:$0xff] }
 0x408   : > { %7615 = vst.msk [vmem:[#allocation4 + $0x1b0] sm:$0xff] %vm413_vm0, %v7551_v59  ;;  %v6453_v12 = vpop.xlane.xlu0 %6452  ;;  %v6551_v36 = vadd.f32 %v6475_v9, %v6359_v1  ;;  %v11584_v32 = vpop.f32.mrf.mxu1  ;;  %7946 = vperm.xlu1 %11690, %v12029_v42   ;;  %8011 = vperm.xlu0 %11691, %v12031_v3   ;;  %v17994_v59 = vld [vmem:[#allocation86_spill] sm:$0xff] }
 0x409   : > { %v6540_v58 = vadd.f32 %v6453_v12, %v6348_v53  ;;  %7613 = vst.msk [vmem:[#allocation4 + $0x1a0] sm:$0xff] %vm413_vm0, %v7549_v16  ;;  %v7552_v23 = vadd.f32 %v11584_v32, %v7068_v48  ;;  %v7727_v57 = vld [vmem:[#allocation3 + $0x118] sm:$0xff]  ;;  %v12037_v44 = vpop.eup %12036  ;;  %v6347_v42 = vmul.f32 %v17994_v59, %v6283_v22  ;;  %v6281_v53 = vld [vmem:[#allocation3 + $0x128] sm:$0xff]  ;;  %v6290_v48 = vld [vmem:[#allocation3 + $0x170] sm:$0xff] }
 0x40a   : > { %6616 = vst.msk [vmem:[#allocation3 + $0x198] sm:$0xff] %vm284_vm2, %v6551_v36  ;;  %v7453_v40 = vpop.f32.mrf.mxu1  ;;  %12050 = vrcp.f32 %v7727_v57  ;;  %v17996_v36 = vld [vmem:[#allocation90_spill] sm:$0xff]  ;;  %v7728_v57 = vld [vmem:[#allocation3 + $0x120] sm:$0xff] }
 0x40b   : > { %6605 = vst.msk [vmem:[#allocation3 + $0x140] sm:$0xff] %vm284_vm2, %v6540_v58  ;;  %v7550_v18 = vadd.f32 %v7453_v40, %v7066_v43  ;;  %v6471_v6 = vpop.xlane.xlu1 %6470  ;;  %v12039_v8 = vpop.eup %12038  ;;  %12052 = vrcp.f32 %v7740_v38  ;;  %v6345_v32 = vmul.f32 %v17996_v36, %v6281_v53  ;;  %v17997_v58 = vld [vmem:[#allocation31_spill] sm:$0xff]  ;;  %v17999_v22 = vld [vmem:[#allocation33_spill] sm:$0xff] }
 0x40c   : > { %7616 = vst.msk [vmem:[#allocation4 + $0x1b8] sm:$0xff] %vm413_vm0, %v7552_v23  ;;  %v6489_v20 = vpop.xlane.xlu0 %6488  ;;  %v6549_v24 = vadd.f32 %v6471_v6, %v6357_v34  ;;  %v11555_v41 = vpop.f32.mrf.mxu0  ;;  %8036 = vperm.xlu1 %11690, %v12033_v28   ;;  %7961 = vperm.xlu0 %11691, %v12035_v50   ;;  %v6354_v43 = vmul.f32 %v17997_v58, %v6290_v48  ;;  %v6687_v34 = vld [vmem:[#allocation4 + $0x1d0] sm:$0xff] }
 0x40d   : > { %v6558_v35 = vadd.f32 %v6489_v20, %v6366_v10  ;;  %7614 = vst.msk [vmem:[#allocation4 + $0x1a8] sm:$0xff] %vm413_vm0, %v7550_v18  ;;  %v7539_v33 = vadd.f32 %v11555_v41, %v7055_v52  ;;  %v7725_v14 = vld [vmem:[#allocation3 + $0x108] sm:$0xff]  ;;  %v12041_v51 = vpop.eup %12040  ;;  %v6685_v52 = vld [vmem:[#allocation4 + $0x1c0] sm:$0xff]  ;;  %v6352_v20 = vmul.f32 %v17999_v22, %v6288_v62  ;;  %v7071_v61 = vmul.f32 %v15772_v30, %v6687_v34 }
 0x40e   : > { %6614 = vst.msk [vmem:[#allocation3 + $0x188] sm:$0xff] %vm284_vm2, %v6549_v24  ;;  %v7369_v39 = vpop.f32.mrf.mxu0  ;;  %12054 = vrcp.f32 %v7725_v14  ;;  %v17998_v18 = vld [vmem:[#allocation89_spill] sm:$0xff]  ;;  %v7069_v59 = vmul.f32 %v15782_v0, %v6685_v52  ;;  %v6285_v62 = vld [vmem:[#allocation3 + $0x148] sm:$0xff]  ;;  %v7734_v52 = vld [vmem:[#allocation3 + $0x150] sm:$0xff] }
 0x40f   : > { %6623 = vst.msk [vmem:[#allocation3 + $0x1d0] sm:$0xff] %vm284_vm2, %v6558_v35  ;;  %v7537_v1 = vadd.f32 %v7369_v39, %v7053_v19  ;;  %v6451_v17 = vpop.xlane.xlu1 %6450  ;;  %v12043_v23 = vpop.eup %12042  ;;  %12056 = vrcp.f32 %v7730_v26  ;;  %v6363_v6 = vmul.f32 %v17998_v18, %v6299_v25  ;;  %v6297_v35 = vld [vmem:[#allocation3 + $0x1a8] sm:$0xff] }
 0x410   : > { %7603 = vst.msk [vmem:[#allocation4 + $0x150] sm:$0xff] %vm413_vm0, %v7539_v33  ;;  %v6485_v3 = vpop.xlane.xlu0 %6484  ;;  %v6539_v27 = vadd.f32 %v6451_v17, %v6347_v42  ;;  %v11556_v16 = vpop.f32.mrf.mxu0  ;;  %8026 = vperm.xlu1 %11690, %v12037_v44   ;;  %7951 = vperm.xlu0 %11691, %v12039_v8   ;;  %v6306_v33 = vld [vmem:[#allocation3 + $0x1f0] sm:$0xff]  ;;  %v6688_v44 = vld [vmem:[#allocation4 + $0x1d8] sm:$0xff] }
 0x411   : > { %v6556_v9 = vadd.f32 %v6485_v3, %v6364_v46  ;;  %7601 = vst.msk [vmem:[#allocation4 + $0x140] sm:$0xff] %vm413_vm0, %v7537_v1  ;;  %v7540_v12 = vadd.f32 %v11556_v16, %v7056_v7  ;;  %v7743_v28 = vld [vmem:[#allocation3 + $0x198] sm:$0xff]  ;;  %v12045_v50 = vpop.eup %12044  ;;  %v6686_v46 = vld [vmem:[#allocation4 + $0x1c8] sm:$0xff]  ;;  %v7746_v8 = vld [vmem:[#allocation3 + $0x1b0] sm:$0xff]  ;;  %v7072_v3 = vmul.f32 %v15714_v63, %v6688_v44 }
 0x412   : > { %6604 = vst.msk [vmem:[#allocation3 + $0x138] sm:$0xff] %vm284_vm2, %v6539_v27  ;;  %v7372_v2 = vpop.f32.mrf.mxu0  ;;  %12058 = vrcp.f32 %v7743_v28  ;;  %v18000_v7 = vld [vmem:[#allocation93_spill] sm:$0xff]  ;;  %v18001_v1 = vld [vmem:[#allocation135_spill] sm:$0xff]  ;;  %v6287_v16 = vld [vmem:[#allocation3 + $0x158] sm:$0xff] }
 0x413   : > { %6621 = vst.msk [vmem:[#allocation3 + $0x1c0] sm:$0xff] %vm284_vm2, %v6556_v9  ;;  %v7538_v55 = vadd.f32 %v7372_v2, %v7054_v56  ;;  %v6447_v11 = vpop.xlane.xlu1 %6446  ;;  %v12047_v45 = vpop.eup %12046  ;;  %12060 = vrcp.f32 %v7728_v57  ;;  %v6361_v14 = vmul.f32 %v18000_v7, %v6297_v35  ;;  %v6370_v17 = vmul.f32 %v18001_v1, %v6306_v33  ;;  %v6304_v56 = vld [vmem:[#allocation3 + $0x1e0] sm:$0xff]  ;;  %v18004_v57 = vld [vmem:[#allocation95_spill] sm:$0xff]  ;;  %v18005_v35 = vld [vmem:[#allocation96_spill] sm:$0xff] }
 0x414   : > { %7604 = vst.msk [vmem:[#allocation4 + $0x158] sm:$0xff] %vm413_vm0, %v7540_v12  ;;  %v6465_v40 = vpop.xlane.xlu0 %6464  ;;  %v6537_v31 = vadd.f32 %v6447_v11, %v6345_v32  ;;  %8056 = vperm.xlu1 %11690, %v12041_v51   ;;  %8041 = vperm.xlu0 %11691, %v12043_v23   ;;  %v12049_v13 = vpop.eup %12048  ;;  %v7070_v2 = vmul.f32 %v15729_v54, %v6686_v46  ;;  %v7744_v32 = vld [vmem:[#allocation3 + $0x1a0] sm:$0xff] }
 0x415   : > { %v6546_v10 = vadd.f32 %v6465_v40, %v6354_v43  ;;  %7602 = vst.msk [vmem:[#allocation4 + $0x148] sm:$0xff] %vm413_vm0, %v7538_v55  ;;  %v7741_v24 = vld [vmem:[#allocation3 + $0x188] sm:$0xff]  ;;  %v18003_v28 = vld [vmem:[#allocation121_spill] sm:$0xff]  ;;  %v6349_v18 = vmul.f32 %v18004_v57, %v6285_v62 }
 0x416   : > { %6602 = vst.msk [vmem:[#allocation3 + $0x128] sm:$0xff] %vm284_vm2, %v6537_v31  ;;  %12062 = vrcp.f32 %v7741_v24  ;;  %v18002_v43 = vld [vmem:[#allocation22_spill] sm:$0xff]  ;;  %v6368_v55 = vmul.f32 %v18003_v28, %v6304_v56  ;;  %v7750_v46 = vld [vmem:[#allocation3 + $0x1d0] sm:$0xff] }
 0x417   : > { %6611 = vst.msk [vmem:[#allocation3 + $0x170] sm:$0xff] %vm284_vm2, %v6546_v10  ;;  %v6483_v41 = vpop.xlane.xlu1 %6482  ;;  %v12051_v53 = vpop.eup %12050  ;;  %12064 = vrcp.f32 %v7746_v8  ;;  %v6351_v23 = vmul.f32 %v18002_v43, %v6287_v16  ;;  %v18006_v8 = vld [vmem:[#allocation25_spill] sm:$0xff]  ;;  %v6674_v56 = vld [vmem:[#allocation4 + $0x168] sm:$0xff] }
 0x418   : > { %v6461_v19 = vpop.xlane.xlu0 %6460  ;;  %v6555_v60 = vadd.f32 %v6483_v41, %v6363_v6  ;;  %v11587_v38 = vpop.f32.mrf.mxu1  ;;  %8046 = vperm.xlu1 %11690, %v12045_v50   ;;  %8031 = vperm.xlu0 %11691, %v12047_v45   ;;  %v6303_v45 = vld [vmem:[#allocation3 + $0x1d8] sm:$0xff]  ;;  %v7732_v41 = vld [vmem:[#allocation3 + $0x140] sm:$0xff]  ;;  %v7058_v28 = vmul.f32 %v15756_v29, %v6674_v56  ;;  %v6691_v29 = vld [vmem:[#allocation4 + $0x1f0] sm:$0xff] }
 0x419   : > { %v6544_v39 = vadd.f32 %v6461_v19, %v6352_v20  ;;  %v7555_v42 = vadd.f32 %v11587_v38, %v7071_v61  ;;  %v7731_v48 = vld [vmem:[#allocation3 + $0x138] sm:$0xff]  ;;  %v12053_v63 = vpop.eup %12052  ;;  %v6367_v19 = vmul.f32 %v18005_v35, %v6303_v45  ;;  %v6301_v38 = vld [vmem:[#allocation3 + $0x1c8] sm:$0xff] }
 0x41a   : > { %6620 = vst.msk [vmem:[#allocation3 + $0x1b8] sm:$0xff] %vm284_vm2, %v6555_v60  ;;  %v7466_v30 = vpop.f32.mrf.mxu1  ;;  %12066 = vrcp.f32 %v7731_v48  ;;  %v6305_v35 = vld [vmem:[#allocation3 + $0x1e8] sm:$0xff] }
 0x41b   : > { %6609 = vst.msk [vmem:[#allocation3 + $0x160] sm:$0xff] %vm284_vm2, %v6544_v39  ;;  %v7553_v0 = vadd.f32 %v7466_v30, %v7069_v59  ;;  %v6479_v27 = vpop.xlane.xlu1 %6478  ;;  %v12055_v11 = vpop.eup %12054  ;;  %12068 = vrcp.f32 %v7744_v32  ;;  %v6675_v39 = vld [vmem:[#allocation4 + $0x170] sm:$0xff]  ;;  %v6365_v30 = vmul.f32 %v18006_v8, %v6301_v38 }
 0x41c   : > { %7619 = vst.msk [vmem:[#allocation4 + $0x1d0] sm:$0xff] %vm413_vm0, %v7555_v42  ;;  %v6497_v9 = vpop.xlane.xlu0 %6496  ;;  %v6553_v12 = vadd.f32 %v6479_v27, %v6361_v14  ;;  %v11588_v51 = vpop.f32.mrf.mxu1  ;;  %8136 = vperm.xlu1 %11690, %v12049_v13   ;;  %8061 = vperm.xlu0 %11691, %v12051_v53   ;;  %v6673_v13 = vld [vmem:[#allocation4 + $0x160] sm:$0xff]  ;;  %v7059_v14 = vmul.f32 %v15787_v5, %v6675_v39  ;;  %v6291_v53 = vld [vmem:[#allocation3 + $0x178] sm:$0xff]  ;;  %v18007_v5 = vld [vmem:[#allocation99_spill] sm:$0xff] }
 0x41d   : > { %v6562_v26 = vadd.f32 %v6497_v9, %v6370_v17  ;;  %7617 = vst.msk [vmem:[#allocation4 + $0x1c0] sm:$0xff] %vm413_vm0, %v7553_v0  ;;  %v7556_v36 = vadd.f32 %v11588_v51, %v7072_v3  ;;  %v7729_v25 = vld [vmem:[#allocation3 + $0x128] sm:$0xff]  ;;  %v12057_v50 = vpop.eup %12056  ;;  %v6676_v3 = vld [vmem:[#allocation4 + $0x178] sm:$0xff]  ;;  %v7057_v27 = vmul.f32 %v15798_v15, %v6673_v13 }
 0x41e   : > { %6618 = vst.msk [vmem:[#allocation3 + $0x1a8] sm:$0xff] %vm284_vm2, %v6553_v12  ;;  %v7469_v58 = vpop.f32.mrf.mxu1  ;;  %12070 = vrcp.f32 %v7729_v25  ;;  %v7748_v12 = vld [vmem:[#allocation3 + $0x1c0] sm:$0xff]  ;;  %v6289_v15 = vld [vmem:[#allocation3 + $0x168] sm:$0xff]  ;;  %v7738_v25 = vld [vmem:[#allocation3 + $0x170] sm:$0xff] }
 0x41f   : > { %6627 = vst.msk [vmem:[#allocation3 + $0x1f0] sm:$0xff] %vm284_vm2, %v6562_v26  ;;  %v7554_v54 = vadd.f32 %v7469_v58, %v7070_v2  ;;  %v6459_v40 = vpop.xlane.xlu1 %6458  ;;  %v12059_v6 = vpop.eup %12058  ;;  %12072 = vrcp.f32 %v7734_v52  ;;  %v6355_v26 = vmul.f32 %v18007_v5, %v6291_v53 }
 0x420   : > { %7620 = vst.msk [vmem:[#allocation4 + $0x1d8] sm:$0xff] %vm413_vm0, %v7556_v36  ;;  %v6493_v34 = vpop.xlane.xlu0 %6492  ;;  %v6543_v31 = vadd.f32 %v6459_v40, %v6351_v23  ;;  %8126 = vperm.xlu1 %11690, %v12053_v63   ;;  %8051 = vperm.xlu0 %11691, %v12055_v11   ;;  %v12061_v24 = vpop.eup %12060  ;;  %v7060_v36 = vmul.f32 %v15743_v4, %v6676_v3 }
 0x421   : > { %v6560_v10 = vadd.f32 %v6493_v34, %v6368_v55  ;;  %7618 = vst.msk [vmem:[#allocation4 + $0x1c8] sm:$0xff] %vm413_vm0, %v7554_v54  ;;  %v7747_v22 = vld [vmem:[#allocation3 + $0x1b8] sm:$0xff]  ;;  %v18008_v54 = vld [vmem:[#allocation114_spill] sm:$0xff] }
 0x422   : > { %6608 = vst.msk [vmem:[#allocation3 + $0x158] sm:$0xff] %vm284_vm2, %v6543_v31  ;;  %12074 = vrcp.f32 %v7747_v22  ;;  %v6353_v40 = vmul.f32 %v18008_v54, %v6289_v15  ;;  %v18009_v22 = vld [vmem:[#allocation108_spill] sm:$0xff] }
 0x423   : > { %6625 = vst.msk [vmem:[#allocation3 + $0x1e0] sm:$0xff] %vm284_vm2, %v6560_v10  ;;  %v6455_v20 = vpop.xlane.xlu1 %6454  ;;  %v12063_v33 = vpop.eup %12062  ;;  %12076 = vrcp.f32 %v7732_v41 }
 0x424   : > { %v6541_v61 = vadd.f32 %v6455_v20, %v6349_v18  ;;  %8076 = vperm.xlu1 %11690, %v12057_v50   ;;  %8141 = vperm.xlu0 %11691, %v12059_v6   ;;  %v12065_v42 = vpop.eup %12064  ;;  %v6307_v50 = vld [vmem:[#allocation3 + $0x1f8] sm:$0xff]  ;;  %v6689_v18 = vld [vmem:[#allocation4 + $0x1e0] sm:$0xff] }
 0x425   : > { %v7745_v44 = vld [vmem:[#allocation3 + $0x1a8] sm:$0xff]  ;;  %v7736_v6 = vld [vmem:[#allocation3 + $0x160] sm:$0xff]  ;;  %v6371_v20 = vmul.f32 %v18009_v22, %v6307_v50 }
 0x426   : > { %6606 = vst.msk [vmem:[#allocation3 + $0x148] sm:$0xff] %vm284_vm2, %v6541_v61  ;;  %12078 = vrcp.f32 %v7745_v44  ;;  %v7075_v61 = vmul.f32 %v15807_v37, %v6691_v29  ;;  %v18010_v37 = vld [vmem:[#allocation26_spill] sm:$0xff] }
 0x427   : > { %v6491_v60 = vpop.xlane.xlu1 %6490  ;;  %v12067_v7 = vpop.eup %12066  ;;  %12080 = vrcp.f32 %v7750_v46  ;;  %v6369_v46 = vmul.f32 %v18010_v37, %v6305_v35  ;;  %v7837_v37 = vld [vmem:[#allocation4 + $0x88] sm:$0xff] }
 0x428   : > { %v6559_v59 = vadd.f32 %v6491_v60, %v6367_v19  ;;  %8066 = vperm.xlu1 %11690, %v12061_v24   ;;  %8131 = vperm.xlu0 %11691, %v12063_v33   ;;  %v12069_v9 = vpop.eup %12068  ;;  %v6692_v19 = vld [vmem:[#allocation4 + $0x1f8] sm:$0xff]  ;;  %v7073_v60 = vmul.f32 %v15817_v47, %v6689_v18 }
 0x429   : > { %v7735_v1 = vld [vmem:[#allocation3 + $0x158] sm:$0xff] }
 0x42a   : > { %6624 = vst.msk [vmem:[#allocation3 + $0x1d8] sm:$0xff] %vm284_vm2, %v6559_v59  ;;  %12082 = vrcp.f32 %v7735_v1  ;;  %v6690_v59 = vld [vmem:[#allocation4 + $0x1e8] sm:$0xff] }
 0x42b   : > { %v6487_v17 = vpop.xlane.xlu1 %6486  ;;  %v12071_v2 = vpop.eup %12070  ;;  %12084 = vrcp.f32 %v7748_v12  ;;  %v7074_v53 = vmul.f32 %v15776_v21, %v6690_v59  ;;  %v7836_v59 = vld [vmem:[#allocation4 + $0x80] sm:$0xff] }
 0x42c   : > { %v6557_v48 = vadd.f32 %v6487_v17, %v6365_v30  ;;  %v11559_v0 = vpop.f32.mrf.mxu0  ;;  %8156 = vperm.xlu1 %11690, %v12065_v42   ;;  %8081 = vperm.xlu0 %11691, %v12067_v7   ;;  %v12073_v11 = vpop.eup %12072  ;;  %v7754_v42 = vld [vmem:[#allocation3 + $0x1f0] sm:$0xff]  ;;  %v7076_v30 = vmul.f32 %v15766_v49, %v6692_v19 }
 0x42d   : > { %v7543_v16 = vadd.f32 %v11559_v0, %v7059_v14  ;;  %v7733_v63 = vld [vmem:[#allocation3 + $0x148] sm:$0xff]  ;;  %v7752_v0 = vld [vmem:[#allocation3 + $0x1e0] sm:$0xff] }
 0x42e   : > { %6622 = vst.msk [vmem:[#allocation3 + $0x1c8] sm:$0xff] %vm284_vm2, %v6557_v48  ;;  %v7385_v51 = vpop.f32.mrf.mxu0  ;;  %12086 = vrcp.f32 %v7733_v63 }
 0x42f   : > { %7607 = vst.msk [vmem:[#allocation4 + $0x170] sm:$0xff] %vm413_vm0, %v7543_v16  ;;  %v7541_v32 = vadd.f32 %v7385_v51, %v7057_v27  ;;  %v6467_v58 = vpop.xlane.xlu1 %6466  ;;  %v12075_v62 = vpop.eup %12074  ;;  %12088 = vrcp.f32 %v7738_v25 }
 0x430   : > { %v6547_v43 = vadd.f32 %v6467_v58, %v6355_v26  ;;  %v11560_v23 = vpop.f32.mrf.mxu0  ;;  %8146 = vperm.xlu1 %11690, %v12069_v9   ;;  %8071 = vperm.xlu0 %11691, %v12071_v2   ;;  %v12077_v57 = vpop.eup %12076 }
 0x431   : > { %7605 = vst.msk [vmem:[#allocation4 + $0x160] sm:$0xff] %vm413_vm0, %v7541_v32  ;;  %v7544_v55 = vadd.f32 %v11560_v23, %v7060_v36  ;;  %v7751_v34 = vld [vmem:[#allocation3 + $0x1d8] sm:$0xff] }
 0x432   : > { %6612 = vst.msk [vmem:[#allocation3 + $0x178] sm:$0xff] %vm284_vm2, %v6547_v43  ;;  %v7388_v4 = vpop.f32.mrf.mxu0  ;;  %12090 = vrcp.f32 %v7751_v34 }
 0x433   : > { %7608 = vst.msk [vmem:[#allocation4 + $0x178] sm:$0xff] %vm413_vm0, %v7544_v55  ;;  %v7542_v31 = vadd.f32 %v7388_v4, %v7058_v28  ;;  %v6463_v10 = vpop.xlane.xlu1 %6462  ;;  %v12079_v45 = vpop.eup %12078  ;;  %12092 = vrcp.f32 %v7736_v6 }
 0x434   : > { %v6545_v52 = vadd.f32 %v6463_v10, %v6353_v40  ;;  %8096 = vperm.xlu1 %11690, %v12073_v11   ;;  %8161 = vperm.xlu0 %11691, %v12075_v62   ;;  %v12081_v39 = vpop.eup %12080 }
 0x435   : > { %7606 = vst.msk [vmem:[#allocation4 + $0x168] sm:$0xff] %vm413_vm0, %v7542_v31  ;;  %v7749_v24 = vld [vmem:[#allocation3 + $0x1c8] sm:$0xff] }
 0x436   : > { %6610 = vst.msk [vmem:[#allocation3 + $0x168] sm:$0xff] %vm284_vm2, %v6545_v52  ;;  %12094 = vrcp.f32 %v7749_v24 }
 0x437   : > { %v6499_v41 = vpop.xlane.xlu1 %6498  ;;  %v12083_v8 = vpop.eup %12082  ;;  %12096 = vrcp.f32 %v7754_v42  ;;  %v7820_v42 = vld [vmem:[#allocation4] sm:$0xff] }
 0x438   : > { %v6563_v33 = vadd.f32 %v6499_v41, %v6371_v20  ;;  %v11591_v44 = vpop.f32.mrf.mxu1  ;;  %8086 = vperm.xlu1 %11690, %v12077_v57   ;;  %8151 = vperm.xlu0 %11691, %v12079_v45   ;;  %v12085_v48 = vpop.eup %12084 }
 0x439   : > { %v7559_v38 = vadd.f32 %v11591_v44, %v7075_v61  ;;  %v7739_v7 = vld [vmem:[#allocation3 + $0x178] sm:$0xff] }
 0x43a   : > { %6628 = vst.msk [vmem:[#allocation3 + $0x1f8] sm:$0xff] %vm284_vm2, %v6563_v33  ;;  %v7482_v13 = vpop.f32.mrf.mxu1  ;;  %12098 = vrcp.f32 %v7739_v7 }
 0x43b   : > { %7623 = vst.msk [vmem:[#allocation4 + $0x1f0] sm:$0xff] %vm413_vm0, %v7559_v38  ;;  %v7557_v14 = vadd.f32 %v7482_v13, %v7073_v60  ;;  %v6495_v1 = vpop.xlane.xlu1 %6494  ;;  %v12087_v27 = vpop.eup %12086  ;;  %12100 = vrcp.f32 %v7752_v0  ;;  %v7822_v38 = vld [vmem:[#allocation4 + $0x10] sm:$0xff]  ;;  %v7839_v13 = vld [vmem:[#allocation4 + $0x98] sm:$0xff] }
 0x43c   : > { %v6561_v47 = vadd.f32 %v6495_v1, %v6369_v46  ;;  %v11592_v17 = vpop.f32.mrf.mxu1  ;;  %8176 = vperm.xlu1 %11690, %v12081_v39   ;;  %8101 = vperm.xlu0 %11691, %v12083_v8   ;;  %v12089_v21 = vpop.eup %12088  ;;  %v7838_v39 = vld [vmem:[#allocation4 + $0x90] sm:$0xff]  ;;  %v7821_v1 = vld [vmem:[#allocation4 + $0x8] sm:$0xff] }
 0x43d   : > { %7621 = vst.msk [vmem:[#allocation4 + $0x1e0] sm:$0xff] %vm413_vm0, %v7557_v14  ;;  %v7560_v3 = vadd.f32 %v11592_v17, %v7076_v30  ;;  %v7737_v16 = vld [vmem:[#allocation3 + $0x168] sm:$0xff]  ;;  %v7823_v14 = vld [vmem:[#allocation4 + $0x18] sm:$0xff]  ;;  %v7826_v0 = vld [vmem:[#allocation4 + $0x30] sm:$0xff] }
 0x43e   : > { %6626 = vst.msk [vmem:[#allocation3 + $0x1e8] sm:$0xff] %vm284_vm2, %v6561_v47  ;;  %v7485_v49 = vpop.f32.mrf.mxu1  ;;  %12102 = vrcp.f32 %v7737_v16  ;;  %v7842_v47 = vld [vmem:[#allocation4 + $0xb0] sm:$0xff]  ;;  %v7843_v16 = vld [vmem:[#allocation4 + $0xb8] sm:$0xff] }
 0x43f   : > { %7624 = vst.msk [vmem:[#allocation4 + $0x1f8] sm:$0xff] %vm413_vm0, %v7560_v3  ;;  %v7558_v9 = vadd.f32 %v7485_v49, %v7074_v53  ;;  %v12091_v56 = vpop.eup %12090  ;;  %v7897_v58 = vpop.permute.xlu1 %7896  ;;  %v7824_v49 = vld [vmem:[#allocation4 + $0x20] sm:$0xff] }
 0x440   : > { %8166 = vperm.xlu1 %11690, %v12085_v48   ;;  %8091 = vperm.xlu0 %11691, %v12087_v27   ;;  %v12093_v51 = vpop.eup %12092  ;;  %v16017_v30 = vmul.f32 %v7897_v58, %v7822_v38  ;;  %v7840_v27 = vld [vmem:[#allocation4 + $0xa0] sm:$0xff]  ;;  %v7830_v58 = vld [vmem:[#allocation4 + $0x50] sm:$0xff] }
 0x441   : > { %7622 = vst.msk [vmem:[#allocation4 + $0x1e8] sm:$0xff] %vm413_vm0, %v7558_v9  ;;  %v7755_v12 = vld [vmem:[#allocation3 + $0x1f8] sm:$0xff] }
 0x442   : > { %12104 = vrcp.f32 %v7755_v12 }
 0x443   : > { %v12095_v5 = vpop.eup %12094 }
 0x444   : > { %8116 = vperm.xlu1 %11690, %v12089_v21   ;;  %8181 = vperm.xlu0 %11691, %v12091_v56   ;;  %v12097_v2 = vpop.eup %12096 }
 0x445   : > { %v7753_v26 = vld [vmem:[#allocation3 + $0x1e8] sm:$0xff] }
 0x446   : > { %12106 = vrcp.f32 %v7753_v26  ;;  %v7841_v26 = vld [vmem:[#allocation4 + $0xa8] sm:$0xff] }
 0x447   : > { %v12099_v36 = vpop.eup %12098 }
 0x448   : > { %8106 = vperm.xlu1 %11690, %v12093_v51   ;;  %8171 = vperm.xlu0 %11691, %v12095_v5   ;;  %v12101_v63 = vpop.eup %12100  ;;  %v7827_v51 = vld [vmem:[#allocation4 + $0x38] sm:$0xff]  ;;  %v7825_v5 = vld [vmem:[#allocation4 + $0x28] sm:$0xff] }
 0x44b   : > { %v12103_v32 = vpop.eup %12102 }
 0x44c   : > { %8196 = vperm.xlu1 %11690, %v12097_v2   ;;  %8121 = vperm.xlu0 %11691, %v12099_v36   ;;  %v7854_v2 = vld [vmem:[#allocation4 + $0x110] sm:$0xff] }
 0x44f   : > { %v12105_v15 = vpop.eup %12104 }
 0x450   : > { %8186 = vperm.xlu1 %11690, %v12101_v63   ;;  %8111 = vperm.xlu0 %11691, %v12103_v32  }
 0x453   : > { %v7887_v43 = vpop.permute.xlu1 %7886  ;;  %v12107_v23 = vpop.eup %12106 }
 0x454   : > { %8201 = vperm.xlu0 %11691, %v12105_v15   ;;  %v16019_v7 = vmul.f32 %v7887_v43, %v7820_v42  ;;  %v7828_v15 = vld [vmem:[#allocation4 + $0x40] sm:$0xff]  ;;  %v7847_v42 = vld [vmem:[#allocation4 + $0xd8] sm:$0xff] }
 0x457   : > { %v7902_v28 = vpop.permute.xlu0 %7901  ;;  %v7977_v55 = vpop.permute.xlu1 %7976 }
 0x458   : > { %8191 = vperm.xlu0 %11691, %v12107_v23   ;;  %v16021_v17 = vmul.f32 %v7902_v28, %v7823_v14  ;;  %v16023_v53 = vmul.f32 %v7977_v55, %v7838_v39  ;;  %v7852_v28 = vld [vmem:[#allocation4 + $0x100] sm:$0xff] }
 0x45b   : > { %v7892_v11 = vpop.permute.xlu0 %7891  ;;  %v7967_v25 = vpop.permute.xlu1 %7966 }
 0x45c   : > { %v16025_v3 = vmul.f32 %v7892_v11, %v7821_v1  ;;  %v16027_v48 = vmul.f32 %v7967_v25, %v7836_v59  ;;  %v7844_v59 = vld [vmem:[#allocation4 + $0xc0] sm:$0xff]  ;;  %v7855_v1 = vld [vmem:[#allocation4 + $0x118] sm:$0xff] }
 0x45f   : > { %v7982_v4 = vpop.permute.xlu0 %7981  ;;  %v7917_v54 = vpop.permute.xlu1 %7916 }
 0x460   : > { %v16029_v9 = vmul.f32 %v7982_v4, %v7839_v13  ;;  %v16031_v21 = vmul.f32 %v7917_v54, %v7826_v0  ;;  %v7831_v54 = vld [vmem:[#allocation4 + $0x58] sm:$0xff]  ;;  %v7850_v0 = vld [vmem:[#allocation4 + $0xf0] sm:$0xff] }
 0x463   : > { %v7972_v40 = vpop.permute.xlu0 %7971  ;;  %v7907_v62 = vpop.permute.xlu1 %7906 }
 0x464   : > { %v16033_v56 = vmul.f32 %v7972_v40, %v7837_v37  ;;  %v16035_v12 = vmul.f32 %v7907_v62, %v7824_v49  ;;  %v7846_v40 = vld [vmem:[#allocation4 + $0xd0] sm:$0xff]  ;;  %v7829_v62 = vld [vmem:[#allocation4 + $0x48] sm:$0xff]  ;;  %v7848_v49 = vld [vmem:[#allocation4 + $0xe0] sm:$0xff] }
 0x467   : > { %v7922_v34 = vpop.permute.xlu0 %7921  ;;  %v7997_v31 = vpop.permute.xlu1 %7996 }
 0x468   : > { %v16037_v36 = vmul.f32 %v7922_v34, %v7827_v51  ;;  %v16039_v63 = vmul.f32 %v7997_v31, %v7842_v47  ;;  %v7870_v47 = vld [vmem:[#allocation4 + $0x190] sm:$0xff] }
 0x46b   : > { %v7912_v10 = vpop.permute.xlu0 %7911  ;;  %v7987_v50 = vpop.permute.xlu1 %7986 }
 0x46c   : > { %v16041_v32 = vmul.f32 %v7912_v10, %v7825_v5  ;;  %v16043_v11 = vmul.f32 %v7987_v50, %v7840_v27  ;;  %v7834_v50 = vld [vmem:[#allocation4 + $0x70] sm:$0xff] }
 0x46f   : > { %v8002_v29 = vpop.permute.xlu0 %8001  ;;  %v7937_v52 = vpop.permute.xlu1 %7936 }
 0x470   : > { %v16045_v25 = vmul.f32 %v8002_v29, %v7843_v16  ;;  %v16047_v4 = vmul.f32 %v7937_v52, %v7830_v58  ;;  %v7849_v58 = vld [vmem:[#allocation4 + $0xe8] sm:$0xff] }
 0x473   : > { %v7992_v57 = vpop.permute.xlu0 %7991  ;;  %v7927_v18 = vpop.permute.xlu1 %7926 }
 0x474   : > { %v16049_v31 = vmul.f32 %v7992_v57, %v7841_v26  ;;  %v16051_v10 = vmul.f32 %v7927_v18, %v7828_v15  ;;  %v7832_v57 = vld [vmem:[#allocation4 + $0x60] sm:$0xff] }
 0x477   : > { %v7942_v6 = vpop.permute.xlu0 %7941  ;;  %v8017_v22 = vpop.permute.xlu1 %8016 }
 0x478   : > { %v16053_v38 = vmul.f32 %v7942_v6, %v7831_v54  ;;  %v16055_v39 = vmul.f32 %v8017_v22, %v7846_v40  ;;  %v7835_v22 = vld [vmem:[#allocation4 + $0x78] sm:$0xff] }
 0x47b   : > { %v7932_v20 = vpop.permute.xlu0 %7931  ;;  %v8007_v45 = vpop.permute.xlu1 %8006 }
 0x47c   : > { %v16057_v13 = vmul.f32 %v7932_v20, %v7829_v62  ;;  %v16059_v29 = vmul.f32 %v8007_v45, %v7844_v59 }
 0x47f   : > { %v8022_v61 = vpop.permute.xlu0 %8021  ;;  %v7957_v24 = vpop.permute.xlu1 %7956 }
 0x480   : > { %v16061_v52 = vmul.f32 %v8022_v61, %v7847_v42  ;;  %v16063_v37 = vmul.f32 %v7957_v24, %v7834_v50  ;;  %v7833_v24 = vld [vmem:[#allocation4 + $0x68] sm:$0xff]  ;;  %v7868_v42 = vld [vmem:[#allocation4 + $0x180] sm:$0xff] }
 0x483   : > { %v16003_v41 = vpop.permute.xlu0 %8011  ;;  %v16005_v35 = vpop.permute.xlu1 %7946 }
 0x484   : > { %v16069_v6 = vmul.f32 %v16005_v35, %v7832_v57 }
 0x487   : > { %v16007_v19 = vpop.permute.xlu0 %7961  ;;  %v16009_v33 = vpop.permute.xlu1 %8036 }
 0x488   : > { %v16076_v35 = vmul.f32 %v16007_v19, %v7835_v22  ;;  %v16079_v5 = vmul.f32 %v16009_v33, %v7850_v0  ;;  %v18011_v33 = vld [vmem:[#allocation9_spill] sm:$0xff] }
 0x48b   : > { %v16011_v44 = vpop.permute.xlu0 %7951  ;;  %v16013_v60 = vpop.permute.xlu1 %8026 }
 0x48c   : > { %v16085_v26 = vmul.f32 %v16013_v60, %v7848_v49  ;;  %v18013_v49 = vld [vmem:[#allocation10_spill] sm:$0xff] }
 0x48f   : > { %v16015_v46 = vpop.permute.xlu0 %8041  ;;  %v8057_v8 = vpop.permute.xlu1 %8056 }
 0x490   : > { %v8238_v43 = vmul.f32 %v8057_v8, %v7854_v2  ;;  %v7845_v8 = vld [vmem:[#allocation4 + $0xc8] sm:$0xff]  ;;  %v7851_v2 = vld [vmem:[#allocation4 + $0xf8] sm:$0xff] }
 0x491   : > { %v16066_v18 = vmul.f32 %v16003_v41, %v7845_v8 }
 0x492   : > { %v8404_v14 = vcombine.low %v16017_v30, %v8238_v43  ;;  %v8405_v20 = vcombine.high %v16017_v30, %v8238_v43  ;;  %v16082_v30 = vmul.f32 %v16011_v44, %v7833_v24 }
 0x493   : > { %v8032_v23 = vpop.permute.xlu0 %8031  ;;  %v8047_v55 = vpop.permute.xlu1 %8046 }
 0x494   : > { %v8236_v34 = vmul.f32 %v8047_v55, %v7852_v28  ;;  %v16092_v28 = vmul.f32 %v16015_v46, %v7851_v2  ;;  %v8412_v55 = vrot.slane %v8404_v14, %v18011_v33  ;;  %v8419_v44 = vrot.slane %v8405_v20, %v18011_v33 }
 0x495   : > { %v16096_v54 = vmul.f32 %v8032_v23, %v7849_v58 }
 0x496   : > { %v8268_v27 = vcombine.low %v16019_v7, %v8236_v34  ;;  %v8269_v41 = vcombine.high %v16019_v7, %v8236_v34 }
 0x497   : > { %v8062_v45 = vpop.permute.xlu0 %8061  ;;  %v8137_v61 = vpop.permute.xlu1 %8136  ;;  %18012 = vst [vmem:[#allocation36_spill] sm:$0xff] %v16096_v54 }
 0x498   : > { %v8239_v16 = vmul.f32 %v8062_v45, %v7855_v1  ;;  %v8254_v51 = vmul.f32 %v8137_v61, %v7870_v47  ;;  %v8276_v62 = vrot.slane %v8268_v27, %v18011_v33  ;;  %v8283_v34 = vrot.slane %v8269_v41, %v18011_v33 }
 0x49a   : > { %v8472_v15 = vcombine.low %v16021_v17, %v8239_v16  ;;  %v8473_v7 = vcombine.high %v16021_v17, %v8239_v16  ;;  %v8420_v43 = vcombine.low %v16023_v53, %v8254_v51  ;;  %v8421_v19 = vcombine.high %v16023_v53, %v8254_v51  ;;  %v7853_v53 = vld [vmem:[#allocation4 + $0x108] sm:$0xff] }
 0x49b   : > { %v8052_v60 = vpop.permute.xlu0 %8051  ;;  %v8127_v40 = vpop.permute.xlu1 %8126 }
 0x49c   : > { %v8428_v17 = vrot.slane %v8420_v43, %v18011_v33  ;;  %v8435_v59 = vrot.slane %v8421_v19, %v18011_v33  ;;  %v16103_v46 = vrot.slane %v8472_v15, %v18011_v33  ;;  %v16106_v50 = vrot.slane %v8473_v7, %v18011_v33 }
 0x49d   : > { %v8237_v23 = vmul.f32 %v8052_v60, %v7853_v53  ;;  %v8252_v8 = vmul.f32 %v8127_v40, %v7868_v42 }
 0x49e   : > { %v8436_v57 = vcombine.low %v8412_v55, %v8428_v17  ;;  %v8437_v22 = vcombine.high %v8412_v55, %v8428_v17  ;;  %v8452_v14 = vcombine.low %v8419_v44, %v8435_v59  ;;  %v8453_v20 = vcombine.high %v8419_v44, %v8435_v59 }
 0x49f   : > { %v8336_v1 = vcombine.low %v16025_v3, %v8237_v23  ;;  %v8337_v45 = vcombine.high %v16025_v3, %v8237_v23  ;;  %v8284_v47 = vcombine.low %v16027_v48, %v8252_v8  ;;  %v8285_v61 = vcombine.high %v16027_v48, %v8252_v8  ;;  %v8142_v0 = vpop.permute.xlu0 %8141  ;;  %v8077_v24 = vpop.permute.xlu1 %8076 }
 0x4a0   : > { %v8444_v27 = vrot.slane %v8436_v57, %v18013_v49  ;;  %v8451_v41 = vrot.slane %v8437_v22, %v18013_v49  ;;  %v8460_v16 = vrot.slane %v8452_v14, %v18013_v49  ;;  %v8467_v51 = vrot.slane %v8453_v20, %v18013_v49  ;;  %v7871_v57 = vld [vmem:[#allocation4 + $0x198] sm:$0xff]  ;;  %v7858_v20 = vld [vmem:[#allocation4 + $0x130] sm:$0xff] }
 0x4a1   : > { %v16117_v2 = vrot.slane %v8336_v1, %v18011_v33  ;;  %v16120_v58 = vrot.slane %v8337_v45, %v18011_v33  ;;  %v8292_v3 = vrot.slane %v8284_v47, %v18011_v33  ;;  %v8299_v48 = vrot.slane %v8285_v61, %v18011_v33  ;;  %v7869_v1 = vld [vmem:[#allocation4 + $0x188] sm:$0xff]  ;;  %v7856_v45 = vld [vmem:[#allocation4 + $0x120] sm:$0xff] }
 0x4a2   : > { %v9492_v15 = vcombine.low %v8444_v27, %v8451_v41  ;;  %v11108_v7 = vcombine.high %v8444_v27, %v8451_v41  ;;  %v9508_v43 = vcombine.low %v8460_v16, %v8467_v51  ;;  %v11109_v19 = vcombine.high %v8460_v16, %v8467_v51 }
 0x4a3   : > { %v8300_v55 = vcombine.low %v8276_v62, %v8292_v3  ;;  %v8301_v44 = vcombine.high %v8276_v62, %v8292_v3  ;;  %v8316_v60 = vcombine.low %v8283_v34, %v8299_v48  ;;  %v8317_v40 = vcombine.high %v8283_v34, %v8299_v48  ;;  %v8132_v17 = vpop.permute.xlu0 %8131  ;;  %v8067_v59 = vpop.permute.xlu1 %8066 }
 0x4a4   : > { %v16125_v53 = vrot.slane %v9492_v15, %v18011_v33  ;;  %v16128_v42 = vrot.slane %v11108_v7, %v18011_v33  ;;  %v16131_v23 = vrot.slane %v9508_v43, %v18011_v33  ;;  %v16134_v8 = vrot.slane %v11109_v19, %v18011_v33 }
 0x4a5   : > { %v8308_v22 = vrot.slane %v8300_v55, %v18013_v49  ;;  %v8315_v62 = vrot.slane %v8301_v44, %v18013_v49  ;;  %v8324_v34 = vrot.slane %v8316_v60, %v18013_v49  ;;  %v8331_v14 = vrot.slane %v8317_v40, %v18013_v49 }
 0x4a6   : > { %v8255_v47 = vmul.f32 %v8142_v0, %v7871_v57  ;;  %v8242_v61 = vmul.f32 %v8077_v24, %v7858_v20  ;;  %v8253_v27 = vmul.f32 %v8132_v17, %v7869_v1  ;;  %v8240_v41 = vmul.f32 %v8067_v59, %v7856_v45 }
 0x4a7   : > { %v9356_v16 = vcombine.low %v8308_v22, %v8315_v62  ;;  %v11104_v51 = vcombine.high %v8308_v22, %v8315_v62  ;;  %v9372_v3 = vcombine.low %v8324_v34, %v8331_v14  ;;  %v11105_v48 = vcombine.high %v8324_v34, %v8331_v14  ;;  %v8082_v62 = vpop.permute.xlu0 %8081  ;;  %v8157_v34 = vpop.permute.xlu1 %8156 }
 0x4a8   : > { %v8488_v15 = vcombine.low %v16029_v9, %v8255_v47  ;;  %v8489_v7 = vcombine.high %v16029_v9, %v8255_v47  ;;  %v8676_v43 = vcombine.low %v16031_v21, %v8242_v61  ;;  %v8677_v19 = vcombine.high %v16031_v21, %v8242_v61 }
 0x4a9   : > { %v16145_v55 = vrot.slane %v9356_v16, %v18011_v33  ;;  %v16148_v0 = vrot.slane %v11104_v51, %v18011_v33  ;;  %v16151_v24 = vrot.slane %v9372_v3, %v18011_v33  ;;  %v16154_v44 = vrot.slane %v11105_v48, %v18011_v33 }
 0x4aa   : > { %v8496_v60 = vrot.slane %v8488_v15, %v18011_v33  ;;  %v8503_v9 = vrot.slane %v8489_v7, %v18011_v33  ;;  %v16159_v40 = vrot.slane %v8676_v43, %v18011_v33  ;;  %v16162_v21 = vrot.slane %v8677_v19, %v18011_v33 }
 0x4ab   : > { %v8352_v17 = vcombine.low %v16033_v56, %v8253_v27  ;;  %v8353_v59 = vcombine.high %v16033_v56, %v8253_v27  ;;  %v8540_v57 = vcombine.low %v16035_v12, %v8240_v41  ;;  %v8541_v22 = vcombine.high %v16035_v12, %v8240_v41 }
 0x4ac   : > { %v8504_v14 = vcombine.low %v16103_v46, %v8496_v60  ;;  %v8505_v20 = vcombine.high %v16103_v46, %v8496_v60  ;;  %v8520_v1 = vcombine.low %v16106_v50, %v8503_v9  ;;  %v8521_v45 = vcombine.high %v16106_v50, %v8503_v9 }
 0x4ad   : > { %v8360_v47 = vrot.slane %v8352_v17, %v18011_v33  ;;  %v8367_v61 = vrot.slane %v8353_v59, %v18011_v33  ;;  %v16175_v56 = vrot.slane %v8540_v57, %v18011_v33  ;;  %v16178_v27 = vrot.slane %v8541_v22, %v18011_v33  ;;  %v8072_v57 = vpop.permute.xlu0 %8071  ;;  %v8147_v22 = vpop.permute.xlu1 %8146 }
 0x4ae   : > { %v8512_v12 = vrot.slane %v8504_v14, %v18013_v49  ;;  %v8519_v41 = vrot.slane %v8505_v20, %v18013_v49  ;;  %v8528_v46 = vrot.slane %v8520_v1, %v18013_v49  ;;  %v8535_v16 = vrot.slane %v8521_v45, %v18013_v49  ;;  %v7859_v1 = vld [vmem:[#allocation4 + $0x138] sm:$0xff] }
 0x4af   : > { %v8368_v50 = vcombine.low %v16117_v2, %v8360_v47  ;;  %v8369_v51 = vcombine.high %v16117_v2, %v8360_v47  ;;  %v8384_v3 = vcombine.low %v16120_v58, %v8367_v61  ;;  %v8385_v48 = vcombine.high %v16120_v58, %v8367_v61 }
 0x4b0   : > { %v9560_v15 = vcombine.low %v8512_v12, %v8519_v41  ;;  %v11110_v7 = vcombine.high %v8512_v12, %v8519_v41  ;;  %v9576_v43 = vcombine.low %v8528_v46, %v8535_v16  ;;  %v11111_v19 = vcombine.high %v8528_v46, %v8535_v16  ;;  %v7874_v41 = vld [vmem:[#allocation4 + $0x1b0] sm:$0xff]  ;;  %v7857_v46 = vld [vmem:[#allocation4 + $0x128] sm:$0xff]  ;;  %v7872_v16 = vld [vmem:[#allocation4 + $0x1a0] sm:$0xff] }
 0x4b1   : > { %v8376_v60 = vrot.slane %v8368_v50, %v18013_v49  ;;  %v8383_v9 = vrot.slane %v8369_v51, %v18013_v49  ;;  %v8392_v17 = vrot.slane %v8384_v3, %v18013_v49  ;;  %v8399_v59 = vrot.slane %v8385_v48, %v18013_v49 }
 0x4b2   : > { %v16193_v2 = vrot.slane %v9560_v15, %v18011_v33  ;;  %v16196_v14 = vrot.slane %v11110_v7, %v18011_v33  ;;  %v16199_v58 = vrot.slane %v9576_v43, %v18011_v33  ;;  %v16202_v20 = vrot.slane %v11111_v19, %v18011_v33 }
 0x4b3   : > { %v9424_v45 = vcombine.low %v8376_v60, %v8383_v9  ;;  %v11106_v47 = vcombine.high %v8376_v60, %v8383_v9  ;;  %v9440_v61 = vcombine.low %v8392_v17, %v8399_v59  ;;  %v11107_v12 = vcombine.high %v8392_v17, %v8399_v59 }
 0x4b4   : > { %v8243_v50 = vmul.f32 %v8082_v62, %v7859_v1  ;;  %v8258_v51 = vmul.f32 %v8157_v34, %v7874_v41  ;;  %v8241_v3 = vmul.f32 %v8072_v57, %v7857_v46  ;;  %v8256_v48 = vmul.f32 %v8147_v22, %v7872_v16 }
 0x4b5   : > { %v16205_v15 = vrot.slane %v9424_v45, %v18011_v33  ;;  %v16208_v7 = vrot.slane %v11106_v47, %v18011_v33  ;;  %v16211_v43 = vrot.slane %v9440_v61, %v18011_v33  ;;  %v16214_v19 = vrot.slane %v11107_v12, %v18011_v33 }
 0x4b6   : > { %v8744_v60 = vcombine.low %v16037_v36, %v8243_v50  ;;  %v8745_v9 = vcombine.high %v16037_v36, %v8243_v50  ;;  %v8692_v62 = vcombine.low %v16039_v63, %v8258_v51  ;;  %v8693_v34 = vcombine.high %v16039_v63, %v8258_v51  ;;  %v8162_v50 = vpop.permute.xlu0 %8161  ;;  %v8097_v51 = vpop.permute.xlu1 %8096 }
 0x4b7   : > { %v8608_v17 = vcombine.low %v16041_v32, %v8241_v3  ;;  %v8609_v59 = vcombine.high %v16041_v32, %v8241_v3  ;;  %v8556_v57 = vcombine.low %v16043_v11, %v8256_v48  ;;  %v8557_v22 = vcombine.high %v16043_v11, %v8256_v48 }
 0x4b8   : > { %v16225_v1 = vrot.slane %v8744_v60, %v18011_v33  ;;  %v16228_v45 = vrot.slane %v8745_v9, %v18011_v33  ;;  %v8700_v36 = vrot.slane %v8692_v62, %v18011_v33  ;;  %v8707_v47 = vrot.slane %v8693_v34, %v18011_v33 }
 0x4b9   : > { %v16233_v63 = vrot.slane %v8608_v17, %v18011_v33  ;;  %v16236_v61 = vrot.slane %v8609_v59, %v18011_v33  ;;  %v8564_v32 = vrot.slane %v8556_v57, %v18011_v33  ;;  %v8571_v11 = vrot.slane %v8557_v22, %v18011_v33 }
 0x4ba   : > { %v8708_v12 = vcombine.low %v16159_v40, %v8700_v36  ;;  %v8709_v41 = vcombine.high %v16159_v40, %v8700_v36  ;;  %v8724_v46 = vcombine.low %v16162_v21, %v8707_v47  ;;  %v8725_v16 = vcombine.high %v16162_v21, %v8707_v47 }
 0x4bb   : > { %v8572_v3 = vcombine.low %v16175_v56, %v8564_v32  ;;  %v8573_v48 = vcombine.high %v16175_v56, %v8564_v32  ;;  %v8588_v60 = vcombine.low %v16178_v27, %v8571_v11  ;;  %v8589_v9 = vcombine.high %v16178_v27, %v8571_v11 }
 0x4bc   : > { %v8716_v62 = vrot.slane %v8708_v12, %v18013_v49  ;;  %v8723_v34 = vrot.slane %v8709_v41, %v18013_v49  ;;  %v8732_v40 = vrot.slane %v8724_v46, %v18013_v49  ;;  %v8739_v17 = vrot.slane %v8725_v16, %v18013_v49 }
 0x4bd   : > { %v8580_v21 = vrot.slane %v8572_v3, %v18013_v49  ;;  %v8587_v59 = vrot.slane %v8573_v48, %v18013_v49  ;;  %v8596_v57 = vrot.slane %v8588_v60, %v18013_v49  ;;  %v8603_v56 = vrot.slane %v8589_v9, %v18013_v49  ;;  %v8152_v60 = vpop.permute.xlu0 %8151  ;;  %v8087_v9 = vpop.permute.xlu1 %8086 }
 0x4be   : > { %v9764_v22 = vcombine.low %v8716_v62, %v8723_v34  ;;  %v11116_v36 = vcombine.high %v8716_v62, %v8723_v34  ;;  %v9780_v47 = vcombine.low %v8732_v40, %v8739_v17  ;;  %v11117_v27 = vcombine.high %v8732_v40, %v8739_v17 }
 0x4bf   : > { %v9628_v32 = vcombine.low %v8580_v21, %v8587_v59  ;;  %v11112_v11 = vcombine.high %v8580_v21, %v8587_v59  ;;  %v9644_v12 = vcombine.low %v8596_v57, %v8603_v56  ;;  %v11113_v41 = vcombine.high %v8596_v57, %v8603_v56  ;;  %v7875_v21 = vld [vmem:[#allocation4 + $0x1b8] sm:$0xff]  ;;  %v7862_v59 = vld [vmem:[#allocation4 + $0x150] sm:$0xff] }
 0x4c0   : > { %v16257_v46 = vrot.slane %v9764_v22, %v18011_v33  ;;  %v16260_v16 = vrot.slane %v11116_v36, %v18011_v33  ;;  %v16263_v3 = vrot.slane %v9780_v47, %v18011_v33  ;;  %v16266_v48 = vrot.slane %v11117_v27, %v18011_v33  ;;  %v7873_v47 = vld [vmem:[#allocation4 + $0x1a8] sm:$0xff]  ;;  %v7860_v27 = vld [vmem:[#allocation4 + $0x140] sm:$0xff] }
 0x4c1   : > { %v16269_v62 = vrot.slane %v9628_v32, %v18011_v33  ;;  %v16272_v34 = vrot.slane %v11112_v11, %v18011_v33  ;;  %v16275_v40 = vrot.slane %v9644_v12, %v18011_v33  ;;  %v16278_v17 = vrot.slane %v11113_v41, %v18011_v33 }
 0x4c2   : > { %v9524_v57 = vcombine.low %v16125_v53, %v16128_v42  ;;  %v9540_v56 = vcombine.low %v16131_v23, %v16134_v8  ;;  %v8259_v22 = vmul.f32 %v8162_v50, %v7875_v21  ;;  %v8246_v36 = vmul.f32 %v8097_v51, %v7862_v59 }
 0x4c3   : > { %18014 = vst [vmem:[#allocation87_spill] sm:$0xff] %v16275_v40  ;;  %18015 = vst [vmem:[#allocation146_spill] sm:$0xff] %v16278_v17  ;;  %v9525_v32 = vcombine.high %v16125_v53, %v16128_v42  ;;  %v9541_v11 = vcombine.high %v16131_v23, %v16134_v8  ;;  %v8257_v12 = vmul.f32 %v8152_v60, %v7873_v47 }
 0x4c4   : > { %v8244_v41 = vmul.f32 %v8087_v9, %v7860_v27  ;;  %v16289_v54 = vrot.slane %v9524_v57, %v18013_v49  ;;  %v16292_v40 = vrot.slane %v9540_v56, %v18013_v49  ;;  %v8760_v17 = vcombine.low %v16045_v25, %v8259_v22 }
 0x4c5   : > { %v8761_v50 = vcombine.high %v16045_v25, %v8259_v22  ;;  %v8948_v51 = vcombine.low %v16047_v4, %v8246_v36  ;;  %v8949_v21 = vcombine.high %v16047_v4, %v8246_v36  ;;  %v16299_v53 = vrot.slane %v9525_v32, %v18013_v49 }
 0x4c6   : > { %v16302_v42 = vrot.slane %v9541_v11, %v18013_v49  ;;  %v9557_v23 = vcombine.high %v16289_v54, %v16292_v40  ;;  %v8768_v8 = vrot.slane %v8760_v17, %v18011_v33  ;;  %v8624_v9 = vcombine.low %v16049_v31, %v8257_v12 }
 0x4c7   : > { %v8775_v60 = vrot.slane %v8761_v50, %v18011_v33  ;;  %v16310_v25 = vrot.slane %v8948_v51, %v18011_v33  ;;  %v16313_v4 = vrot.slane %v8949_v21, %v18011_v33  ;;  %v8625_v57 = vcombine.high %v16049_v31, %v8257_v12 }
 0x4c8   : > { %v9558_v59 = vcombine.low %v16299_v53, %v16302_v42  ;;  %10464 = vrot.lane.b32.xlu1 %v9557_v23, %s12191_s10  ;;  %v8776_v17 = vcombine.low %v16225_v1, %v8768_v8  ;;  %v8777_v56 = vcombine.high %v16225_v1, %v8768_v8  ;;  %v8632_v47 = vrot.slane %v8624_v9, %v18011_v33 }
 0x4c9   : > { %v8792_v22 = vcombine.low %v16228_v45, %v8775_v60  ;;  %v8793_v36 = vcombine.high %v16228_v45, %v8775_v60  ;;  %v8639_v27 = vrot.slane %v8625_v57, %v18011_v33  ;;  %v8812_v32 = vcombine.low %v16051_v10, %v8244_v41 }
 0x4ca   : > { %v8813_v11 = vcombine.high %v16051_v10, %v8244_v41  ;;  %v8784_v31 = vrot.slane %v8776_v17, %v18013_v49  ;;  %v8791_v12 = vrot.slane %v8777_v56, %v18013_v49  ;;  %v8640_v51 = vcombine.low %v16233_v63, %v8632_v47 }
 0x4cb   : > { %v8800_v50 = vrot.slane %v8792_v22, %v18013_v49  ;;  %v8807_v1 = vrot.slane %v8793_v36, %v18013_v49  ;;  %v8641_v45 = vcombine.high %v16233_v63, %v8632_v47  ;;  %v8656_v21 = vcombine.low %v16236_v61, %v8639_v27 }
 0x4cc   : > { %v8657_v23 = vcombine.high %v16236_v61, %v8639_v27  ;;  %v9832_v8 = vcombine.low %v8784_v31, %v8791_v12  ;;  %v11118_v60 = vcombine.high %v8784_v31, %v8791_v12  ;;  %10528 = vrot.lane.b32.xlu1 %v9558_v59, %s12192_s11  ;;  %v8648_v41 = vrot.slane %v8640_v51, %v18013_v49  ;;  %v8102_v59 = vpop.permute.xlu0 %8101 }
 0x4cd   : > { %v9848_v9 = vcombine.low %v8800_v50, %v8807_v1  ;;  %v11119_v10 = vcombine.high %v8800_v50, %v8807_v1  ;;  %v8655_v57 = vrot.slane %v8641_v45, %v18013_v49  ;;  %v8664_v17 = vrot.slane %v8656_v21, %v18013_v49  ;;  %v8177_v50 = vpop.permute.xlu1 %8176 }
 0x4ce   : > { %v8671_v56 = vrot.slane %v8657_v23, %v18013_v49  ;;  %v16341_v63 = vrot.slane %v9832_v8, %v18011_v33  ;;  %v16344_v61 = vrot.slane %v11118_v60, %v18011_v33  ;;  %v16353_v1 = vrot.slane %v8812_v32, %v18011_v33 }
 0x4cf   : > { %v16347_v22 = vrot.slane %v9848_v9, %v18011_v33  ;;  %v16350_v36 = vrot.slane %v11119_v10, %v18011_v33  ;;  %v9696_v47 = vcombine.low %v8648_v41, %v8655_v57  ;;  %v11114_v27 = vcombine.high %v8648_v41, %v8655_v57 }
 0x4d0   : > { %v9712_v31 = vcombine.low %v8664_v17, %v8671_v56  ;;  %v11115_v12 = vcombine.high %v8664_v17, %v8671_v56  ;;  %v16356_v51 = vrot.slane %v8813_v11, %v18011_v33  ;;  %v9592_v45 = vcombine.low %v16193_v2, %v16196_v14  ;;  %v7863_v11 = vld [vmem:[#allocation4 + $0x158] sm:$0xff]  ;;  %v7878_v17 = vld [vmem:[#allocation4 + $0x1d0] sm:$0xff] }
 0x4d1   : > { %v9608_v21 = vcombine.low %v16199_v58, %v16202_v20  ;;  %v16363_v23 = vrot.slane %v9696_v47, %v18011_v33  ;;  %v16366_v8 = vrot.slane %v11114_v27, %v18011_v33  ;;  %v9559_v41 = vcombine.high %v16299_v53, %v16302_v42 }
 0x4d2   : > { %v16369_v60 = vrot.slane %v9712_v31, %v18011_v33  ;;  %v16372_v32 = vrot.slane %v11115_v12, %v18011_v33  ;;  %v16375_v9 = vrot.slane %v9592_v45, %v18013_v49  ;;  %v8247_v57 = vmul.f32 %v8102_v59, %v7863_v11  ;;  %v8167_v45 = vpop.permute.xlu1 %8166 }
 0x4d3   : > { %v16378_v10 = vrot.slane %v9608_v21, %v18013_v49  ;;  %v8262_v56 = vmul.f32 %v8177_v50, %v7878_v17  ;;  %v9593_v47 = vcombine.high %v16193_v2, %v16196_v14  ;;  %v9609_v27 = vcombine.high %v16199_v58, %v16202_v20  ;;  %10592 = vrot.lane.b32.xlu1 %v9559_v41, %s12193_s18  ;;  %v8092_v2 = vpop.permute.xlu0 %8091 }
 0x4d4   : > { %18016 = vst [vmem:[#allocation38_spill] sm:$0xff] %v16375_v9  ;;  %v9388_v31 = vcombine.low %v16145_v55, %v16148_v0  ;;  %v9016_v53 = vcombine.low %v16053_v38, %v8247_v57  ;;  %v9017_v42 = vcombine.high %v16053_v38, %v8247_v57  ;;  %v9404_v59 = vcombine.low %v16151_v24, %v16154_v44 }
 0x4d5   : > { %18017 = vst [vmem:[#allocation150_spill] sm:$0xff] %v16378_v10  ;;  %v9625_v12 = vcombine.high %v16375_v9, %v16378_v10  ;;  %v8964_v14 = vcombine.low %v16055_v39, %v8262_v56  ;;  %v8965_v58 = vcombine.high %v16055_v39, %v8262_v56  ;;  %v9607_v20 = vrot.slane %v9593_v47, %v18013_v49  ;;  %v7861_v39 = vld [vmem:[#allocation4 + $0x148] sm:$0xff] }
 0x4d6   : > { %v9623_v50 = vrot.slane %v9609_v27, %v18013_v49  ;;  %v16401_v21 = vrot.slane %v9016_v53, %v18011_v33  ;;  %v16404_v38 = vrot.slane %v9017_v42, %v18011_v33  ;;  %v16407_v11 = vrot.slane %v9388_v31, %v18013_v49  ;;  %v7876_v27 = vld [vmem:[#allocation4 + $0x1c0] sm:$0xff] }
 0x4d7   : > { %10466 = vrot.lane.b32.xlu0 %v9625_v12, %s12191_s10  ;;  %v16410_v41 = vrot.slane %v9404_v59, %v18013_v49  ;;  %v8972_v57 = vrot.slane %v8964_v14, %v18011_v33  ;;  %v8979_v17 = vrot.slane %v8965_v58, %v18011_v33  ;;  %v8245_v47 = vmul.f32 %v8092_v2, %v7861_v39 }
 0x4d8   : > { %18018 = vst [vmem:[#allocation35_spill] sm:$0xff] %v16407_v11  ;;  %v9626_v56 = vcombine.low %v9607_v20, %v9623_v50  ;;  %v8260_v53 = vmul.f32 %v8167_v45, %v7876_v27  ;;  %v9627_v42 = vcombine.high %v9607_v20, %v9623_v50  ;;  %v9389_v31 = vcombine.high %v16145_v55, %v16148_v0 }
 0x4d9   : > { %18019 = vst [vmem:[#allocation129_spill] sm:$0xff] %v16410_v41  ;;  %v9421_v12 = vcombine.high %v16407_v11, %v16410_v41  ;;  %v8980_v9 = vcombine.low %v16310_v25, %v8972_v57  ;;  %v8981_v59 = vcombine.high %v16310_v25, %v8972_v57  ;;  %v8996_v10 = vcombine.low %v16313_v4, %v8979_v17 }
 0x4da   : > { %v8997_v14 = vcombine.high %v16313_v4, %v8979_v17  ;;  %v8880_v2 = vcombine.low %v16057_v13, %v8245_v47  ;;  %v8881_v58 = vcombine.high %v16057_v13, %v8245_v47  ;;  %v8828_v20 = vcombine.low %v16059_v29, %v8260_v53 }
 0x4db   : > { %10530 = vrot.lane.b32.xlu0 %v9626_v56, %s12192_s11  ;;  %10460 = vrot.lane.b32.xlu1 %v9421_v12, %s12191_s10  ;;  %v8988_v55 = vrot.slane %v8980_v9, %v18013_v49  ;;  %v8995_v0 = vrot.slane %v8981_v59, %v18013_v49  ;;  %v9004_v25 = vrot.slane %v8996_v10, %v18013_v49  ;;  %v8182_v59 = vpop.permute.xlu0 %8181 }
 0x4dc   : > { %v9011_v50 = vrot.slane %v8997_v14, %v18013_v49  ;;  %v16432_v4 = vrot.slane %v8880_v2, %v18011_v33  ;;  %v16435_v45 = vrot.slane %v8881_v58, %v18011_v33  ;;  %v8829_v39 = vcombine.high %v16059_v29, %v8260_v53  ;;  %v8117_v14 = vpop.permute.xlu1 %8116 }
 0x4dd   : > { %v8836_v13 = vrot.slane %v8828_v20, %v18011_v33  ;;  %v10036_v57 = vcombine.low %v8988_v55, %v8995_v0  ;;  %v11124_v17 = vcombine.high %v8988_v55, %v8995_v0  ;;  %v9403_v12 = vrot.slane %v9389_v31, %v18013_v49  ;;  %v7879_v55 = vld [vmem:[#allocation4 + $0x1d8] sm:$0xff]  ;;  %v7866_v0 = vld [vmem:[#allocation4 + $0x170] sm:$0xff] }
 0x4de   : > { %v10052_v56 = vcombine.low %v9004_v25, %v9011_v50  ;;  %v11125_v9 = vcombine.high %v9004_v25, %v9011_v50  ;;  %v8843_v47 = vrot.slane %v8829_v39, %v18011_v33  ;;  %v9405_v25 = vcombine.high %v16151_v24, %v16154_v44 }
 0x4df   : > { %v8844_v10 = vcombine.low %v16353_v1, %v8836_v13  ;;  %v8845_v27 = vcombine.high %v16353_v1, %v8836_v13  ;;  %10594 = vrot.lane.b32.xlu0 %v9627_v42, %s12193_s18  ;;  %v16445_v29 = vrot.slane %v10036_v57, %v18011_v33  ;;  %v16448_v53 = vrot.slane %v11124_v17, %v18011_v33 }
 0x4e0   : > { %v16451_v2 = vrot.slane %v10052_v56, %v18011_v33  ;;  %v16454_v58 = vrot.slane %v11125_v9, %v18011_v33  ;;  %v8860_v31 = vcombine.low %v16356_v51, %v8843_v47  ;;  %v8861_v20 = vcombine.high %v16356_v51, %v8843_v47 }
 0x4e1   : > { %v8852_v1 = vrot.slane %v8844_v10, %v18013_v49  ;;  %v8859_v42 = vrot.slane %v8845_v27, %v18013_v49  ;;  %v8263_v50 = vmul.f32 %v8182_v59, %v7879_v55  ;;  %v8250_v39 = vmul.f32 %v8117_v14, %v7866_v0  ;;  %v8172_v55 = vpop.permute.xlu0 %8171 }
 0x4e2   : > { %v9456_v13 = vcombine.low %v16205_v15, %v16208_v7  ;;  %v8868_v57 = vrot.slane %v8860_v31, %v18013_v49  ;;  %v8875_v17 = vrot.slane %v8861_v20, %v18013_v49  ;;  %v9419_v10 = vrot.slane %v9405_v25, %v18013_v49 }
 0x4e3   : > { %v9900_v56 = vcombine.low %v8852_v1, %v8859_v42  ;;  %v11120_v9 = vcombine.high %v8852_v1, %v8859_v42  ;;  %v9032_v51 = vcombine.low %v16061_v52, %v8263_v50  ;;  %v9033_v47 = vcombine.high %v16061_v52, %v8263_v50 }
 0x4e4   : > { %v9220_v27 = vcombine.low %v16063_v37, %v8250_v39  ;;  %v9916_v59 = vcombine.low %v8868_v57, %v8875_v17  ;;  %v11121_v14 = vcombine.high %v8868_v57, %v8875_v17  ;;  %v9422_v31 = vcombine.low %v9403_v12, %v9419_v10 }
 0x4e5   : > { %v16471_v24 = vrot.slane %v9900_v56, %v18011_v33  ;;  %v16474_v44 = vrot.slane %v11120_v9, %v18011_v33  ;;  %v9040_v20 = vrot.slane %v9032_v51, %v18011_v33  ;;  %v9047_v1 = vrot.slane %v9033_v47, %v18011_v33  ;;  %v7877_v56 = vld [vmem:[#allocation4 + $0x1c8] sm:$0xff]  ;;  %v8107_v9 = vpop.permute.xlu1 %8106 }
 0x4e6   : > { %v9221_v42 = vcombine.high %v16063_v37, %v8250_v39  ;;  %v16480_v52 = vrot.slane %v9916_v59, %v18011_v33  ;;  %v16483_v0 = vrot.slane %v11121_v14, %v18011_v33  ;;  %v16486_v25 = vrot.slane %v9220_v27, %v18011_v33  ;;  %10524 = vrot.lane.b32.xlu1 %v9422_v31, %s12192_s11 }
 0x4e7   : > { %v16489_v50 = vrot.slane %v9456_v13, %v18013_v49  ;;  %v9048_v57 = vcombine.low %v16401_v21, %v9040_v20  ;;  %v9049_v17 = vcombine.high %v16401_v21, %v9040_v20  ;;  %v9064_v37 = vcombine.low %v16404_v38, %v9047_v1  ;;  %v7864_v20 = vld [vmem:[#allocation4 + $0x160] sm:$0xff] }
 0x4e8   : > { %v9065_v39 = vcombine.high %v16404_v38, %v9047_v1  ;;  %v16497_v51 = vrot.slane %v9221_v42, %v18011_v33  ;;  %v9472_v47 = vcombine.low %v16211_v43, %v16214_v19  ;;  %v9423_v13 = vcombine.high %v9403_v12, %v9419_v10 }
 0x4e9   : > { %18020 = vst [vmem:[#allocation91_spill] sm:$0xff] %v16489_v50  ;;  %v8261_v27 = vmul.f32 %v8172_v55, %v7877_v56  ;;  %v9056_v59 = vrot.slane %v9048_v57, %v18013_v49  ;;  %v9063_v14 = vrot.slane %v9049_v17, %v18013_v49  ;;  %v9072_v21 = vrot.slane %v9064_v37, %v18013_v49 }
 0x4ea   : > { %v9079_v31 = vrot.slane %v9065_v39, %v18013_v49  ;;  %v16506_v38 = vrot.slane %v9472_v47, %v18013_v49  ;;  %v8248_v11 = vmul.f32 %v8107_v9, %v7864_v20  ;;  %10588 = vrot.lane.b32.xlu1 %v9423_v13, %s12193_s18  ;;  %v8122_v13 = vpop.permute.xlu0 %8121  ;;  %v9457_v20 = vcombine.high %v16205_v15, %v16208_v7 }
 0x4eb   : > { %v8896_v1 = vcombine.low %v16066_v18, %v8261_v27  ;;  %v8897_v42 = vcombine.high %v16066_v18, %v8261_v27  ;;  %v10104_v41 = vcombine.low %v9056_v59, %v9063_v14  ;;  %v11126_v12 = vcombine.high %v9056_v59, %v9063_v14 }
 0x4ec   : > { %v10120_v10 = vcombine.low %v9072_v21, %v9079_v31  ;;  %v11127_v55 = vcombine.high %v9072_v21, %v9079_v31  ;;  %v9489_v57 = vcombine.high %v16489_v50, %v16506_v38  ;;  %v9084_v39 = vcombine.low %v16069_v6, %v8248_v11 }
 0x4ed   : > { %v8904_v17 = vrot.slane %v8896_v1, %v18011_v33  ;;  %v8911_v37 = vrot.slane %v8897_v42, %v18011_v33  ;;  %v16517_v56 = vrot.slane %v10104_v41, %v18011_v33  ;;  %v16520_v18 = vrot.slane %v11126_v12, %v18011_v33 }
 0x4ee   : > { %v16523_v9 = vrot.slane %v10120_v10, %v18011_v33  ;;  %v16526_v47 = vrot.slane %v11127_v55, %v18011_v33  ;;  %10462 = vrot.lane.b32.xlu0 %v9489_v57, %s12191_s10  ;;  %v9085_v21 = vcombine.high %v16069_v6, %v8248_v11  ;;  %v16535_v31 = vrot.slane %v9084_v39, %v18011_v33 }
 0x4ef   : > { %v8912_v27 = vcombine.low %v16432_v4, %v8904_v17  ;;  %v8913_v59 = vcombine.high %v16432_v4, %v8904_v17  ;;  %v8928_v14 = vcombine.low %v16435_v45, %v8911_v37  ;;  %v8929_v41 = vcombine.high %v16435_v45, %v8911_v37  ;;  %v8197_v45 = vpop.permute.xlu1 %8196  ;;  %v7867_v17 = vld [vmem:[#allocation4 + $0x178] sm:$0xff] }
 0x4f0   : > { %v9473_v1 = vcombine.high %v16211_v43, %v16214_v19  ;;  %v16546_v6 = vrot.slane %v9085_v21, %v18011_v33  ;;  %v9471_v11 = vrot.slane %v9457_v20, %v18013_v49  ;;  %v9796_v15 = vcombine.low %v16257_v46, %v16260_v16 }
 0x4f1   : > { %v8920_v42 = vrot.slane %v8912_v27, %v18013_v49  ;;  %v8927_v12 = vrot.slane %v8913_v59, %v18013_v49  ;;  %v8936_v4 = vrot.slane %v8928_v14, %v18013_v49  ;;  %v8943_v10 = vrot.slane %v8929_v41, %v18013_v49  ;;  %v8112_v14 = vpop.permute.xlu0 %8111 }
 0x4f2   : > { %v9487_v55 = vrot.slane %v9473_v1, %v18013_v49  ;;  %v16553_v39 = vrot.slane %v9796_v15, %v18013_v49  ;;  %v9812_v27 = vcombine.low %v16263_v3, %v16266_v48  ;;  %v8251_v59 = vmul.f32 %v8122_v13, %v7867_v17  ;;  %v7865_v15 = vld [vmem:[#allocation4 + $0x168] sm:$0xff] }
 0x4f3   : > { %v9968_v7 = vcombine.low %v8920_v42, %v8927_v12  ;;  %v11122_v43 = vcombine.high %v8920_v42, %v8927_v12  ;;  %v9984_v19 = vcombine.low %v8936_v4, %v8943_v10  ;;  %v11123_v57 = vcombine.high %v8936_v4, %v8943_v10  ;;  %v7882_v42 = vld [vmem:[#allocation4 + $0x1f0] sm:$0xff]  ;;  %v8187_v17 = vpop.permute.xlu1 %8186 }
 0x4f4   : > { %v9490_v37 = vcombine.low %v9471_v11, %v9487_v55  ;;  %v16571_v12 = vrot.slane %v9812_v27, %v18013_v49  ;;  %v9288_v13 = vcombine.low %v16076_v35, %v8251_v59  ;;  %v9289_v4 = vcombine.high %v16076_v35, %v8251_v59 }
 0x4f5   : > { %v16558_v41 = vrot.slane %v9968_v7, %v18011_v33  ;;  %v16561_v21 = vrot.slane %v11122_v43, %v18011_v33  ;;  %v16564_v20 = vrot.slane %v9984_v19, %v18011_v33  ;;  %v16567_v1 = vrot.slane %v11123_v57, %v18011_v33 }
 0x4f6   : > { %10526 = vrot.lane.b32.xlu0 %v9490_v37, %s12192_s11  ;;  %v8266_v10 = vmul.f32 %v8197_v45, %v7882_v42  ;;  %v9491_v7 = vcombine.high %v9471_v11, %v9487_v55  ;;  %v9797_v43 = vcombine.high %v16257_v46, %v16260_v16  ;;  %v9813_v19 = vcombine.high %v16263_v3, %v16266_v48  ;;  %v7880_v48 = vld [vmem:[#allocation4 + $0x1e0] sm:$0xff] }
 0x4f7   : > { %v8249_v57 = vmul.f32 %v8112_v14, %v7865_v15  ;;  %v9829_v37 = vcombine.high %v16553_v39, %v16571_v12  ;;  %v16582_v27 = vrot.slane %v9288_v13, %v18011_v33  ;;  %v16585_v50 = vrot.slane %v9289_v4, %v18011_v33 }
 0x4f8   : > { %v9236_v35 = vcombine.low %v16079_v5, %v8266_v10  ;;  %v9237_v45 = vcombine.high %v16079_v5, %v8266_v10  ;;  %v9811_v46 = vrot.slane %v9797_v43, %v18013_v49  ;;  %v9827_v16 = vrot.slane %v9813_v19, %v18013_v49 }
 0x4f9   : > { %v9152_v3 = vcombine.low %v16082_v30, %v8249_v57  ;;  %10472 = vrot.lane.b32.xlu1 %v9829_v37, %s12191_s10  ;;  %v9153_v55 = vcombine.high %v16082_v30, %v8249_v57  ;;  %v8264_v59 = vmul.f32 %v8187_v17, %v7880_v48  ;;  %v9864_v13 = vcombine.low %v16341_v63, %v16344_v61 }
 0x4fa   : > { %v9244_v11 = vrot.slane %v9236_v35, %v18011_v33  ;;  %10590 = vrot.lane.b32.xlu0 %v9491_v7, %s12193_s18  ;;  %v9251_v14 = vrot.slane %v9237_v45, %v18011_v33  ;;  %v9830_v42 = vcombine.low %v9811_v46, %v9827_v16  ;;  %v9880_v35 = vcombine.low %v16347_v22, %v16350_v36 }
 0x4fb   : > { %v16598_v5 = vrot.slane %v9152_v3, %v18011_v33  ;;  %v16605_v15 = vrot.slane %v9153_v55, %v18011_v33  ;;  %v9100_v7 = vcombine.low %v16085_v26, %v8264_v59  ;;  %v9101_v19 = vcombine.high %v16085_v26, %v8264_v59 }
 0x4fc   : > { %v9252_v4 = vcombine.low %v16486_v25, %v9244_v11  ;;  %v9253_v10 = vcombine.high %v16486_v25, %v9244_v11  ;;  %v9268_v30 = vcombine.low %v16497_v51, %v9251_v14  ;;  %v9269_v43 = vcombine.high %v16497_v51, %v9251_v14  ;;  %v8202_v14 = vpop.permute.xlu0 %8201 }
 0x4fd   : > { %v16612_v57 = vrot.slane %v9864_v13, %v18013_v49  ;;  %10536 = vrot.lane.b32.xlu1 %v9830_v42, %s12192_s11  ;;  %v9108_v25 = vrot.slane %v9100_v7, %v18011_v33  ;;  %v9115_v26 = vrot.slane %v9101_v19, %v18011_v33  ;;  %v9831_v3 = vcombine.high %v9811_v46, %v9827_v16 }
 0x4fe   : > { %v9260_v17 = vrot.slane %v9252_v4, %v18013_v49  ;;  %v9267_v37 = vrot.slane %v9253_v10, %v18013_v49  ;;  %v9276_v45 = vrot.slane %v9268_v30, %v18013_v49  ;;  %v9283_v51 = vrot.slane %v9269_v43, %v18013_v49 }
 0x4ff   : > { %v9116_v55 = vcombine.low %v16535_v31, %v9108_v25  ;;  %v9117_v59 = vcombine.high %v16535_v31, %v9108_v25  ;;  %v9132_v4 = vcombine.low %v16546_v6, %v9115_v26  ;;  %v9133_v10 = vcombine.high %v16546_v6, %v9115_v26 }
 0x500   : > { %v10308_v48 = vcombine.low %v9260_v17, %v9267_v37  ;;  %v11132_v11 = vcombine.high %v9260_v17, %v9267_v37  ;;  %v10324_v42 = vcombine.low %v9276_v45, %v9283_v51  ;;  %v11133_v13 = vcombine.high %v9276_v45, %v9283_v51  ;;  %v7883_v17 = vld [vmem:[#allocation4 + $0x1f8] sm:$0xff] }
 0x501   : > { %v9124_v46 = vrot.slane %v9116_v55, %v18013_v49  ;;  %v9131_v16 = vrot.slane %v9117_v59, %v18013_v49  ;;  %10600 = vrot.lane.b32.xlu1 %v9831_v3, %s12193_s18  ;;  %v9140_v6 = vrot.slane %v9132_v4, %v18013_v49  ;;  %v9147_v19 = vrot.slane %v9133_v10, %v18013_v49 }
 0x502   : > { %v16628_v7 = vrot.slane %v10308_v48, %v18011_v33  ;;  %v16631_v30 = vrot.slane %v11132_v11, %v18011_v33  ;;  %v16637_v31 = vrot.slane %v10324_v42, %v18011_v33  ;;  %v16640_v43 = vrot.slane %v11133_v13, %v18011_v33 }
 0x503   : > { %v10172_v37 = vcombine.low %v9124_v46, %v9131_v16  ;;  %v11128_v25 = vcombine.high %v9124_v46, %v9131_v16  ;;  %v16645_v45 = vrot.slane %v9880_v35, %v18013_v49  ;;  %v8267_v51 = vmul.f32 %v8202_v14, %v7883_v17  ;;  %v8192_v14 = vpop.permute.xlu0 %8191  ;;  %v18021_v46 = vld [vmem:[#allocation146_spill] sm:$0xff]  ;;  %v18022_v16 = vld [vmem:[#allocation87_spill] sm:$0xff] }
 0x504   : > { %v10188_v26 = vcombine.low %v9140_v6, %v9147_v19  ;;  %v11129_v48 = vcombine.high %v9140_v6, %v9147_v19  ;;  %v9865_v3 = vcombine.high %v16341_v63, %v16344_v61  ;;  %v9881_v11 = vcombine.high %v16347_v22, %v16350_v36  ;;  %v7881_v19 = vld [vmem:[#allocation4 + $0x1e8] sm:$0xff] }
 0x505   : > { %v16652_v55 = vrot.slane %v10172_v37, %v18011_v33  ;;  %v16655_v59 = vrot.slane %v11128_v25, %v18011_v33  ;;  %v9897_v42 = vcombine.high %v16612_v57, %v16645_v45  ;;  %v9304_v35 = vcombine.low %v16092_v28, %v8267_v51 }
 0x506   : > { %v16661_v13 = vrot.slane %v10188_v26, %v18011_v33  ;;  %v16664_v63 = vrot.slane %v11129_v48, %v18011_v33  ;;  %v9305_v61 = vcombine.high %v16092_v28, %v8267_v51  ;;  %v9879_v22 = vrot.slane %v9865_v3, %v18013_v49 }
 0x507   : > { %10474 = vrot.lane.b32.xlu0 %v9897_v42, %s12191_s10  ;;  %v9312_v36 = vrot.slane %v9304_v35, %v18011_v33  ;;  %v9895_v4 = vrot.slane %v9881_v11, %v18013_v49  ;;  %v9660_v10 = vcombine.low %v16269_v62, %v16272_v34  ;;  %v9676_v6 = vcombine.low %v18022_v16, %v18021_v46 }
 0x508   : > { %v9319_v17 = vrot.slane %v9305_v61, %v18011_v33  ;;  %v8265_v37 = vmul.f32 %v8192_v14, %v7881_v19  ;;  %v9661_v28 = vcombine.high %v16269_v62, %v16272_v34  ;;  %v9677_v25 = vcombine.high %v18022_v16, %v18021_v46  ;;  %v18023_v14 = vld [vmem:[#allocation36_spill] sm:$0xff] }
 0x509   : > { %v9320_v51 = vcombine.low %v16582_v27, %v9312_v36  ;;  %v9321_v26 = vcombine.high %v16582_v27, %v9312_v36  ;;  %v9898_v48 = vcombine.low %v9879_v22, %v9895_v4  ;;  %v16683_v3 = vrot.slane %v9660_v10, %v18013_v49 }
 0x50a   : > { %v9336_v11 = vcombine.low %v16585_v50, %v9319_v17  ;;  %v9337_v42 = vcombine.high %v16585_v50, %v9319_v17  ;;  %v16688_v35 = vrot.slane %v9676_v6, %v18013_v49  ;;  %v9168_v62 = vcombine.low %v18023_v14, %v8265_v37 }
 0x50b   : > { %v9328_v34 = vrot.slane %v9320_v51, %v18013_v49  ;;  %v9335_v61 = vrot.slane %v9321_v26, %v18013_v49  ;;  %10538 = vrot.lane.b32.xlu0 %v9898_v48, %s12192_s11  ;;  %v9169_v27 = vcombine.high %v18023_v14, %v8265_v37  ;;  %v9899_v36 = vcombine.high %v9879_v22, %v9895_v4 }
 0x50c   : > { %v9344_v10 = vrot.slane %v9336_v11, %v18013_v49  ;;  %v9351_v46 = vrot.slane %v9337_v42, %v18013_v49  ;;  %v9693_v50 = vcombine.high %v16683_v3, %v16688_v35  ;;  %v9176_v16 = vrot.slane %v9168_v62, %v18011_v33 }
 0x50d   : > { %v10376_v6 = vcombine.low %v9328_v34, %v9335_v61  ;;  %v11134_v19 = vcombine.high %v9328_v34, %v9335_v61  ;;  %v9183_v17 = vrot.slane %v9169_v27, %v18011_v33  ;;  %v9675_v51 = vrot.slane %v9661_v28, %v18013_v49 }
 0x50e   : > { %v10392_v26 = vcombine.low %v9344_v10, %v9351_v46  ;;  %v11135_v48 = vcombine.high %v9344_v10, %v9351_v46  ;;  %10468 = vrot.lane.b32.xlu1 %v9693_v50, %s12191_s10  ;;  %v9184_v22 = vcombine.low %v16598_v5, %v9176_v16  ;;  %v9185_v4 = vcombine.high %v16598_v5, %v9176_v16 }
 0x50f   : > { %v16706_v37 = vrot.slane %v10376_v6, %v18011_v33  ;;  %v16709_v11 = vrot.slane %v11134_v19, %v18011_v33  ;;  %v9200_v42 = vcombine.low %v16605_v15, %v9183_v17  ;;  %v9201_v14 = vcombine.high %v16605_v15, %v9183_v17  ;;  %10602 = vrot.lane.b32.xlu0 %v9899_v36, %s12193_s18 }
 0x510   : > { %v16715_v28 = vrot.slane %v10392_v26, %v18011_v33  ;;  %v16718_v62 = vrot.slane %v11135_v48, %v18011_v33  ;;  %v9192_v5 = vrot.slane %v9184_v22, %v18013_v49  ;;  %v9199_v34 = vrot.slane %v9185_v4, %v18013_v49 }
 0x511   : > { %v9208_v61 = vrot.slane %v9200_v42, %v18013_v49  ;;  %v9215_v27 = vrot.slane %v9201_v14, %v18013_v49  ;;  %v9691_v10 = vrot.slane %v9677_v25, %v18013_v49  ;;  %v9728_v15 = vcombine.low %v16363_v23, %v16366_v8 }
 0x512   : > { %v10240_v36 = vcombine.low %v9192_v5, %v9199_v34  ;;  %v11130_v46 = vcombine.high %v9192_v5, %v9199_v34  ;;  %v9744_v50 = vcombine.low %v16369_v60, %v16372_v32  ;;  %v9729_v16 = vcombine.high %v16363_v23, %v16366_v8 }
 0x513   : > { %v10256_v6 = vcombine.low %v9208_v61, %v9215_v27  ;;  %v11131_v19 = vcombine.high %v9208_v61, %v9215_v27  ;;  %v9694_v17 = vcombine.low %v9675_v51, %v9691_v10  ;;  %v16732_v26 = vrot.slane %v9728_v15, %v18013_v49 }
 0x514   : > { %v16735_v48 = vrot.slane %v10240_v36, %v18011_v33  ;;  %v16738_v25 = vrot.slane %v11130_v46, %v18011_v33  ;;  %v16741_v22 = vrot.slane %v9744_v50, %v18013_v49  ;;  %v9695_v4 = vcombine.high %v9675_v51, %v9691_v10 }
 0x515   : > { %v16744_v42 = vrot.slane %v10256_v6, %v18011_v33  ;;  %v16747_v23 = vrot.slane %v11131_v19, %v18011_v33  ;;  %10532 = vrot.lane.b32.xlu1 %v9694_v17, %s12192_s11  ;;  %v9743_v8 = vrot.slane %v9729_v16, %v18013_v49  ;;  %v9745_v14 = vcombine.high %v16369_v60, %v16372_v32 }
 0x516   : > { %v9761_v5 = vcombine.high %v16732_v26, %v16741_v22  ;;  %v10068_v34 = vcombine.low %v16445_v29, %v16448_v53  ;;  %v10084_v51 = vcombine.low %v16451_v2, %v16454_v58  ;;  %v10069_v33 = vcombine.high %v16445_v29, %v16448_v53 }
 0x517   : > { %v9759_v61 = vrot.slane %v9745_v14, %v18013_v49  ;;  %v10085_v27 = vcombine.high %v16451_v2, %v16454_v58  ;;  %v10136_v60 = vcombine.low %v16517_v56, %v16520_v18  ;;  %v10152_v32 = vcombine.low %v16523_v9, %v16526_v47 }
 0x518   : > { %10470 = vrot.lane.b32.xlu0 %v9761_v5, %s12191_s10  ;;  %v16770_v10 = vrot.slane %v10068_v34, %v18013_v49  ;;  %v16773_v15 = vrot.slane %v10084_v51, %v18013_v49  ;;  %v10083_v29 = vrot.slane %v10069_v33, %v18013_v49  ;;  %v10137_v53 = vcombine.high %v16517_v56, %v16520_v18 }
 0x519   : > { %10596 = vrot.lane.b32.xlu1 %v9695_v4, %s12193_s18  ;;  %v9762_v2 = vcombine.low %v9743_v8, %v9759_v61  ;;  %v9763_v58 = vcombine.high %v9743_v8, %v9759_v61  ;;  %v10099_v36 = vrot.slane %v10085_v27, %v18013_v49  ;;  %v16781_v46 = vrot.slane %v10136_v60, %v18013_v49 }
 0x51a   : > { %v10101_v50 = vcombine.high %v16770_v10, %v16773_v15  ;;  %v16786_v16 = vrot.slane %v10152_v32, %v18013_v49  ;;  %v16789_v6 = vrot.slane %v10137_v53, %v18013_v49  ;;  %v10153_v56 = vcombine.high %v16523_v9, %v16526_v47 }
 0x51b   : > { %v10102_v18 = vcombine.low %v10083_v29, %v10099_v36  ;;  %v10103_v19 = vcombine.high %v10083_v29, %v10099_v36  ;;  %v9932_v17 = vcombine.low %v16471_v24, %v16474_v44  ;;  %v9948_v4 = vcombine.low %v16480_v52, %v16483_v0 }
 0x51c   : > { %10534 = vrot.lane.b32.xlu0 %v9762_v2, %s12192_s11  ;;  %v10169_v8 = vcombine.high %v16781_v46, %v16786_v16  ;;  %v16801_v14 = vrot.slane %v10153_v56, %v18013_v49  ;;  %v9933_v5 = vcombine.high %v16471_v24, %v16474_v44  ;;  %v9949_v9 = vcombine.high %v16480_v52, %v16483_v0 }
 0x51d   : > { %10480 = vrot.lane.b32.xlu1 %v10101_v50, %s12191_s10  ;;  %v16809_v47 = vrot.slane %v9932_v17, %v18013_v49  ;;  %v16812_v34 = vrot.slane %v9948_v4, %v18013_v49  ;;  %v10000_v51 = vcombine.low %v16558_v41, %v16561_v21  ;;  %v10016_v33 = vcombine.low %v16564_v20, %v16567_v1 }
 0x51e   : > { %v10170_v24 = vcombine.low %v16789_v6, %v16801_v14  ;;  %v10171_v44 = vcombine.high %v16789_v6, %v16801_v14  ;;  %v16823_v52 = vrot.slane %v9933_v5, %v18013_v49  ;;  %v16826_v0 = vrot.slane %v9949_v9, %v18013_v49 }
 0x51f   : > { %v9965_v61 = vcombine.high %v16809_v47, %v16812_v34  ;;  %v16831_v27 = vrot.slane %v10000_v51, %v18013_v49  ;;  %v16834_v60 = vrot.slane %v10016_v33, %v18013_v49  ;;  %v10001_v32 = vcombine.high %v16558_v41, %v16561_v21 }
 0x520   : > { %10598 = vrot.lane.b32.xlu0 %v9763_v58, %s12193_s18  ;;  %v9966_v29 = vcombine.low %v16823_v52, %v16826_v0  ;;  %v9967_v53 = vcombine.high %v16823_v52, %v16826_v0  ;;  %v10017_v2 = vcombine.high %v16564_v20, %v16567_v1  ;;  %v10340_v36 = vcombine.low %v16628_v7, %v16631_v30 }
 0x521   : > { %10544 = vrot.lane.b32.xlu1 %v10102_v18, %s12192_s11  ;;  %v10033_v50 = vcombine.high %v16831_v27, %v16834_v60  ;;  %v16851_v41 = vrot.slane %v10001_v32, %v18013_v49  ;;  %v10356_v21 = vcombine.low %v16637_v31, %v16640_v43  ;;  %v10341_v58 = vcombine.high %v16628_v7, %v16631_v30 }
 0x522   : > { %v16858_v6 = vrot.slane %v10017_v2, %v18013_v49  ;;  %v16861_v20 = vrot.slane %v10340_v36, %v18013_v49  ;;  %v10357_v1 = vcombine.high %v16637_v31, %v16640_v43  ;;  %v10408_v56 = vcombine.low %v16706_v37, %v16709_v11 }
 0x523   : > { %v16868_v18 = vrot.slane %v10356_v21, %v18013_v49  ;;  %v16871_v17 = vrot.slane %v10341_v58, %v18013_v49  ;;  %v10424_v7 = vcombine.low %v16715_v28, %v16718_v62  ;;  %v10204_v30 = vcombine.low %v16652_v55, %v16655_v59 }
 0x524   : > { %10482 = vrot.lane.b32.xlu0 %v10169_v8, %s12191_s10  ;;  %v10034_v31 = vcombine.low %v16851_v41, %v16858_v6  ;;  %v10035_v43 = vcombine.high %v16851_v41, %v16858_v6  ;;  %v16883_v4 = vrot.slane %v10357_v1, %v18013_v49  ;;  %v16886_v14 = vrot.slane %v10408_v56, %v18013_v49 }
 0x525   : > { %10608 = vrot.lane.b32.xlu1 %v10103_v19, %s12193_s18  ;;  %v10373_v5 = vcombine.high %v16861_v20, %v16868_v18  ;;  %v16892_v9 = vrot.slane %v10424_v7, %v18013_v49  ;;  %v16895_v8 = vrot.slane %v10204_v30, %v18013_v49  ;;  %v10220_v51 = vcombine.low %v16661_v13, %v16664_v63 }
 0x526   : > { %v10374_v33 = vcombine.low %v16871_v17, %v16883_v4  ;;  %v10409_v32 = vcombine.high %v16706_v37, %v16709_v11  ;;  %v10425_v19 = vcombine.high %v16715_v28, %v16718_v62  ;;  %v10205_v2 = vcombine.high %v16652_v55, %v16655_v59 }
 0x527   : > { %v10441_v36 = vcombine.high %v16886_v14, %v16892_v9  ;;  %v16910_v41 = vrot.slane %v10220_v51, %v18013_v49  ;;  %v10221_v21 = vcombine.high %v16661_v13, %v16664_v63  ;;  %v10272_v58 = vcombine.low %v16735_v48, %v16738_v25 }
 0x528   : > { %10546 = vrot.lane.b32.xlu0 %v10170_v24, %s12192_s11  ;;  %v16918_v37 = vrot.slane %v10409_v32, %v18013_v49  ;;  %v16921_v11 = vrot.slane %v10425_v19, %v18013_v49  ;;  %v10219_v55 = vrot.slane %v10205_v2, %v18013_v49  ;;  %v10288_v59 = vcombine.low %v16744_v42, %v16747_v23 }
 0x529   : > { %10476 = vrot.lane.b32.xlu1 %v9965_v61, %s12191_s10  ;;  %v10237_v13 = vcombine.high %v16895_v8, %v16910_v41  ;;  %v10235_v63 = vrot.slane %v10221_v21, %v18013_v49  ;;  %v16931_v28 = vrot.slane %v10272_v58, %v18013_v49  ;;  %v10273_v62 = vcombine.high %v16735_v48, %v16738_v25 }
 0x52a   : > { %v10442_v24 = vcombine.low %v16918_v37, %v16921_v11  ;;  %v16938_v6 = vrot.slane %v10288_v59, %v18013_v49  ;;  %v10289_v61 = vcombine.high %v16744_v42, %v16747_v23  ;;  %v10375_v1 = vcombine.high %v16871_v17, %v16883_v4 }
 0x52b   : > { %v10238_v56 = vcombine.low %v10219_v55, %v10235_v63  ;;  %v10239_v7 = vcombine.high %v10219_v55, %v10235_v63  ;;  %v10287_v30 = vrot.slane %v10273_v62, %v18013_v49  ;;  %v10443_v51 = vcombine.high %v16918_v37, %v16921_v11 }
 0x52c   : > { %10610 = vrot.lane.b32.xlu0 %v10171_v44, %s12193_s18  ;;  %v10305_v48 = vcombine.high %v16931_v28, %v16938_v6  ;;  %v10303_v25 = vrot.slane %v10289_v61, %v18013_v49  ;;  %v9828_v42 = vcombine.low %v16553_v39, %v16571_v12  ;;  %v9896_v23 = vcombine.low %v16612_v57, %v16645_v45 }
 0x52d   : > { %10540 = vrot.lane.b32.xlu1 %v9966_v29, %s12192_s11  ;;  %v9692_v32 = vcombine.low %v16683_v3, %v16688_v35  ;;  %v9760_v44 = vcombine.low %v16732_v26, %v16741_v22  ;;  %v10100_v19 = vcombine.low %v16770_v10, %v16773_v15  ;;  %v10168_v49 = vcombine.low %v16781_v46, %v16786_v16 }
 0x52e   : > { %v10306_v17 = vcombine.low %v10287_v30, %v10303_v25  ;;  %v10307_v4 = vcombine.high %v10287_v30, %v10303_v25  ;;  %v9964_v29 = vcombine.low %v16809_v47, %v16812_v34  ;;  %v10032_v2 = vcombine.low %v16831_v27, %v16834_v60 }
 0x52f   : > { %v10372_v21 = vcombine.low %v16861_v20, %v16868_v18  ;;  %v10440_v58 = vcombine.low %v16886_v14, %v16892_v9  ;;  %v10236_v37 = vcombine.low %v16895_v8, %v16910_v41  ;;  %v10304_v11 = vcombine.low %v16931_v28, %v16938_v6 }
 0x530   : > { %10478 = vrot.lane.b32.xlu0 %v10033_v50, %s12191_s10  ;;  %v9556_v52 = vcombine.low %v16289_v54, %v16292_v40  ;;  %v18024_v40 = vld [vmem:[#allocation150_spill] sm:$0xff] }
 0x531   : > { %10604 = vrot.lane.b32.xlu1 %v9967_v53, %s12193_s18 }
 0x534   : > { %10542 = vrot.lane.b32.xlu0 %v10034_v31, %s12192_s11 }
 0x535   : > { %10488 = vrot.lane.b32.xlu1 %v10373_v5, %s12191_s10 }
 0x538   : > { %10606 = vrot.lane.b32.xlu0 %v10035_v43, %s12193_s18 }
 0x539   : > { %10552 = vrot.lane.b32.xlu1 %v10374_v33, %s12192_s11  ;;  %v18025_v33 = vld [vmem:[#allocation38_spill] sm:$0xff] }
 0x53a   : > { %v10465_v50 = vpop.permute.xlu1 %10464 }
 0x53b   : > { %v10638_v0 = vsel %vm413_vm0, %v9556_v52, %v10465_v50  ;;  %v18028_v50 = vld [vmem:[#allocation91_spill] sm:$0xff] }
 0x53c   : > { %10490 = vrot.lane.b32.xlu0 %v10441_v36, %s12191_s10  ;;  %v9624_v36 = vcombine.low %v18025_v33, %v18024_v40 }
 0x53d   : > { %10484 = vrot.lane.b32.xlu1 %v10237_v13, %s12191_s10 }
 0x53e   : > { %v10529_v55 = vpop.permute.xlu1 %10528 }
 0x53f   : > { %v10655_v53 = vsel %vm10652_vm3, %v10638_v0, %v10529_v55  ;;  %v9488_v55 = vcombine.low %v18028_v50, %v16506_v38 }
 0x540   : > { %10554 = vrot.lane.b32.xlu0 %v10442_v24, %s12192_s11 }
 0x541   : > { %10548 = vrot.lane.b32.xlu1 %v10238_v56, %s12192_s11  ;;  %v18027_v56 = vld [vmem:[#allocation35_spill] sm:$0xff] }
 0x544   : > { %10486 = vrot.lane.b32.xlu0 %v10305_v48, %s12191_s10 }
 0x545   : > { %10612 = vrot.lane.b32.xlu1 %v10239_v7, %s12193_s18  ;;  %v10593_v31 = vpop.permute.xlu1 %10592 }
 0x546   : > { %v10672_v43 = vsel %vm10669_vm4, %v10655_v53, %v10593_v31 }
 0x547   : > { %10688 = vst [vmem:[%s17000_s23 + $0x10] sm:$0xff] %v10672_v43 }
 0x548   : > { %10550 = vrot.lane.b32.xlu0 %v10306_v17, %s12192_s11 }
 0x549   : > { %v10467_v5 = vpop.permute.xlu0 %10466  ;;  %10616 = vrot.lane.b32.xlu1 %v10375_v1, %s12193_s18  ;;  %v18026_v1 = vld [vmem:[#allocation129_spill] sm:$0xff] }
 0x54a   : > { %v10639_v59 = vsel %vm413_vm0, %v9624_v36, %v10467_v5  ;;  %v9420_v7 = vcombine.low %v18027_v56, %v18026_v1 }
 0x54c   : > { %10614 = vrot.lane.b32.xlu0 %v10307_v4, %s12193_s18 }
 0x54d   : > { %v10531_v54 = vpop.permute.xlu0 %10530  ;;  %v10461_v24 = vpop.permute.xlu1 %10460 }
 0x54e   : > { %v10656_v13 = vsel %vm10652_vm3, %v10639_v59, %v10531_v54  ;;  %v10636_v30 = vsel %vm413_vm0, %v9420_v7, %v10461_v24 }
 0x550   : > { %10618 = vrot.lane.b32.xlu0 %v10443_v51, %s12193_s18 }
 0x551   : > { %v10595_v63 = vpop.permute.xlu0 %10594 }
 0x552   : > { %v10673_v62 = vsel %vm10669_vm4, %v10656_v13, %v10595_v63 }
 0x553   : > { %10689 = vst [vmem:[%s17000_s23 + $0x18] sm:$0xff] %v10673_v62 }
 0x558   : > { %v10525_v61 = vpop.permute.xlu1 %10524 }
 0x559   : > { %v10653_v48 = vsel %vm10652_vm3, %v10636_v30, %v10525_v61 }
 0x55c   : > { %v10589_v25 = vpop.permute.xlu1 %10588 }
 0x55d   : > { %v10670_v17 = vsel %vm10669_vm4, %v10653_v48, %v10589_v25 }
 0x55e   : > { %10686 = vst [vmem:[%s17000_s23] sm:$0xff] %v10670_v17 }
 0x560   : > { %v10463_v51 = vpop.permute.xlu0 %10462 }
 0x561   : > { %v10637_v52 = vsel %vm413_vm0, %v9488_v55, %v10463_v51 }
 0x568   : > { %v10527_v4 = vpop.permute.xlu0 %10526 }
 0x569   : > { %v10654_v0 = vsel %vm10652_vm3, %v10637_v52, %v10527_v4 }
 0x56b   : > { %v10473_v53 = vpop.permute.xlu1 %10472 }
 0x56c   : > { %v10591_v31 = vpop.permute.xlu0 %10590  ;;  %v10642_v54 = vsel %vm413_vm0, %v9828_v42, %v10473_v53 }
 0x56d   : > { %v10671_v43 = vsel %vm10669_vm4, %v10654_v0, %v10591_v31 }
 0x56e   : > { %10687 = vst [vmem:[%s17000_s23 + $0x8] sm:$0xff] %v10671_v43 }
 0x56f   : > { %v10537_v5 = vpop.permute.xlu1 %10536 }
 0x570   : > { %v10659_v40 = vsel %vm10652_vm3, %v10642_v54, %v10537_v5 }
 0x573   : > { %v10601_v33 = vpop.permute.xlu1 %10600 }
 0x574   : > { %v10676_v38 = vsel %vm10669_vm4, %v10659_v40, %v10601_v33 }
 0x575   : > { %10692 = vst [vmem:[%s17000_s23 + $0x30] sm:$0xff] %v10676_v38 }
 0x579   : > { %v10475_v36 = vpop.permute.xlu0 %10474 }
 0x57a   : > { %v10643_v13 = vsel %vm413_vm0, %v9896_v23, %v10475_v36 }
 0x57d   : > { %v10539_v59 = vpop.permute.xlu0 %10538 }
 0x57e   : > { %v10660_v63 = vsel %vm10652_vm3, %v10643_v13, %v10539_v59 }
 0x580   : > { %v10469_v62 = vpop.permute.xlu1 %10468 }
 0x581   : > { %v10603_v39 = vpop.permute.xlu0 %10602  ;;  %v10640_v24 = vsel %vm413_vm0, %v9692_v32, %v10469_v62 }
 0x582   : > { %v10677_v12 = vsel %vm10669_vm4, %v10660_v63, %v10603_v39 }
 0x583   : > { %10693 = vst [vmem:[%s17000_s23 + $0x38] sm:$0xff] %v10677_v12 }
 0x587   : > { %v10533_v42 = vpop.permute.xlu1 %10532 }
 0x588   : > { %v10657_v1 = vsel %vm10652_vm3, %v10640_v24, %v10533_v42 }
 0x58a   : > { %v10471_v61 = vpop.permute.xlu0 %10470 }
 0x58b   : > { %v10597_v57 = vpop.permute.xlu1 %10596  ;;  %v10641_v7 = vsel %vm413_vm0, %v9760_v44, %v10471_v61 }
 0x58c   : > { %v10674_v45 = vsel %vm10669_vm4, %v10657_v1, %v10597_v57 }
 0x58d   : > { %10690 = vst [vmem:[%s17000_s23 + $0x20] sm:$0xff] %v10674_v45 }
 0x58e   : > { %v10535_v23 = vpop.permute.xlu0 %10534 }
 0x58f   : > { %v10481_v56 = vpop.permute.xlu1 %10480  ;;  %v10658_v30 = vsel %vm10652_vm3, %v10641_v7, %v10535_v23 }
 0x590   : > { %v10646_v48 = vsel %vm413_vm0, %v10100_v19, %v10481_v56 }
 0x592   : > { %v10599_v3 = vpop.permute.xlu0 %10598 }
 0x593   : > { %v10675_v35 = vsel %vm10669_vm4, %v10658_v30, %v10599_v3  ;;  %v10545_v32 = vpop.permute.xlu1 %10544 }
 0x594   : > { %10691 = vst [vmem:[%s17000_s23 + $0x28] sm:$0xff] %v10675_v35  ;;  %v10663_v17 = vsel %vm10652_vm3, %v10646_v48, %v10545_v32 }
 0x596   : > { %v10483_v25 = vpop.permute.xlu0 %10482 }
 0x597   : > { %v10609_v51 = vpop.permute.xlu1 %10608  ;;  %v10647_v4 = vsel %vm413_vm0, %v10168_v49, %v10483_v25 }
 0x598   : > { %v10680_v26 = vsel %vm10669_vm4, %v10663_v17, %v10609_v51 }
 0x599   : > { %10696 = vst [vmem:[%s17000_s23 + $0x50] sm:$0xff] %v10680_v26 }
 0x59a   : > { %v10547_v22 = vpop.permute.xlu0 %10546 }
 0x59b   : > { %v10477_v44 = vpop.permute.xlu1 %10476  ;;  %v10664_v50 = vsel %vm10652_vm3, %v10647_v4, %v10547_v22 }
 0x59c   : > { %v10644_v55 = vsel %vm413_vm0, %v9964_v29, %v10477_v44 }
 0x59e   : > { %v10611_v10 = vpop.permute.xlu0 %10610 }
 0x59f   : > { %v10681_v15 = vsel %vm10669_vm4, %v10664_v50, %v10611_v10  ;;  %v10541_v19 = vpop.permute.xlu1 %10540 }
 0x5a0   : > { %10697 = vst [vmem:[%s17000_s23 + $0x58] sm:$0xff] %v10681_v15  ;;  %v10661_v0 = vsel %vm10652_vm3, %v10644_v55, %v10541_v19 }
 0x5a2   : > { %v10479_v52 = vpop.permute.xlu0 %10478 }
 0x5a3   : > { %v10605_v53 = vpop.permute.xlu1 %10604  ;;  %v10645_v31 = vsel %vm413_vm0, %v10032_v2, %v10479_v52 }
 0x5a4   : > { %v10678_v46 = vsel %vm10669_vm4, %v10661_v0, %v10605_v53 }
 0x5a5   : > { %10694 = vst [vmem:[%s17000_s23 + $0x40] sm:$0xff] %v10678_v46 }
 0x5a6   : > { %v10543_v16 = vpop.permute.xlu0 %10542 }
 0x5a7   : > { %v10489_v49 = vpop.permute.xlu1 %10488  ;;  %v10662_v43 = vsel %vm10652_vm3, %v10645_v31, %v10543_v16 }
 0x5a8   : > { %v10650_v59 = vsel %vm413_vm0, %v10372_v21, %v10489_v49 }
 0x5aa   : > { %v10607_v47 = vpop.permute.xlu0 %10606 }
 0x5ab   : > { %v10679_v34 = vsel %vm10669_vm4, %v10662_v43, %v10607_v47  ;;  %v10553_v29 = vpop.permute.xlu1 %10552 }
 0x5ac   : > { %10695 = vst [vmem:[%s17000_s23 + $0x48] sm:$0xff] %v10679_v34  ;;  %v10667_v8 = vsel %vm10652_vm3, %v10650_v59, %v10553_v29 }
 0x5ae   : > { %v10491_v5 = vpop.permute.xlu0 %10490 }
 0x5af   : > { %v10485_v54 = vpop.permute.xlu1 %10484  ;;  %v10651_v21 = vsel %vm413_vm0, %v10440_v58, %v10491_v5 }
 0x5b0   : > { %v10648_v27 = vsel %vm413_vm0, %v10236_v37, %v10485_v54 }
 0x5b2   : > { %v10555_v40 = vpop.permute.xlu0 %10554 }
 0x5b3   : > { %v10549_v33 = vpop.permute.xlu1 %10548  ;;  %v10668_v28 = vsel %vm10652_vm3, %v10651_v21, %v10555_v40 }
 0x5b4   : > { %v10665_v2 = vsel %vm10652_vm3, %v10648_v27, %v10549_v33 }
 0x5b6   : > { %v10487_v60 = vpop.permute.xlu0 %10486 }
 0x5b7   : > { %v10613_v38 = vpop.permute.xlu1 %10612  ;;  %v10649_v63 = vsel %vm413_vm0, %v10304_v11, %v10487_v60 }
 0x5b8   : > { %v10682_v36 = vsel %vm10669_vm4, %v10665_v2, %v10613_v38 }
 0x5b9   : > { %10698 = vst [vmem:[%s17000_s23 + $0x60] sm:$0xff] %v10682_v36 }
 0x5ba   : > { %v10551_v13 = vpop.permute.xlu0 %10550 }
 0x5bb   : > { %v10617_v41 = vpop.permute.xlu1 %10616  ;;  %v10666_v62 = vsel %vm10652_vm3, %v10649_v63, %v10551_v13 }
 0x5bc   : > { %v10684_v37 = vsel %vm10669_vm4, %v10667_v8, %v10617_v41 }
 0x5bd   : > { %10700 = vst [vmem:[%s17000_s23 + $0x70] sm:$0xff] %v10684_v37 }
 0x5be   : > { %v10615_v20 = vpop.permute.xlu0 %10614 }
 0x5bf   : > { %v10683_v18 = vsel %vm10669_vm4, %v10666_v62, %v10615_v20 }
 0x5c0   : > { %10699 = vst [vmem:[%s17000_s23 + $0x68] sm:$0xff] %v10683_v18 }
 0x5c2   : > { %v10619_v6 = vpop.permute.xlu0 %10618 }
 0x5c3   : > { %v10685_v11 = vsel %vm10669_vm4, %v10668_v28, %v10619_v6 }
 0x5c4   : > { %10701 = vst [vmem:[%s17000_s23 + $0x78] sm:$0xff] %v10685_v11 }
 0x5c5   : > { %12121 = shalt.err (!%p12118_p5)
}
 0x5c6   : > { %s12122_s8 = scalar_lea.hbm %s17110_s30, 2048  ;;  %s12126_s11 = scalar_lea.hbm %s17167_s3, 4096 }
 0x5c7   : > { %p12123_p6 = scmp.ne.s32.totalorder %s17110_s30, %s12122_s8  ;;  %p12127_p10 = scmp.lt.s32.totalorder %s17110_s30, %s17167_s3 }
 0x5c8   : > { %p12128_p11 = scmp.lt.s32.totalorder %s12126_s11, %s12122_s8 }
 0x5c9   : > { %p12124_p7 = pnand %p12123_p6, %p12257_p4 }
 0x5ca   : > { %p12129_p12 = por %p12128_p11, %p12127_p10 }
 0x5cb   : > { %p12125_p9 = pneg %p12124_p7 }
 0x5cd   : > { %p12130_p13 = pnand %p12129_p12, %p12125_p9 }
 0x5cf   : > { %12133 = shalt.err (!%p12130_p13)
}
 0x5d0   : > { %s12195_s21 = smov 128   ;;  %s12196_s23 = smov 8  }
 0x5d1   : > { %11625 = dma.vmem_to_hbm [thread:$0]  (%p12257_p4), %s17112_s27, 2048, %s17110_s30, %s17119_s15, %s12195_s21, %s12195_s21, %s12196_s23  }
 0x5d2 PF: > { %p11631_p0 = scmp.ge.s32.totalorder %s12184_s17, 2  ;;  %s10733_s26 = sand.u32 1, %s12164_s12  }
 0x5d3   : > { %s10734_s28 = scalar_lea.sflag [#allocation7], %s10733_s26 }
 0x5d4   : > { %p11628_p1 = pnand %p11631_p0, %p12264_p8 }
 0x5d6   : > { %p11629_p2 = pneg %p11628_p1 }
 0x5d8   : > { %12159 = dma.done.wait (%p11629_p2), %s10734_s28, 2048  }
 0x5d9   : > { %12161 = vsyncadd (%p11629_p2), %s10734_s28, 4294965248  ;;  %s16_s17 = sadd.s32 1, %s12184_s17   ;;  %s18029_s12 = smov %s12168_s13 }
 0x5da   : > { %p13_p3 = scmp.ge.s32.totalorder %s16_s17, 4   ;;  %s18030_s13 = smov %s12172_s14 }
 0x5db   : > { %s18031_s14 = smov %s12270_s25  ;;  %s18032_s15 = smov %s12180_s16 }
 0x5dc   : > { %s18033_s16 = smov %s18035_s20  ;;  %15 = sbr.rel (!%p13_p3) target bundleno = 4 (0x4), region = 81 }
 0x5e1   :  { %10739 = vsyncpa [#allocation7], 1 }
 0x5e2   :  { %10741 = vsyncpa [#allocation7 + $0x1], 1 }

</bundles_post_ra>
